<compile_context>
chip_gen: v7x
topology: tpu7x:2x2x1
jax: 0.10.0
libtpu: 0.0.40
codegen_flags: <defaults>
</compile_context>

<pallas_src>
import numpy as np
import jax
import jax.numpy as jnp
from jax.experimental import pallas as pl
from jax.experimental.pallas import tpu as pltpu

# ---------------- model hyper-parameters (small test sizes) ----------------
N_CELL = 128           # (original script: 400)
DEG = 2
NUM = DEG + 1          # 3
SEQ = NUM * N_CELL     # length of the flat input vector (original: 1200)
N_CH = 8               # conv channel width
BATCH = 2


def _round_up(x, m):
    return (x + m - 1) // m * m


# -------------------------------- wrapper -----------------------------------
def pdecnn2_forward(xt, Average, Average1, d1e, d2e, torch_params, tile_b=None):
    """xt: (B, 1, seq) float32  ->  (B, 1, seq) float32  (PDECNN2.forward)."""
    w1, b1, w2, b2, w3, b3, w4, b4 = torch_params
    B, one, seq = xt.shape
    n_cell = Average.shape[0]
    num = seq // n_cell
    n_ch = w1.shape[0]
    assert one == 1 and Average.shape == (n_cell, seq) and num * n_cell == seq

    f32 = jnp.float32
    bf16 = jnp.bfloat16
    # tb=64 default keeps >=2 grid iterations (megacore) whenever batch allows.
    tb = tile_b if tile_b is not None else min(64, _round_up(B, 8))
    bp = _round_up(B, tb)

    # ---- fused constant operator BIG = [avgT | avg1T | d1T | d2T] (bf16) ----
    # Each column segment is padded to a multiple of 128 lanes so the slices of
    # the (tb, width) fused product stay aligned at the original sizes too.
    c0p = _round_up(n_cell, 128)
    s_p = _round_up(seq, 128)

    def pad_cols(m, w):
        return jnp.pad(m, ((0, 0), (0, w - m.shape[1])))

    avgT = pad_cols(jnp.transpose(Average).astype(f32), c0p)     # (seq, c0p)
    avg1T = pad_cols(jnp.transpose(Average1).astype(f32), s_p)   # (seq, s_p)
    d1T = pad_cols(jnp.transpose(d1e).astype(f32), s_p)          # (seq, s_p)
    d2T = pad_cols(jnp.transpose(d2e).astype(f32), s_p)          # (seq, s_p)
    big = jnp.concatenate([avgT, avg1T, d1T, d2T], axis=1).astype(bf16)
    off1, off2, off3 = c0p, c0p + s_p, c0p + 2 * s_p

    # column sums of the bf16-rounded d1T/d2T (recovers the mean-removal of the
    # d1/d2 normalization without serializing behind mean/std)
    cs = jnp.stack([jnp.sum(d1T.astype(bf16).astype(f32), axis=0)[:seq],
                    jnp.sum(d2T.astype(bf16).astype(f32), axis=0)[:seq]], axis=0)

    # channel-interleave scatter folded with (I - Average1^T): G (num*n_cell, seq)
    idx = np.arange(n_cell)
    scat = np.zeros((num, n_cell, seq), np.float32)
    for c in range(num):
        scat[c, idx, idx * num + c] = 1.0
    G = jnp.asarray(scat.reshape(num * n_cell, seq)) @ (
        jnp.eye(seq, dtype=f32) - jnp.transpose(Average1).astype(f32))

    # conv weights / biases as tiny 1-D SMEM arrays (torch layout (Cout,Cin,3),
    # row-major flatten -> index (o*Cin + c)*3 + t)
    cw1, cw2, cw3, cw4 = (w.astype(f32).reshape(-1) for w in (w1, w2, w3, w4))
    cb1, cb2, cb3, cb4 = (b.astype(f32).reshape(-1) for b in (b1, b2, b3, b4))

    # ---- batched input: (B, 1, seq) -> (bp, seq), zero-pad extra rows --------
    x2d = xt.reshape(B, seq).astype(f32)
    if bp != B:
        x2d = jnp.pad(x2d, ((0, bp - B), (0, 0)))

    # ------------------------------- kernel ----------------------------------
    def kernel(x_ref, big_ref, cs_ref, g_ref,
               w1_ref, b1_ref, w2_ref, b2_ref, w3_ref, b3_ref, w4_ref, b4_ref,
               out_ref):
        x = x_ref[...]                                        # (tb, seq) f32

        # one fused MXU pass:  x @ [avgT | avg1T | d1T | d2T]  (bf16, f32 acc)
        p = jnp.dot(x.astype(bf16), big_ref[...], preferred_element_type=f32)
        xt1 = p[:, 0:n_cell]                                  # lane-aligned slices
        xt11 = p[:, off1:off1 + seq]
        xd1 = p[:, off2:off2 + seq]
        xd2 = p[:, off3:off3 + seq]

        mean = jnp.mean(x, axis=-1, keepdims=True)            # (tb, 1)
        diff = x - mean
        var = jnp.sum(diff * diff, axis=-1, keepdims=True) / (seq - 1) + 1e-8
        inv_std = jax.lax.rsqrt(var)                          # EUP
        std = var * inv_std                                   # == sqrt(var)

        cs_v = cs_ref[...]
        # |xt_n @ dT| == |x @ dT - mean * colsum(dT)| * inv_std
        minlimit = jnp.minimum(jnp.abs(xd1 - mean * cs_v[0:1, :]),
                               jnp.abs(xd2 - mean * cs_v[1:2, :])) * inv_std
        xt1_n = (xt1 - mean) * inv_std                        # (tb, n_cell)
        xt11_n = (xt11 - mean) * inv_std                      # (tb, seq)

        # replicate-pad boundary masks: built ONCE, reused by every conv layer
        lane = jax.lax.broadcasted_iota(jnp.int32, (tb, n_cell), 1)
        at_left = lane == 0
        at_right = lane == n_cell - 1

        def rep_shift(u):                                     # u: (tb, n_cell)
            ul = jnp.where(at_left, u, pltpu.roll(u, 1, axis=1))
            ur = jnp.where(at_right, u, pltpu.roll(u, n_cell - 1, axis=1))
            return ul, u, ur

        def conv_layer(us, w_ref, b_ref, cout, act):
            # Conv1d(k=3, replicate): contraction is only over the 3*Cin taps.
            # Scalar tap weights from SMEM, activations stay lane-dense
            # (tb, n_cell) tiles -- no kron constants, no concat, no relayout.
            cin = len(us)
            taps = [rep_shift(u) for u in us]                 # cin x (ul,uc,ur)
            outs = []
            for o in range(cout):
                acc = None
                for c in range(cin):
                    for t in range(3):
                        w = w_ref[(o * cin + c) * 3 + t]      # SMEM scalar
                        term = taps[c][t] * w
                        acc = term if acc is None else acc + term
                acc = acc + b_ref[o]                          # scalar bias
                outs.append(jnp.tanh(acc) if act else acc)
            return outs

        u = conv_layer([xt1_n], w1_ref, b1_ref, n_ch, True)
        u = conv_layer(u, w2_ref, b2_ref, n_ch, True)
        u = conv_layer(u, w3_ref, b3_ref, n_ch, True)
        u4 = conv_layer(u, w4_ref, b4_ref, num, False)        # num x (tb, n_cell)

        # channel interleave + (I - Average1) fused:  v = sum_c u4_c @ G_c
        v = None
        for c in range(num):
            g_c = g_ref[c * n_cell:(c + 1) * n_cell, :]       # (n_cell, seq)
            t = jnp.dot(u4[c], g_c, preferred_element_type=f32)
            v = t if v is None else v + t

        v = jnp.clip(v, -minlimit, minlimit)                  # min(|v|,m)*sgn(v)
        avg1T_v = big_ref[:, off1:off1 + seq]                 # reuse bf16 slice
        v = (v - jnp.dot(v.astype(bf16), avg1T_v, preferred_element_type=f32)
             + xt11_n)
        out_ref[...] = v * std + mean

    # ------------------------------- specs ------------------------------------
    fixed2 = lambda i: (0, 0)
    # grid-invariant constants: single-buffered (no wasted 2nd VMEM copy)
    const_spec = lambda a: pl.BlockSpec(a.shape, fixed2,
                                        pipeline_mode=pl.Buffered(1))
    smem_spec = pl.BlockSpec(memory_space=pltpu.MemorySpace.SMEM)
    in_specs = [
        pl.BlockSpec((tb, seq), lambda i: (i, 0)),            # batched x tile
        const_spec(big), const_spec(cs), const_spec(G),
        smem_spec, smem_spec, smem_spec, smem_spec,
        smem_spec, smem_spec, smem_spec, smem_spec,
    ]
    out_spec = pl.BlockSpec((tb, seq), lambda i: (i, 0))      # lane-dense output

    # explicit scoped-VMEM budget: single-buffered constants + double-buffered
    # x/out tiles + headroom for intermediates; capped at 56 MiB (v7x TC = 64).
    need = (big.size * big.dtype.itemsize + G.size * 4 + cs.size * 4
            + 2 * 2 * tb * seq * 4                     # x + out, double buffered
            + 8 * tb * big.shape[1] * 4)               # intermediate headroom
    vmem_limit = int(min(max(need, 24 * 1024 * 1024), 56 * 1024 * 1024))

    out = pl.pallas_call(
        kernel,
        out_shape=jax.ShapeDtypeStruct((bp, seq), f32),
        grid_spec=pltpu.PrefetchScalarGridSpec(
            num_scalar_prefetch=0, grid=(bp // tb,),
            in_specs=in_specs, out_specs=out_spec),
        compiler_params=pltpu.CompilerParams(
            dimension_semantics=("parallel",),
            vmem_limit_bytes=vmem_limit),
    )(x2d, big, cs, G, cw1, cb1, cw2, cb2, cw3, cb3, cw4, cb4)

    return out[:B].reshape(B, 1, seq)


# ------------------------ pure-JAX reference (checks) ------------------------
def conv1d_replicate_ref(x, w, b):
    # x: (B, Cin, L), w: (Cout, Cin, 3), b: (Cout,)
    L = x.shape[-1]
    xp = jnp.pad(x, ((0, 0), (0, 0), (1, 1)), mode='edge')
    out = (jnp.einsum('oc,bcl->bol', w[:, :, 0], xp[:, :, 0:L])
           + jnp.einsum('oc,bcl->bol', w[:, :, 1], xp[:, :, 1:L + 1])
           + jnp.einsum('oc,bcl->bol', w[:, :, 2], xp[:, :, 2:L + 2]))
    return out + b[None, :, None]


def reference_forward(xt, Average, Average1, d1e, d2e, torch_params):
    w1, b1, w2, b2, w3, b3, w4, b4 = torch_params
    xt1 = jnp.einsum('lk,ijk->ijl', Average, xt)
    xt11 = jnp.einsum('lk,ijk->ijl', Average1, xt)
    mean = xt.mean(axis=-1, keepdims=True)
    var = jnp.var(xt, axis=-1, keepdims=True, ddof=1) + 1e-8
    std = jnp.sqrt(var)
    xt_ = (xt - mean) / std
    xt1 = (xt1 - mean) / std
    xt11 = (xt11 - mean) / std
    minlimit = jnp.minimum(jnp.abs(jnp.einsum('lk,ijk->ijl', d1e, xt_)),
                           jnp.abs(jnp.einsum('lk,ijk->ijl', d2e, xt_)))
    u = jnp.tanh(conv1d_replicate_ref(xt1, w1, b1))
    u = jnp.tanh(conv1d_replicate_ref(u, w2, b2))
    u = jnp.tanh(conv1d_replicate_ref(u, w3, b3))
    u = conv1d_replicate_ref(u, w4, b4)
    u = jnp.transpose(u, (0, 2, 1)).reshape(-1, 1, NUM * N_CELL)
    u = u - jnp.einsum('lk,ijk->ijl', Average1, u)
    u = jnp.minimum(jnp.abs(u), minlimit) * jnp.sign(u)
    u = u - jnp.einsum('lk,ijk->ijl', Average1, u) + xt11
    u = u * std + mean
    return u


# --------------------------------- main --------------------------------------
if __name__ == "__main__":
    key = jax.random.PRNGKey(0)
    keys = jax.random.split(key, 16)

    # Synthetic deterministic "globals" (Average, Average1, d1, d2).
    Average = jax.random.uniform(keys[0], (N_CELL, SEQ), jnp.float32)
    Average = Average / jnp.sum(Average, axis=1, keepdims=True)       # row-stochastic
    Average1 = jax.random.uniform(keys[1], (SEQ, SEQ), jnp.float32)
    Average1 = Average1 / jnp.sum(Average1, axis=1, keepdims=True)
    d1_raw = 0.1 * jax.random.normal(keys[2], (SEQ, SEQ), jnp.float32)
    d2_raw = 0.1 * jax.random.normal(keys[3], (SEQ, SEQ), jnp.float32)
    d1e = d1_raw @ Average1        # d1 = d1 @ Average1 (module-level line)
    d2e = d2_raw @ Average1

    # Conv parameters (torch layout: (Cout, Cin, K), bias (Cout,)).
    def uinit(k, shape, fan_in):
        bound = 1.0 / np.sqrt(fan_in)
        return jax.random.uniform(k, shape, jnp.float32, -bound, bound)

    w1 = uinit(keys[4], (N_CH, 1, 3), 1 * 3);       b1 = uinit(keys[5], (N_CH,), 1 * 3)
    w2 = uinit(keys[6], (N_CH, N_CH, 3), N_CH * 3); b2 = uinit(keys[7], (N_CH,), N_CH * 3)
    w3 = uinit(keys[8], (N_CH, N_CH, 3), N_CH * 3); b3 = uinit(keys[9], (N_CH,), N_CH * 3)
    w4 = uinit(keys[10], (NUM, N_CH, 3), N_CH * 3); b4 = uinit(keys[11], (NUM,), N_CH * 3)
    # NOTE: c1/c2/c3, pool1/2/3, nl4 and f() are defined in __init__ but never
    # used in forward(), so they are intentionally omitted.

    # Input xt: (B, 1, seq)  (PyTorch NCL with a single channel).
    xt = jax.random.normal(keys[12], (BATCH, 1, SEQ), jnp.float32)

    params = (w1, b1, w2, b2, w3, b3, w4, b4)

    out = pdecnn2_forward(xt, Average, Average1, d1e, d2e, params)
    out = jax.block_until_ready(out)

    ref = reference_forward(xt, Average, Average1, d1e, d2e, params)
    ref = jax.block_until_ready(ref)

    err = float(jnp.max(jnp.abs(out - ref)))
    if not np.isfinite(err) or err > 2e-3:
        raise AssertionError(f"kernel mismatch vs reference, max abs err={err}")

    print("KERNEL_OK")
</pallas_src>

<mosaic_0001>
module attributes {stable_mosaic.version = 11 : i64} {
  func.func @kernel(%arg0: i32, %arg1: memref<8x384xf32, #tpu.memory_space<vmem>>, %arg2: memref<384x1280xbf16, #tpu.memory_space<vmem>>, %arg3: memref<2x384xf32, #tpu.memory_space<vmem>>, %arg4: memref<384x384xf32, #tpu.memory_space<vmem>>, %arg5: memref<24xf32, #tpu.memory_space<smem>>, %arg6: memref<8xf32, #tpu.memory_space<smem>>, %arg7: memref<192xf32, #tpu.memory_space<smem>>, %arg8: memref<8xf32, #tpu.memory_space<smem>>, %arg9: memref<192xf32, #tpu.memory_space<smem>>, %arg10: memref<8xf32, #tpu.memory_space<smem>>, %arg11: memref<72xf32, #tpu.memory_space<smem>>, %arg12: memref<3xf32, #tpu.memory_space<smem>>, %arg13: memref<8x384xf32, #tpu.memory_space<vmem>>) attributes {dimension_semantics = [#tpu.dimension_semantics<parallel>], iteration_bounds = array<i64: 1>, scalar_prefetch = 0 : i64, scratch_operands = 0 : i64, tpu.core_type = #tpu.core_type<tc>, window_params = [{transform_indices = @transform_0, window_bounds = array<i64: 8, 384>}, {pipeline_mode = #tpu.pipeline_mode<synchronous>, transform_indices = @transform_1, window_bounds = array<i64: 384, 1280>}, {pipeline_mode = #tpu.pipeline_mode<synchronous>, transform_indices = @transform_2, window_bounds = array<i64: 2, 384>}, {pipeline_mode = #tpu.pipeline_mode<synchronous>, transform_indices = @transform_3, window_bounds = array<i64: 384, 384>}, {transform_indices = @transform_4, window_bounds = array<i64: 24>}, {transform_indices = @transform_5, window_bounds = array<i64: 8>}, {transform_indices = @transform_6, window_bounds = array<i64: 192>}, {transform_indices = @transform_7, window_bounds = array<i64: 8>}, {transform_indices = @transform_8, window_bounds = array<i64: 192>}, {transform_indices = @transform_9, window_bounds = array<i64: 8>}, {transform_indices = @transform_10, window_bounds = array<i64: 72>}, {transform_indices = @transform_11, window_bounds = array<i64: 3>}, {transform_indices = @transform_12, window_bounds = array<i64: 8, 384>}]} {
    %c0 = arith.constant 0 : index
    %c0_0 = arith.constant 0 : index
    %0 = vector.load %arg1[%c0, %c0_0] : memref<8x384xf32, #tpu.memory_space<vmem>>, vector<8x384xf32>
    %1 = arith.truncf %0 : vector<8x384xf32> to vector<8x384xbf16>
    %c0_1 = arith.constant 0 : index
    %c0_2 = arith.constant 0 : index
    %2 = vector.load %arg2[%c0_1, %c0_2] : memref<384x1280xbf16, #tpu.memory_space<vmem>>, vector<384x1280xbf16>
    %cst = arith.constant dense<0.000000e+00> : vector<8x1280xf32>
    %3 = tpu.matmul %1, %2, %cst {dimension_numbers = #tpu.dot_dimension_numbers<[1], [0], [0], [1], [0, 0, 1, 1], [], []>} : vector<8x384xbf16>, vector<384x1280xbf16>, vector<8x1280xf32> -> vector<8x1280xf32>
    %4 = vector.extract_strided_slice %3 {offsets = [0, 0], sizes = [8, 128], strides = [1, 1]} : vector<8x1280xf32> to vector<8x128xf32>
    %5 = vector.extract_strided_slice %3 {offsets = [0, 128], sizes = [8, 384], strides = [1, 1]} : vector<8x1280xf32> to vector<8x384xf32>
    %6 = vector.extract_strided_slice %3 {offsets = [0, 512], sizes = [8, 384], strides = [1, 1]} : vector<8x1280xf32> to vector<8x384xf32>
    %7 = vector.extract_strided_slice %3 {offsets = [0, 896], sizes = [8, 384], strides = [1, 1]} : vector<8x1280xf32> to vector<8x384xf32>
    %cst_3 = arith.constant dense<0.000000e+00> : vector<8xf32>
    %8 = vector.multi_reduction <add>, %0, %cst_3 [1] : vector<8x384xf32> to vector<8xf32>
    %9 = vector.shape_cast %8 : vector<8xf32> to vector<8x1xf32>
    %cst_4 = arith.constant 3.840000e+02 : f32
    %10 = vector.broadcast %cst_4 : f32 to vector<8x1xf32>
    %11 = arith.divf %9, %10 : vector<8x1xf32>
    %12 = vector.broadcast %11 : vector<8x1xf32> to vector<8x384xf32>
    %13 = arith.subf %0, %12 : vector<8x384xf32>
    %14 = arith.mulf %13, %13 : vector<8x384xf32>
    %cst_5 = arith.constant dense<0.000000e+00> : vector<8xf32>
    %15 = vector.multi_reduction <add>, %14, %cst_5 [1] : vector<8x384xf32> to vector<8xf32>
    %16 = vector.shape_cast %15 : vector<8xf32> to vector<8x1xf32>
    %cst_6 = arith.constant 3.830000e+02 : f32
    %17 = vector.broadcast %cst_6 : f32 to vector<8x1xf32>
    %18 = arith.divf %16, %17 : vector<8x1xf32>
    %cst_7 = arith.constant 9.99999993E-9 : f32
    %19 = vector.broadcast %cst_7 : f32 to vector<8x1xf32>
    %20 = arith.addf %18, %19 : vector<8x1xf32>
    %21 = math.rsqrt %20 : vector<8x1xf32>
    %22 = arith.mulf %20, %21 : vector<8x1xf32>
    %c0_8 = arith.constant 0 : index
    %c0_9 = arith.constant 0 : index
    %23 = vector.load %arg3[%c0_8, %c0_9] : memref<2x384xf32, #tpu.memory_space<vmem>>, vector<2x384xf32>
    %24 = vector.extract_strided_slice %23 {offsets = [0, 0], sizes = [1, 384], strides = [1, 1]} : vector<2x384xf32> to vector<1x384xf32>
    %25 = vector.broadcast %11 : vector<8x1xf32> to vector<8x384xf32>
    %26 = vector.broadcast %24 : vector<1x384xf32> to vector<8x384xf32>
    %27 = arith.mulf %25, %26 : vector<8x384xf32>
    %28 = arith.subf %6, %27 : vector<8x384xf32>
    %29 = math.absf %28 : vector<8x384xf32>
    %30 = vector.extract_strided_slice %23 {offsets = [1, 0], sizes = [1, 384], strides = [1, 1]} : vector<2x384xf32> to vector<1x384xf32>
    %31 = vector.broadcast %11 : vector<8x1xf32> to vector<8x384xf32>
    %32 = vector.broadcast %30 : vector<1x384xf32> to vector<8x384xf32>
    %33 = arith.mulf %31, %32 : vector<8x384xf32>
    %34 = arith.subf %7, %33 : vector<8x384xf32>
    %35 = math.absf %34 : vector<8x384xf32>
    %36 = arith.minimumf %29, %35 : vector<8x384xf32>
    %37 = vector.broadcast %21 : vector<8x1xf32> to vector<8x384xf32>
    %38 = arith.mulf %36, %37 : vector<8x384xf32>
    %39 = vector.broadcast %11 : vector<8x1xf32> to vector<8x128xf32>
    %40 = arith.subf %4, %39 : vector<8x128xf32>
    %41 = vector.broadcast %21 : vector<8x1xf32> to vector<8x128xf32>
    %42 = arith.mulf %40, %41 : vector<8x128xf32>
    %43 = vector.broadcast %11 : vector<8x1xf32> to vector<8x384xf32>
    %44 = arith.subf %5, %43 : vector<8x384xf32>
    %45 = vector.broadcast %21 : vector<8x1xf32> to vector<8x384xf32>
    %46 = arith.mulf %44, %45 : vector<8x384xf32>
    %47 = tpu.iota {dimensions = array<i32: 1>} : vector<8x128xi32>
    %c0_i32 = arith.constant 0 : i32
    %48 = vector.broadcast %c0_i32 : i32 to vector<8x128xi32>
    %49 = arith.cmpi eq, %47, %48 : vector<8x128xi32>
    %c127_i32 = arith.constant 127 : i32
    %50 = vector.broadcast %c127_i32 : i32 to vector<8x128xi32>
    %51 = arith.cmpi eq, %47, %50 : vector<8x128xi32>
    %c1_i32 = arith.constant 1 : i32
    %52 = tpu.dynamic_rotate %42 by %c1_i32 dim 1 : vector<8x128xf32>, i32 -> vector<8x128xf32>
    %53 = arith.select %49, %42, %52 : vector<8x128xi1>, vector<8x128xf32>
    %c127_i32_10 = arith.constant 127 : i32
    %54 = tpu.dynamic_rotate %42 by %c127_i32_10 dim 1 : vector<8x128xf32>, i32 -> vector<8x128xf32>
    %55 = arith.select %51, %42, %54 : vector<8x128xi1>, vector<8x128xf32>
    %c0_11 = arith.constant 0 : index
    %56 = memref.load %arg5[%c0_11] : memref<24xf32, #tpu.memory_space<smem>>
    %57 = vector.broadcast %56 : f32 to vector<8x128xf32>
    %58 = arith.mulf %53, %57 : vector<8x128xf32>
    %c1 = arith.constant 1 : index
    %59 = memref.load %arg5[%c1] : memref<24xf32, #tpu.memory_space<smem>>
    %60 = vector.broadcast %59 : f32 to vector<8x128xf32>
    %61 = arith.mulf %42, %60 : vector<8x128xf32>
    %62 = arith.addf %58, %61 : vector<8x128xf32>
    %c2 = arith.constant 2 : index
    %63 = memref.load %arg5[%c2] : memref<24xf32, #tpu.memory_space<smem>>
    %64 = vector.broadcast %63 : f32 to vector<8x128xf32>
    %65 = arith.mulf %55, %64 : vector<8x128xf32>
    %66 = arith.addf %62, %65 : vector<8x128xf32>
    %c0_12 = arith.constant 0 : index
    %67 = memref.load %arg6[%c0_12] : memref<8xf32, #tpu.memory_space<smem>>
    %68 = vector.broadcast %67 : f32 to vector<8x128xf32>
    %69 = arith.addf %66, %68 : vector<8x128xf32>
    %70 = math.tanh %69 : vector<8x128xf32>
    %c3 = arith.constant 3 : index
    %71 = memref.load %arg5[%c3] : memref<24xf32, #tpu.memory_space<smem>>
    %72 = vector.broadcast %71 : f32 to vector<8x128xf32>
    %73 = arith.mulf %53, %72 : vector<8x128xf32>
    %c4 = arith.constant 4 : index
    %74 = memref.load %arg5[%c4] : memref<24xf32, #tpu.memory_space<smem>>
    %75 = vector.broadcast %74 : f32 to vector<8x128xf32>
    %76 = arith.mulf %42, %75 : vector<8x128xf32>
    %77 = arith.addf %73, %76 : vector<8x128xf32>
    %c5 = arith.constant 5 : index
    %78 = memref.load %arg5[%c5] : memref<24xf32, #tpu.memory_space<smem>>
    %79 = vector.broadcast %78 : f32 to vector<8x128xf32>
    %80 = arith.mulf %55, %79 : vector<8x128xf32>
    %81 = arith.addf %77, %80 : vector<8x128xf32>
    %c1_13 = arith.constant 1 : index
    %82 = memref.load %arg6[%c1_13] : memref<8xf32, #tpu.memory_space<smem>>
    %83 = vector.broadcast %82 : f32 to vector<8x128xf32>
    %84 = arith.addf %81, %83 : vector<8x128xf32>
    %85 = math.tanh %84 : vector<8x128xf32>
    %c6 = arith.constant 6 : index
    %86 = memref.load %arg5[%c6] : memref<24xf32, #tpu.memory_space<smem>>
    %87 = vector.broadcast %86 : f32 to vector<8x128xf32>
    %88 = arith.mulf %53, %87 : vector<8x128xf32>
    %c7 = arith.constant 7 : index
    %89 = memref.load %arg5[%c7] : memref<24xf32, #tpu.memory_space<smem>>
    %90 = vector.broadcast %89 : f32 to vector<8x128xf32>
    %91 = arith.mulf %42, %90 : vector<8x128xf32>
    %92 = arith.addf %88, %91 : vector<8x128xf32>
    %c8 = arith.constant 8 : index
    %93 = memref.load %arg5[%c8] : memref<24xf32, #tpu.memory_space<smem>>
    %94 = vector.broadcast %93 : f32 to vector<8x128xf32>
    %95 = arith.mulf %55, %94 : vector<8x128xf32>
    %96 = arith.addf %92, %95 : vector<8x128xf32>
    %c2_14 = arith.constant 2 : index
    %97 = memref.load %arg6[%c2_14] : memref<8xf32, #tpu.memory_space<smem>>
    %98 = vector.broadcast %97 : f32 to vector<8x128xf32>
    %99 = arith.addf %96, %98 : vector<8x128xf32>
    %100 = math.tanh %99 : vector<8x128xf32>
    %c9 = arith.constant 9 : index
    %101 = memref.load %arg5[%c9] : memref<24xf32, #tpu.memory_space<smem>>
    %102 = vector.broadcast %101 : f32 to vector<8x128xf32>
    %103 = arith.mulf %53, %102 : vector<8x128xf32>
    %c10 = arith.constant 10 : index
    %104 = memref.load %arg5[%c10] : memref<24xf32, #tpu.memory_space<smem>>
    %105 = vector.broadcast %104 : f32 to vector<8x128xf32>
    %106 = arith.mulf %42, %105 : vector<8x128xf32>
    %107 = arith.addf %103, %106 : vector<8x128xf32>
    %c11 = arith.constant 11 : index
    %108 = memref.load %arg5[%c11] : memref<24xf32, #tpu.memory_space<smem>>
    %109 = vector.broadcast %108 : f32 to vector<8x128xf32>
    %110 = arith.mulf %55, %109 : vector<8x128xf32>
    %111 = arith.addf %107, %110 : vector<8x128xf32>
    %c3_15 = arith.constant 3 : index
    %112 = memref.load %arg6[%c3_15] : memref<8xf32, #tpu.memory_space<smem>>
    %113 = vector.broadcast %112 : f32 to vector<8x128xf32>
    %114 = arith.addf %111, %113 : vector<8x128xf32>
    %115 = math.tanh %114 : vector<8x128xf32>
    %c12 = arith.constant 12 : index
    %116 = memref.load %arg5[%c12] : memref<24xf32, #tpu.memory_space<smem>>
    %117 = vector.broadcast %116 : f32 to vector<8x128xf32>
    %118 = arith.mulf %53, %117 : vector<8x128xf32>
    %c13 = arith.constant 13 : index
    %119 = memref.load %arg5[%c13] : memref<24xf32, #tpu.memory_space<smem>>
    %120 = vector.broadcast %119 : f32 to vector<8x128xf32>
    %121 = arith.mulf %42, %120 : vector<8x128xf32>
    %122 = arith.addf %118, %121 : vector<8x128xf32>
    %c14 = arith.constant 14 : index
    %123 = memref.load %arg5[%c14] : memref<24xf32, #tpu.memory_space<smem>>
    %124 = vector.broadcast %123 : f32 to vector<8x128xf32>
    %125 = arith.mulf %55, %124 : vector<8x128xf32>
    %126 = arith.addf %122, %125 : vector<8x128xf32>
    %c4_16 = arith.constant 4 : index
    %127 = memref.load %arg6[%c4_16] : memref<8xf32, #tpu.memory_space<smem>>
    %128 = vector.broadcast %127 : f32 to vector<8x128xf32>
    %129 = arith.addf %126, %128 : vector<8x128xf32>
    %130 = math.tanh %129 : vector<8x128xf32>
    %c15 = arith.constant 15 : index
    %131 = memref.load %arg5[%c15] : memref<24xf32, #tpu.memory_space<smem>>
    %132 = vector.broadcast %131 : f32 to vector<8x128xf32>
    %133 = arith.mulf %53, %132 : vector<8x128xf32>
    %c16 = arith.constant 16 : index
    %134 = memref.load %arg5[%c16] : memref<24xf32, #tpu.memory_space<smem>>
    %135 = vector.broadcast %134 : f32 to vector<8x128xf32>
    %136 = arith.mulf %42, %135 : vector<8x128xf32>
    %137 = arith.addf %133, %136 : vector<8x128xf32>
    %c17 = arith.constant 17 : index
    %138 = memref.load %arg5[%c17] : memref<24xf32, #tpu.memory_space<smem>>
    %139 = vector.broadcast %138 : f32 to vector<8x128xf32>
    %140 = arith.mulf %55, %139 : vector<8x128xf32>
    %141 = arith.addf %137, %140 : vector<8x128xf32>
    %c5_17 = arith.constant 5 : index
    %142 = memref.load %arg6[%c5_17] : memref<8xf32, #tpu.memory_space<smem>>
    %143 = vector.broadcast %142 : f32 to vector<8x128xf32>
    %144 = arith.addf %141, %143 : vector<8x128xf32>
    %145 = math.tanh %144 : vector<8x128xf32>
    %c18 = arith.constant 18 : index
    %146 = memref.load %arg5[%c18] : memref<24xf32, #tpu.memory_space<smem>>
    %147 = vector.broadcast %146 : f32 to vector<8x128xf32>
    %148 = arith.mulf %53, %147 : vector<8x128xf32>
    %c19 = arith.constant 19 : index
    %149 = memref.load %arg5[%c19] : memref<24xf32, #tpu.memory_space<smem>>
    %150 = vector.broadcast %149 : f32 to vector<8x128xf32>
    %151 = arith.mulf %42, %150 : vector<8x128xf32>
    %152 = arith.addf %148, %151 : vector<8x128xf32>
    %c20 = arith.constant 20 : index
    %153 = memref.load %arg5[%c20] : memref<24xf32, #tpu.memory_space<smem>>
    %154 = vector.broadcast %153 : f32 to vector<8x128xf32>
    %155 = arith.mulf %55, %154 : vector<8x128xf32>
    %156 = arith.addf %152, %155 : vector<8x128xf32>
    %c6_18 = arith.constant 6 : index
    %157 = memref.load %arg6[%c6_18] : memref<8xf32, #tpu.memory_space<smem>>
    %158 = vector.broadcast %157 : f32 to vector<8x128xf32>
    %159 = arith.addf %156, %158 : vector<8x128xf32>
    %160 = math.tanh %159 : vector<8x128xf32>
    %c21 = arith.constant 21 : index
    %161 = memref.load %arg5[%c21] : memref<24xf32, #tpu.memory_space<smem>>
    %162 = vector.broadcast %161 : f32 to vector<8x128xf32>
    %163 = arith.mulf %53, %162 : vector<8x128xf32>
    %c22 = arith.constant 22 : index
    %164 = memref.load %arg5[%c22] : memref<24xf32, #tpu.memory_space<smem>>
    %165 = vector.broadcast %164 : f32 to vector<8x128xf32>
    %166 = arith.mulf %42, %165 : vector<8x128xf32>
    %167 = arith.addf %163, %166 : vector<8x128xf32>
    %c23 = arith.constant 23 : index
    %168 = memref.load %arg5[%c23] : memref<24xf32, #tpu.memory_space<smem>>
    %169 = vector.broadcast %168 : f32 to vector<8x128xf32>
    %170 = arith.mulf %55, %169 : vector<8x128xf32>
    %171 = arith.addf %167, %170 : vector<8x128xf32>
    %c7_19 = arith.constant 7 : index
    %172 = memref.load %arg6[%c7_19] : memref<8xf32, #tpu.memory_space<smem>>
    %173 = vector.broadcast %172 : f32 to vector<8x128xf32>
    %174 = arith.addf %171, %173 : vector<8x128xf32>
    %175 = math.tanh %174 : vector<8x128xf32>
    %c1_i32_20 = arith.constant 1 : i32
    %176 = tpu.dynamic_rotate %70 by %c1_i32_20 dim 1 : vector<8x128xf32>, i32 -> vector<8x128xf32>
    %177 = arith.select %49, %70, %176 : vector<8x128xi1>, vector<8x128xf32>
    %c127_i32_21 = arith.constant 127 : i32
    %178 = tpu.dynamic_rotate %70 by %c127_i32_21 dim 1 : vector<8x128xf32>, i32 -> vector<8x128xf32>
    %179 = arith.select %51, %70, %178 : vector<8x128xi1>, vector<8x128xf32>
    %c1_i32_22 = arith.constant 1 : i32
    %180 = tpu.dynamic_rotate %85 by %c1_i32_22 dim 1 : vector<8x128xf32>, i32 -> vector<8x128xf32>
    %181 = arith.select %49, %85, %180 : vector<8x128xi1>, vector<8x128xf32>
    %c127_i32_23 = arith.constant 127 : i32
    %182 = tpu.dynamic_rotate %85 by %c127_i32_23 dim 1 : vector<8x128xf32>, i32 -> vector<8x128xf32>
    %183 = arith.select %51, %85, %182 : vector<8x128xi1>, vector<8x128xf32>
    %c1_i32_24 = arith.constant 1 : i32
    %184 = tpu.dynamic_rotate %100 by %c1_i32_24 dim 1 : vector<8x128xf32>, i32 -> vector<8x128xf32>
    %185 = arith.select %49, %100, %184 : vector<8x128xi1>, vector<8x128xf32>
    %c127_i32_25 = arith.constant 127 : i32
    %186 = tpu.dynamic_rotate %100 by %c127_i32_25 dim 1 : vector<8x128xf32>, i32 -> vector<8x128xf32>
    %187 = arith.select %51, %100, %186 : vector<8x128xi1>, vector<8x128xf32>
    %c1_i32_26 = arith.constant 1 : i32
    %188 = tpu.dynamic_rotate %115 by %c1_i32_26 dim 1 : vector<8x128xf32>, i32 -> vector<8x128xf32>
    %189 = arith.select %49, %115, %188 : vector<8x128xi1>, vector<8x128xf32>
    %c127_i32_27 = arith.constant 127 : i32
    %190 = tpu.dynamic_rotate %115 by %c127_i32_27 dim 1 : vector<8x128xf32>, i32 -> vector<8x128xf32>
    %191 = arith.select %51, %115, %190 : vector<8x128xi1>, vector<8x128xf32>
    %c1_i32_28 = arith.constant 1 : i32
    %192 = tpu.dynamic_rotate %130 by %c1_i32_28 dim 1 : vector<8x128xf32>, i32 -> vector<8x128xf32>
    %193 = arith.select %49, %130, %192 : vector<8x128xi1>, vector<8x128xf32>
    %c127_i32_29 = arith.constant 127 : i32
    %194 = tpu.dynamic_rotate %130 by %c127_i32_29 dim 1 : vector<8x128xf32>, i32 -> vector<8x128xf32>
    %195 = arith.select %51, %130, %194 : vector<8x128xi1>, vector<8x128xf32>
    %c1_i32_30 = arith.constant 1 : i32
    %196 = tpu.dynamic_rotate %145 by %c1_i32_30 dim 1 : vector<8x128xf32>, i32 -> vector<8x128xf32>
    %197 = arith.select %49, %145, %196 : vector<8x128xi1>, vector<8x128xf32>
    %c127_i32_31 = arith.constant 127 : i32
    %198 = tpu.dynamic_rotate %145 by %c127_i32_31 dim 1 : vector<8x128xf32>, i32 -> vector<8x128xf32>
    %199 = arith.select %51, %145, %198 : vector<8x128xi1>, vector<8x128xf32>
    %c1_i32_32 = arith.constant 1 : i32
    %200 = tpu.dynamic_rotate %160 by %c1_i32_32 dim 1 : vector<8x128xf32>, i32 -> vector<8x128xf32>
    %201 = arith.select %49, %160, %200 : vector<8x128xi1>, vector<8x128xf32>
    %c127_i32_33 = arith.constant 127 : i32
    %202 = tpu.dynamic_rotate %160 by %c127_i32_33 dim 1 : vector<8x128xf32>, i32 -> vector<8x128xf32>
    %203 = arith.select %51, %160, %202 : vector<8x128xi1>, vector<8x128xf32>
    %c1_i32_34 = arith.constant 1 : i32
    %204 = tpu.dynamic_rotate %175 by %c1_i32_34 dim 1 : vector<8x128xf32>, i32 -> vector<8x128xf32>
    %205 = arith.select %49, %175, %204 : vector<8x128xi1>, vector<8x128xf32>
    %c127_i32_35 = arith.constant 127 : i32
    %206 = tpu.dynamic_rotate %175 by %c127_i32_35 dim 1 : vector<8x128xf32>, i32 -> vector<8x128xf32>
    %207 = arith.select %51, %175, %206 : vector<8x128xi1>, vector<8x128xf32>
    %c0_36 = arith.constant 0 : index
    %208 = memref.load %arg7[%c0_36] : memref<192xf32, #tpu.memory_space<smem>>
    %209 = vector.broadcast %208 : f32 to vector<8x128xf32>
    %210 = arith.mulf %177, %209 : vector<8x128xf32>
    %c1_37 = arith.constant 1 : index
    %211 = memref.load %arg7[%c1_37] : memref<192xf32, #tpu.memory_space<smem>>
    %212 = vector.broadcast %211 : f32 to vector<8x128xf32>
    %213 = arith.mulf %70, %212 : vector<8x128xf32>
    %214 = arith.addf %210, %213 : vector<8x128xf32>
    %c2_38 = arith.constant 2 : index
    %215 = memref.load %arg7[%c2_38] : memref<192xf32, #tpu.memory_space<smem>>
    %216 = vector.broadcast %215 : f32 to vector<8x128xf32>
    %217 = arith.mulf %179, %216 : vector<8x128xf32>
    %218 = arith.addf %214, %217 : vector<8x128xf32>
    %c3_39 = arith.constant 3 : index
    %219 = memref.load %arg7[%c3_39] : memref<192xf32, #tpu.memory_space<smem>>
    %220 = vector.broadcast %219 : f32 to vector<8x128xf32>
    %221 = arith.mulf %181, %220 : vector<8x128xf32>
    %222 = arith.addf %218, %221 : vector<8x128xf32>
    %c4_40 = arith.constant 4 : index
    %223 = memref.load %arg7[%c4_40] : memref<192xf32, #tpu.memory_space<smem>>
    %224 = vector.broadcast %223 : f32 to vector<8x128xf32>
    %225 = arith.mulf %85, %224 : vector<8x128xf32>
    %226 = arith.addf %222, %225 : vector<8x128xf32>
    %c5_41 = arith.constant 5 : index
    %227 = memref.load %arg7[%c5_41] : memref<192xf32, #tpu.memory_space<smem>>
    %228 = vector.broadcast %227 : f32 to vector<8x128xf32>
    %229 = arith.mulf %183, %228 : vector<8x128xf32>
    %230 = arith.addf %226, %229 : vector<8x128xf32>
    %c6_42 = arith.constant 6 : index
    %231 = memref.load %arg7[%c6_42] : memref<192xf32, #tpu.memory_space<smem>>
    %232 = vector.broadcast %231 : f32 to vector<8x128xf32>
    %233 = arith.mulf %185, %232 : vector<8x128xf32>
    %234 = arith.addf %230, %233 : vector<8x128xf32>
    %c7_43 = arith.constant 7 : index
    %235 = memref.load %arg7[%c7_43] : memref<192xf32, #tpu.memory_space<smem>>
    %236 = vector.broadcast %235 : f32 to vector<8x128xf32>
    %237 = arith.mulf %100, %236 : vector<8x128xf32>
    %238 = arith.addf %234, %237 : vector<8x128xf32>
    %c8_44 = arith.constant 8 : index
    %239 = memref.load %arg7[%c8_44] : memref<192xf32, #tpu.memory_space<smem>>
    %240 = vector.broadcast %239 : f32 to vector<8x128xf32>
    %241 = arith.mulf %187, %240 : vector<8x128xf32>
    %242 = arith.addf %238, %241 : vector<8x128xf32>
    %c9_45 = arith.constant 9 : index
    %243 = memref.load %arg7[%c9_45] : memref<192xf32, #tpu.memory_space<smem>>
    %244 = vector.broadcast %243 : f32 to vector<8x128xf32>
    %245 = arith.mulf %189, %244 : vector<8x128xf32>
    %246 = arith.addf %242, %245 : vector<8x128xf32>
    %c10_46 = arith.constant 10 : index
    %247 = memref.load %arg7[%c10_46] : memref<192xf32, #tpu.memory_space<smem>>
    %248 = vector.broadcast %247 : f32 to vector<8x128xf32>
    %249 = arith.mulf %115, %248 : vector<8x128xf32>
    %250 = arith.addf %246, %249 : vector<8x128xf32>
    %c11_47 = arith.constant 11 : index
    %251 = memref.load %arg7[%c11_47] : memref<192xf32, #tpu.memory_space<smem>>
    %252 = vector.broadcast %251 : f32 to vector<8x128xf32>
    %253 = arith.mulf %191, %252 : vector<8x128xf32>
    %254 = arith.addf %250, %253 : vector<8x128xf32>
    %c12_48 = arith.constant 12 : index
    %255 = memref.load %arg7[%c12_48] : memref<192xf32, #tpu.memory_space<smem>>
    %256 = vector.broadcast %255 : f32 to vector<8x128xf32>
    %257 = arith.mulf %193, %256 : vector<8x128xf32>
    %258 = arith.addf %254, %257 : vector<8x128xf32>
    %c13_49 = arith.constant 13 : index
    %259 = memref.load %arg7[%c13_49] : memref<192xf32, #tpu.memory_space<smem>>
    %260 = vector.broadcast %259 : f32 to vector<8x128xf32>
    %261 = arith.mulf %130, %260 : vector<8x128xf32>
    %262 = arith.addf %258, %261 : vector<8x128xf32>
    %c14_50 = arith.constant 14 : index
    %263 = memref.load %arg7[%c14_50] : memref<192xf32, #tpu.memory_space<smem>>
    %264 = vector.broadcast %263 : f32 to vector<8x128xf32>
    %265 = arith.mulf %195, %264 : vector<8x128xf32>
    %266 = arith.addf %262, %265 : vector<8x128xf32>
    %c15_51 = arith.constant 15 : index
    %267 = memref.load %arg7[%c15_51] : memref<192xf32, #tpu.memory_space<smem>>
    %268 = vector.broadcast %267 : f32 to vector<8x128xf32>
    %269 = arith.mulf %197, %268 : vector<8x128xf32>
    %270 = arith.addf %266, %269 : vector<8x128xf32>
    %c16_52 = arith.constant 16 : index
    %271 = memref.load %arg7[%c16_52] : memref<192xf32, #tpu.memory_space<smem>>
    %272 = vector.broadcast %271 : f32 to vector<8x128xf32>
    %273 = arith.mulf %145, %272 : vector<8x128xf32>
    %274 = arith.addf %270, %273 : vector<8x128xf32>
    %c17_53 = arith.constant 17 : index
    %275 = memref.load %arg7[%c17_53] : memref<192xf32, #tpu.memory_space<smem>>
    %276 = vector.broadcast %275 : f32 to vector<8x128xf32>
    %277 = arith.mulf %199, %276 : vector<8x128xf32>
    %278 = arith.addf %274, %277 : vector<8x128xf32>
    %c18_54 = arith.constant 18 : index
    %279 = memref.load %arg7[%c18_54] : memref<192xf32, #tpu.memory_space<smem>>
    %280 = vector.broadcast %279 : f32 to vector<8x128xf32>
    %281 = arith.mulf %201, %280 : vector<8x128xf32>
    %282 = arith.addf %278, %281 : vector<8x128xf32>
    %c19_55 = arith.constant 19 : index
    %283 = memref.load %arg7[%c19_55] : memref<192xf32, #tpu.memory_space<smem>>
    %284 = vector.broadcast %283 : f32 to vector<8x128xf32>
    %285 = arith.mulf %160, %284 : vector<8x128xf32>
    %286 = arith.addf %282, %285 : vector<8x128xf32>
    %c20_56 = arith.constant 20 : index
    %287 = memref.load %arg7[%c20_56] : memref<192xf32, #tpu.memory_space<smem>>
    %288 = vector.broadcast %287 : f32 to vector<8x128xf32>
    %289 = arith.mulf %203, %288 : vector<8x128xf32>
    %290 = arith.addf %286, %289 : vector<8x128xf32>
    %c21_57 = arith.constant 21 : index
    %291 = memref.load %arg7[%c21_57] : memref<192xf32, #tpu.memory_space<smem>>
    %292 = vector.broadcast %291 : f32 to vector<8x128xf32>
    %293 = arith.mulf %205, %292 : vector<8x128xf32>
    %294 = arith.addf %290, %293 : vector<8x128xf32>
    %c22_58 = arith.constant 22 : index
    %295 = memref.load %arg7[%c22_58] : memref<192xf32, #tpu.memory_space<smem>>
    %296 = vector.broadcast %295 : f32 to vector<8x128xf32>
    %297 = arith.mulf %175, %296 : vector<8x128xf32>
    %298 = arith.addf %294, %297 : vector<8x128xf32>
    %c23_59 = arith.constant 23 : index
    %299 = memref.load %arg7[%c23_59] : memref<192xf32, #tpu.memory_space<smem>>
    %300 = vector.broadcast %299 : f32 to vector<8x128xf32>
    %301 = arith.mulf %207, %300 : vector<8x128xf32>
    %302 = arith.addf %298, %301 : vector<8x128xf32>
    %c0_60 = arith.constant 0 : index
    %303 = memref.load %arg8[%c0_60] : memref<8xf32, #tpu.memory_space<smem>>
    %304 = vector.broadcast %303 : f32 to vector<8x128xf32>
    %305 = arith.addf %302, %304 : vector<8x128xf32>
    %306 = math.tanh %305 : vector<8x128xf32>
    %c24 = arith.constant 24 : index
    %307 = memref.load %arg7[%c24] : memref<192xf32, #tpu.memory_space<smem>>
    %308 = vector.broadcast %307 : f32 to vector<8x128xf32>
    %309 = arith.mulf %177, %308 : vector<8x128xf32>
    %c25 = arith.constant 25 : index
    %310 = memref.load %arg7[%c25] : memref<192xf32, #tpu.memory_space<smem>>
    %311 = vector.broadcast %310 : f32 to vector<8x128xf32>
    %312 = arith.mulf %70, %311 : vector<8x128xf32>
    %313 = arith.addf %309, %312 : vector<8x128xf32>
    %c26 = arith.constant 26 : index
    %314 = memref.load %arg7[%c26] : memref<192xf32, #tpu.memory_space<smem>>
    %315 = vector.broadcast %314 : f32 to vector<8x128xf32>
    %316 = arith.mulf %179, %315 : vector<8x128xf32>
    %317 = arith.addf %313, %316 : vector<8x128xf32>
    %c27 = arith.constant 27 : index
    %318 = memref.load %arg7[%c27] : memref<192xf32, #tpu.memory_space<smem>>
    %319 = vector.broadcast %318 : f32 to vector<8x128xf32>
    %320 = arith.mulf %181, %319 : vector<8x128xf32>
    %321 = arith.addf %317, %320 : vector<8x128xf32>
    %c28 = arith.constant 28 : index
    %322 = memref.load %arg7[%c28] : memref<192xf32, #tpu.memory_space<smem>>
    %323 = vector.broadcast %322 : f32 to vector<8x128xf32>
    %324 = arith.mulf %85, %323 : vector<8x128xf32>
    %325 = arith.addf %321, %324 : vector<8x128xf32>
    %c29 = arith.constant 29 : index
    %326 = memref.load %arg7[%c29] : memref<192xf32, #tpu.memory_space<smem>>
    %327 = vector.broadcast %326 : f32 to vector<8x128xf32>
    %328 = arith.mulf %183, %327 : vector<8x128xf32>
    %329 = arith.addf %325, %328 : vector<8x128xf32>
    %c30 = arith.constant 30 : index
    %330 = memref.load %arg7[%c30] : memref<192xf32, #tpu.memory_space<smem>>
    %331 = vector.broadcast %330 : f32 to vector<8x128xf32>
    %332 = arith.mulf %185, %331 : vector<8x128xf32>
    %333 = arith.addf %329, %332 : vector<8x128xf32>
    %c31 = arith.constant 31 : index
    %334 = memref.load %arg7[%c31] : memref<192xf32, #tpu.memory_space<smem>>
    %335 = vector.broadcast %334 : f32 to vector<8x128xf32>
    %336 = arith.mulf %100, %335 : vector<8x128xf32>
    %337 = arith.addf %333, %336 : vector<8x128xf32>
    %c32 = arith.constant 32 : index
    %338 = memref.load %arg7[%c32] : memref<192xf32, #tpu.memory_space<smem>>
    %339 = vector.broadcast %338 : f32 to vector<8x128xf32>
    %340 = arith.mulf %187, %339 : vector<8x128xf32>
    %341 = arith.addf %337, %340 : vector<8x128xf32>
    %c33 = arith.constant 33 : index
    %342 = memref.load %arg7[%c33] : memref<192xf32, #tpu.memory_space<smem>>
    %343 = vector.broadcast %342 : f32 to vector<8x128xf32>
    %344 = arith.mulf %189, %343 : vector<8x128xf32>
    %345 = arith.addf %341, %344 : vector<8x128xf32>
    %c34 = arith.constant 34 : index
    %346 = memref.load %arg7[%c34] : memref<192xf32, #tpu.memory_space<smem>>
    %347 = vector.broadcast %346 : f32 to vector<8x128xf32>
    %348 = arith.mulf %115, %347 : vector<8x128xf32>
    %349 = arith.addf %345, %348 : vector<8x128xf32>
    %c35 = arith.constant 35 : index
    %350 = memref.load %arg7[%c35] : memref<192xf32, #tpu.memory_space<smem>>
    %351 = vector.broadcast %350 : f32 to vector<8x128xf32>
    %352 = arith.mulf %191, %351 : vector<8x128xf32>
    %353 = arith.addf %349, %352 : vector<8x128xf32>
    %c36 = arith.constant 36 : index
    %354 = memref.load %arg7[%c36] : memref<192xf32, #tpu.memory_space<smem>>
    %355 = vector.broadcast %354 : f32 to vector<8x128xf32>
    %356 = arith.mulf %193, %355 : vector<8x128xf32>
    %357 = arith.addf %353, %356 : vector<8x128xf32>
    %c37 = arith.constant 37 : index
    %358 = memref.load %arg7[%c37] : memref<192xf32, #tpu.memory_space<smem>>
    %359 = vector.broadcast %358 : f32 to vector<8x128xf32>
    %360 = arith.mulf %130, %359 : vector<8x128xf32>
    %361 = arith.addf %357, %360 : vector<8x128xf32>
    %c38 = arith.constant 38 : index
    %362 = memref.load %arg7[%c38] : memref<192xf32, #tpu.memory_space<smem>>
    %363 = vector.broadcast %362 : f32 to vector<8x128xf32>
    %364 = arith.mulf %195, %363 : vector<8x128xf32>
    %365 = arith.addf %361, %364 : vector<8x128xf32>
    %c39 = arith.constant 39 : index
    %366 = memref.load %arg7[%c39] : memref<192xf32, #tpu.memory_space<smem>>
    %367 = vector.broadcast %366 : f32 to vector<8x128xf32>
    %368 = arith.mulf %197, %367 : vector<8x128xf32>
    %369 = arith.addf %365, %368 : vector<8x128xf32>
    %c40 = arith.constant 40 : index
    %370 = memref.load %arg7[%c40] : memref<192xf32, #tpu.memory_space<smem>>
    %371 = vector.broadcast %370 : f32 to vector<8x128xf32>
    %372 = arith.mulf %145, %371 : vector<8x128xf32>
    %373 = arith.addf %369, %372 : vector<8x128xf32>
    %c41 = arith.constant 41 : index
    %374 = memref.load %arg7[%c41] : memref<192xf32, #tpu.memory_space<smem>>
    %375 = vector.broadcast %374 : f32 to vector<8x128xf32>
    %376 = arith.mulf %199, %375 : vector<8x128xf32>
    %377 = arith.addf %373, %376 : vector<8x128xf32>
    %c42 = arith.constant 42 : index
    %378 = memref.load %arg7[%c42] : memref<192xf32, #tpu.memory_space<smem>>
    %379 = vector.broadcast %378 : f32 to vector<8x128xf32>
    %380 = arith.mulf %201, %379 : vector<8x128xf32>
    %381 = arith.addf %377, %380 : vector<8x128xf32>
    %c43 = arith.constant 43 : index
    %382 = memref.load %arg7[%c43] : memref<192xf32, #tpu.memory_space<smem>>
    %383 = vector.broadcast %382 : f32 to vector<8x128xf32>
    %384 = arith.mulf %160, %383 : vector<8x128xf32>
    %385 = arith.addf %381, %384 : vector<8x128xf32>
    %c44 = arith.constant 44 : index
    %386 = memref.load %arg7[%c44] : memref<192xf32, #tpu.memory_space<smem>>
    %387 = vector.broadcast %386 : f32 to vector<8x128xf32>
    %388 = arith.mulf %203, %387 : vector<8x128xf32>
    %389 = arith.addf %385, %388 : vector<8x128xf32>
    %c45 = arith.constant 45 : index
    %390 = memref.load %arg7[%c45] : memref<192xf32, #tpu.memory_space<smem>>
    %391 = vector.broadcast %390 : f32 to vector<8x128xf32>
    %392 = arith.mulf %205, %391 : vector<8x128xf32>
    %393 = arith.addf %389, %392 : vector<8x128xf32>
    %c46 = arith.constant 46 : index
    %394 = memref.load %arg7[%c46] : memref<192xf32, #tpu.memory_space<smem>>
    %395 = vector.broadcast %394 : f32 to vector<8x128xf32>
    %396 = arith.mulf %175, %395 : vector<8x128xf32>
    %397 = arith.addf %393, %396 : vector<8x128xf32>
    %c47 = arith.constant 47 : index
    %398 = memref.load %arg7[%c47] : memref<192xf32, #tpu.memory_space<smem>>
    %399 = vector.broadcast %398 : f32 to vector<8x128xf32>
    %400 = arith.mulf %207, %399 : vector<8x128xf32>
    %401 = arith.addf %397, %400 : vector<8x128xf32>
    %c1_61 = arith.constant 1 : index
    %402 = memref.load %arg8[%c1_61] : memref<8xf32, #tpu.memory_space<smem>>
    %403 = vector.broadcast %402 : f32 to vector<8x128xf32>
    %404 = arith.addf %401, %403 : vector<8x128xf32>
    %405 = math.tanh %404 : vector<8x128xf32>
    %c48 = arith.constant 48 : index
    %406 = memref.load %arg7[%c48] : memref<192xf32, #tpu.memory_space<smem>>
    %407 = vector.broadcast %406 : f32 to vector<8x128xf32>
    %408 = arith.mulf %177, %407 : vector<8x128xf32>
    %c49 = arith.constant 49 : index
    %409 = memref.load %arg7[%c49] : memref<192xf32, #tpu.memory_space<smem>>
    %410 = vector.broadcast %409 : f32 to vector<8x128xf32>
    %411 = arith.mulf %70, %410 : vector<8x128xf32>
    %412 = arith.addf %408, %411 : vector<8x128xf32>
    %c50 = arith.constant 50 : index
    %413 = memref.load %arg7[%c50] : memref<192xf32, #tpu.memory_space<smem>>
    %414 = vector.broadcast %413 : f32 to vector<8x128xf32>
    %415 = arith.mulf %179, %414 : vector<8x128xf32>
    %416 = arith.addf %412, %415 : vector<8x128xf32>
    %c51 = arith.constant 51 : index
    %417 = memref.load %arg7[%c51] : memref<192xf32, #tpu.memory_space<smem>>
    %418 = vector.broadcast %417 : f32 to vector<8x128xf32>
    %419 = arith.mulf %181, %418 : vector<8x128xf32>
    %420 = arith.addf %416, %419 : vector<8x128xf32>
    %c52 = arith.constant 52 : index
    %421 = memref.load %arg7[%c52] : memref<192xf32, #tpu.memory_space<smem>>
    %422 = vector.broadcast %421 : f32 to vector<8x128xf32>
    %423 = arith.mulf %85, %422 : vector<8x128xf32>
    %424 = arith.addf %420, %423 : vector<8x128xf32>
    %c53 = arith.constant 53 : index
    %425 = memref.load %arg7[%c53] : memref<192xf32, #tpu.memory_space<smem>>
    %426 = vector.broadcast %425 : f32 to vector<8x128xf32>
    %427 = arith.mulf %183, %426 : vector<8x128xf32>
    %428 = arith.addf %424, %427 : vector<8x128xf32>
    %c54 = arith.constant 54 : index
    %429 = memref.load %arg7[%c54] : memref<192xf32, #tpu.memory_space<smem>>
    %430 = vector.broadcast %429 : f32 to vector<8x128xf32>
    %431 = arith.mulf %185, %430 : vector<8x128xf32>
    %432 = arith.addf %428, %431 : vector<8x128xf32>
    %c55 = arith.constant 55 : index
    %433 = memref.load %arg7[%c55] : memref<192xf32, #tpu.memory_space<smem>>
    %434 = vector.broadcast %433 : f32 to vector<8x128xf32>
    %435 = arith.mulf %100, %434 : vector<8x128xf32>
    %436 = arith.addf %432, %435 : vector<8x128xf32>
    %c56 = arith.constant 56 : index
    %437 = memref.load %arg7[%c56] : memref<192xf32, #tpu.memory_space<smem>>
    %438 = vector.broadcast %437 : f32 to vector<8x128xf32>
    %439 = arith.mulf %187, %438 : vector<8x128xf32>
    %440 = arith.addf %436, %439 : vector<8x128xf32>
    %c57 = arith.constant 57 : index
    %441 = memref.load %arg7[%c57] : memref<192xf32, #tpu.memory_space<smem>>
    %442 = vector.broadcast %441 : f32 to vector<8x128xf32>
    %443 = arith.mulf %189, %442 : vector<8x128xf32>
    %444 = arith.addf %440, %443 : vector<8x128xf32>
    %c58 = arith.constant 58 : index
    %445 = memref.load %arg7[%c58] : memref<192xf32, #tpu.memory_space<smem>>
    %446 = vector.broadcast %445 : f32 to vector<8x128xf32>
    %447 = arith.mulf %115, %446 : vector<8x128xf32>
    %448 = arith.addf %444, %447 : vector<8x128xf32>
    %c59 = arith.constant 59 : index
    %449 = memref.load %arg7[%c59] : memref<192xf32, #tpu.memory_space<smem>>
    %450 = vector.broadcast %449 : f32 to vector<8x128xf32>
    %451 = arith.mulf %191, %450 : vector<8x128xf32>
    %452 = arith.addf %448, %451 : vector<8x128xf32>
    %c60 = arith.constant 60 : index
    %453 = memref.load %arg7[%c60] : memref<192xf32, #tpu.memory_space<smem>>
    %454 = vector.broadcast %453 : f32 to vector<8x128xf32>
    %455 = arith.mulf %193, %454 : vector<8x128xf32>
    %456 = arith.addf %452, %455 : vector<8x128xf32>
    %c61 = arith.constant 61 : index
    %457 = memref.load %arg7[%c61] : memref<192xf32, #tpu.memory_space<smem>>
    %458 = vector.broadcast %457 : f32 to vector<8x128xf32>
    %459 = arith.mulf %130, %458 : vector<8x128xf32>
    %460 = arith.addf %456, %459 : vector<8x128xf32>
    %c62 = arith.constant 62 : index
    %461 = memref.load %arg7[%c62] : memref<192xf32, #tpu.memory_space<smem>>
    %462 = vector.broadcast %461 : f32 to vector<8x128xf32>
    %463 = arith.mulf %195, %462 : vector<8x128xf32>
    %464 = arith.addf %460, %463 : vector<8x128xf32>
    %c63 = arith.constant 63 : index
    %465 = memref.load %arg7[%c63] : memref<192xf32, #tpu.memory_space<smem>>
    %466 = vector.broadcast %465 : f32 to vector<8x128xf32>
    %467 = arith.mulf %197, %466 : vector<8x128xf32>
    %468 = arith.addf %464, %467 : vector<8x128xf32>
    %c64 = arith.constant 64 : index
    %469 = memref.load %arg7[%c64] : memref<192xf32, #tpu.memory_space<smem>>
    %470 = vector.broadcast %469 : f32 to vector<8x128xf32>
    %471 = arith.mulf %145, %470 : vector<8x128xf32>
    %472 = arith.addf %468, %471 : vector<8x128xf32>
    %c65 = arith.constant 65 : index
    %473 = memref.load %arg7[%c65] : memref<192xf32, #tpu.memory_space<smem>>
    %474 = vector.broadcast %473 : f32 to vector<8x128xf32>
    %475 = arith.mulf %199, %474 : vector<8x128xf32>
    %476 = arith.addf %472, %475 : vector<8x128xf32>
    %c66 = arith.constant 66 : index
    %477 = memref.load %arg7[%c66] : memref<192xf32, #tpu.memory_space<smem>>
    %478 = vector.broadcast %477 : f32 to vector<8x128xf32>
    %479 = arith.mulf %201, %478 : vector<8x128xf32>
    %480 = arith.addf %476, %479 : vector<8x128xf32>
    %c67 = arith.constant 67 : index
    %481 = memref.load %arg7[%c67] : memref<192xf32, #tpu.memory_space<smem>>
    %482 = vector.broadcast %481 : f32 to vector<8x128xf32>
    %483 = arith.mulf %160, %482 : vector<8x128xf32>
    %484 = arith.addf %480, %483 : vector<8x128xf32>
    %c68 = arith.constant 68 : index
    %485 = memref.load %arg7[%c68] : memref<192xf32, #tpu.memory_space<smem>>
    %486 = vector.broadcast %485 : f32 to vector<8x128xf32>
    %487 = arith.mulf %203, %486 : vector<8x128xf32>
    %488 = arith.addf %484, %487 : vector<8x128xf32>
    %c69 = arith.constant 69 : index
    %489 = memref.load %arg7[%c69] : memref<192xf32, #tpu.memory_space<smem>>
    %490 = vector.broadcast %489 : f32 to vector<8x128xf32>
    %491 = arith.mulf %205, %490 : vector<8x128xf32>
    %492 = arith.addf %488, %491 : vector<8x128xf32>
    %c70 = arith.constant 70 : index
    %493 = memref.load %arg7[%c70] : memref<192xf32, #tpu.memory_space<smem>>
    %494 = vector.broadcast %493 : f32 to vector<8x128xf32>
    %495 = arith.mulf %175, %494 : vector<8x128xf32>
    %496 = arith.addf %492, %495 : vector<8x128xf32>
    %c71 = arith.constant 71 : index
    %497 = memref.load %arg7[%c71] : memref<192xf32, #tpu.memory_space<smem>>
    %498 = vector.broadcast %497 : f32 to vector<8x128xf32>
    %499 = arith.mulf %207, %498 : vector<8x128xf32>
    %500 = arith.addf %496, %499 : vector<8x128xf32>
    %c2_62 = arith.constant 2 : index
    %501 = memref.load %arg8[%c2_62] : memref<8xf32, #tpu.memory_space<smem>>
    %502 = vector.broadcast %501 : f32 to vector<8x128xf32>
    %503 = arith.addf %500, %502 : vector<8x128xf32>
    %504 = math.tanh %503 : vector<8x128xf32>
    %c72 = arith.constant 72 : index
    %505 = memref.load %arg7[%c72] : memref<192xf32, #tpu.memory_space<smem>>
    %506 = vector.broadcast %505 : f32 to vector<8x128xf32>
    %507 = arith.mulf %177, %506 : vector<8x128xf32>
    %c73 = arith.constant 73 : index
    %508 = memref.load %arg7[%c73] : memref<192xf32, #tpu.memory_space<smem>>
    %509 = vector.broadcast %508 : f32 to vector<8x128xf32>
    %510 = arith.mulf %70, %509 : vector<8x128xf32>
    %511 = arith.addf %507, %510 : vector<8x128xf32>
    %c74 = arith.constant 74 : index
    %512 = memref.load %arg7[%c74] : memref<192xf32, #tpu.memory_space<smem>>
    %513 = vector.broadcast %512 : f32 to vector<8x128xf32>
    %514 = arith.mulf %179, %513 : vector<8x128xf32>
    %515 = arith.addf %511, %514 : vector<8x128xf32>
    %c75 = arith.constant 75 : index
    %516 = memref.load %arg7[%c75] : memref<192xf32, #tpu.memory_space<smem>>
    %517 = vector.broadcast %516 : f32 to vector<8x128xf32>
    %518 = arith.mulf %181, %517 : vector<8x128xf32>
    %519 = arith.addf %515, %518 : vector<8x128xf32>
    %c76 = arith.constant 76 : index
    %520 = memref.load %arg7[%c76] : memref<192xf32, #tpu.memory_space<smem>>
    %521 = vector.broadcast %520 : f32 to vector<8x128xf32>
    %522 = arith.mulf %85, %521 : vector<8x128xf32>
    %523 = arith.addf %519, %522 : vector<8x128xf32>
    %c77 = arith.constant 77 : index
    %524 = memref.load %arg7[%c77] : memref<192xf32, #tpu.memory_space<smem>>
    %525 = vector.broadcast %524 : f32 to vector<8x128xf32>
    %526 = arith.mulf %183, %525 : vector<8x128xf32>
    %527 = arith.addf %523, %526 : vector<8x128xf32>
    %c78 = arith.constant 78 : index
    %528 = memref.load %arg7[%c78] : memref<192xf32, #tpu.memory_space<smem>>
    %529 = vector.broadcast %528 : f32 to vector<8x128xf32>
    %530 = arith.mulf %185, %529 : vector<8x128xf32>
    %531 = arith.addf %527, %530 : vector<8x128xf32>
    %c79 = arith.constant 79 : index
    %532 = memref.load %arg7[%c79] : memref<192xf32, #tpu.memory_space<smem>>
    %533 = vector.broadcast %532 : f32 to vector<8x128xf32>
    %534 = arith.mulf %100, %533 : vector<8x128xf32>
    %535 = arith.addf %531, %534 : vector<8x128xf32>
    %c80 = arith.constant 80 : index
    %536 = memref.load %arg7[%c80] : memref<192xf32, #tpu.memory_space<smem>>
    %537 = vector.broadcast %536 : f32 to vector<8x128xf32>
    %538 = arith.mulf %187, %537 : vector<8x128xf32>
    %539 = arith.addf %535, %538 : vector<8x128xf32>
    %c81 = arith.constant 81 : index
    %540 = memref.load %arg7[%c81] : memref<192xf32, #tpu.memory_space<smem>>
    %541 = vector.broadcast %540 : f32 to vector<8x128xf32>
    %542 = arith.mulf %189, %541 : vector<8x128xf32>
    %543 = arith.addf %539, %542 : vector<8x128xf32>
    %c82 = arith.constant 82 : index
    %544 = memref.load %arg7[%c82] : memref<192xf32, #tpu.memory_space<smem>>
    %545 = vector.broadcast %544 : f32 to vector<8x128xf32>
    %546 = arith.mulf %115, %545 : vector<8x128xf32>
    %547 = arith.addf %543, %546 : vector<8x128xf32>
    %c83 = arith.constant 83 : index
    %548 = memref.load %arg7[%c83] : memref<192xf32, #tpu.memory_space<smem>>
    %549 = vector.broadcast %548 : f32 to vector<8x128xf32>
    %550 = arith.mulf %191, %549 : vector<8x128xf32>
    %551 = arith.addf %547, %550 : vector<8x128xf32>
    %c84 = arith.constant 84 : index
    %552 = memref.load %arg7[%c84] : memref<192xf32, #tpu.memory_space<smem>>
    %553 = vector.broadcast %552 : f32 to vector<8x128xf32>
    %554 = arith.mulf %193, %553 : vector<8x128xf32>
    %555 = arith.addf %551, %554 : vector<8x128xf32>
    %c85 = arith.constant 85 : index
    %556 = memref.load %arg7[%c85] : memref<192xf32, #tpu.memory_space<smem>>
    %557 = vector.broadcast %556 : f32 to vector<8x128xf32>
    %558 = arith.mulf %130, %557 : vector<8x128xf32>
    %559 = arith.addf %555, %558 : vector<8x128xf32>
    %c86 = arith.constant 86 : index
    %560 = memref.load %arg7[%c86] : memref<192xf32, #tpu.memory_space<smem>>
    %561 = vector.broadcast %560 : f32 to vector<8x128xf32>
    %562 = arith.mulf %195, %561 : vector<8x128xf32>
    %563 = arith.addf %559, %562 : vector<8x128xf32>
    %c87 = arith.constant 87 : index
    %564 = memref.load %arg7[%c87] : memref<192xf32, #tpu.memory_space<smem>>
    %565 = vector.broadcast %564 : f32 to vector<8x128xf32>
    %566 = arith.mulf %197, %565 : vector<8x128xf32>
    %567 = arith.addf %563, %566 : vector<8x128xf32>
    %c88 = arith.constant 88 : index
    %568 = memref.load %arg7[%c88] : memref<192xf32, #tpu.memory_space<smem>>
    %569 = vector.broadcast %568 : f32 to vector<8x128xf32>
    %570 = arith.mulf %145, %569 : vector<8x128xf32>
    %571 = arith.addf %567, %570 : vector<8x128xf32>
    %c89 = arith.constant 89 : index
    %572 = memref.load %arg7[%c89] : memref<192xf32, #tpu.memory_space<smem>>
    %573 = vector.broadcast %572 : f32 to vector<8x128xf32>
    %574 = arith.mulf %199, %573 : vector<8x128xf32>
    %575 = arith.addf %571, %574 : vector<8x128xf32>
    %c90 = arith.constant 90 : index
    %576 = memref.load %arg7[%c90] : memref<192xf32, #tpu.memory_space<smem>>
    %577 = vector.broadcast %576 : f32 to vector<8x128xf32>
    %578 = arith.mulf %201, %577 : vector<8x128xf32>
    %579 = arith.addf %575, %578 : vector<8x128xf32>
    %c91 = arith.constant 91 : index
    %580 = memref.load %arg7[%c91] : memref<192xf32, #tpu.memory_space<smem>>
    %581 = vector.broadcast %580 : f32 to vector<8x128xf32>
    %582 = arith.mulf %160, %581 : vector<8x128xf32>
    %583 = arith.addf %579, %582 : vector<8x128xf32>
    %c92 = arith.constant 92 : index
    %584 = memref.load %arg7[%c92] : memref<192xf32, #tpu.memory_space<smem>>
    %585 = vector.broadcast %584 : f32 to vector<8x128xf32>
    %586 = arith.mulf %203, %585 : vector<8x128xf32>
    %587 = arith.addf %583, %586 : vector<8x128xf32>
    %c93 = arith.constant 93 : index
    %588 = memref.load %arg7[%c93] : memref<192xf32, #tpu.memory_space<smem>>
    %589 = vector.broadcast %588 : f32 to vector<8x128xf32>
    %590 = arith.mulf %205, %589 : vector<8x128xf32>
    %591 = arith.addf %587, %590 : vector<8x128xf32>
    %c94 = arith.constant 94 : index
    %592 = memref.load %arg7[%c94] : memref<192xf32, #tpu.memory_space<smem>>
    %593 = vector.broadcast %592 : f32 to vector<8x128xf32>
    %594 = arith.mulf %175, %593 : vector<8x128xf32>
    %595 = arith.addf %591, %594 : vector<8x128xf32>
    %c95 = arith.constant 95 : index
    %596 = memref.load %arg7[%c95] : memref<192xf32, #tpu.memory_space<smem>>
    %597 = vector.broadcast %596 : f32 to vector<8x128xf32>
    %598 = arith.mulf %207, %597 : vector<8x128xf32>
    %599 = arith.addf %595, %598 : vector<8x128xf32>
    %c3_63 = arith.constant 3 : index
    %600 = memref.load %arg8[%c3_63] : memref<8xf32, #tpu.memory_space<smem>>
    %601 = vector.broadcast %600 : f32 to vector<8x128xf32>
    %602 = arith.addf %599, %601 : vector<8x128xf32>
    %603 = math.tanh %602 : vector<8x128xf32>
    %c96 = arith.constant 96 : index
    %604 = memref.load %arg7[%c96] : memref<192xf32, #tpu.memory_space<smem>>
    %605 = vector.broadcast %604 : f32 to vector<8x128xf32>
    %606 = arith.mulf %177, %605 : vector<8x128xf32>
    %c97 = arith.constant 97 : index
    %607 = memref.load %arg7[%c97] : memref<192xf32, #tpu.memory_space<smem>>
    %608 = vector.broadcast %607 : f32 to vector<8x128xf32>
    %609 = arith.mulf %70, %608 : vector<8x128xf32>
    %610 = arith.addf %606, %609 : vector<8x128xf32>
    %c98 = arith.constant 98 : index
    %611 = memref.load %arg7[%c98] : memref<192xf32, #tpu.memory_space<smem>>
    %612 = vector.broadcast %611 : f32 to vector<8x128xf32>
    %613 = arith.mulf %179, %612 : vector<8x128xf32>
    %614 = arith.addf %610, %613 : vector<8x128xf32>
    %c99 = arith.constant 99 : index
    %615 = memref.load %arg7[%c99] : memref<192xf32, #tpu.memory_space<smem>>
    %616 = vector.broadcast %615 : f32 to vector<8x128xf32>
    %617 = arith.mulf %181, %616 : vector<8x128xf32>
    %618 = arith.addf %614, %617 : vector<8x128xf32>
    %c100 = arith.constant 100 : index
    %619 = memref.load %arg7[%c100] : memref<192xf32, #tpu.memory_space<smem>>
    %620 = vector.broadcast %619 : f32 to vector<8x128xf32>
    %621 = arith.mulf %85, %620 : vector<8x128xf32>
    %622 = arith.addf %618, %621 : vector<8x128xf32>
    %c101 = arith.constant 101 : index
    %623 = memref.load %arg7[%c101] : memref<192xf32, #tpu.memory_space<smem>>
    %624 = vector.broadcast %623 : f32 to vector<8x128xf32>
    %625 = arith.mulf %183, %624 : vector<8x128xf32>
    %626 = arith.addf %622, %625 : vector<8x128xf32>
    %c102 = arith.constant 102 : index
    %627 = memref.load %arg7[%c102] : memref<192xf32, #tpu.memory_space<smem>>
    %628 = vector.broadcast %627 : f32 to vector<8x128xf32>
    %629 = arith.mulf %185, %628 : vector<8x128xf32>
    %630 = arith.addf %626, %629 : vector<8x128xf32>
    %c103 = arith.constant 103 : index
    %631 = memref.load %arg7[%c103] : memref<192xf32, #tpu.memory_space<smem>>
    %632 = vector.broadcast %631 : f32 to vector<8x128xf32>
    %633 = arith.mulf %100, %632 : vector<8x128xf32>
    %634 = arith.addf %630, %633 : vector<8x128xf32>
    %c104 = arith.constant 104 : index
    %635 = memref.load %arg7[%c104] : memref<192xf32, #tpu.memory_space<smem>>
    %636 = vector.broadcast %635 : f32 to vector<8x128xf32>
    %637 = arith.mulf %187, %636 : vector<8x128xf32>
    %638 = arith.addf %634, %637 : vector<8x128xf32>
    %c105 = arith.constant 105 : index
    %639 = memref.load %arg7[%c105] : memref<192xf32, #tpu.memory_space<smem>>
    %640 = vector.broadcast %639 : f32 to vector<8x128xf32>
    %641 = arith.mulf %189, %640 : vector<8x128xf32>
    %642 = arith.addf %638, %641 : vector<8x128xf32>
    %c106 = arith.constant 106 : index
    %643 = memref.load %arg7[%c106] : memref<192xf32, #tpu.memory_space<smem>>
    %644 = vector.broadcast %643 : f32 to vector<8x128xf32>
    %645 = arith.mulf %115, %644 : vector<8x128xf32>
    %646 = arith.addf %642, %645 : vector<8x128xf32>
    %c107 = arith.constant 107 : index
    %647 = memref.load %arg7[%c107] : memref<192xf32, #tpu.memory_space<smem>>
    %648 = vector.broadcast %647 : f32 to vector<8x128xf32>
    %649 = arith.mulf %191, %648 : vector<8x128xf32>
    %650 = arith.addf %646, %649 : vector<8x128xf32>
    %c108 = arith.constant 108 : index
    %651 = memref.load %arg7[%c108] : memref<192xf32, #tpu.memory_space<smem>>
    %652 = vector.broadcast %651 : f32 to vector<8x128xf32>
    %653 = arith.mulf %193, %652 : vector<8x128xf32>
    %654 = arith.addf %650, %653 : vector<8x128xf32>
    %c109 = arith.constant 109 : index
    %655 = memref.load %arg7[%c109] : memref<192xf32, #tpu.memory_space<smem>>
    %656 = vector.broadcast %655 : f32 to vector<8x128xf32>
    %657 = arith.mulf %130, %656 : vector<8x128xf32>
    %658 = arith.addf %654, %657 : vector<8x128xf32>
    %c110 = arith.constant 110 : index
    %659 = memref.load %arg7[%c110] : memref<192xf32, #tpu.memory_space<smem>>
    %660 = vector.broadcast %659 : f32 to vector<8x128xf32>
    %661 = arith.mulf %195, %660 : vector<8x128xf32>
    %662 = arith.addf %658, %661 : vector<8x128xf32>
    %c111 = arith.constant 111 : index
    %663 = memref.load %arg7[%c111] : memref<192xf32, #tpu.memory_space<smem>>
    %664 = vector.broadcast %663 : f32 to vector<8x128xf32>
    %665 = arith.mulf %197, %664 : vector<8x128xf32>
    %666 = arith.addf %662, %665 : vector<8x128xf32>
    %c112 = arith.constant 112 : index
    %667 = memref.load %arg7[%c112] : memref<192xf32, #tpu.memory_space<smem>>
    %668 = vector.broadcast %667 : f32 to vector<8x128xf32>
    %669 = arith.mulf %145, %668 : vector<8x128xf32>
    %670 = arith.addf %666, %669 : vector<8x128xf32>
    %c113 = arith.constant 113 : index
    %671 = memref.load %arg7[%c113] : memref<192xf32, #tpu.memory_space<smem>>
    %672 = vector.broadcast %671 : f32 to vector<8x128xf32>
    %673 = arith.mulf %199, %672 : vector<8x128xf32>
    %674 = arith.addf %670, %673 : vector<8x128xf32>
    %c114 = arith.constant 114 : index
    %675 = memref.load %arg7[%c114] : memref<192xf32, #tpu.memory_space<smem>>
    %676 = vector.broadcast %675 : f32 to vector<8x128xf32>
    %677 = arith.mulf %201, %676 : vector<8x128xf32>
    %678 = arith.addf %674, %677 : vector<8x128xf32>
    %c115 = arith.constant 115 : index
    %679 = memref.load %arg7[%c115] : memref<192xf32, #tpu.memory_space<smem>>
    %680 = vector.broadcast %679 : f32 to vector<8x128xf32>
    %681 = arith.mulf %160, %680 : vector<8x128xf32>
    %682 = arith.addf %678, %681 : vector<8x128xf32>
    %c116 = arith.constant 116 : index
    %683 = memref.load %arg7[%c116] : memref<192xf32, #tpu.memory_space<smem>>
    %684 = vector.broadcast %683 : f32 to vector<8x128xf32>
    %685 = arith.mulf %203, %684 : vector<8x128xf32>
    %686 = arith.addf %682, %685 : vector<8x128xf32>
    %c117 = arith.constant 117 : index
    %687 = memref.load %arg7[%c117] : memref<192xf32, #tpu.memory_space<smem>>
    %688 = vector.broadcast %687 : f32 to vector<8x128xf32>
    %689 = arith.mulf %205, %688 : vector<8x128xf32>
    %690 = arith.addf %686, %689 : vector<8x128xf32>
    %c118 = arith.constant 118 : index
    %691 = memref.load %arg7[%c118] : memref<192xf32, #tpu.memory_space<smem>>
    %692 = vector.broadcast %691 : f32 to vector<8x128xf32>
    %693 = arith.mulf %175, %692 : vector<8x128xf32>
    %694 = arith.addf %690, %693 : vector<8x128xf32>
    %c119 = arith.constant 119 : index
    %695 = memref.load %arg7[%c119] : memref<192xf32, #tpu.memory_space<smem>>
    %696 = vector.broadcast %695 : f32 to vector<8x128xf32>
    %697 = arith.mulf %207, %696 : vector<8x128xf32>
    %698 = arith.addf %694, %697 : vector<8x128xf32>
    %c4_64 = arith.constant 4 : index
    %699 = memref.load %arg8[%c4_64] : memref<8xf32, #tpu.memory_space<smem>>
    %700 = vector.broadcast %699 : f32 to vector<8x128xf32>
    %701 = arith.addf %698, %700 : vector<8x128xf32>
    %702 = math.tanh %701 : vector<8x128xf32>
    %c120 = arith.constant 120 : index
    %703 = memref.load %arg7[%c120] : memref<192xf32, #tpu.memory_space<smem>>
    %704 = vector.broadcast %703 : f32 to vector<8x128xf32>
    %705 = arith.mulf %177, %704 : vector<8x128xf32>
    %c121 = arith.constant 121 : index
    %706 = memref.load %arg7[%c121] : memref<192xf32, #tpu.memory_space<smem>>
    %707 = vector.broadcast %706 : f32 to vector<8x128xf32>
    %708 = arith.mulf %70, %707 : vector<8x128xf32>
    %709 = arith.addf %705, %708 : vector<8x128xf32>
    %c122 = arith.constant 122 : index
    %710 = memref.load %arg7[%c122] : memref<192xf32, #tpu.memory_space<smem>>
    %711 = vector.broadcast %710 : f32 to vector<8x128xf32>
    %712 = arith.mulf %179, %711 : vector<8x128xf32>
    %713 = arith.addf %709, %712 : vector<8x128xf32>
    %c123 = arith.constant 123 : index
    %714 = memref.load %arg7[%c123] : memref<192xf32, #tpu.memory_space<smem>>
    %715 = vector.broadcast %714 : f32 to vector<8x128xf32>
    %716 = arith.mulf %181, %715 : vector<8x128xf32>
    %717 = arith.addf %713, %716 : vector<8x128xf32>
    %c124 = arith.constant 124 : index
    %718 = memref.load %arg7[%c124] : memref<192xf32, #tpu.memory_space<smem>>
    %719 = vector.broadcast %718 : f32 to vector<8x128xf32>
    %720 = arith.mulf %85, %719 : vector<8x128xf32>
    %721 = arith.addf %717, %720 : vector<8x128xf32>
    %c125 = arith.constant 125 : index
    %722 = memref.load %arg7[%c125] : memref<192xf32, #tpu.memory_space<smem>>
    %723 = vector.broadcast %722 : f32 to vector<8x128xf32>
    %724 = arith.mulf %183, %723 : vector<8x128xf32>
    %725 = arith.addf %721, %724 : vector<8x128xf32>
    %c126 = arith.constant 126 : index
    %726 = memref.load %arg7[%c126] : memref<192xf32, #tpu.memory_space<smem>>
    %727 = vector.broadcast %726 : f32 to vector<8x128xf32>
    %728 = arith.mulf %185, %727 : vector<8x128xf32>
    %729 = arith.addf %725, %728 : vector<8x128xf32>
    %c127 = arith.constant 127 : index
    %730 = memref.load %arg7[%c127] : memref<192xf32, #tpu.memory_space<smem>>
    %731 = vector.broadcast %730 : f32 to vector<8x128xf32>
    %732 = arith.mulf %100, %731 : vector<8x128xf32>
    %733 = arith.addf %729, %732 : vector<8x128xf32>
    %c128 = arith.constant 128 : index
    %734 = memref.load %arg7[%c128] : memref<192xf32, #tpu.memory_space<smem>>
    %735 = vector.broadcast %734 : f32 to vector<8x128xf32>
    %736 = arith.mulf %187, %735 : vector<8x128xf32>
    %737 = arith.addf %733, %736 : vector<8x128xf32>
    %c129 = arith.constant 129 : index
    %738 = memref.load %arg7[%c129] : memref<192xf32, #tpu.memory_space<smem>>
    %739 = vector.broadcast %738 : f32 to vector<8x128xf32>
    %740 = arith.mulf %189, %739 : vector<8x128xf32>
    %741 = arith.addf %737, %740 : vector<8x128xf32>
    %c130 = arith.constant 130 : index
    %742 = memref.load %arg7[%c130] : memref<192xf32, #tpu.memory_space<smem>>
    %743 = vector.broadcast %742 : f32 to vector<8x128xf32>
    %744 = arith.mulf %115, %743 : vector<8x128xf32>
    %745 = arith.addf %741, %744 : vector<8x128xf32>
    %c131 = arith.constant 131 : index
    %746 = memref.load %arg7[%c131] : memref<192xf32, #tpu.memory_space<smem>>
    %747 = vector.broadcast %746 : f32 to vector<8x128xf32>
    %748 = arith.mulf %191, %747 : vector<8x128xf32>
    %749 = arith.addf %745, %748 : vector<8x128xf32>
    %c132 = arith.constant 132 : index
    %750 = memref.load %arg7[%c132] : memref<192xf32, #tpu.memory_space<smem>>
    %751 = vector.broadcast %750 : f32 to vector<8x128xf32>
    %752 = arith.mulf %193, %751 : vector<8x128xf32>
    %753 = arith.addf %749, %752 : vector<8x128xf32>
    %c133 = arith.constant 133 : index
    %754 = memref.load %arg7[%c133] : memref<192xf32, #tpu.memory_space<smem>>
    %755 = vector.broadcast %754 : f32 to vector<8x128xf32>
    %756 = arith.mulf %130, %755 : vector<8x128xf32>
    %757 = arith.addf %753, %756 : vector<8x128xf32>
    %c134 = arith.constant 134 : index
    %758 = memref.load %arg7[%c134] : memref<192xf32, #tpu.memory_space<smem>>
    %759 = vector.broadcast %758 : f32 to vector<8x128xf32>
    %760 = arith.mulf %195, %759 : vector<8x128xf32>
    %761 = arith.addf %757, %760 : vector<8x128xf32>
    %c135 = arith.constant 135 : index
    %762 = memref.load %arg7[%c135] : memref<192xf32, #tpu.memory_space<smem>>
    %763 = vector.broadcast %762 : f32 to vector<8x128xf32>
    %764 = arith.mulf %197, %763 : vector<8x128xf32>
    %765 = arith.addf %761, %764 : vector<8x128xf32>
    %c136 = arith.constant 136 : index
    %766 = memref.load %arg7[%c136] : memref<192xf32, #tpu.memory_space<smem>>
    %767 = vector.broadcast %766 : f32 to vector<8x128xf32>
    %768 = arith.mulf %145, %767 : vector<8x128xf32>
    %769 = arith.addf %765, %768 : vector<8x128xf32>
    %c137 = arith.constant 137 : index
    %770 = memref.load %arg7[%c137] : memref<192xf32, #tpu.memory_space<smem>>
    %771 = vector.broadcast %770 : f32 to vector<8x128xf32>
    %772 = arith.mulf %199, %771 : vector<8x128xf32>
    %773 = arith.addf %769, %772 : vector<8x128xf32>
    %c138 = arith.constant 138 : index
    %774 = memref.load %arg7[%c138] : memref<192xf32, #tpu.memory_space<smem>>
    %775 = vector.broadcast %774 : f32 to vector<8x128xf32>
    %776 = arith.mulf %201, %775 : vector<8x128xf32>
    %777 = arith.addf %773, %776 : vector<8x128xf32>
    %c139 = arith.constant 139 : index
    %778 = memref.load %arg7[%c139] : memref<192xf32, #tpu.memory_space<smem>>
    %779 = vector.broadcast %778 : f32 to vector<8x128xf32>
    %780 = arith.mulf %160, %779 : vector<8x128xf32>
    %781 = arith.addf %777, %780 : vector<8x128xf32>
    %c140 = arith.constant 140 : index
    %782 = memref.load %arg7[%c140] : memref<192xf32, #tpu.memory_space<smem>>
    %783 = vector.broadcast %782 : f32 to vector<8x128xf32>
    %784 = arith.mulf %203, %783 : vector<8x128xf32>
    %785 = arith.addf %781, %784 : vector<8x128xf32>
    %c141 = arith.constant 141 : index
    %786 = memref.load %arg7[%c141] : memref<192xf32, #tpu.memory_space<smem>>
    %787 = vector.broadcast %786 : f32 to vector<8x128xf32>
    %788 = arith.mulf %205, %787 : vector<8x128xf32>
    %789 = arith.addf %785, %788 : vector<8x128xf32>
    %c142 = arith.constant 142 : index
    %790 = memref.load %arg7[%c142] : memref<192xf32, #tpu.memory_space<smem>>
    %791 = vector.broadcast %790 : f32 to vector<8x128xf32>
    %792 = arith.mulf %175, %791 : vector<8x128xf32>
    %793 = arith.addf %789, %792 : vector<8x128xf32>
    %c143 = arith.constant 143 : index
    %794 = memref.load %arg7[%c143] : memref<192xf32, #tpu.memory_space<smem>>
    %795 = vector.broadcast %794 : f32 to vector<8x128xf32>
    %796 = arith.mulf %207, %795 : vector<8x128xf32>
    %797 = arith.addf %793, %796 : vector<8x128xf32>
    %c5_65 = arith.constant 5 : index
    %798 = memref.load %arg8[%c5_65] : memref<8xf32, #tpu.memory_space<smem>>
    %799 = vector.broadcast %798 : f32 to vector<8x128xf32>
    %800 = arith.addf %797, %799 : vector<8x128xf32>
    %801 = math.tanh %800 : vector<8x128xf32>
    %c144 = arith.constant 144 : index
    %802 = memref.load %arg7[%c144] : memref<192xf32, #tpu.memory_space<smem>>
    %803 = vector.broadcast %802 : f32 to vector<8x128xf32>
    %804 = arith.mulf %177, %803 : vector<8x128xf32>
    %c145 = arith.constant 145 : index
    %805 = memref.load %arg7[%c145] : memref<192xf32, #tpu.memory_space<smem>>
    %806 = vector.broadcast %805 : f32 to vector<8x128xf32>
    %807 = arith.mulf %70, %806 : vector<8x128xf32>
    %808 = arith.addf %804, %807 : vector<8x128xf32>
    %c146 = arith.constant 146 : index
    %809 = memref.load %arg7[%c146] : memref<192xf32, #tpu.memory_space<smem>>
    %810 = vector.broadcast %809 : f32 to vector<8x128xf32>
    %811 = arith.mulf %179, %810 : vector<8x128xf32>
    %812 = arith.addf %808, %811 : vector<8x128xf32>
    %c147 = arith.constant 147 : index
    %813 = memref.load %arg7[%c147] : memref<192xf32, #tpu.memory_space<smem>>
    %814 = vector.broadcast %813 : f32 to vector<8x128xf32>
    %815 = arith.mulf %181, %814 : vector<8x128xf32>
    %816 = arith.addf %812, %815 : vector<8x128xf32>
    %c148 = arith.constant 148 : index
    %817 = memref.load %arg7[%c148] : memref<192xf32, #tpu.memory_space<smem>>
    %818 = vector.broadcast %817 : f32 to vector<8x128xf32>
    %819 = arith.mulf %85, %818 : vector<8x128xf32>
    %820 = arith.addf %816, %819 : vector<8x128xf32>
    %c149 = arith.constant 149 : index
    %821 = memref.load %arg7[%c149] : memref<192xf32, #tpu.memory_space<smem>>
    %822 = vector.broadcast %821 : f32 to vector<8x128xf32>
    %823 = arith.mulf %183, %822 : vector<8x128xf32>
    %824 = arith.addf %820, %823 : vector<8x128xf32>
    %c150 = arith.constant 150 : index
    %825 = memref.load %arg7[%c150] : memref<192xf32, #tpu.memory_space<smem>>
    %826 = vector.broadcast %825 : f32 to vector<8x128xf32>
    %827 = arith.mulf %185, %826 : vector<8x128xf32>
    %828 = arith.addf %824, %827 : vector<8x128xf32>
    %c151 = arith.constant 151 : index
    %829 = memref.load %arg7[%c151] : memref<192xf32, #tpu.memory_space<smem>>
    %830 = vector.broadcast %829 : f32 to vector<8x128xf32>
    %831 = arith.mulf %100, %830 : vector<8x128xf32>
    %832 = arith.addf %828, %831 : vector<8x128xf32>
    %c152 = arith.constant 152 : index
    %833 = memref.load %arg7[%c152] : memref<192xf32, #tpu.memory_space<smem>>
    %834 = vector.broadcast %833 : f32 to vector<8x128xf32>
    %835 = arith.mulf %187, %834 : vector<8x128xf32>
    %836 = arith.addf %832, %835 : vector<8x128xf32>
    %c153 = arith.constant 153 : index
    %837 = memref.load %arg7[%c153] : memref<192xf32, #tpu.memory_space<smem>>
    %838 = vector.broadcast %837 : f32 to vector<8x128xf32>
    %839 = arith.mulf %189, %838 : vector<8x128xf32>
    %840 = arith.addf %836, %839 : vector<8x128xf32>
    %c154 = arith.constant 154 : index
    %841 = memref.load %arg7[%c154] : memref<192xf32, #tpu.memory_space<smem>>
    %842 = vector.broadcast %841 : f32 to vector<8x128xf32>
    %843 = arith.mulf %115, %842 : vector<8x128xf32>
    %844 = arith.addf %840, %843 : vector<8x128xf32>
    %c155 = arith.constant 155 : index
    %845 = memref.load %arg7[%c155] : memref<192xf32, #tpu.memory_space<smem>>
    %846 = vector.broadcast %845 : f32 to vector<8x128xf32>
    %847 = arith.mulf %191, %846 : vector<8x128xf32>
    %848 = arith.addf %844, %847 : vector<8x128xf32>
    %c156 = arith.constant 156 : index
    %849 = memref.load %arg7[%c156] : memref<192xf32, #tpu.memory_space<smem>>
    %850 = vector.broadcast %849 : f32 to vector<8x128xf32>
    %851 = arith.mulf %193, %850 : vector<8x128xf32>
    %852 = arith.addf %848, %851 : vector<8x128xf32>
    %c157 = arith.constant 157 : index
    %853 = memref.load %arg7[%c157] : memref<192xf32, #tpu.memory_space<smem>>
    %854 = vector.broadcast %853 : f32 to vector<8x128xf32>
    %855 = arith.mulf %130, %854 : vector<8x128xf32>
    %856 = arith.addf %852, %855 : vector<8x128xf32>
    %c158 = arith.constant 158 : index
    %857 = memref.load %arg7[%c158] : memref<192xf32, #tpu.memory_space<smem>>
    %858 = vector.broadcast %857 : f32 to vector<8x128xf32>
    %859 = arith.mulf %195, %858 : vector<8x128xf32>
    %860 = arith.addf %856, %859 : vector<8x128xf32>
    %c159 = arith.constant 159 : index
    %861 = memref.load %arg7[%c159] : memref<192xf32, #tpu.memory_space<smem>>
    %862 = vector.broadcast %861 : f32 to vector<8x128xf32>
    %863 = arith.mulf %197, %862 : vector<8x128xf32>
    %864 = arith.addf %860, %863 : vector<8x128xf32>
    %c160 = arith.constant 160 : index
    %865 = memref.load %arg7[%c160] : memref<192xf32, #tpu.memory_space<smem>>
    %866 = vector.broadcast %865 : f32 to vector<8x128xf32>
    %867 = arith.mulf %145, %866 : vector<8x128xf32>
    %868 = arith.addf %864, %867 : vector<8x128xf32>
    %c161 = arith.constant 161 : index
    %869 = memref.load %arg7[%c161] : memref<192xf32, #tpu.memory_space<smem>>
    %870 = vector.broadcast %869 : f32 to vector<8x128xf32>
    %871 = arith.mulf %199, %870 : vector<8x128xf32>
    %872 = arith.addf %868, %871 : vector<8x128xf32>
    %c162 = arith.constant 162 : index
    %873 = memref.load %arg7[%c162] : memref<192xf32, #tpu.memory_space<smem>>
    %874 = vector.broadcast %873 : f32 to vector<8x128xf32>
    %875 = arith.mulf %201, %874 : vector<8x128xf32>
    %876 = arith.addf %872, %875 : vector<8x128xf32>
    %c163 = arith.constant 163 : index
    %877 = memref.load %arg7[%c163] : memref<192xf32, #tpu.memory_space<smem>>
    %878 = vector.broadcast %877 : f32 to vector<8x128xf32>
    %879 = arith.mulf %160, %878 : vector<8x128xf32>
    %880 = arith.addf %876, %879 : vector<8x128xf32>
    %c164 = arith.constant 164 : index
    %881 = memref.load %arg7[%c164] : memref<192xf32, #tpu.memory_space<smem>>
    %882 = vector.broadcast %881 : f32 to vector<8x128xf32>
    %883 = arith.mulf %203, %882 : vector<8x128xf32>
    %884 = arith.addf %880, %883 : vector<8x128xf32>
    %c165 = arith.constant 165 : index
    %885 = memref.load %arg7[%c165] : memref<192xf32, #tpu.memory_space<smem>>
    %886 = vector.broadcast %885 : f32 to vector<8x128xf32>
    %887 = arith.mulf %205, %886 : vector<8x128xf32>
    %888 = arith.addf %884, %887 : vector<8x128xf32>
    %c166 = arith.constant 166 : index
    %889 = memref.load %arg7[%c166] : memref<192xf32, #tpu.memory_space<smem>>
    %890 = vector.broadcast %889 : f32 to vector<8x128xf32>
    %891 = arith.mulf %175, %890 : vector<8x128xf32>
    %892 = arith.addf %888, %891 : vector<8x128xf32>
    %c167 = arith.constant 167 : index
    %893 = memref.load %arg7[%c167] : memref<192xf32, #tpu.memory_space<smem>>
    %894 = vector.broadcast %893 : f32 to vector<8x128xf32>
    %895 = arith.mulf %207, %894 : vector<8x128xf32>
    %896 = arith.addf %892, %895 : vector<8x128xf32>
    %c6_66 = arith.constant 6 : index
    %897 = memref.load %arg8[%c6_66] : memref<8xf32, #tpu.memory_space<smem>>
    %898 = vector.broadcast %897 : f32 to vector<8x128xf32>
    %899 = arith.addf %896, %898 : vector<8x128xf32>
    %900 = math.tanh %899 : vector<8x128xf32>
    %c168 = arith.constant 168 : index
    %901 = memref.load %arg7[%c168] : memref<192xf32, #tpu.memory_space<smem>>
    %902 = vector.broadcast %901 : f32 to vector<8x128xf32>
    %903 = arith.mulf %177, %902 : vector<8x128xf32>
    %c169 = arith.constant 169 : index
    %904 = memref.load %arg7[%c169] : memref<192xf32, #tpu.memory_space<smem>>
    %905 = vector.broadcast %904 : f32 to vector<8x128xf32>
    %906 = arith.mulf %70, %905 : vector<8x128xf32>
    %907 = arith.addf %903, %906 : vector<8x128xf32>
    %c170 = arith.constant 170 : index
    %908 = memref.load %arg7[%c170] : memref<192xf32, #tpu.memory_space<smem>>
    %909 = vector.broadcast %908 : f32 to vector<8x128xf32>
    %910 = arith.mulf %179, %909 : vector<8x128xf32>
    %911 = arith.addf %907, %910 : vector<8x128xf32>
    %c171 = arith.constant 171 : index
    %912 = memref.load %arg7[%c171] : memref<192xf32, #tpu.memory_space<smem>>
    %913 = vector.broadcast %912 : f32 to vector<8x128xf32>
    %914 = arith.mulf %181, %913 : vector<8x128xf32>
    %915 = arith.addf %911, %914 : vector<8x128xf32>
    %c172 = arith.constant 172 : index
    %916 = memref.load %arg7[%c172] : memref<192xf32, #tpu.memory_space<smem>>
    %917 = vector.broadcast %916 : f32 to vector<8x128xf32>
    %918 = arith.mulf %85, %917 : vector<8x128xf32>
    %919 = arith.addf %915, %918 : vector<8x128xf32>
    %c173 = arith.constant 173 : index
    %920 = memref.load %arg7[%c173] : memref<192xf32, #tpu.memory_space<smem>>
    %921 = vector.broadcast %920 : f32 to vector<8x128xf32>
    %922 = arith.mulf %183, %921 : vector<8x128xf32>
    %923 = arith.addf %919, %922 : vector<8x128xf32>
    %c174 = arith.constant 174 : index
    %924 = memref.load %arg7[%c174] : memref<192xf32, #tpu.memory_space<smem>>
    %925 = vector.broadcast %924 : f32 to vector<8x128xf32>
    %926 = arith.mulf %185, %925 : vector<8x128xf32>
    %927 = arith.addf %923, %926 : vector<8x128xf32>
    %c175 = arith.constant 175 : index
    %928 = memref.load %arg7[%c175] : memref<192xf32, #tpu.memory_space<smem>>
    %929 = vector.broadcast %928 : f32 to vector<8x128xf32>
    %930 = arith.mulf %100, %929 : vector<8x128xf32>
    %931 = arith.addf %927, %930 : vector<8x128xf32>
    %c176 = arith.constant 176 : index
    %932 = memref.load %arg7[%c176] : memref<192xf32, #tpu.memory_space<smem>>
    %933 = vector.broadcast %932 : f32 to vector<8x128xf32>
    %934 = arith.mulf %187, %933 : vector<8x128xf32>
    %935 = arith.addf %931, %934 : vector<8x128xf32>
    %c177 = arith.constant 177 : index
    %936 = memref.load %arg7[%c177] : memref<192xf32, #tpu.memory_space<smem>>
    %937 = vector.broadcast %936 : f32 to vector<8x128xf32>
    %938 = arith.mulf %189, %937 : vector<8x128xf32>
    %939 = arith.addf %935, %938 : vector<8x128xf32>
    %c178 = arith.constant 178 : index
    %940 = memref.load %arg7[%c178] : memref<192xf32, #tpu.memory_space<smem>>
    %941 = vector.broadcast %940 : f32 to vector<8x128xf32>
    %942 = arith.mulf %115, %941 : vector<8x128xf32>
    %943 = arith.addf %939, %942 : vector<8x128xf32>
    %c179 = arith.constant 179 : index
    %944 = memref.load %arg7[%c179] : memref<192xf32, #tpu.memory_space<smem>>
    %945 = vector.broadcast %944 : f32 to vector<8x128xf32>
    %946 = arith.mulf %191, %945 : vector<8x128xf32>
    %947 = arith.addf %943, %946 : vector<8x128xf32>
    %c180 = arith.constant 180 : index
    %948 = memref.load %arg7[%c180] : memref<192xf32, #tpu.memory_space<smem>>
    %949 = vector.broadcast %948 : f32 to vector<8x128xf32>
    %950 = arith.mulf %193, %949 : vector<8x128xf32>
    %951 = arith.addf %947, %950 : vector<8x128xf32>
    %c181 = arith.constant 181 : index
    %952 = memref.load %arg7[%c181] : memref<192xf32, #tpu.memory_space<smem>>
    %953 = vector.broadcast %952 : f32 to vector<8x128xf32>
    %954 = arith.mulf %130, %953 : vector<8x128xf32>
    %955 = arith.addf %951, %954 : vector<8x128xf32>
    %c182 = arith.constant 182 : index
    %956 = memref.load %arg7[%c182] : memref<192xf32, #tpu.memory_space<smem>>
    %957 = vector.broadcast %956 : f32 to vector<8x128xf32>
    %958 = arith.mulf %195, %957 : vector<8x128xf32>
    %959 = arith.addf %955, %958 : vector<8x128xf32>
    %c183 = arith.constant 183 : index
    %960 = memref.load %arg7[%c183] : memref<192xf32, #tpu.memory_space<smem>>
    %961 = vector.broadcast %960 : f32 to vector<8x128xf32>
    %962 = arith.mulf %197, %961 : vector<8x128xf32>
    %963 = arith.addf %959, %962 : vector<8x128xf32>
    %c184 = arith.constant 184 : index
    %964 = memref.load %arg7[%c184] : memref<192xf32, #tpu.memory_space<smem>>
    %965 = vector.broadcast %964 : f32 to vector<8x128xf32>
    %966 = arith.mulf %145, %965 : vector<8x128xf32>
    %967 = arith.addf %963, %966 : vector<8x128xf32>
    %c185 = arith.constant 185 : index
    %968 = memref.load %arg7[%c185] : memref<192xf32, #tpu.memory_space<smem>>
    %969 = vector.broadcast %968 : f32 to vector<8x128xf32>
    %970 = arith.mulf %199, %969 : vector<8x128xf32>
    %971 = arith.addf %967, %970 : vector<8x128xf32>
    %c186 = arith.constant 186 : index
    %972 = memref.load %arg7[%c186] : memref<192xf32, #tpu.memory_space<smem>>
    %973 = vector.broadcast %972 : f32 to vector<8x128xf32>
    %974 = arith.mulf %201, %973 : vector<8x128xf32>
    %975 = arith.addf %971, %974 : vector<8x128xf32>
    %c187 = arith.constant 187 : index
    %976 = memref.load %arg7[%c187] : memref<192xf32, #tpu.memory_space<smem>>
    %977 = vector.broadcast %976 : f32 to vector<8x128xf32>
    %978 = arith.mulf %160, %977 : vector<8x128xf32>
    %979 = arith.addf %975, %978 : vector<8x128xf32>
    %c188 = arith.constant 188 : index
    %980 = memref.load %arg7[%c188] : memref<192xf32, #tpu.memory_space<smem>>
    %981 = vector.broadcast %980 : f32 to vector<8x128xf32>
    %982 = arith.mulf %203, %981 : vector<8x128xf32>
    %983 = arith.addf %979, %982 : vector<8x128xf32>
    %c189 = arith.constant 189 : index
    %984 = memref.load %arg7[%c189] : memref<192xf32, #tpu.memory_space<smem>>
    %985 = vector.broadcast %984 : f32 to vector<8x128xf32>
    %986 = arith.mulf %205, %985 : vector<8x128xf32>
    %987 = arith.addf %983, %986 : vector<8x128xf32>
    %c190 = arith.constant 190 : index
    %988 = memref.load %arg7[%c190] : memref<192xf32, #tpu.memory_space<smem>>
    %989 = vector.broadcast %988 : f32 to vector<8x128xf32>
    %990 = arith.mulf %175, %989 : vector<8x128xf32>
    %991 = arith.addf %987, %990 : vector<8x128xf32>
    %c191 = arith.constant 191 : index
    %992 = memref.load %arg7[%c191] : memref<192xf32, #tpu.memory_space<smem>>
    %993 = vector.broadcast %992 : f32 to vector<8x128xf32>
    %994 = arith.mulf %207, %993 : vector<8x128xf32>
    %995 = arith.addf %991, %994 : vector<8x128xf32>
    %c7_67 = arith.constant 7 : index
    %996 = memref.load %arg8[%c7_67] : memref<8xf32, #tpu.memory_space<smem>>
    %997 = vector.broadcast %996 : f32 to vector<8x128xf32>
    %998 = arith.addf %995, %997 : vector<8x128xf32>
    %999 = math.tanh %998 : vector<8x128xf32>
    %c1_i32_68 = arith.constant 1 : i32
    %1000 = tpu.dynamic_rotate %306 by %c1_i32_68 dim 1 : vector<8x128xf32>, i32 -> vector<8x128xf32>
    %1001 = arith.select %49, %306, %1000 : vector<8x128xi1>, vector<8x128xf32>
    %c127_i32_69 = arith.constant 127 : i32
    %1002 = tpu.dynamic_rotate %306 by %c127_i32_69 dim 1 : vector<8x128xf32>, i32 -> vector<8x128xf32>
    %1003 = arith.select %51, %306, %1002 : vector<8x128xi1>, vector<8x128xf32>
    %c1_i32_70 = arith.constant 1 : i32
    %1004 = tpu.dynamic_rotate %405 by %c1_i32_70 dim 1 : vector<8x128xf32>, i32 -> vector<8x128xf32>
    %1005 = arith.select %49, %405, %1004 : vector<8x128xi1>, vector<8x128xf32>
    %c127_i32_71 = arith.constant 127 : i32
    %1006 = tpu.dynamic_rotate %405 by %c127_i32_71 dim 1 : vector<8x128xf32>, i32 -> vector<8x128xf32>
    %1007 = arith.select %51, %405, %1006 : vector<8x128xi1>, vector<8x128xf32>
    %c1_i32_72 = arith.constant 1 : i32
    %1008 = tpu.dynamic_rotate %504 by %c1_i32_72 dim 1 : vector<8x128xf32>, i32 -> vector<8x128xf32>
    %1009 = arith.select %49, %504, %1008 : vector<8x128xi1>, vector<8x128xf32>
    %c127_i32_73 = arith.constant 127 : i32
    %1010 = tpu.dynamic_rotate %504 by %c127_i32_73 dim 1 : vector<8x128xf32>, i32 -> vector<8x128xf32>
    %1011 = arith.select %51, %504, %1010 : vector<8x128xi1>, vector<8x128xf32>
    %c1_i32_74 = arith.constant 1 : i32
    %1012 = tpu.dynamic_rotate %603 by %c1_i32_74 dim 1 : vector<8x128xf32>, i32 -> vector<8x128xf32>
    %1013 = arith.select %49, %603, %1012 : vector<8x128xi1>, vector<8x128xf32>
    %c127_i32_75 = arith.constant 127 : i32
    %1014 = tpu.dynamic_rotate %603 by %c127_i32_75 dim 1 : vector<8x128xf32>, i32 -> vector<8x128xf32>
    %1015 = arith.select %51, %603, %1014 : vector<8x128xi1>, vector<8x128xf32>
    %c1_i32_76 = arith.constant 1 : i32
    %1016 = tpu.dynamic_rotate %702 by %c1_i32_76 dim 1 : vector<8x128xf32>, i32 -> vector<8x128xf32>
    %1017 = arith.select %49, %702, %1016 : vector<8x128xi1>, vector<8x128xf32>
    %c127_i32_77 = arith.constant 127 : i32
    %1018 = tpu.dynamic_rotate %702 by %c127_i32_77 dim 1 : vector<8x128xf32>, i32 -> vector<8x128xf32>
    %1019 = arith.select %51, %702, %1018 : vector<8x128xi1>, vector<8x128xf32>
    %c1_i32_78 = arith.constant 1 : i32
    %1020 = tpu.dynamic_rotate %801 by %c1_i32_78 dim 1 : vector<8x128xf32>, i32 -> vector<8x128xf32>
    %1021 = arith.select %49, %801, %1020 : vector<8x128xi1>, vector<8x128xf32>
    %c127_i32_79 = arith.constant 127 : i32
    %1022 = tpu.dynamic_rotate %801 by %c127_i32_79 dim 1 : vector<8x128xf32>, i32 -> vector<8x128xf32>
    %1023 = arith.select %51, %801, %1022 : vector<8x128xi1>, vector<8x128xf32>
    %c1_i32_80 = arith.constant 1 : i32
    %1024 = tpu.dynamic_rotate %900 by %c1_i32_80 dim 1 : vector<8x128xf32>, i32 -> vector<8x128xf32>
    %1025 = arith.select %49, %900, %1024 : vector<8x128xi1>, vector<8x128xf32>
    %c127_i32_81 = arith.constant 127 : i32
    %1026 = tpu.dynamic_rotate %900 by %c127_i32_81 dim 1 : vector<8x128xf32>, i32 -> vector<8x128xf32>
    %1027 = arith.select %51, %900, %1026 : vector<8x128xi1>, vector<8x128xf32>
    %c1_i32_82 = arith.constant 1 : i32
    %1028 = tpu.dynamic_rotate %999 by %c1_i32_82 dim 1 : vector<8x128xf32>, i32 -> vector<8x128xf32>
    %1029 = arith.select %49, %999, %1028 : vector<8x128xi1>, vector<8x128xf32>
    %c127_i32_83 = arith.constant 127 : i32
    %1030 = tpu.dynamic_rotate %999 by %c127_i32_83 dim 1 : vector<8x128xf32>, i32 -> vector<8x128xf32>
    %1031 = arith.select %51, %999, %1030 : vector<8x128xi1>, vector<8x128xf32>
    %c0_84 = arith.constant 0 : index
    %1032 = memref.load %arg9[%c0_84] : memref<192xf32, #tpu.memory_space<smem>>
    %1033 = vector.broadcast %1032 : f32 to vector<8x128xf32>
    %1034 = arith.mulf %1001, %1033 : vector<8x128xf32>
    %c1_85 = arith.constant 1 : index
    %1035 = memref.load %arg9[%c1_85] : memref<192xf32, #tpu.memory_space<smem>>
    %1036 = vector.broadcast %1035 : f32 to vector<8x128xf32>
    %1037 = arith.mulf %306, %1036 : vector<8x128xf32>
    %1038 = arith.addf %1034, %1037 : vector<8x128xf32>
    %c2_86 = arith.constant 2 : index
    %1039 = memref.load %arg9[%c2_86] : memref<192xf32, #tpu.memory_space<smem>>
    %1040 = vector.broadcast %1039 : f32 to vector<8x128xf32>
    %1041 = arith.mulf %1003, %1040 : vector<8x128xf32>
    %1042 = arith.addf %1038, %1041 : vector<8x128xf32>
    %c3_87 = arith.constant 3 : index
    %1043 = memref.load %arg9[%c3_87] : memref<192xf32, #tpu.memory_space<smem>>
    %1044 = vector.broadcast %1043 : f32 to vector<8x128xf32>
    %1045 = arith.mulf %1005, %1044 : vector<8x128xf32>
    %1046 = arith.addf %1042, %1045 : vector<8x128xf32>
    %c4_88 = arith.constant 4 : index
    %1047 = memref.load %arg9[%c4_88] : memref<192xf32, #tpu.memory_space<smem>>
    %1048 = vector.broadcast %1047 : f32 to vector<8x128xf32>
    %1049 = arith.mulf %405, %1048 : vector<8x128xf32>
    %1050 = arith.addf %1046, %1049 : vector<8x128xf32>
    %c5_89 = arith.constant 5 : index
    %1051 = memref.load %arg9[%c5_89] : memref<192xf32, #tpu.memory_space<smem>>
    %1052 = vector.broadcast %1051 : f32 to vector<8x128xf32>
    %1053 = arith.mulf %1007, %1052 : vector<8x128xf32>
    %1054 = arith.addf %1050, %1053 : vector<8x128xf32>
    %c6_90 = arith.constant 6 : index
    %1055 = memref.load %arg9[%c6_90] : memref<192xf32, #tpu.memory_space<smem>>
    %1056 = vector.broadcast %1055 : f32 to vector<8x128xf32>
    %1057 = arith.mulf %1009, %1056 : vector<8x128xf32>
    %1058 = arith.addf %1054, %1057 : vector<8x128xf32>
    %c7_91 = arith.constant 7 : index
    %1059 = memref.load %arg9[%c7_91] : memref<192xf32, #tpu.memory_space<smem>>
    %1060 = vector.broadcast %1059 : f32 to vector<8x128xf32>
    %1061 = arith.mulf %504, %1060 : vector<8x128xf32>
    %1062 = arith.addf %1058, %1061 : vector<8x128xf32>
    %c8_92 = arith.constant 8 : index
    %1063 = memref.load %arg9[%c8_92] : memref<192xf32, #tpu.memory_space<smem>>
    %1064 = vector.broadcast %1063 : f32 to vector<8x128xf32>
    %1065 = arith.mulf %1011, %1064 : vector<8x128xf32>
    %1066 = arith.addf %1062, %1065 : vector<8x128xf32>
    %c9_93 = arith.constant 9 : index
    %1067 = memref.load %arg9[%c9_93] : memref<192xf32, #tpu.memory_space<smem>>
    %1068 = vector.broadcast %1067 : f32 to vector<8x128xf32>
    %1069 = arith.mulf %1013, %1068 : vector<8x128xf32>
    %1070 = arith.addf %1066, %1069 : vector<8x128xf32>
    %c10_94 = arith.constant 10 : index
    %1071 = memref.load %arg9[%c10_94] : memref<192xf32, #tpu.memory_space<smem>>
    %1072 = vector.broadcast %1071 : f32 to vector<8x128xf32>
    %1073 = arith.mulf %603, %1072 : vector<8x128xf32>
    %1074 = arith.addf %1070, %1073 : vector<8x128xf32>
    %c11_95 = arith.constant 11 : index
    %1075 = memref.load %arg9[%c11_95] : memref<192xf32, #tpu.memory_space<smem>>
    %1076 = vector.broadcast %1075 : f32 to vector<8x128xf32>
    %1077 = arith.mulf %1015, %1076 : vector<8x128xf32>
    %1078 = arith.addf %1074, %1077 : vector<8x128xf32>
    %c12_96 = arith.constant 12 : index
    %1079 = memref.load %arg9[%c12_96] : memref<192xf32, #tpu.memory_space<smem>>
    %1080 = vector.broadcast %1079 : f32 to vector<8x128xf32>
    %1081 = arith.mulf %1017, %1080 : vector<8x128xf32>
    %1082 = arith.addf %1078, %1081 : vector<8x128xf32>
    %c13_97 = arith.constant 13 : index
    %1083 = memref.load %arg9[%c13_97] : memref<192xf32, #tpu.memory_space<smem>>
    %1084 = vector.broadcast %1083 : f32 to vector<8x128xf32>
    %1085 = arith.mulf %702, %1084 : vector<8x128xf32>
    %1086 = arith.addf %1082, %1085 : vector<8x128xf32>
    %c14_98 = arith.constant 14 : index
    %1087 = memref.load %arg9[%c14_98] : memref<192xf32, #tpu.memory_space<smem>>
    %1088 = vector.broadcast %1087 : f32 to vector<8x128xf32>
    %1089 = arith.mulf %1019, %1088 : vector<8x128xf32>
    %1090 = arith.addf %1086, %1089 : vector<8x128xf32>
    %c15_99 = arith.constant 15 : index
    %1091 = memref.load %arg9[%c15_99] : memref<192xf32, #tpu.memory_space<smem>>
    %1092 = vector.broadcast %1091 : f32 to vector<8x128xf32>
    %1093 = arith.mulf %1021, %1092 : vector<8x128xf32>
    %1094 = arith.addf %1090, %1093 : vector<8x128xf32>
    %c16_100 = arith.constant 16 : index
    %1095 = memref.load %arg9[%c16_100] : memref<192xf32, #tpu.memory_space<smem>>
    %1096 = vector.broadcast %1095 : f32 to vector<8x128xf32>
    %1097 = arith.mulf %801, %1096 : vector<8x128xf32>
    %1098 = arith.addf %1094, %1097 : vector<8x128xf32>
    %c17_101 = arith.constant 17 : index
    %1099 = memref.load %arg9[%c17_101] : memref<192xf32, #tpu.memory_space<smem>>
    %1100 = vector.broadcast %1099 : f32 to vector<8x128xf32>
    %1101 = arith.mulf %1023, %1100 : vector<8x128xf32>
    %1102 = arith.addf %1098, %1101 : vector<8x128xf32>
    %c18_102 = arith.constant 18 : index
    %1103 = memref.load %arg9[%c18_102] : memref<192xf32, #tpu.memory_space<smem>>
    %1104 = vector.broadcast %1103 : f32 to vector<8x128xf32>
    %1105 = arith.mulf %1025, %1104 : vector<8x128xf32>
    %1106 = arith.addf %1102, %1105 : vector<8x128xf32>
    %c19_103 = arith.constant 19 : index
    %1107 = memref.load %arg9[%c19_103] : memref<192xf32, #tpu.memory_space<smem>>
    %1108 = vector.broadcast %1107 : f32 to vector<8x128xf32>
    %1109 = arith.mulf %900, %1108 : vector<8x128xf32>
    %1110 = arith.addf %1106, %1109 : vector<8x128xf32>
    %c20_104 = arith.constant 20 : index
    %1111 = memref.load %arg9[%c20_104] : memref<192xf32, #tpu.memory_space<smem>>
    %1112 = vector.broadcast %1111 : f32 to vector<8x128xf32>
    %1113 = arith.mulf %1027, %1112 : vector<8x128xf32>
    %1114 = arith.addf %1110, %1113 : vector<8x128xf32>
    %c21_105 = arith.constant 21 : index
    %1115 = memref.load %arg9[%c21_105] : memref<192xf32, #tpu.memory_space<smem>>
    %1116 = vector.broadcast %1115 : f32 to vector<8x128xf32>
    %1117 = arith.mulf %1029, %1116 : vector<8x128xf32>
    %1118 = arith.addf %1114, %1117 : vector<8x128xf32>
    %c22_106 = arith.constant 22 : index
    %1119 = memref.load %arg9[%c22_106] : memref<192xf32, #tpu.memory_space<smem>>
    %1120 = vector.broadcast %1119 : f32 to vector<8x128xf32>
    %1121 = arith.mulf %999, %1120 : vector<8x128xf32>
    %1122 = arith.addf %1118, %1121 : vector<8x128xf32>
    %c23_107 = arith.constant 23 : index
    %1123 = memref.load %arg9[%c23_107] : memref<192xf32, #tpu.memory_space<smem>>
    %1124 = vector.broadcast %1123 : f32 to vector<8x128xf32>
    %1125 = arith.mulf %1031, %1124 : vector<8x128xf32>
    %1126 = arith.addf %1122, %1125 : vector<8x128xf32>
    %c0_108 = arith.constant 0 : index
    %1127 = memref.load %arg10[%c0_108] : memref<8xf32, #tpu.memory_space<smem>>
    %1128 = vector.broadcast %1127 : f32 to vector<8x128xf32>
    %1129 = arith.addf %1126, %1128 : vector<8x128xf32>
    %1130 = math.tanh %1129 : vector<8x128xf32>
    %c24_109 = arith.constant 24 : index
    %1131 = memref.load %arg9[%c24_109] : memref<192xf32, #tpu.memory_space<smem>>
    %1132 = vector.broadcast %1131 : f32 to vector<8x128xf32>
    %1133 = arith.mulf %1001, %1132 : vector<8x128xf32>
    %c25_110 = arith.constant 25 : index
    %1134 = memref.load %arg9[%c25_110] : memref<192xf32, #tpu.memory_space<smem>>
    %1135 = vector.broadcast %1134 : f32 to vector<8x128xf32>
    %1136 = arith.mulf %306, %1135 : vector<8x128xf32>
    %1137 = arith.addf %1133, %1136 : vector<8x128xf32>
    %c26_111 = arith.constant 26 : index
    %1138 = memref.load %arg9[%c26_111] : memref<192xf32, #tpu.memory_space<smem>>
    %1139 = vector.broadcast %1138 : f32 to vector<8x128xf32>
    %1140 = arith.mulf %1003, %1139 : vector<8x128xf32>
    %1141 = arith.addf %1137, %1140 : vector<8x128xf32>
    %c27_112 = arith.constant 27 : index
    %1142 = memref.load %arg9[%c27_112] : memref<192xf32, #tpu.memory_space<smem>>
    %1143 = vector.broadcast %1142 : f32 to vector<8x128xf32>
    %1144 = arith.mulf %1005, %1143 : vector<8x128xf32>
    %1145 = arith.addf %1141, %1144 : vector<8x128xf32>
    %c28_113 = arith.constant 28 : index
    %1146 = memref.load %arg9[%c28_113] : memref<192xf32, #tpu.memory_space<smem>>
    %1147 = vector.broadcast %1146 : f32 to vector<8x128xf32>
    %1148 = arith.mulf %405, %1147 : vector<8x128xf32>
    %1149 = arith.addf %1145, %1148 : vector<8x128xf32>
    %c29_114 = arith.constant 29 : index
    %1150 = memref.load %arg9[%c29_114] : memref<192xf32, #tpu.memory_space<smem>>
    %1151 = vector.broadcast %1150 : f32 to vector<8x128xf32>
    %1152 = arith.mulf %1007, %1151 : vector<8x128xf32>
    %1153 = arith.addf %1149, %1152 : vector<8x128xf32>
    %c30_115 = arith.constant 30 : index
    %1154 = memref.load %arg9[%c30_115] : memref<192xf32, #tpu.memory_space<smem>>
    %1155 = vector.broadcast %1154 : f32 to vector<8x128xf32>
    %1156 = arith.mulf %1009, %1155 : vector<8x128xf32>
    %1157 = arith.addf %1153, %1156 : vector<8x128xf32>
    %c31_116 = arith.constant 31 : index
    %1158 = memref.load %arg9[%c31_116] : memref<192xf32, #tpu.memory_space<smem>>
    %1159 = vector.broadcast %1158 : f32 to vector<8x128xf32>
    %1160 = arith.mulf %504, %1159 : vector<8x128xf32>
    %1161 = arith.addf %1157, %1160 : vector<8x128xf32>
    %c32_117 = arith.constant 32 : index
    %1162 = memref.load %arg9[%c32_117] : memref<192xf32, #tpu.memory_space<smem>>
    %1163 = vector.broadcast %1162 : f32 to vector<8x128xf32>
    %1164 = arith.mulf %1011, %1163 : vector<8x128xf32>
    %1165 = arith.addf %1161, %1164 : vector<8x128xf32>
    %c33_118 = arith.constant 33 : index
    %1166 = memref.load %arg9[%c33_118] : memref<192xf32, #tpu.memory_space<smem>>
    %1167 = vector.broadcast %1166 : f32 to vector<8x128xf32>
    %1168 = arith.mulf %1013, %1167 : vector<8x128xf32>
    %1169 = arith.addf %1165, %1168 : vector<8x128xf32>
    %c34_119 = arith.constant 34 : index
    %1170 = memref.load %arg9[%c34_119] : memref<192xf32, #tpu.memory_space<smem>>
    %1171 = vector.broadcast %1170 : f32 to vector<8x128xf32>
    %1172 = arith.mulf %603, %1171 : vector<8x128xf32>
    %1173 = arith.addf %1169, %1172 : vector<8x128xf32>
    %c35_120 = arith.constant 35 : index
    %1174 = memref.load %arg9[%c35_120] : memref<192xf32, #tpu.memory_space<smem>>
    %1175 = vector.broadcast %1174 : f32 to vector<8x128xf32>
    %1176 = arith.mulf %1015, %1175 : vector<8x128xf32>
    %1177 = arith.addf %1173, %1176 : vector<8x128xf32>
    %c36_121 = arith.constant 36 : index
    %1178 = memref.load %arg9[%c36_121] : memref<192xf32, #tpu.memory_space<smem>>
    %1179 = vector.broadcast %1178 : f32 to vector<8x128xf32>
    %1180 = arith.mulf %1017, %1179 : vector<8x128xf32>
    %1181 = arith.addf %1177, %1180 : vector<8x128xf32>
    %c37_122 = arith.constant 37 : index
    %1182 = memref.load %arg9[%c37_122] : memref<192xf32, #tpu.memory_space<smem>>
    %1183 = vector.broadcast %1182 : f32 to vector<8x128xf32>
    %1184 = arith.mulf %702, %1183 : vector<8x128xf32>
    %1185 = arith.addf %1181, %1184 : vector<8x128xf32>
    %c38_123 = arith.constant 38 : index
    %1186 = memref.load %arg9[%c38_123] : memref<192xf32, #tpu.memory_space<smem>>
    %1187 = vector.broadcast %1186 : f32 to vector<8x128xf32>
    %1188 = arith.mulf %1019, %1187 : vector<8x128xf32>
    %1189 = arith.addf %1185, %1188 : vector<8x128xf32>
    %c39_124 = arith.constant 39 : index
    %1190 = memref.load %arg9[%c39_124] : memref<192xf32, #tpu.memory_space<smem>>
    %1191 = vector.broadcast %1190 : f32 to vector<8x128xf32>
    %1192 = arith.mulf %1021, %1191 : vector<8x128xf32>
    %1193 = arith.addf %1189, %1192 : vector<8x128xf32>
    %c40_125 = arith.constant 40 : index
    %1194 = memref.load %arg9[%c40_125] : memref<192xf32, #tpu.memory_space<smem>>
    %1195 = vector.broadcast %1194 : f32 to vector<8x128xf32>
    %1196 = arith.mulf %801, %1195 : vector<8x128xf32>
    %1197 = arith.addf %1193, %1196 : vector<8x128xf32>
    %c41_126 = arith.constant 41 : index
    %1198 = memref.load %arg9[%c41_126] : memref<192xf32, #tpu.memory_space<smem>>
    %1199 = vector.broadcast %1198 : f32 to vector<8x128xf32>
    %1200 = arith.mulf %1023, %1199 : vector<8x128xf32>
    %1201 = arith.addf %1197, %1200 : vector<8x128xf32>
    %c42_127 = arith.constant 42 : index
    %1202 = memref.load %arg9[%c42_127] : memref<192xf32, #tpu.memory_space<smem>>
    %1203 = vector.broadcast %1202 : f32 to vector<8x128xf32>
    %1204 = arith.mulf %1025, %1203 : vector<8x128xf32>
    %1205 = arith.addf %1201, %1204 : vector<8x128xf32>
    %c43_128 = arith.constant 43 : index
    %1206 = memref.load %arg9[%c43_128] : memref<192xf32, #tpu.memory_space<smem>>
    %1207 = vector.broadcast %1206 : f32 to vector<8x128xf32>
    %1208 = arith.mulf %900, %1207 : vector<8x128xf32>
    %1209 = arith.addf %1205, %1208 : vector<8x128xf32>
    %c44_129 = arith.constant 44 : index
    %1210 = memref.load %arg9[%c44_129] : memref<192xf32, #tpu.memory_space<smem>>
    %1211 = vector.broadcast %1210 : f32 to vector<8x128xf32>
    %1212 = arith.mulf %1027, %1211 : vector<8x128xf32>
    %1213 = arith.addf %1209, %1212 : vector<8x128xf32>
    %c45_130 = arith.constant 45 : index
    %1214 = memref.load %arg9[%c45_130] : memref<192xf32, #tpu.memory_space<smem>>
    %1215 = vector.broadcast %1214 : f32 to vector<8x128xf32>
    %1216 = arith.mulf %1029, %1215 : vector<8x128xf32>
    %1217 = arith.addf %1213, %1216 : vector<8x128xf32>
    %c46_131 = arith.constant 46 : index
    %1218 = memref.load %arg9[%c46_131] : memref<192xf32, #tpu.memory_space<smem>>
    %1219 = vector.broadcast %1218 : f32 to vector<8x128xf32>
    %1220 = arith.mulf %999, %1219 : vector<8x128xf32>
    %1221 = arith.addf %1217, %1220 : vector<8x128xf32>
    %c47_132 = arith.constant 47 : index
    %1222 = memref.load %arg9[%c47_132] : memref<192xf32, #tpu.memory_space<smem>>
    %1223 = vector.broadcast %1222 : f32 to vector<8x128xf32>
    %1224 = arith.mulf %1031, %1223 : vector<8x128xf32>
    %1225 = arith.addf %1221, %1224 : vector<8x128xf32>
    %c1_133 = arith.constant 1 : index
    %1226 = memref.load %arg10[%c1_133] : memref<8xf32, #tpu.memory_space<smem>>
    %1227 = vector.broadcast %1226 : f32 to vector<8x128xf32>
    %1228 = arith.addf %1225, %1227 : vector<8x128xf32>
    %1229 = math.tanh %1228 : vector<8x128xf32>
    %c48_134 = arith.constant 48 : index
    %1230 = memref.load %arg9[%c48_134] : memref<192xf32, #tpu.memory_space<smem>>
    %1231 = vector.broadcast %1230 : f32 to vector<8x128xf32>
    %1232 = arith.mulf %1001, %1231 : vector<8x128xf32>
    %c49_135 = arith.constant 49 : index
    %1233 = memref.load %arg9[%c49_135] : memref<192xf32, #tpu.memory_space<smem>>
    %1234 = vector.broadcast %1233 : f32 to vector<8x128xf32>
    %1235 = arith.mulf %306, %1234 : vector<8x128xf32>
    %1236 = arith.addf %1232, %1235 : vector<8x128xf32>
    %c50_136 = arith.constant 50 : index
    %1237 = memref.load %arg9[%c50_136] : memref<192xf32, #tpu.memory_space<smem>>
    %1238 = vector.broadcast %1237 : f32 to vector<8x128xf32>
    %1239 = arith.mulf %1003, %1238 : vector<8x128xf32>
    %1240 = arith.addf %1236, %1239 : vector<8x128xf32>
    %c51_137 = arith.constant 51 : index
    %1241 = memref.load %arg9[%c51_137] : memref<192xf32, #tpu.memory_space<smem>>
    %1242 = vector.broadcast %1241 : f32 to vector<8x128xf32>
    %1243 = arith.mulf %1005, %1242 : vector<8x128xf32>
    %1244 = arith.addf %1240, %1243 : vector<8x128xf32>
    %c52_138 = arith.constant 52 : index
    %1245 = memref.load %arg9[%c52_138] : memref<192xf32, #tpu.memory_space<smem>>
    %1246 = vector.broadcast %1245 : f32 to vector<8x128xf32>
    %1247 = arith.mulf %405, %1246 : vector<8x128xf32>
    %1248 = arith.addf %1244, %1247 : vector<8x128xf32>
    %c53_139 = arith.constant 53 : index
    %1249 = memref.load %arg9[%c53_139] : memref<192xf32, #tpu.memory_space<smem>>
    %1250 = vector.broadcast %1249 : f32 to vector<8x128xf32>
    %1251 = arith.mulf %1007, %1250 : vector<8x128xf32>
    %1252 = arith.addf %1248, %1251 : vector<8x128xf32>
    %c54_140 = arith.constant 54 : index
    %1253 = memref.load %arg9[%c54_140] : memref<192xf32, #tpu.memory_space<smem>>
    %1254 = vector.broadcast %1253 : f32 to vector<8x128xf32>
    %1255 = arith.mulf %1009, %1254 : vector<8x128xf32>
    %1256 = arith.addf %1252, %1255 : vector<8x128xf32>
    %c55_141 = arith.constant 55 : index
    %1257 = memref.load %arg9[%c55_141] : memref<192xf32, #tpu.memory_space<smem>>
    %1258 = vector.broadcast %1257 : f32 to vector<8x128xf32>
    %1259 = arith.mulf %504, %1258 : vector<8x128xf32>
    %1260 = arith.addf %1256, %1259 : vector<8x128xf32>
    %c56_142 = arith.constant 56 : index
    %1261 = memref.load %arg9[%c56_142] : memref<192xf32, #tpu.memory_space<smem>>
    %1262 = vector.broadcast %1261 : f32 to vector<8x128xf32>
    %1263 = arith.mulf %1011, %1262 : vector<8x128xf32>
    %1264 = arith.addf %1260, %1263 : vector<8x128xf32>
    %c57_143 = arith.constant 57 : index
    %1265 = memref.load %arg9[%c57_143] : memref<192xf32, #tpu.memory_space<smem>>
    %1266 = vector.broadcast %1265 : f32 to vector<8x128xf32>
    %1267 = arith.mulf %1013, %1266 : vector<8x128xf32>
    %1268 = arith.addf %1264, %1267 : vector<8x128xf32>
    %c58_144 = arith.constant 58 : index
    %1269 = memref.load %arg9[%c58_144] : memref<192xf32, #tpu.memory_space<smem>>
    %1270 = vector.broadcast %1269 : f32 to vector<8x128xf32>
    %1271 = arith.mulf %603, %1270 : vector<8x128xf32>
    %1272 = arith.addf %1268, %1271 : vector<8x128xf32>
    %c59_145 = arith.constant 59 : index
    %1273 = memref.load %arg9[%c59_145] : memref<192xf32, #tpu.memory_space<smem>>
    %1274 = vector.broadcast %1273 : f32 to vector<8x128xf32>
    %1275 = arith.mulf %1015, %1274 : vector<8x128xf32>
    %1276 = arith.addf %1272, %1275 : vector<8x128xf32>
    %c60_146 = arith.constant 60 : index
    %1277 = memref.load %arg9[%c60_146] : memref<192xf32, #tpu.memory_space<smem>>
    %1278 = vector.broadcast %1277 : f32 to vector<8x128xf32>
    %1279 = arith.mulf %1017, %1278 : vector<8x128xf32>
    %1280 = arith.addf %1276, %1279 : vector<8x128xf32>
    %c61_147 = arith.constant 61 : index
    %1281 = memref.load %arg9[%c61_147] : memref<192xf32, #tpu.memory_space<smem>>
    %1282 = vector.broadcast %1281 : f32 to vector<8x128xf32>
    %1283 = arith.mulf %702, %1282 : vector<8x128xf32>
    %1284 = arith.addf %1280, %1283 : vector<8x128xf32>
    %c62_148 = arith.constant 62 : index
    %1285 = memref.load %arg9[%c62_148] : memref<192xf32, #tpu.memory_space<smem>>
    %1286 = vector.broadcast %1285 : f32 to vector<8x128xf32>
    %1287 = arith.mulf %1019, %1286 : vector<8x128xf32>
    %1288 = arith.addf %1284, %1287 : vector<8x128xf32>
    %c63_149 = arith.constant 63 : index
    %1289 = memref.load %arg9[%c63_149] : memref<192xf32, #tpu.memory_space<smem>>
    %1290 = vector.broadcast %1289 : f32 to vector<8x128xf32>
    %1291 = arith.mulf %1021, %1290 : vector<8x128xf32>
    %1292 = arith.addf %1288, %1291 : vector<8x128xf32>
    %c64_150 = arith.constant 64 : index
    %1293 = memref.load %arg9[%c64_150] : memref<192xf32, #tpu.memory_space<smem>>
    %1294 = vector.broadcast %1293 : f32 to vector<8x128xf32>
    %1295 = arith.mulf %801, %1294 : vector<8x128xf32>
    %1296 = arith.addf %1292, %1295 : vector<8x128xf32>
    %c65_151 = arith.constant 65 : index
    %1297 = memref.load %arg9[%c65_151] : memref<192xf32, #tpu.memory_space<smem>>
    %1298 = vector.broadcast %1297 : f32 to vector<8x128xf32>
    %1299 = arith.mulf %1023, %1298 : vector<8x128xf32>
    %1300 = arith.addf %1296, %1299 : vector<8x128xf32>
    %c66_152 = arith.constant 66 : index
    %1301 = memref.load %arg9[%c66_152] : memref<192xf32, #tpu.memory_space<smem>>
    %1302 = vector.broadcast %1301 : f32 to vector<8x128xf32>
    %1303 = arith.mulf %1025, %1302 : vector<8x128xf32>
    %1304 = arith.addf %1300, %1303 : vector<8x128xf32>
    %c67_153 = arith.constant 67 : index
    %1305 = memref.load %arg9[%c67_153] : memref<192xf32, #tpu.memory_space<smem>>
    %1306 = vector.broadcast %1305 : f32 to vector<8x128xf32>
    %1307 = arith.mulf %900, %1306 : vector<8x128xf32>
    %1308 = arith.addf %1304, %1307 : vector<8x128xf32>
    %c68_154 = arith.constant 68 : index
    %1309 = memref.load %arg9[%c68_154] : memref<192xf32, #tpu.memory_space<smem>>
    %1310 = vector.broadcast %1309 : f32 to vector<8x128xf32>
    %1311 = arith.mulf %1027, %1310 : vector<8x128xf32>
    %1312 = arith.addf %1308, %1311 : vector<8x128xf32>
    %c69_155 = arith.constant 69 : index
    %1313 = memref.load %arg9[%c69_155] : memref<192xf32, #tpu.memory_space<smem>>
    %1314 = vector.broadcast %1313 : f32 to vector<8x128xf32>
    %1315 = arith.mulf %1029, %1314 : vector<8x128xf32>
    %1316 = arith.addf %1312, %1315 : vector<8x128xf32>
    %c70_156 = arith.constant 70 : index
    %1317 = memref.load %arg9[%c70_156] : memref<192xf32, #tpu.memory_space<smem>>
    %1318 = vector.broadcast %1317 : f32 to vector<8x128xf32>
    %1319 = arith.mulf %999, %1318 : vector<8x128xf32>
    %1320 = arith.addf %1316, %1319 : vector<8x128xf32>
    %c71_157 = arith.constant 71 : index
    %1321 = memref.load %arg9[%c71_157] : memref<192xf32, #tpu.memory_space<smem>>
    %1322 = vector.broadcast %1321 : f32 to vector<8x128xf32>
    %1323 = arith.mulf %1031, %1322 : vector<8x128xf32>
    %1324 = arith.addf %1320, %1323 : vector<8x128xf32>
    %c2_158 = arith.constant 2 : index
    %1325 = memref.load %arg10[%c2_158] : memref<8xf32, #tpu.memory_space<smem>>
    %1326 = vector.broadcast %1325 : f32 to vector<8x128xf32>
    %1327 = arith.addf %1324, %1326 : vector<8x128xf32>
    %1328 = math.tanh %1327 : vector<8x128xf32>
    %c72_159 = arith.constant 72 : index
    %1329 = memref.load %arg9[%c72_159] : memref<192xf32, #tpu.memory_space<smem>>
    %1330 = vector.broadcast %1329 : f32 to vector<8x128xf32>
    %1331 = arith.mulf %1001, %1330 : vector<8x128xf32>
    %c73_160 = arith.constant 73 : index
    %1332 = memref.load %arg9[%c73_160] : memref<192xf32, #tpu.memory_space<smem>>
    %1333 = vector.broadcast %1332 : f32 to vector<8x128xf32>
    %1334 = arith.mulf %306, %1333 : vector<8x128xf32>
    %1335 = arith.addf %1331, %1334 : vector<8x128xf32>
    %c74_161 = arith.constant 74 : index
    %1336 = memref.load %arg9[%c74_161] : memref<192xf32, #tpu.memory_space<smem>>
    %1337 = vector.broadcast %1336 : f32 to vector<8x128xf32>
    %1338 = arith.mulf %1003, %1337 : vector<8x128xf32>
    %1339 = arith.addf %1335, %1338 : vector<8x128xf32>
    %c75_162 = arith.constant 75 : index
    %1340 = memref.load %arg9[%c75_162] : memref<192xf32, #tpu.memory_space<smem>>
    %1341 = vector.broadcast %1340 : f32 to vector<8x128xf32>
    %1342 = arith.mulf %1005, %1341 : vector<8x128xf32>
    %1343 = arith.addf %1339, %1342 : vector<8x128xf32>
    %c76_163 = arith.constant 76 : index
    %1344 = memref.load %arg9[%c76_163] : memref<192xf32, #tpu.memory_space<smem>>
    %1345 = vector.broadcast %1344 : f32 to vector<8x128xf32>
    %1346 = arith.mulf %405, %1345 : vector<8x128xf32>
    %1347 = arith.addf %1343, %1346 : vector<8x128xf32>
    %c77_164 = arith.constant 77 : index
    %1348 = memref.load %arg9[%c77_164] : memref<192xf32, #tpu.memory_space<smem>>
    %1349 = vector.broadcast %1348 : f32 to vector<8x128xf32>
    %1350 = arith.mulf %1007, %1349 : vector<8x128xf32>
    %1351 = arith.addf %1347, %1350 : vector<8x128xf32>
    %c78_165 = arith.constant 78 : index
    %1352 = memref.load %arg9[%c78_165] : memref<192xf32, #tpu.memory_space<smem>>
    %1353 = vector.broadcast %1352 : f32 to vector<8x128xf32>
    %1354 = arith.mulf %1009, %1353 : vector<8x128xf32>
    %1355 = arith.addf %1351, %1354 : vector<8x128xf32>
    %c79_166 = arith.constant 79 : index
    %1356 = memref.load %arg9[%c79_166] : memref<192xf32, #tpu.memory_space<smem>>
    %1357 = vector.broadcast %1356 : f32 to vector<8x128xf32>
    %1358 = arith.mulf %504, %1357 : vector<8x128xf32>
    %1359 = arith.addf %1355, %1358 : vector<8x128xf32>
    %c80_167 = arith.constant 80 : index
    %1360 = memref.load %arg9[%c80_167] : memref<192xf32, #tpu.memory_space<smem>>
    %1361 = vector.broadcast %1360 : f32 to vector<8x128xf32>
    %1362 = arith.mulf %1011, %1361 : vector<8x128xf32>
    %1363 = arith.addf %1359, %1362 : vector<8x128xf32>
    %c81_168 = arith.constant 81 : index
    %1364 = memref.load %arg9[%c81_168] : memref<192xf32, #tpu.memory_space<smem>>
    %1365 = vector.broadcast %1364 : f32 to vector<8x128xf32>
    %1366 = arith.mulf %1013, %1365 : vector<8x128xf32>
    %1367 = arith.addf %1363, %1366 : vector<8x128xf32>
    %c82_169 = arith.constant 82 : index
    %1368 = memref.load %arg9[%c82_169] : memref<192xf32, #tpu.memory_space<smem>>
    %1369 = vector.broadcast %1368 : f32 to vector<8x128xf32>
    %1370 = arith.mulf %603, %1369 : vector<8x128xf32>
    %1371 = arith.addf %1367, %1370 : vector<8x128xf32>
    %c83_170 = arith.constant 83 : index
    %1372 = memref.load %arg9[%c83_170] : memref<192xf32, #tpu.memory_space<smem>>
    %1373 = vector.broadcast %1372 : f32 to vector<8x128xf32>
    %1374 = arith.mulf %1015, %1373 : vector<8x128xf32>
    %1375 = arith.addf %1371, %1374 : vector<8x128xf32>
    %c84_171 = arith.constant 84 : index
    %1376 = memref.load %arg9[%c84_171] : memref<192xf32, #tpu.memory_space<smem>>
    %1377 = vector.broadcast %1376 : f32 to vector<8x128xf32>
    %1378 = arith.mulf %1017, %1377 : vector<8x128xf32>
    %1379 = arith.addf %1375, %1378 : vector<8x128xf32>
    %c85_172 = arith.constant 85 : index
    %1380 = memref.load %arg9[%c85_172] : memref<192xf32, #tpu.memory_space<smem>>
    %1381 = vector.broadcast %1380 : f32 to vector<8x128xf32>
    %1382 = arith.mulf %702, %1381 : vector<8x128xf32>
    %1383 = arith.addf %1379, %1382 : vector<8x128xf32>
    %c86_173 = arith.constant 86 : index
    %1384 = memref.load %arg9[%c86_173] : memref<192xf32, #tpu.memory_space<smem>>
    %1385 = vector.broadcast %1384 : f32 to vector<8x128xf32>
    %1386 = arith.mulf %1019, %1385 : vector<8x128xf32>
    %1387 = arith.addf %1383, %1386 : vector<8x128xf32>
    %c87_174 = arith.constant 87 : index
    %1388 = memref.load %arg9[%c87_174] : memref<192xf32, #tpu.memory_space<smem>>
    %1389 = vector.broadcast %1388 : f32 to vector<8x128xf32>
    %1390 = arith.mulf %1021, %1389 : vector<8x128xf32>
    %1391 = arith.addf %1387, %1390 : vector<8x128xf32>
    %c88_175 = arith.constant 88 : index
    %1392 = memref.load %arg9[%c88_175] : memref<192xf32, #tpu.memory_space<smem>>
    %1393 = vector.broadcast %1392 : f32 to vector<8x128xf32>
    %1394 = arith.mulf %801, %1393 : vector<8x128xf32>
    %1395 = arith.addf %1391, %1394 : vector<8x128xf32>
    %c89_176 = arith.constant 89 : index
    %1396 = memref.load %arg9[%c89_176] : memref<192xf32, #tpu.memory_space<smem>>
    %1397 = vector.broadcast %1396 : f32 to vector<8x128xf32>
    %1398 = arith.mulf %1023, %1397 : vector<8x128xf32>
    %1399 = arith.addf %1395, %1398 : vector<8x128xf32>
    %c90_177 = arith.constant 90 : index
    %1400 = memref.load %arg9[%c90_177] : memref<192xf32, #tpu.memory_space<smem>>
    %1401 = vector.broadcast %1400 : f32 to vector<8x128xf32>
    %1402 = arith.mulf %1025, %1401 : vector<8x128xf32>
    %1403 = arith.addf %1399, %1402 : vector<8x128xf32>
    %c91_178 = arith.constant 91 : index
    %1404 = memref.load %arg9[%c91_178] : memref<192xf32, #tpu.memory_space<smem>>
    %1405 = vector.broadcast %1404 : f32 to vector<8x128xf32>
    %1406 = arith.mulf %900, %1405 : vector<8x128xf32>
    %1407 = arith.addf %1403, %1406 : vector<8x128xf32>
    %c92_179 = arith.constant 92 : index
    %1408 = memref.load %arg9[%c92_179] : memref<192xf32, #tpu.memory_space<smem>>
    %1409 = vector.broadcast %1408 : f32 to vector<8x128xf32>
    %1410 = arith.mulf %1027, %1409 : vector<8x128xf32>
    %1411 = arith.addf %1407, %1410 : vector<8x128xf32>
    %c93_180 = arith.constant 93 : index
    %1412 = memref.load %arg9[%c93_180] : memref<192xf32, #tpu.memory_space<smem>>
    %1413 = vector.broadcast %1412 : f32 to vector<8x128xf32>
    %1414 = arith.mulf %1029, %1413 : vector<8x128xf32>
    %1415 = arith.addf %1411, %1414 : vector<8x128xf32>
    %c94_181 = arith.constant 94 : index
    %1416 = memref.load %arg9[%c94_181] : memref<192xf32, #tpu.memory_space<smem>>
    %1417 = vector.broadcast %1416 : f32 to vector<8x128xf32>
    %1418 = arith.mulf %999, %1417 : vector<8x128xf32>
    %1419 = arith.addf %1415, %1418 : vector<8x128xf32>
    %c95_182 = arith.constant 95 : index
    %1420 = memref.load %arg9[%c95_182] : memref<192xf32, #tpu.memory_space<smem>>
    %1421 = vector.broadcast %1420 : f32 to vector<8x128xf32>
    %1422 = arith.mulf %1031, %1421 : vector<8x128xf32>
    %1423 = arith.addf %1419, %1422 : vector<8x128xf32>
    %c3_183 = arith.constant 3 : index
    %1424 = memref.load %arg10[%c3_183] : memref<8xf32, #tpu.memory_space<smem>>
    %1425 = vector.broadcast %1424 : f32 to vector<8x128xf32>
    %1426 = arith.addf %1423, %1425 : vector<8x128xf32>
    %1427 = math.tanh %1426 : vector<8x128xf32>
    %c96_184 = arith.constant 96 : index
    %1428 = memref.load %arg9[%c96_184] : memref<192xf32, #tpu.memory_space<smem>>
    %1429 = vector.broadcast %1428 : f32 to vector<8x128xf32>
    %1430 = arith.mulf %1001, %1429 : vector<8x128xf32>
    %c97_185 = arith.constant 97 : index
    %1431 = memref.load %arg9[%c97_185] : memref<192xf32, #tpu.memory_space<smem>>
    %1432 = vector.broadcast %1431 : f32 to vector<8x128xf32>
    %1433 = arith.mulf %306, %1432 : vector<8x128xf32>
    %1434 = arith.addf %1430, %1433 : vector<8x128xf32>
    %c98_186 = arith.constant 98 : index
    %1435 = memref.load %arg9[%c98_186] : memref<192xf32, #tpu.memory_space<smem>>
    %1436 = vector.broadcast %1435 : f32 to vector<8x128xf32>
    %1437 = arith.mulf %1003, %1436 : vector<8x128xf32>
    %1438 = arith.addf %1434, %1437 : vector<8x128xf32>
    %c99_187 = arith.constant 99 : index
    %1439 = memref.load %arg9[%c99_187] : memref<192xf32, #tpu.memory_space<smem>>
    %1440 = vector.broadcast %1439 : f32 to vector<8x128xf32>
    %1441 = arith.mulf %1005, %1440 : vector<8x128xf32>
    %1442 = arith.addf %1438, %1441 : vector<8x128xf32>
    %c100_188 = arith.constant 100 : index
    %1443 = memref.load %arg9[%c100_188] : memref<192xf32, #tpu.memory_space<smem>>
    %1444 = vector.broadcast %1443 : f32 to vector<8x128xf32>
    %1445 = arith.mulf %405, %1444 : vector<8x128xf32>
    %1446 = arith.addf %1442, %1445 : vector<8x128xf32>
    %c101_189 = arith.constant 101 : index
    %1447 = memref.load %arg9[%c101_189] : memref<192xf32, #tpu.memory_space<smem>>
    %1448 = vector.broadcast %1447 : f32 to vector<8x128xf32>
    %1449 = arith.mulf %1007, %1448 : vector<8x128xf32>
    %1450 = arith.addf %1446, %1449 : vector<8x128xf32>
    %c102_190 = arith.constant 102 : index
    %1451 = memref.load %arg9[%c102_190] : memref<192xf32, #tpu.memory_space<smem>>
    %1452 = vector.broadcast %1451 : f32 to vector<8x128xf32>
    %1453 = arith.mulf %1009, %1452 : vector<8x128xf32>
    %1454 = arith.addf %1450, %1453 : vector<8x128xf32>
    %c103_191 = arith.constant 103 : index
    %1455 = memref.load %arg9[%c103_191] : memref<192xf32, #tpu.memory_space<smem>>
    %1456 = vector.broadcast %1455 : f32 to vector<8x128xf32>
    %1457 = arith.mulf %504, %1456 : vector<8x128xf32>
    %1458 = arith.addf %1454, %1457 : vector<8x128xf32>
    %c104_192 = arith.constant 104 : index
    %1459 = memref.load %arg9[%c104_192] : memref<192xf32, #tpu.memory_space<smem>>
    %1460 = vector.broadcast %1459 : f32 to vector<8x128xf32>
    %1461 = arith.mulf %1011, %1460 : vector<8x128xf32>
    %1462 = arith.addf %1458, %1461 : vector<8x128xf32>
    %c105_193 = arith.constant 105 : index
    %1463 = memref.load %arg9[%c105_193] : memref<192xf32, #tpu.memory_space<smem>>
    %1464 = vector.broadcast %1463 : f32 to vector<8x128xf32>
    %1465 = arith.mulf %1013, %1464 : vector<8x128xf32>
    %1466 = arith.addf %1462, %1465 : vector<8x128xf32>
    %c106_194 = arith.constant 106 : index
    %1467 = memref.load %arg9[%c106_194] : memref<192xf32, #tpu.memory_space<smem>>
    %1468 = vector.broadcast %1467 : f32 to vector<8x128xf32>
    %1469 = arith.mulf %603, %1468 : vector<8x128xf32>
    %1470 = arith.addf %1466, %1469 : vector<8x128xf32>
    %c107_195 = arith.constant 107 : index
    %1471 = memref.load %arg9[%c107_195] : memref<192xf32, #tpu.memory_space<smem>>
    %1472 = vector.broadcast %1471 : f32 to vector<8x128xf32>
    %1473 = arith.mulf %1015, %1472 : vector<8x128xf32>
    %1474 = arith.addf %1470, %1473 : vector<8x128xf32>
    %c108_196 = arith.constant 108 : index
    %1475 = memref.load %arg9[%c108_196] : memref<192xf32, #tpu.memory_space<smem>>
    %1476 = vector.broadcast %1475 : f32 to vector<8x128xf32>
    %1477 = arith.mulf %1017, %1476 : vector<8x128xf32>
    %1478 = arith.addf %1474, %1477 : vector<8x128xf32>
    %c109_197 = arith.constant 109 : index
    %1479 = memref.load %arg9[%c109_197] : memref<192xf32, #tpu.memory_space<smem>>
    %1480 = vector.broadcast %1479 : f32 to vector<8x128xf32>
    %1481 = arith.mulf %702, %1480 : vector<8x128xf32>
    %1482 = arith.addf %1478, %1481 : vector<8x128xf32>
    %c110_198 = arith.constant 110 : index
    %1483 = memref.load %arg9[%c110_198] : memref<192xf32, #tpu.memory_space<smem>>
    %1484 = vector.broadcast %1483 : f32 to vector<8x128xf32>
    %1485 = arith.mulf %1019, %1484 : vector<8x128xf32>
    %1486 = arith.addf %1482, %1485 : vector<8x128xf32>
    %c111_199 = arith.constant 111 : index
    %1487 = memref.load %arg9[%c111_199] : memref<192xf32, #tpu.memory_space<smem>>
    %1488 = vector.broadcast %1487 : f32 to vector<8x128xf32>
    %1489 = arith.mulf %1021, %1488 : vector<8x128xf32>
    %1490 = arith.addf %1486, %1489 : vector<8x128xf32>
    %c112_200 = arith.constant 112 : index
    %1491 = memref.load %arg9[%c112_200] : memref<192xf32, #tpu.memory_space<smem>>
    %1492 = vector.broadcast %1491 : f32 to vector<8x128xf32>
    %1493 = arith.mulf %801, %1492 : vector<8x128xf32>
    %1494 = arith.addf %1490, %1493 : vector<8x128xf32>
    %c113_201 = arith.constant 113 : index
    %1495 = memref.load %arg9[%c113_201] : memref<192xf32, #tpu.memory_space<smem>>
    %1496 = vector.broadcast %1495 : f32 to vector<8x128xf32>
    %1497 = arith.mulf %1023, %1496 : vector<8x128xf32>
    %1498 = arith.addf %1494, %1497 : vector<8x128xf32>
    %c114_202 = arith.constant 114 : index
    %1499 = memref.load %arg9[%c114_202] : memref<192xf32, #tpu.memory_space<smem>>
    %1500 = vector.broadcast %1499 : f32 to vector<8x128xf32>
    %1501 = arith.mulf %1025, %1500 : vector<8x128xf32>
    %1502 = arith.addf %1498, %1501 : vector<8x128xf32>
    %c115_203 = arith.constant 115 : index
    %1503 = memref.load %arg9[%c115_203] : memref<192xf32, #tpu.memory_space<smem>>
    %1504 = vector.broadcast %1503 : f32 to vector<8x128xf32>
    %1505 = arith.mulf %900, %1504 : vector<8x128xf32>
    %1506 = arith.addf %1502, %1505 : vector<8x128xf32>
    %c116_204 = arith.constant 116 : index
    %1507 = memref.load %arg9[%c116_204] : memref<192xf32, #tpu.memory_space<smem>>
    %1508 = vector.broadcast %1507 : f32 to vector<8x128xf32>
    %1509 = arith.mulf %1027, %1508 : vector<8x128xf32>
    %1510 = arith.addf %1506, %1509 : vector<8x128xf32>
    %c117_205 = arith.constant 117 : index
    %1511 = memref.load %arg9[%c117_205] : memref<192xf32, #tpu.memory_space<smem>>
    %1512 = vector.broadcast %1511 : f32 to vector<8x128xf32>
    %1513 = arith.mulf %1029, %1512 : vector<8x128xf32>
    %1514 = arith.addf %1510, %1513 : vector<8x128xf32>
    %c118_206 = arith.constant 118 : index
    %1515 = memref.load %arg9[%c118_206] : memref<192xf32, #tpu.memory_space<smem>>
    %1516 = vector.broadcast %1515 : f32 to vector<8x128xf32>
    %1517 = arith.mulf %999, %1516 : vector<8x128xf32>
    %1518 = arith.addf %1514, %1517 : vector<8x128xf32>
    %c119_207 = arith.constant 119 : index
    %1519 = memref.load %arg9[%c119_207] : memref<192xf32, #tpu.memory_space<smem>>
    %1520 = vector.broadcast %1519 : f32 to vector<8x128xf32>
    %1521 = arith.mulf %1031, %1520 : vector<8x128xf32>
    %1522 = arith.addf %1518, %1521 : vector<8x128xf32>
    %c4_208 = arith.constant 4 : index
    %1523 = memref.load %arg10[%c4_208] : memref<8xf32, #tpu.memory_space<smem>>
    %1524 = vector.broadcast %1523 : f32 to vector<8x128xf32>
    %1525 = arith.addf %1522, %1524 : vector<8x128xf32>
    %1526 = math.tanh %1525 : vector<8x128xf32>
    %c120_209 = arith.constant 120 : index
    %1527 = memref.load %arg9[%c120_209] : memref<192xf32, #tpu.memory_space<smem>>
    %1528 = vector.broadcast %1527 : f32 to vector<8x128xf32>
    %1529 = arith.mulf %1001, %1528 : vector<8x128xf32>
    %c121_210 = arith.constant 121 : index
    %1530 = memref.load %arg9[%c121_210] : memref<192xf32, #tpu.memory_space<smem>>
    %1531 = vector.broadcast %1530 : f32 to vector<8x128xf32>
    %1532 = arith.mulf %306, %1531 : vector<8x128xf32>
    %1533 = arith.addf %1529, %1532 : vector<8x128xf32>
    %c122_211 = arith.constant 122 : index
    %1534 = memref.load %arg9[%c122_211] : memref<192xf32, #tpu.memory_space<smem>>
    %1535 = vector.broadcast %1534 : f32 to vector<8x128xf32>
    %1536 = arith.mulf %1003, %1535 : vector<8x128xf32>
    %1537 = arith.addf %1533, %1536 : vector<8x128xf32>
    %c123_212 = arith.constant 123 : index
    %1538 = memref.load %arg9[%c123_212] : memref<192xf32, #tpu.memory_space<smem>>
    %1539 = vector.broadcast %1538 : f32 to vector<8x128xf32>
    %1540 = arith.mulf %1005, %1539 : vector<8x128xf32>
    %1541 = arith.addf %1537, %1540 : vector<8x128xf32>
    %c124_213 = arith.constant 124 : index
    %1542 = memref.load %arg9[%c124_213] : memref<192xf32, #tpu.memory_space<smem>>
    %1543 = vector.broadcast %1542 : f32 to vector<8x128xf32>
    %1544 = arith.mulf %405, %1543 : vector<8x128xf32>
    %1545 = arith.addf %1541, %1544 : vector<8x128xf32>
    %c125_214 = arith.constant 125 : index
    %1546 = memref.load %arg9[%c125_214] : memref<192xf32, #tpu.memory_space<smem>>
    %1547 = vector.broadcast %1546 : f32 to vector<8x128xf32>
    %1548 = arith.mulf %1007, %1547 : vector<8x128xf32>
    %1549 = arith.addf %1545, %1548 : vector<8x128xf32>
    %c126_215 = arith.constant 126 : index
    %1550 = memref.load %arg9[%c126_215] : memref<192xf32, #tpu.memory_space<smem>>
    %1551 = vector.broadcast %1550 : f32 to vector<8x128xf32>
    %1552 = arith.mulf %1009, %1551 : vector<8x128xf32>
    %1553 = arith.addf %1549, %1552 : vector<8x128xf32>
    %c127_216 = arith.constant 127 : index
    %1554 = memref.load %arg9[%c127_216] : memref<192xf32, #tpu.memory_space<smem>>
    %1555 = vector.broadcast %1554 : f32 to vector<8x128xf32>
    %1556 = arith.mulf %504, %1555 : vector<8x128xf32>
    %1557 = arith.addf %1553, %1556 : vector<8x128xf32>
    %c128_217 = arith.constant 128 : index
    %1558 = memref.load %arg9[%c128_217] : memref<192xf32, #tpu.memory_space<smem>>
    %1559 = vector.broadcast %1558 : f32 to vector<8x128xf32>
    %1560 = arith.mulf %1011, %1559 : vector<8x128xf32>
    %1561 = arith.addf %1557, %1560 : vector<8x128xf32>
    %c129_218 = arith.constant 129 : index
    %1562 = memref.load %arg9[%c129_218] : memref<192xf32, #tpu.memory_space<smem>>
    %1563 = vector.broadcast %1562 : f32 to vector<8x128xf32>
    %1564 = arith.mulf %1013, %1563 : vector<8x128xf32>
    %1565 = arith.addf %1561, %1564 : vector<8x128xf32>
    %c130_219 = arith.constant 130 : index
    %1566 = memref.load %arg9[%c130_219] : memref<192xf32, #tpu.memory_space<smem>>
    %1567 = vector.broadcast %1566 : f32 to vector<8x128xf32>
    %1568 = arith.mulf %603, %1567 : vector<8x128xf32>
    %1569 = arith.addf %1565, %1568 : vector<8x128xf32>
    %c131_220 = arith.constant 131 : index
    %1570 = memref.load %arg9[%c131_220] : memref<192xf32, #tpu.memory_space<smem>>
    %1571 = vector.broadcast %1570 : f32 to vector<8x128xf32>
    %1572 = arith.mulf %1015, %1571 : vector<8x128xf32>
    %1573 = arith.addf %1569, %1572 : vector<8x128xf32>
    %c132_221 = arith.constant 132 : index
    %1574 = memref.load %arg9[%c132_221] : memref<192xf32, #tpu.memory_space<smem>>
    %1575 = vector.broadcast %1574 : f32 to vector<8x128xf32>
    %1576 = arith.mulf %1017, %1575 : vector<8x128xf32>
    %1577 = arith.addf %1573, %1576 : vector<8x128xf32>
    %c133_222 = arith.constant 133 : index
    %1578 = memref.load %arg9[%c133_222] : memref<192xf32, #tpu.memory_space<smem>>
    %1579 = vector.broadcast %1578 : f32 to vector<8x128xf32>
    %1580 = arith.mulf %702, %1579 : vector<8x128xf32>
    %1581 = arith.addf %1577, %1580 : vector<8x128xf32>
    %c134_223 = arith.constant 134 : index
    %1582 = memref.load %arg9[%c134_223] : memref<192xf32, #tpu.memory_space<smem>>
    %1583 = vector.broadcast %1582 : f32 to vector<8x128xf32>
    %1584 = arith.mulf %1019, %1583 : vector<8x128xf32>
    %1585 = arith.addf %1581, %1584 : vector<8x128xf32>
    %c135_224 = arith.constant 135 : index
    %1586 = memref.load %arg9[%c135_224] : memref<192xf32, #tpu.memory_space<smem>>
    %1587 = vector.broadcast %1586 : f32 to vector<8x128xf32>
    %1588 = arith.mulf %1021, %1587 : vector<8x128xf32>
    %1589 = arith.addf %1585, %1588 : vector<8x128xf32>
    %c136_225 = arith.constant 136 : index
    %1590 = memref.load %arg9[%c136_225] : memref<192xf32, #tpu.memory_space<smem>>
    %1591 = vector.broadcast %1590 : f32 to vector<8x128xf32>
    %1592 = arith.mulf %801, %1591 : vector<8x128xf32>
    %1593 = arith.addf %1589, %1592 : vector<8x128xf32>
    %c137_226 = arith.constant 137 : index
    %1594 = memref.load %arg9[%c137_226] : memref<192xf32, #tpu.memory_space<smem>>
    %1595 = vector.broadcast %1594 : f32 to vector<8x128xf32>
    %1596 = arith.mulf %1023, %1595 : vector<8x128xf32>
    %1597 = arith.addf %1593, %1596 : vector<8x128xf32>
    %c138_227 = arith.constant 138 : index
    %1598 = memref.load %arg9[%c138_227] : memref<192xf32, #tpu.memory_space<smem>>
    %1599 = vector.broadcast %1598 : f32 to vector<8x128xf32>
    %1600 = arith.mulf %1025, %1599 : vector<8x128xf32>
    %1601 = arith.addf %1597, %1600 : vector<8x128xf32>
    %c139_228 = arith.constant 139 : index
    %1602 = memref.load %arg9[%c139_228] : memref<192xf32, #tpu.memory_space<smem>>
    %1603 = vector.broadcast %1602 : f32 to vector<8x128xf32>
    %1604 = arith.mulf %900, %1603 : vector<8x128xf32>
    %1605 = arith.addf %1601, %1604 : vector<8x128xf32>
    %c140_229 = arith.constant 140 : index
    %1606 = memref.load %arg9[%c140_229] : memref<192xf32, #tpu.memory_space<smem>>
    %1607 = vector.broadcast %1606 : f32 to vector<8x128xf32>
    %1608 = arith.mulf %1027, %1607 : vector<8x128xf32>
    %1609 = arith.addf %1605, %1608 : vector<8x128xf32>
    %c141_230 = arith.constant 141 : index
    %1610 = memref.load %arg9[%c141_230] : memref<192xf32, #tpu.memory_space<smem>>
    %1611 = vector.broadcast %1610 : f32 to vector<8x128xf32>
    %1612 = arith.mulf %1029, %1611 : vector<8x128xf32>
    %1613 = arith.addf %1609, %1612 : vector<8x128xf32>
    %c142_231 = arith.constant 142 : index
    %1614 = memref.load %arg9[%c142_231] : memref<192xf32, #tpu.memory_space<smem>>
    %1615 = vector.broadcast %1614 : f32 to vector<8x128xf32>
    %1616 = arith.mulf %999, %1615 : vector<8x128xf32>
    %1617 = arith.addf %1613, %1616 : vector<8x128xf32>
    %c143_232 = arith.constant 143 : index
    %1618 = memref.load %arg9[%c143_232] : memref<192xf32, #tpu.memory_space<smem>>
    %1619 = vector.broadcast %1618 : f32 to vector<8x128xf32>
    %1620 = arith.mulf %1031, %1619 : vector<8x128xf32>
    %1621 = arith.addf %1617, %1620 : vector<8x128xf32>
    %c5_233 = arith.constant 5 : index
    %1622 = memref.load %arg10[%c5_233] : memref<8xf32, #tpu.memory_space<smem>>
    %1623 = vector.broadcast %1622 : f32 to vector<8x128xf32>
    %1624 = arith.addf %1621, %1623 : vector<8x128xf32>
    %1625 = math.tanh %1624 : vector<8x128xf32>
    %c144_234 = arith.constant 144 : index
    %1626 = memref.load %arg9[%c144_234] : memref<192xf32, #tpu.memory_space<smem>>
    %1627 = vector.broadcast %1626 : f32 to vector<8x128xf32>
    %1628 = arith.mulf %1001, %1627 : vector<8x128xf32>
    %c145_235 = arith.constant 145 : index
    %1629 = memref.load %arg9[%c145_235] : memref<192xf32, #tpu.memory_space<smem>>
    %1630 = vector.broadcast %1629 : f32 to vector<8x128xf32>
    %1631 = arith.mulf %306, %1630 : vector<8x128xf32>
    %1632 = arith.addf %1628, %1631 : vector<8x128xf32>
    %c146_236 = arith.constant 146 : index
    %1633 = memref.load %arg9[%c146_236] : memref<192xf32, #tpu.memory_space<smem>>
    %1634 = vector.broadcast %1633 : f32 to vector<8x128xf32>
    %1635 = arith.mulf %1003, %1634 : vector<8x128xf32>
    %1636 = arith.addf %1632, %1635 : vector<8x128xf32>
    %c147_237 = arith.constant 147 : index
    %1637 = memref.load %arg9[%c147_237] : memref<192xf32, #tpu.memory_space<smem>>
    %1638 = vector.broadcast %1637 : f32 to vector<8x128xf32>
    %1639 = arith.mulf %1005, %1638 : vector<8x128xf32>
    %1640 = arith.addf %1636, %1639 : vector<8x128xf32>
    %c148_238 = arith.constant 148 : index
    %1641 = memref.load %arg9[%c148_238] : memref<192xf32, #tpu.memory_space<smem>>
    %1642 = vector.broadcast %1641 : f32 to vector<8x128xf32>
    %1643 = arith.mulf %405, %1642 : vector<8x128xf32>
    %1644 = arith.addf %1640, %1643 : vector<8x128xf32>
    %c149_239 = arith.constant 149 : index
    %1645 = memref.load %arg9[%c149_239] : memref<192xf32, #tpu.memory_space<smem>>
    %1646 = vector.broadcast %1645 : f32 to vector<8x128xf32>
    %1647 = arith.mulf %1007, %1646 : vector<8x128xf32>
    %1648 = arith.addf %1644, %1647 : vector<8x128xf32>
    %c150_240 = arith.constant 150 : index
    %1649 = memref.load %arg9[%c150_240] : memref<192xf32, #tpu.memory_space<smem>>
    %1650 = vector.broadcast %1649 : f32 to vector<8x128xf32>
    %1651 = arith.mulf %1009, %1650 : vector<8x128xf32>
    %1652 = arith.addf %1648, %1651 : vector<8x128xf32>
    %c151_241 = arith.constant 151 : index
    %1653 = memref.load %arg9[%c151_241] : memref<192xf32, #tpu.memory_space<smem>>
    %1654 = vector.broadcast %1653 : f32 to vector<8x128xf32>
    %1655 = arith.mulf %504, %1654 : vector<8x128xf32>
    %1656 = arith.addf %1652, %1655 : vector<8x128xf32>
    %c152_242 = arith.constant 152 : index
    %1657 = memref.load %arg9[%c152_242] : memref<192xf32, #tpu.memory_space<smem>>
    %1658 = vector.broadcast %1657 : f32 to vector<8x128xf32>
    %1659 = arith.mulf %1011, %1658 : vector<8x128xf32>
    %1660 = arith.addf %1656, %1659 : vector<8x128xf32>
    %c153_243 = arith.constant 153 : index
    %1661 = memref.load %arg9[%c153_243] : memref<192xf32, #tpu.memory_space<smem>>
    %1662 = vector.broadcast %1661 : f32 to vector<8x128xf32>
    %1663 = arith.mulf %1013, %1662 : vector<8x128xf32>
    %1664 = arith.addf %1660, %1663 : vector<8x128xf32>
    %c154_244 = arith.constant 154 : index
    %1665 = memref.load %arg9[%c154_244] : memref<192xf32, #tpu.memory_space<smem>>
    %1666 = vector.broadcast %1665 : f32 to vector<8x128xf32>
    %1667 = arith.mulf %603, %1666 : vector<8x128xf32>
    %1668 = arith.addf %1664, %1667 : vector<8x128xf32>
    %c155_245 = arith.constant 155 : index
    %1669 = memref.load %arg9[%c155_245] : memref<192xf32, #tpu.memory_space<smem>>
    %1670 = vector.broadcast %1669 : f32 to vector<8x128xf32>
    %1671 = arith.mulf %1015, %1670 : vector<8x128xf32>
    %1672 = arith.addf %1668, %1671 : vector<8x128xf32>
    %c156_246 = arith.constant 156 : index
    %1673 = memref.load %arg9[%c156_246] : memref<192xf32, #tpu.memory_space<smem>>
    %1674 = vector.broadcast %1673 : f32 to vector<8x128xf32>
    %1675 = arith.mulf %1017, %1674 : vector<8x128xf32>
    %1676 = arith.addf %1672, %1675 : vector<8x128xf32>
    %c157_247 = arith.constant 157 : index
    %1677 = memref.load %arg9[%c157_247] : memref<192xf32, #tpu.memory_space<smem>>
    %1678 = vector.broadcast %1677 : f32 to vector<8x128xf32>
    %1679 = arith.mulf %702, %1678 : vector<8x128xf32>
    %1680 = arith.addf %1676, %1679 : vector<8x128xf32>
    %c158_248 = arith.constant 158 : index
    %1681 = memref.load %arg9[%c158_248] : memref<192xf32, #tpu.memory_space<smem>>
    %1682 = vector.broadcast %1681 : f32 to vector<8x128xf32>
    %1683 = arith.mulf %1019, %1682 : vector<8x128xf32>
    %1684 = arith.addf %1680, %1683 : vector<8x128xf32>
    %c159_249 = arith.constant 159 : index
    %1685 = memref.load %arg9[%c159_249] : memref<192xf32, #tpu.memory_space<smem>>
    %1686 = vector.broadcast %1685 : f32 to vector<8x128xf32>
    %1687 = arith.mulf %1021, %1686 : vector<8x128xf32>
    %1688 = arith.addf %1684, %1687 : vector<8x128xf32>
    %c160_250 = arith.constant 160 : index
    %1689 = memref.load %arg9[%c160_250] : memref<192xf32, #tpu.memory_space<smem>>
    %1690 = vector.broadcast %1689 : f32 to vector<8x128xf32>
    %1691 = arith.mulf %801, %1690 : vector<8x128xf32>
    %1692 = arith.addf %1688, %1691 : vector<8x128xf32>
    %c161_251 = arith.constant 161 : index
    %1693 = memref.load %arg9[%c161_251] : memref<192xf32, #tpu.memory_space<smem>>
    %1694 = vector.broadcast %1693 : f32 to vector<8x128xf32>
    %1695 = arith.mulf %1023, %1694 : vector<8x128xf32>
    %1696 = arith.addf %1692, %1695 : vector<8x128xf32>
    %c162_252 = arith.constant 162 : index
    %1697 = memref.load %arg9[%c162_252] : memref<192xf32, #tpu.memory_space<smem>>
    %1698 = vector.broadcast %1697 : f32 to vector<8x128xf32>
    %1699 = arith.mulf %1025, %1698 : vector<8x128xf32>
    %1700 = arith.addf %1696, %1699 : vector<8x128xf32>
    %c163_253 = arith.constant 163 : index
    %1701 = memref.load %arg9[%c163_253] : memref<192xf32, #tpu.memory_space<smem>>
    %1702 = vector.broadcast %1701 : f32 to vector<8x128xf32>
    %1703 = arith.mulf %900, %1702 : vector<8x128xf32>
    %1704 = arith.addf %1700, %1703 : vector<8x128xf32>
    %c164_254 = arith.constant 164 : index
    %1705 = memref.load %arg9[%c164_254] : memref<192xf32, #tpu.memory_space<smem>>
    %1706 = vector.broadcast %1705 : f32 to vector<8x128xf32>
    %1707 = arith.mulf %1027, %1706 : vector<8x128xf32>
    %1708 = arith.addf %1704, %1707 : vector<8x128xf32>
    %c165_255 = arith.constant 165 : index
    %1709 = memref.load %arg9[%c165_255] : memref<192xf32, #tpu.memory_space<smem>>
    %1710 = vector.broadcast %1709 : f32 to vector<8x128xf32>
    %1711 = arith.mulf %1029, %1710 : vector<8x128xf32>
    %1712 = arith.addf %1708, %1711 : vector<8x128xf32>
    %c166_256 = arith.constant 166 : index
    %1713 = memref.load %arg9[%c166_256] : memref<192xf32, #tpu.memory_space<smem>>
    %1714 = vector.broadcast %1713 : f32 to vector<8x128xf32>
    %1715 = arith.mulf %999, %1714 : vector<8x128xf32>
    %1716 = arith.addf %1712, %1715 : vector<8x128xf32>
    %c167_257 = arith.constant 167 : index
    %1717 = memref.load %arg9[%c167_257] : memref<192xf32, #tpu.memory_space<smem>>
    %1718 = vector.broadcast %1717 : f32 to vector<8x128xf32>
    %1719 = arith.mulf %1031, %1718 : vector<8x128xf32>
    %1720 = arith.addf %1716, %1719 : vector<8x128xf32>
    %c6_258 = arith.constant 6 : index
    %1721 = memref.load %arg10[%c6_258] : memref<8xf32, #tpu.memory_space<smem>>
    %1722 = vector.broadcast %1721 : f32 to vector<8x128xf32>
    %1723 = arith.addf %1720, %1722 : vector<8x128xf32>
    %1724 = math.tanh %1723 : vector<8x128xf32>
    %c168_259 = arith.constant 168 : index
    %1725 = memref.load %arg9[%c168_259] : memref<192xf32, #tpu.memory_space<smem>>
    %1726 = vector.broadcast %1725 : f32 to vector<8x128xf32>
    %1727 = arith.mulf %1001, %1726 : vector<8x128xf32>
    %c169_260 = arith.constant 169 : index
    %1728 = memref.load %arg9[%c169_260] : memref<192xf32, #tpu.memory_space<smem>>
    %1729 = vector.broadcast %1728 : f32 to vector<8x128xf32>
    %1730 = arith.mulf %306, %1729 : vector<8x128xf32>
    %1731 = arith.addf %1727, %1730 : vector<8x128xf32>
    %c170_261 = arith.constant 170 : index
    %1732 = memref.load %arg9[%c170_261] : memref<192xf32, #tpu.memory_space<smem>>
    %1733 = vector.broadcast %1732 : f32 to vector<8x128xf32>
    %1734 = arith.mulf %1003, %1733 : vector<8x128xf32>
    %1735 = arith.addf %1731, %1734 : vector<8x128xf32>
    %c171_262 = arith.constant 171 : index
    %1736 = memref.load %arg9[%c171_262] : memref<192xf32, #tpu.memory_space<smem>>
    %1737 = vector.broadcast %1736 : f32 to vector<8x128xf32>
    %1738 = arith.mulf %1005, %1737 : vector<8x128xf32>
    %1739 = arith.addf %1735, %1738 : vector<8x128xf32>
    %c172_263 = arith.constant 172 : index
    %1740 = memref.load %arg9[%c172_263] : memref<192xf32, #tpu.memory_space<smem>>
    %1741 = vector.broadcast %1740 : f32 to vector<8x128xf32>
    %1742 = arith.mulf %405, %1741 : vector<8x128xf32>
    %1743 = arith.addf %1739, %1742 : vector<8x128xf32>
    %c173_264 = arith.constant 173 : index
    %1744 = memref.load %arg9[%c173_264] : memref<192xf32, #tpu.memory_space<smem>>
    %1745 = vector.broadcast %1744 : f32 to vector<8x128xf32>
    %1746 = arith.mulf %1007, %1745 : vector<8x128xf32>
    %1747 = arith.addf %1743, %1746 : vector<8x128xf32>
    %c174_265 = arith.constant 174 : index
    %1748 = memref.load %arg9[%c174_265] : memref<192xf32, #tpu.memory_space<smem>>
    %1749 = vector.broadcast %1748 : f32 to vector<8x128xf32>
    %1750 = arith.mulf %1009, %1749 : vector<8x128xf32>
    %1751 = arith.addf %1747, %1750 : vector<8x128xf32>
    %c175_266 = arith.constant 175 : index
    %1752 = memref.load %arg9[%c175_266] : memref<192xf32, #tpu.memory_space<smem>>
    %1753 = vector.broadcast %1752 : f32 to vector<8x128xf32>
    %1754 = arith.mulf %504, %1753 : vector<8x128xf32>
    %1755 = arith.addf %1751, %1754 : vector<8x128xf32>
    %c176_267 = arith.constant 176 : index
    %1756 = memref.load %arg9[%c176_267] : memref<192xf32, #tpu.memory_space<smem>>
    %1757 = vector.broadcast %1756 : f32 to vector<8x128xf32>
    %1758 = arith.mulf %1011, %1757 : vector<8x128xf32>
    %1759 = arith.addf %1755, %1758 : vector<8x128xf32>
    %c177_268 = arith.constant 177 : index
    %1760 = memref.load %arg9[%c177_268] : memref<192xf32, #tpu.memory_space<smem>>
    %1761 = vector.broadcast %1760 : f32 to vector<8x128xf32>
    %1762 = arith.mulf %1013, %1761 : vector<8x128xf32>
    %1763 = arith.addf %1759, %1762 : vector<8x128xf32>
    %c178_269 = arith.constant 178 : index
    %1764 = memref.load %arg9[%c178_269] : memref<192xf32, #tpu.memory_space<smem>>
    %1765 = vector.broadcast %1764 : f32 to vector<8x128xf32>
    %1766 = arith.mulf %603, %1765 : vector<8x128xf32>
    %1767 = arith.addf %1763, %1766 : vector<8x128xf32>
    %c179_270 = arith.constant 179 : index
    %1768 = memref.load %arg9[%c179_270] : memref<192xf32, #tpu.memory_space<smem>>
    %1769 = vector.broadcast %1768 : f32 to vector<8x128xf32>
    %1770 = arith.mulf %1015, %1769 : vector<8x128xf32>
    %1771 = arith.addf %1767, %1770 : vector<8x128xf32>
    %c180_271 = arith.constant 180 : index
    %1772 = memref.load %arg9[%c180_271] : memref<192xf32, #tpu.memory_space<smem>>
    %1773 = vector.broadcast %1772 : f32 to vector<8x128xf32>
    %1774 = arith.mulf %1017, %1773 : vector<8x128xf32>
    %1775 = arith.addf %1771, %1774 : vector<8x128xf32>
    %c181_272 = arith.constant 181 : index
    %1776 = memref.load %arg9[%c181_272] : memref<192xf32, #tpu.memory_space<smem>>
    %1777 = vector.broadcast %1776 : f32 to vector<8x128xf32>
    %1778 = arith.mulf %702, %1777 : vector<8x128xf32>
    %1779 = arith.addf %1775, %1778 : vector<8x128xf32>
    %c182_273 = arith.constant 182 : index
    %1780 = memref.load %arg9[%c182_273] : memref<192xf32, #tpu.memory_space<smem>>
    %1781 = vector.broadcast %1780 : f32 to vector<8x128xf32>
    %1782 = arith.mulf %1019, %1781 : vector<8x128xf32>
    %1783 = arith.addf %1779, %1782 : vector<8x128xf32>
    %c183_274 = arith.constant 183 : index
    %1784 = memref.load %arg9[%c183_274] : memref<192xf32, #tpu.memory_space<smem>>
    %1785 = vector.broadcast %1784 : f32 to vector<8x128xf32>
    %1786 = arith.mulf %1021, %1785 : vector<8x128xf32>
    %1787 = arith.addf %1783, %1786 : vector<8x128xf32>
    %c184_275 = arith.constant 184 : index
    %1788 = memref.load %arg9[%c184_275] : memref<192xf32, #tpu.memory_space<smem>>
    %1789 = vector.broadcast %1788 : f32 to vector<8x128xf32>
    %1790 = arith.mulf %801, %1789 : vector<8x128xf32>
    %1791 = arith.addf %1787, %1790 : vector<8x128xf32>
    %c185_276 = arith.constant 185 : index
    %1792 = memref.load %arg9[%c185_276] : memref<192xf32, #tpu.memory_space<smem>>
    %1793 = vector.broadcast %1792 : f32 to vector<8x128xf32>
    %1794 = arith.mulf %1023, %1793 : vector<8x128xf32>
    %1795 = arith.addf %1791, %1794 : vector<8x128xf32>
    %c186_277 = arith.constant 186 : index
    %1796 = memref.load %arg9[%c186_277] : memref<192xf32, #tpu.memory_space<smem>>
    %1797 = vector.broadcast %1796 : f32 to vector<8x128xf32>
    %1798 = arith.mulf %1025, %1797 : vector<8x128xf32>
    %1799 = arith.addf %1795, %1798 : vector<8x128xf32>
    %c187_278 = arith.constant 187 : index
    %1800 = memref.load %arg9[%c187_278] : memref<192xf32, #tpu.memory_space<smem>>
    %1801 = vector.broadcast %1800 : f32 to vector<8x128xf32>
    %1802 = arith.mulf %900, %1801 : vector<8x128xf32>
    %1803 = arith.addf %1799, %1802 : vector<8x128xf32>
    %c188_279 = arith.constant 188 : index
    %1804 = memref.load %arg9[%c188_279] : memref<192xf32, #tpu.memory_space<smem>>
    %1805 = vector.broadcast %1804 : f32 to vector<8x128xf32>
    %1806 = arith.mulf %1027, %1805 : vector<8x128xf32>
    %1807 = arith.addf %1803, %1806 : vector<8x128xf32>
    %c189_280 = arith.constant 189 : index
    %1808 = memref.load %arg9[%c189_280] : memref<192xf32, #tpu.memory_space<smem>>
    %1809 = vector.broadcast %1808 : f32 to vector<8x128xf32>
    %1810 = arith.mulf %1029, %1809 : vector<8x128xf32>
    %1811 = arith.addf %1807, %1810 : vector<8x128xf32>
    %c190_281 = arith.constant 190 : index
    %1812 = memref.load %arg9[%c190_281] : memref<192xf32, #tpu.memory_space<smem>>
    %1813 = vector.broadcast %1812 : f32 to vector<8x128xf32>
    %1814 = arith.mulf %999, %1813 : vector<8x128xf32>
    %1815 = arith.addf %1811, %1814 : vector<8x128xf32>
    %c191_282 = arith.constant 191 : index
    %1816 = memref.load %arg9[%c191_282] : memref<192xf32, #tpu.memory_space<smem>>
    %1817 = vector.broadcast %1816 : f32 to vector<8x128xf32>
    %1818 = arith.mulf %1031, %1817 : vector<8x128xf32>
    %1819 = arith.addf %1815, %1818 : vector<8x128xf32>
    %c7_283 = arith.constant 7 : index
    %1820 = memref.load %arg10[%c7_283] : memref<8xf32, #tpu.memory_space<smem>>
    %1821 = vector.broadcast %1820 : f32 to vector<8x128xf32>
    %1822 = arith.addf %1819, %1821 : vector<8x128xf32>
    %1823 = math.tanh %1822 : vector<8x128xf32>
    %c1_i32_284 = arith.constant 1 : i32
    %1824 = tpu.dynamic_rotate %1130 by %c1_i32_284 dim 1 : vector<8x128xf32>, i32 -> vector<8x128xf32>
    %1825 = arith.select %49, %1130, %1824 : vector<8x128xi1>, vector<8x128xf32>
    %c127_i32_285 = arith.constant 127 : i32
    %1826 = tpu.dynamic_rotate %1130 by %c127_i32_285 dim 1 : vector<8x128xf32>, i32 -> vector<8x128xf32>
    %1827 = arith.select %51, %1130, %1826 : vector<8x128xi1>, vector<8x128xf32>
    %c1_i32_286 = arith.constant 1 : i32
    %1828 = tpu.dynamic_rotate %1229 by %c1_i32_286 dim 1 : vector<8x128xf32>, i32 -> vector<8x128xf32>
    %1829 = arith.select %49, %1229, %1828 : vector<8x128xi1>, vector<8x128xf32>
    %c127_i32_287 = arith.constant 127 : i32
    %1830 = tpu.dynamic_rotate %1229 by %c127_i32_287 dim 1 : vector<8x128xf32>, i32 -> vector<8x128xf32>
    %1831 = arith.select %51, %1229, %1830 : vector<8x128xi1>, vector<8x128xf32>
    %c1_i32_288 = arith.constant 1 : i32
    %1832 = tpu.dynamic_rotate %1328 by %c1_i32_288 dim 1 : vector<8x128xf32>, i32 -> vector<8x128xf32>
    %1833 = arith.select %49, %1328, %1832 : vector<8x128xi1>, vector<8x128xf32>
    %c127_i32_289 = arith.constant 127 : i32
    %1834 = tpu.dynamic_rotate %1328 by %c127_i32_289 dim 1 : vector<8x128xf32>, i32 -> vector<8x128xf32>
    %1835 = arith.select %51, %1328, %1834 : vector<8x128xi1>, vector<8x128xf32>
    %c1_i32_290 = arith.constant 1 : i32
    %1836 = tpu.dynamic_rotate %1427 by %c1_i32_290 dim 1 : vector<8x128xf32>, i32 -> vector<8x128xf32>
    %1837 = arith.select %49, %1427, %1836 : vector<8x128xi1>, vector<8x128xf32>
    %c127_i32_291 = arith.constant 127 : i32
    %1838 = tpu.dynamic_rotate %1427 by %c127_i32_291 dim 1 : vector<8x128xf32>, i32 -> vector<8x128xf32>
    %1839 = arith.select %51, %1427, %1838 : vector<8x128xi1>, vector<8x128xf32>
    %c1_i32_292 = arith.constant 1 : i32
    %1840 = tpu.dynamic_rotate %1526 by %c1_i32_292 dim 1 : vector<8x128xf32>, i32 -> vector<8x128xf32>
    %1841 = arith.select %49, %1526, %1840 : vector<8x128xi1>, vector<8x128xf32>
    %c127_i32_293 = arith.constant 127 : i32
    %1842 = tpu.dynamic_rotate %1526 by %c127_i32_293 dim 1 : vector<8x128xf32>, i32 -> vector<8x128xf32>
    %1843 = arith.select %51, %1526, %1842 : vector<8x128xi1>, vector<8x128xf32>
    %c1_i32_294 = arith.constant 1 : i32
    %1844 = tpu.dynamic_rotate %1625 by %c1_i32_294 dim 1 : vector<8x128xf32>, i32 -> vector<8x128xf32>
    %1845 = arith.select %49, %1625, %1844 : vector<8x128xi1>, vector<8x128xf32>
    %c127_i32_295 = arith.constant 127 : i32
    %1846 = tpu.dynamic_rotate %1625 by %c127_i32_295 dim 1 : vector<8x128xf32>, i32 -> vector<8x128xf32>
    %1847 = arith.select %51, %1625, %1846 : vector<8x128xi1>, vector<8x128xf32>
    %c1_i32_296 = arith.constant 1 : i32
    %1848 = tpu.dynamic_rotate %1724 by %c1_i32_296 dim 1 : vector<8x128xf32>, i32 -> vector<8x128xf32>
    %1849 = arith.select %49, %1724, %1848 : vector<8x128xi1>, vector<8x128xf32>
    %c127_i32_297 = arith.constant 127 : i32
    %1850 = tpu.dynamic_rotate %1724 by %c127_i32_297 dim 1 : vector<8x128xf32>, i32 -> vector<8x128xf32>
    %1851 = arith.select %51, %1724, %1850 : vector<8x128xi1>, vector<8x128xf32>
    %c1_i32_298 = arith.constant 1 : i32
    %1852 = tpu.dynamic_rotate %1823 by %c1_i32_298 dim 1 : vector<8x128xf32>, i32 -> vector<8x128xf32>
    %1853 = arith.select %49, %1823, %1852 : vector<8x128xi1>, vector<8x128xf32>
    %c127_i32_299 = arith.constant 127 : i32
    %1854 = tpu.dynamic_rotate %1823 by %c127_i32_299 dim 1 : vector<8x128xf32>, i32 -> vector<8x128xf32>
    %1855 = arith.select %51, %1823, %1854 : vector<8x128xi1>, vector<8x128xf32>
    %c0_300 = arith.constant 0 : index
    %1856 = memref.load %arg11[%c0_300] : memref<72xf32, #tpu.memory_space<smem>>
    %1857 = vector.broadcast %1856 : f32 to vector<8x128xf32>
    %1858 = arith.mulf %1825, %1857 : vector<8x128xf32>
    %c1_301 = arith.constant 1 : index
    %1859 = memref.load %arg11[%c1_301] : memref<72xf32, #tpu.memory_space<smem>>
    %1860 = vector.broadcast %1859 : f32 to vector<8x128xf32>
    %1861 = arith.mulf %1130, %1860 : vector<8x128xf32>
    %1862 = arith.addf %1858, %1861 : vector<8x128xf32>
    %c2_302 = arith.constant 2 : index
    %1863 = memref.load %arg11[%c2_302] : memref<72xf32, #tpu.memory_space<smem>>
    %1864 = vector.broadcast %1863 : f32 to vector<8x128xf32>
    %1865 = arith.mulf %1827, %1864 : vector<8x128xf32>
    %1866 = arith.addf %1862, %1865 : vector<8x128xf32>
    %c3_303 = arith.constant 3 : index
    %1867 = memref.load %arg11[%c3_303] : memref<72xf32, #tpu.memory_space<smem>>
    %1868 = vector.broadcast %1867 : f32 to vector<8x128xf32>
    %1869 = arith.mulf %1829, %1868 : vector<8x128xf32>
    %1870 = arith.addf %1866, %1869 : vector<8x128xf32>
    %c4_304 = arith.constant 4 : index
    %1871 = memref.load %arg11[%c4_304] : memref<72xf32, #tpu.memory_space<smem>>
    %1872 = vector.broadcast %1871 : f32 to vector<8x128xf32>
    %1873 = arith.mulf %1229, %1872 : vector<8x128xf32>
    %1874 = arith.addf %1870, %1873 : vector<8x128xf32>
    %c5_305 = arith.constant 5 : index
    %1875 = memref.load %arg11[%c5_305] : memref<72xf32, #tpu.memory_space<smem>>
    %1876 = vector.broadcast %1875 : f32 to vector<8x128xf32>
    %1877 = arith.mulf %1831, %1876 : vector<8x128xf32>
    %1878 = arith.addf %1874, %1877 : vector<8x128xf32>
    %c6_306 = arith.constant 6 : index
    %1879 = memref.load %arg11[%c6_306] : memref<72xf32, #tpu.memory_space<smem>>
    %1880 = vector.broadcast %1879 : f32 to vector<8x128xf32>
    %1881 = arith.mulf %1833, %1880 : vector<8x128xf32>
    %1882 = arith.addf %1878, %1881 : vector<8x128xf32>
    %c7_307 = arith.constant 7 : index
    %1883 = memref.load %arg11[%c7_307] : memref<72xf32, #tpu.memory_space<smem>>
    %1884 = vector.broadcast %1883 : f32 to vector<8x128xf32>
    %1885 = arith.mulf %1328, %1884 : vector<8x128xf32>
    %1886 = arith.addf %1882, %1885 : vector<8x128xf32>
    %c8_308 = arith.constant 8 : index
    %1887 = memref.load %arg11[%c8_308] : memref<72xf32, #tpu.memory_space<smem>>
    %1888 = vector.broadcast %1887 : f32 to vector<8x128xf32>
    %1889 = arith.mulf %1835, %1888 : vector<8x128xf32>
    %1890 = arith.addf %1886, %1889 : vector<8x128xf32>
    %c9_309 = arith.constant 9 : index
    %1891 = memref.load %arg11[%c9_309] : memref<72xf32, #tpu.memory_space<smem>>
    %1892 = vector.broadcast %1891 : f32 to vector<8x128xf32>
    %1893 = arith.mulf %1837, %1892 : vector<8x128xf32>
    %1894 = arith.addf %1890, %1893 : vector<8x128xf32>
    %c10_310 = arith.constant 10 : index
    %1895 = memref.load %arg11[%c10_310] : memref<72xf32, #tpu.memory_space<smem>>
    %1896 = vector.broadcast %1895 : f32 to vector<8x128xf32>
    %1897 = arith.mulf %1427, %1896 : vector<8x128xf32>
    %1898 = arith.addf %1894, %1897 : vector<8x128xf32>
    %c11_311 = arith.constant 11 : index
    %1899 = memref.load %arg11[%c11_311] : memref<72xf32, #tpu.memory_space<smem>>
    %1900 = vector.broadcast %1899 : f32 to vector<8x128xf32>
    %1901 = arith.mulf %1839, %1900 : vector<8x128xf32>
    %1902 = arith.addf %1898, %1901 : vector<8x128xf32>
    %c12_312 = arith.constant 12 : index
    %1903 = memref.load %arg11[%c12_312] : memref<72xf32, #tpu.memory_space<smem>>
    %1904 = vector.broadcast %1903 : f32 to vector<8x128xf32>
    %1905 = arith.mulf %1841, %1904 : vector<8x128xf32>
    %1906 = arith.addf %1902, %1905 : vector<8x128xf32>
    %c13_313 = arith.constant 13 : index
    %1907 = memref.load %arg11[%c13_313] : memref<72xf32, #tpu.memory_space<smem>>
    %1908 = vector.broadcast %1907 : f32 to vector<8x128xf32>
    %1909 = arith.mulf %1526, %1908 : vector<8x128xf32>
    %1910 = arith.addf %1906, %1909 : vector<8x128xf32>
    %c14_314 = arith.constant 14 : index
    %1911 = memref.load %arg11[%c14_314] : memref<72xf32, #tpu.memory_space<smem>>
    %1912 = vector.broadcast %1911 : f32 to vector<8x128xf32>
    %1913 = arith.mulf %1843, %1912 : vector<8x128xf32>
    %1914 = arith.addf %1910, %1913 : vector<8x128xf32>
    %c15_315 = arith.constant 15 : index
    %1915 = memref.load %arg11[%c15_315] : memref<72xf32, #tpu.memory_space<smem>>
    %1916 = vector.broadcast %1915 : f32 to vector<8x128xf32>
    %1917 = arith.mulf %1845, %1916 : vector<8x128xf32>
    %1918 = arith.addf %1914, %1917 : vector<8x128xf32>
    %c16_316 = arith.constant 16 : index
    %1919 = memref.load %arg11[%c16_316] : memref<72xf32, #tpu.memory_space<smem>>
    %1920 = vector.broadcast %1919 : f32 to vector<8x128xf32>
    %1921 = arith.mulf %1625, %1920 : vector<8x128xf32>
    %1922 = arith.addf %1918, %1921 : vector<8x128xf32>
    %c17_317 = arith.constant 17 : index
    %1923 = memref.load %arg11[%c17_317] : memref<72xf32, #tpu.memory_space<smem>>
    %1924 = vector.broadcast %1923 : f32 to vector<8x128xf32>
    %1925 = arith.mulf %1847, %1924 : vector<8x128xf32>
    %1926 = arith.addf %1922, %1925 : vector<8x128xf32>
    %c18_318 = arith.constant 18 : index
    %1927 = memref.load %arg11[%c18_318] : memref<72xf32, #tpu.memory_space<smem>>
    %1928 = vector.broadcast %1927 : f32 to vector<8x128xf32>
    %1929 = arith.mulf %1849, %1928 : vector<8x128xf32>
    %1930 = arith.addf %1926, %1929 : vector<8x128xf32>
    %c19_319 = arith.constant 19 : index
    %1931 = memref.load %arg11[%c19_319] : memref<72xf32, #tpu.memory_space<smem>>
    %1932 = vector.broadcast %1931 : f32 to vector<8x128xf32>
    %1933 = arith.mulf %1724, %1932 : vector<8x128xf32>
    %1934 = arith.addf %1930, %1933 : vector<8x128xf32>
    %c20_320 = arith.constant 20 : index
    %1935 = memref.load %arg11[%c20_320] : memref<72xf32, #tpu.memory_space<smem>>
    %1936 = vector.broadcast %1935 : f32 to vector<8x128xf32>
    %1937 = arith.mulf %1851, %1936 : vector<8x128xf32>
    %1938 = arith.addf %1934, %1937 : vector<8x128xf32>
    %c21_321 = arith.constant 21 : index
    %1939 = memref.load %arg11[%c21_321] : memref<72xf32, #tpu.memory_space<smem>>
    %1940 = vector.broadcast %1939 : f32 to vector<8x128xf32>
    %1941 = arith.mulf %1853, %1940 : vector<8x128xf32>
    %1942 = arith.addf %1938, %1941 : vector<8x128xf32>
    %c22_322 = arith.constant 22 : index
    %1943 = memref.load %arg11[%c22_322] : memref<72xf32, #tpu.memory_space<smem>>
    %1944 = vector.broadcast %1943 : f32 to vector<8x128xf32>
    %1945 = arith.mulf %1823, %1944 : vector<8x128xf32>
    %1946 = arith.addf %1942, %1945 : vector<8x128xf32>
    %c23_323 = arith.constant 23 : index
    %1947 = memref.load %arg11[%c23_323] : memref<72xf32, #tpu.memory_space<smem>>
    %1948 = vector.broadcast %1947 : f32 to vector<8x128xf32>
    %1949 = arith.mulf %1855, %1948 : vector<8x128xf32>
    %1950 = arith.addf %1946, %1949 : vector<8x128xf32>
    %c0_324 = arith.constant 0 : index
    %1951 = memref.load %arg12[%c0_324] : memref<3xf32, #tpu.memory_space<smem>>
    %1952 = vector.broadcast %1951 : f32 to vector<8x128xf32>
    %1953 = arith.addf %1950, %1952 : vector<8x128xf32>
    %c24_325 = arith.constant 24 : index
    %1954 = memref.load %arg11[%c24_325] : memref<72xf32, #tpu.memory_space<smem>>
    %1955 = vector.broadcast %1954 : f32 to vector<8x128xf32>
    %1956 = arith.mulf %1825, %1955 : vector<8x128xf32>
    %c25_326 = arith.constant 25 : index
    %1957 = memref.load %arg11[%c25_326] : memref<72xf32, #tpu.memory_space<smem>>
    %1958 = vector.broadcast %1957 : f32 to vector<8x128xf32>
    %1959 = arith.mulf %1130, %1958 : vector<8x128xf32>
    %1960 = arith.addf %1956, %1959 : vector<8x128xf32>
    %c26_327 = arith.constant 26 : index
    %1961 = memref.load %arg11[%c26_327] : memref<72xf32, #tpu.memory_space<smem>>
    %1962 = vector.broadcast %1961 : f32 to vector<8x128xf32>
    %1963 = arith.mulf %1827, %1962 : vector<8x128xf32>
    %1964 = arith.addf %1960, %1963 : vector<8x128xf32>
    %c27_328 = arith.constant 27 : index
    %1965 = memref.load %arg11[%c27_328] : memref<72xf32, #tpu.memory_space<smem>>
    %1966 = vector.broadcast %1965 : f32 to vector<8x128xf32>
    %1967 = arith.mulf %1829, %1966 : vector<8x128xf32>
    %1968 = arith.addf %1964, %1967 : vector<8x128xf32>
    %c28_329 = arith.constant 28 : index
    %1969 = memref.load %arg11[%c28_329] : memref<72xf32, #tpu.memory_space<smem>>
    %1970 = vector.broadcast %1969 : f32 to vector<8x128xf32>
    %1971 = arith.mulf %1229, %1970 : vector<8x128xf32>
    %1972 = arith.addf %1968, %1971 : vector<8x128xf32>
    %c29_330 = arith.constant 29 : index
    %1973 = memref.load %arg11[%c29_330] : memref<72xf32, #tpu.memory_space<smem>>
    %1974 = vector.broadcast %1973 : f32 to vector<8x128xf32>
    %1975 = arith.mulf %1831, %1974 : vector<8x128xf32>
    %1976 = arith.addf %1972, %1975 : vector<8x128xf32>
    %c30_331 = arith.constant 30 : index
    %1977 = memref.load %arg11[%c30_331] : memref<72xf32, #tpu.memory_space<smem>>
    %1978 = vector.broadcast %1977 : f32 to vector<8x128xf32>
    %1979 = arith.mulf %1833, %1978 : vector<8x128xf32>
    %1980 = arith.addf %1976, %1979 : vector<8x128xf32>
    %c31_332 = arith.constant 31 : index
    %1981 = memref.load %arg11[%c31_332] : memref<72xf32, #tpu.memory_space<smem>>
    %1982 = vector.broadcast %1981 : f32 to vector<8x128xf32>
    %1983 = arith.mulf %1328, %1982 : vector<8x128xf32>
    %1984 = arith.addf %1980, %1983 : vector<8x128xf32>
    %c32_333 = arith.constant 32 : index
    %1985 = memref.load %arg11[%c32_333] : memref<72xf32, #tpu.memory_space<smem>>
    %1986 = vector.broadcast %1985 : f32 to vector<8x128xf32>
    %1987 = arith.mulf %1835, %1986 : vector<8x128xf32>
    %1988 = arith.addf %1984, %1987 : vector<8x128xf32>
    %c33_334 = arith.constant 33 : index
    %1989 = memref.load %arg11[%c33_334] : memref<72xf32, #tpu.memory_space<smem>>
    %1990 = vector.broadcast %1989 : f32 to vector<8x128xf32>
    %1991 = arith.mulf %1837, %1990 : vector<8x128xf32>
    %1992 = arith.addf %1988, %1991 : vector<8x128xf32>
    %c34_335 = arith.constant 34 : index
    %1993 = memref.load %arg11[%c34_335] : memref<72xf32, #tpu.memory_space<smem>>
    %1994 = vector.broadcast %1993 : f32 to vector<8x128xf32>
    %1995 = arith.mulf %1427, %1994 : vector<8x128xf32>
    %1996 = arith.addf %1992, %1995 : vector<8x128xf32>
    %c35_336 = arith.constant 35 : index
    %1997 = memref.load %arg11[%c35_336] : memref<72xf32, #tpu.memory_space<smem>>
    %1998 = vector.broadcast %1997 : f32 to vector<8x128xf32>
    %1999 = arith.mulf %1839, %1998 : vector<8x128xf32>
    %2000 = arith.addf %1996, %1999 : vector<8x128xf32>
    %c36_337 = arith.constant 36 : index
    %2001 = memref.load %arg11[%c36_337] : memref<72xf32, #tpu.memory_space<smem>>
    %2002 = vector.broadcast %2001 : f32 to vector<8x128xf32>
    %2003 = arith.mulf %1841, %2002 : vector<8x128xf32>
    %2004 = arith.addf %2000, %2003 : vector<8x128xf32>
    %c37_338 = arith.constant 37 : index
    %2005 = memref.load %arg11[%c37_338] : memref<72xf32, #tpu.memory_space<smem>>
    %2006 = vector.broadcast %2005 : f32 to vector<8x128xf32>
    %2007 = arith.mulf %1526, %2006 : vector<8x128xf32>
    %2008 = arith.addf %2004, %2007 : vector<8x128xf32>
    %c38_339 = arith.constant 38 : index
    %2009 = memref.load %arg11[%c38_339] : memref<72xf32, #tpu.memory_space<smem>>
    %2010 = vector.broadcast %2009 : f32 to vector<8x128xf32>
    %2011 = arith.mulf %1843, %2010 : vector<8x128xf32>
    %2012 = arith.addf %2008, %2011 : vector<8x128xf32>
    %c39_340 = arith.constant 39 : index
    %2013 = memref.load %arg11[%c39_340] : memref<72xf32, #tpu.memory_space<smem>>
    %2014 = vector.broadcast %2013 : f32 to vector<8x128xf32>
    %2015 = arith.mulf %1845, %2014 : vector<8x128xf32>
    %2016 = arith.addf %2012, %2015 : vector<8x128xf32>
    %c40_341 = arith.constant 40 : index
    %2017 = memref.load %arg11[%c40_341] : memref<72xf32, #tpu.memory_space<smem>>
    %2018 = vector.broadcast %2017 : f32 to vector<8x128xf32>
    %2019 = arith.mulf %1625, %2018 : vector<8x128xf32>
    %2020 = arith.addf %2016, %2019 : vector<8x128xf32>
    %c41_342 = arith.constant 41 : index
    %2021 = memref.load %arg11[%c41_342] : memref<72xf32, #tpu.memory_space<smem>>
    %2022 = vector.broadcast %2021 : f32 to vector<8x128xf32>
    %2023 = arith.mulf %1847, %2022 : vector<8x128xf32>
    %2024 = arith.addf %2020, %2023 : vector<8x128xf32>
    %c42_343 = arith.constant 42 : index
    %2025 = memref.load %arg11[%c42_343] : memref<72xf32, #tpu.memory_space<smem>>
    %2026 = vector.broadcast %2025 : f32 to vector<8x128xf32>
    %2027 = arith.mulf %1849, %2026 : vector<8x128xf32>
    %2028 = arith.addf %2024, %2027 : vector<8x128xf32>
    %c43_344 = arith.constant 43 : index
    %2029 = memref.load %arg11[%c43_344] : memref<72xf32, #tpu.memory_space<smem>>
    %2030 = vector.broadcast %2029 : f32 to vector<8x128xf32>
    %2031 = arith.mulf %1724, %2030 : vector<8x128xf32>
    %2032 = arith.addf %2028, %2031 : vector<8x128xf32>
    %c44_345 = arith.constant 44 : index
    %2033 = memref.load %arg11[%c44_345] : memref<72xf32, #tpu.memory_space<smem>>
    %2034 = vector.broadcast %2033 : f32 to vector<8x128xf32>
    %2035 = arith.mulf %1851, %2034 : vector<8x128xf32>
    %2036 = arith.addf %2032, %2035 : vector<8x128xf32>
    %c45_346 = arith.constant 45 : index
    %2037 = memref.load %arg11[%c45_346] : memref<72xf32, #tpu.memory_space<smem>>
    %2038 = vector.broadcast %2037 : f32 to vector<8x128xf32>
    %2039 = arith.mulf %1853, %2038 : vector<8x128xf32>
    %2040 = arith.addf %2036, %2039 : vector<8x128xf32>
    %c46_347 = arith.constant 46 : index
    %2041 = memref.load %arg11[%c46_347] : memref<72xf32, #tpu.memory_space<smem>>
    %2042 = vector.broadcast %2041 : f32 to vector<8x128xf32>
    %2043 = arith.mulf %1823, %2042 : vector<8x128xf32>
    %2044 = arith.addf %2040, %2043 : vector<8x128xf32>
    %c47_348 = arith.constant 47 : index
    %2045 = memref.load %arg11[%c47_348] : memref<72xf32, #tpu.memory_space<smem>>
    %2046 = vector.broadcast %2045 : f32 to vector<8x128xf32>
    %2047 = arith.mulf %1855, %2046 : vector<8x128xf32>
    %2048 = arith.addf %2044, %2047 : vector<8x128xf32>
    %c1_349 = arith.constant 1 : index
    %2049 = memref.load %arg12[%c1_349] : memref<3xf32, #tpu.memory_space<smem>>
    %2050 = vector.broadcast %2049 : f32 to vector<8x128xf32>
    %2051 = arith.addf %2048, %2050 : vector<8x128xf32>
    %c48_350 = arith.constant 48 : index
    %2052 = memref.load %arg11[%c48_350] : memref<72xf32, #tpu.memory_space<smem>>
    %2053 = vector.broadcast %2052 : f32 to vector<8x128xf32>
    %2054 = arith.mulf %1825, %2053 : vector<8x128xf32>
    %c49_351 = arith.constant 49 : index
    %2055 = memref.load %arg11[%c49_351] : memref<72xf32, #tpu.memory_space<smem>>
    %2056 = vector.broadcast %2055 : f32 to vector<8x128xf32>
    %2057 = arith.mulf %1130, %2056 : vector<8x128xf32>
    %2058 = arith.addf %2054, %2057 : vector<8x128xf32>
    %c50_352 = arith.constant 50 : index
    %2059 = memref.load %arg11[%c50_352] : memref<72xf32, #tpu.memory_space<smem>>
    %2060 = vector.broadcast %2059 : f32 to vector<8x128xf32>
    %2061 = arith.mulf %1827, %2060 : vector<8x128xf32>
    %2062 = arith.addf %2058, %2061 : vector<8x128xf32>
    %c51_353 = arith.constant 51 : index
    %2063 = memref.load %arg11[%c51_353] : memref<72xf32, #tpu.memory_space<smem>>
    %2064 = vector.broadcast %2063 : f32 to vector<8x128xf32>
    %2065 = arith.mulf %1829, %2064 : vector<8x128xf32>
    %2066 = arith.addf %2062, %2065 : vector<8x128xf32>
    %c52_354 = arith.constant 52 : index
    %2067 = memref.load %arg11[%c52_354] : memref<72xf32, #tpu.memory_space<smem>>
    %2068 = vector.broadcast %2067 : f32 to vector<8x128xf32>
    %2069 = arith.mulf %1229, %2068 : vector<8x128xf32>
    %2070 = arith.addf %2066, %2069 : vector<8x128xf32>
    %c53_355 = arith.constant 53 : index
    %2071 = memref.load %arg11[%c53_355] : memref<72xf32, #tpu.memory_space<smem>>
    %2072 = vector.broadcast %2071 : f32 to vector<8x128xf32>
    %2073 = arith.mulf %1831, %2072 : vector<8x128xf32>
    %2074 = arith.addf %2070, %2073 : vector<8x128xf32>
    %c54_356 = arith.constant 54 : index
    %2075 = memref.load %arg11[%c54_356] : memref<72xf32, #tpu.memory_space<smem>>
    %2076 = vector.broadcast %2075 : f32 to vector<8x128xf32>
    %2077 = arith.mulf %1833, %2076 : vector<8x128xf32>
    %2078 = arith.addf %2074, %2077 : vector<8x128xf32>
    %c55_357 = arith.constant 55 : index
    %2079 = memref.load %arg11[%c55_357] : memref<72xf32, #tpu.memory_space<smem>>
    %2080 = vector.broadcast %2079 : f32 to vector<8x128xf32>
    %2081 = arith.mulf %1328, %2080 : vector<8x128xf32>
    %2082 = arith.addf %2078, %2081 : vector<8x128xf32>
    %c56_358 = arith.constant 56 : index
    %2083 = memref.load %arg11[%c56_358] : memref<72xf32, #tpu.memory_space<smem>>
    %2084 = vector.broadcast %2083 : f32 to vector<8x128xf32>
    %2085 = arith.mulf %1835, %2084 : vector<8x128xf32>
    %2086 = arith.addf %2082, %2085 : vector<8x128xf32>
    %c57_359 = arith.constant 57 : index
    %2087 = memref.load %arg11[%c57_359] : memref<72xf32, #tpu.memory_space<smem>>
    %2088 = vector.broadcast %2087 : f32 to vector<8x128xf32>
    %2089 = arith.mulf %1837, %2088 : vector<8x128xf32>
    %2090 = arith.addf %2086, %2089 : vector<8x128xf32>
    %c58_360 = arith.constant 58 : index
    %2091 = memref.load %arg11[%c58_360] : memref<72xf32, #tpu.memory_space<smem>>
    %2092 = vector.broadcast %2091 : f32 to vector<8x128xf32>
    %2093 = arith.mulf %1427, %2092 : vector<8x128xf32>
    %2094 = arith.addf %2090, %2093 : vector<8x128xf32>
    %c59_361 = arith.constant 59 : index
    %2095 = memref.load %arg11[%c59_361] : memref<72xf32, #tpu.memory_space<smem>>
    %2096 = vector.broadcast %2095 : f32 to vector<8x128xf32>
    %2097 = arith.mulf %1839, %2096 : vector<8x128xf32>
    %2098 = arith.addf %2094, %2097 : vector<8x128xf32>
    %c60_362 = arith.constant 60 : index
    %2099 = memref.load %arg11[%c60_362] : memref<72xf32, #tpu.memory_space<smem>>
    %2100 = vector.broadcast %2099 : f32 to vector<8x128xf32>
    %2101 = arith.mulf %1841, %2100 : vector<8x128xf32>
    %2102 = arith.addf %2098, %2101 : vector<8x128xf32>
    %c61_363 = arith.constant 61 : index
    %2103 = memref.load %arg11[%c61_363] : memref<72xf32, #tpu.memory_space<smem>>
    %2104 = vector.broadcast %2103 : f32 to vector<8x128xf32>
    %2105 = arith.mulf %1526, %2104 : vector<8x128xf32>
    %2106 = arith.addf %2102, %2105 : vector<8x128xf32>
    %c62_364 = arith.constant 62 : index
    %2107 = memref.load %arg11[%c62_364] : memref<72xf32, #tpu.memory_space<smem>>
    %2108 = vector.broadcast %2107 : f32 to vector<8x128xf32>
    %2109 = arith.mulf %1843, %2108 : vector<8x128xf32>
    %2110 = arith.addf %2106, %2109 : vector<8x128xf32>
    %c63_365 = arith.constant 63 : index
    %2111 = memref.load %arg11[%c63_365] : memref<72xf32, #tpu.memory_space<smem>>
    %2112 = vector.broadcast %2111 : f32 to vector<8x128xf32>
    %2113 = arith.mulf %1845, %2112 : vector<8x128xf32>
    %2114 = arith.addf %2110, %2113 : vector<8x128xf32>
    %c64_366 = arith.constant 64 : index
    %2115 = memref.load %arg11[%c64_366] : memref<72xf32, #tpu.memory_space<smem>>
    %2116 = vector.broadcast %2115 : f32 to vector<8x128xf32>
    %2117 = arith.mulf %1625, %2116 : vector<8x128xf32>
    %2118 = arith.addf %2114, %2117 : vector<8x128xf32>
    %c65_367 = arith.constant 65 : index
    %2119 = memref.load %arg11[%c65_367] : memref<72xf32, #tpu.memory_space<smem>>
    %2120 = vector.broadcast %2119 : f32 to vector<8x128xf32>
    %2121 = arith.mulf %1847, %2120 : vector<8x128xf32>
    %2122 = arith.addf %2118, %2121 : vector<8x128xf32>
    %c66_368 = arith.constant 66 : index
    %2123 = memref.load %arg11[%c66_368] : memref<72xf32, #tpu.memory_space<smem>>
    %2124 = vector.broadcast %2123 : f32 to vector<8x128xf32>
    %2125 = arith.mulf %1849, %2124 : vector<8x128xf32>
    %2126 = arith.addf %2122, %2125 : vector<8x128xf32>
    %c67_369 = arith.constant 67 : index
    %2127 = memref.load %arg11[%c67_369] : memref<72xf32, #tpu.memory_space<smem>>
    %2128 = vector.broadcast %2127 : f32 to vector<8x128xf32>
    %2129 = arith.mulf %1724, %2128 : vector<8x128xf32>
    %2130 = arith.addf %2126, %2129 : vector<8x128xf32>
    %c68_370 = arith.constant 68 : index
    %2131 = memref.load %arg11[%c68_370] : memref<72xf32, #tpu.memory_space<smem>>
    %2132 = vector.broadcast %2131 : f32 to vector<8x128xf32>
    %2133 = arith.mulf %1851, %2132 : vector<8x128xf32>
    %2134 = arith.addf %2130, %2133 : vector<8x128xf32>
    %c69_371 = arith.constant 69 : index
    %2135 = memref.load %arg11[%c69_371] : memref<72xf32, #tpu.memory_space<smem>>
    %2136 = vector.broadcast %2135 : f32 to vector<8x128xf32>
    %2137 = arith.mulf %1853, %2136 : vector<8x128xf32>
    %2138 = arith.addf %2134, %2137 : vector<8x128xf32>
    %c70_372 = arith.constant 70 : index
    %2139 = memref.load %arg11[%c70_372] : memref<72xf32, #tpu.memory_space<smem>>
    %2140 = vector.broadcast %2139 : f32 to vector<8x128xf32>
    %2141 = arith.mulf %1823, %2140 : vector<8x128xf32>
    %2142 = arith.addf %2138, %2141 : vector<8x128xf32>
    %c71_373 = arith.constant 71 : index
    %2143 = memref.load %arg11[%c71_373] : memref<72xf32, #tpu.memory_space<smem>>
    %2144 = vector.broadcast %2143 : f32 to vector<8x128xf32>
    %2145 = arith.mulf %1855, %2144 : vector<8x128xf32>
    %2146 = arith.addf %2142, %2145 : vector<8x128xf32>
    %c2_374 = arith.constant 2 : index
    %2147 = memref.load %arg12[%c2_374] : memref<3xf32, #tpu.memory_space<smem>>
    %2148 = vector.broadcast %2147 : f32 to vector<8x128xf32>
    %2149 = arith.addf %2146, %2148 : vector<8x128xf32>
    %c0_375 = arith.constant 0 : index
    %c0_376 = arith.constant 0 : index
    %2150 = vector.load %arg4[%c0_375, %c0_376] : memref<384x384xf32, #tpu.memory_space<vmem>>, vector<128x384xf32>
    %cst_377 = arith.constant dense<0.000000e+00> : vector<8x384xf32>
    %2151 = tpu.matmul %1953, %2150, %cst_377 {dimension_numbers = #tpu.dot_dimension_numbers<[1], [0], [0], [1], [0, 0, 1, 1], [], []>} : vector<8x128xf32>, vector<128x384xf32>, vector<8x384xf32> -> vector<8x384xf32>
    %c128_378 = arith.constant 128 : index
    %c0_379 = arith.constant 0 : index
    %2152 = vector.load %arg4[%c128_378, %c0_379] : memref<384x384xf32, #tpu.memory_space<vmem>>, vector<128x384xf32>
    %cst_380 = arith.constant dense<0.000000e+00> : vector<8x384xf32>
    %2153 = tpu.matmul %2051, %2152, %cst_380 {dimension_numbers = #tpu.dot_dimension_numbers<[1], [0], [0], [1], [0, 0, 1, 1], [], []>} : vector<8x128xf32>, vector<128x384xf32>, vector<8x384xf32> -> vector<8x384xf32>
    %2154 = arith.addf %2151, %2153 : vector<8x384xf32>
    %c256 = arith.constant 256 : index
    %c0_381 = arith.constant 0 : index
    %2155 = vector.load %arg4[%c256, %c0_381] : memref<384x384xf32, #tpu.memory_space<vmem>>, vector<128x384xf32>
    %cst_382 = arith.constant dense<0.000000e+00> : vector<8x384xf32>
    %2156 = tpu.matmul %2149, %2155, %cst_382 {dimension_numbers = #tpu.dot_dimension_numbers<[1], [0], [0], [1], [0, 0, 1, 1], [], []>} : vector<8x128xf32>, vector<128x384xf32>, vector<8x384xf32> -> vector<8x384xf32>
    %2157 = arith.addf %2154, %2156 : vector<8x384xf32>
    %cst_383 = arith.constant 0.000000e+00 : f32
    %2158 = vector.broadcast %cst_383 : f32 to vector<8x384xf32>
    %2159 = arith.subf %2158, %38 : vector<8x384xf32>
    %2160 = arith.maximumf %2159, %2157 : vector<8x384xf32>
    %2161 = arith.minimumf %38, %2160 : vector<8x384xf32>
    %c0_384 = arith.constant 0 : index
    %c128_385 = arith.constant 128 : index
    %2162 = vector.load %arg2[%c0_384, %c128_385] : memref<384x1280xbf16, #tpu.memory_space<vmem>>, vector<384x384xbf16>
    %2163 = arith.truncf %2161 : vector<8x384xf32> to vector<8x384xbf16>
    %cst_386 = arith.constant dense<0.000000e+00> : vector<8x384xf32>
    %2164 = tpu.matmul %2163, %2162, %cst_386 {dimension_numbers = #tpu.dot_dimension_numbers<[1], [0], [0], [1], [0, 0, 1, 1], [], []>} : vector<8x384xbf16>, vector<384x384xbf16>, vector<8x384xf32> -> vector<8x384xf32>
    %2165 = arith.subf %2161, %2164 : vector<8x384xf32>
    %2166 = arith.addf %2165, %46 : vector<8x384xf32>
    %2167 = vector.broadcast %22 : vector<8x1xf32> to vector<8x384xf32>
    %2168 = arith.mulf %2166, %2167 : vector<8x384xf32>
    %2169 = vector.broadcast %11 : vector<8x1xf32> to vector<8x384xf32>
    %2170 = arith.addf %2168, %2169 : vector<8x384xf32>
    %c0_387 = arith.constant 0 : index
    %c0_388 = arith.constant 0 : index
    %2171 = vector.load %arg13[%c0_387, %c0_388] : memref<8x384xf32, #tpu.memory_space<vmem>>, vector<8x384xf32>
    tpu.vector_store %arg13[%c0_387, %c0_388], %2170 {strides = array<i32>} : memref<8x384xf32, #tpu.memory_space<vmem>>, vector<8x384xf32>,
    return
  }
  func.func @transform_0(%arg0: i32) -> (i32, i32) {
    %c0_i32 = arith.constant 0 : i32
    %c0_i32_0 = arith.constant 0 : i32
    return %arg0, %c0_i32 : i32, i32
  }
  func.func @transform_1(%arg0: i32) -> (i32, i32) {
    %c0_i32 = arith.constant 0 : i32
    %c0_i32_0 = arith.constant 0 : i32
    %c0_i32_1 = arith.constant 0 : i32
    return %c0_i32, %c0_i32_0 : i32, i32
  }
  func.func @transform_2(%arg0: i32) -> (i32, i32) {
    %c0_i32 = arith.constant 0 : i32
    %c0_i32_0 = arith.constant 0 : i32
    %c0_i32_1 = arith.constant 0 : i32
    return %c0_i32, %c0_i32_0 : i32, i32
  }
  func.func @transform_3(%arg0: i32) -> (i32, i32) {
    %c0_i32 = arith.constant 0 : i32
    %c0_i32_0 = arith.constant 0 : i32
    %c0_i32_1 = arith.constant 0 : i32
    return %c0_i32, %c0_i32_0 : i32, i32
  }
  func.func @transform_4(%arg0: i32) -> i32 {
    %c0_i32 = arith.constant 0 : i32
    %c0_i32_0 = arith.constant 0 : i32
    return %c0_i32 : i32
  }
  func.func @transform_5(%arg0: i32) -> i32 {
    %c0_i32 = arith.constant 0 : i32
    %c0_i32_0 = arith.constant 0 : i32
    return %c0_i32 : i32
  }
  func.func @transform_6(%arg0: i32) -> i32 {
    %c0_i32 = arith.constant 0 : i32
    %c0_i32_0 = arith.constant 0 : i32
    return %c0_i32 : i32
  }
  func.func @transform_7(%arg0: i32) -> i32 {
    %c0_i32 = arith.constant 0 : i32
    %c0_i32_0 = arith.constant 0 : i32
    return %c0_i32 : i32
  }
  func.func @transform_8(%arg0: i32) -> i32 {
    %c0_i32 = arith.constant 0 : i32
    %c0_i32_0 = arith.constant 0 : i32
    return %c0_i32 : i32
  }
  func.func @transform_9(%arg0: i32) -> i32 {
    %c0_i32 = arith.constant 0 : i32
    %c0_i32_0 = arith.constant 0 : i32
    return %c0_i32 : i32
  }
  func.func @transform_10(%arg0: i32) -> i32 {
    %c0_i32 = arith.constant 0 : i32
    %c0_i32_0 = arith.constant 0 : i32
    return %c0_i32 : i32
  }
  func.func @transform_11(%arg0: i32) -> i32 {
    %c0_i32 = arith.constant 0 : i32
    %c0_i32_0 = arith.constant 0 : i32
    return %c0_i32 : i32
  }
  func.func @transform_12(%arg0: i32) -> (i32, i32) {
    %c0_i32 = arith.constant 0 : i32
    %c0_i32_0 = arith.constant 0 : i32
    return %arg0, %c0_i32 : i32, i32
  }
}

</mosaic_0001>

<bundles_post_ra>
// kernel: tpu_custom_call.1
= control target key start
LH: loop header
LB: loop body
LE: loop exit
PB: predicated region body
PF: predicated region fallthrough
CT: control target
= control target key end

     0   :  { %s11188_s0 = inlined_call_operand.hbm [shape: f32[8,384], index: 0, kind: input, shape index: {}]   ;;  %s11189_s1 = inlined_call_operand.hbm [shape: bf16[384,1280], index: 1, kind: input, shape index: {}]   ;;  %s11190_s2 = inlined_call_operand.vmem [shape: f32[2,384], index: 2, kind: input, shape index: {}]   ;;  %s11191_s3 = inlined_call_operand.hbm [shape: f32[384,384], index: 3, kind: input, shape index: {}]   ;;  %s11192_s4 = inlined_call_operand.vmem [shape: f32[24], index: 4, kind: input, shape index: {}]   ;;  %s11193_s5 = inlined_call_operand.vmem [shape: f32[8], index: 5, kind: input, shape index: {}]   ;;  %s11194_s6 = inlined_call_operand.vmem [shape: f32[192], index: 6, kind: input, shape index: {}]   ;;  %s11195_s7 = inlined_call_operand.vmem [shape: f32[8], index: 7, kind: input, shape index: {}]   ;;  %s11196_s8 = inlined_call_operand.vmem [shape: f32[192], index: 8, kind: input, shape index: {}]   ;;  %s11197_s9 = inlined_call_operand.vmem [shape: f32[8], index: 9, kind: input, shape index: {}]   ;;  %s11198_s10 = inlined_call_operand.vmem [shape: f32[72], index: 10, kind: input, shape index: {}]   ;;  %s11199_s11 = inlined_call_operand.vmem [shape: f32[3], index: 11, kind: input, shape index: {}]   ;;  %s11200_s12 = inlined_call_operand.hbm [shape: f32[8,384], index: 12, kind: output, shape index: {}]  }
   0x1   :  { %11543 = sst [smem:[#allocation180_spill]] %s11200_s12 }
   0x2   :  { %17 = vsyncpa [#allocation3], 0 }
   0x3   :  { %18 = vsyncpa [#allocation7], 0 }
   0x4   :  { %19 = vsyncpa [#allocation5], 0 }
   0x5   :  { %20 = vsyncpa [#allocation11], 0 }
   0x6   :  { %21 = vsyncpa [#allocation14], 0 }
   0x7   :  { %22 = vsyncpa [#allocation17], 0 }
   0x8   :  { %23 = vsyncpa [#allocation20], 0 }
   0x9   :  { %24 = vsyncpa [#allocation4], 0  ;;  %s7502_s21 = smov [#allocation6]   ;;  %s77_s25 = sshll.u32 %s11193_s5, 4  ;;  %s78_s25 = int_to_ptr.vmem [resolvable:$true] %s77_s25 }
   0xa   :  { %s40_s22 = sshll.u32 %s7502_s21, 4  ;;  %s7302_s28 = scalar_lea.hbm %s11189_s1, 30720  ;;  %s41_s22 = int_to_ptr.vmem [resolvable:$true] %s40_s22 }
   0xb   :  { %p7303_p0 = scmp.ne.s32.totalorder %s11189_s1, %s7302_s28  ;;  %p7306_p1 = scmp.lt.u32.totalorder %s7302_s28, %s11189_s1 }
   0xd   :  { %p7308_p2 = pnand %p7306_p1, %p7303_p0 }
   0xf   :  { %7311 = shalt.err (!%p7308_p2)
}
  0x10   :  { %s7312_s15 = scalar_lea.vmem %s41_s22, 30720  ;;  %p7317_p4 = scmp.lt.s32.totalorder %s41_s22, %s41_s22 }
  0x11   :  { %p7313_p3 = scmp.ne.s32.totalorder %s41_s22, %s7312_s15  ;;  %p7318_p5 = scmp.lt.s32.totalorder %s7312_s15, %s7312_s15 }
  0x13   :  { %p7319_p6 = por %p7318_p5, %p7317_p4 }
  0x15   :  { %p7320_p7 = pnand %p7319_p6, %p7313_p3 }
  0x17   :  { %7323 = shalt.err (!%p7320_p7)
}
  0x18   :  { %s7503_s5 = smov 640   ;;  %s7504_s16 = smov 40  }
  0x19   :  { %46 = dma.hbm_to_vmem [thread:$0]  %s11189_s1, 30720, %s41_s22, [#allocation7], %s7503_s5, %s7503_s5, %s7504_s16  }
  0x1a   :  { %s7324_s19 = scalar_lea.vmem %s78_s25, 16  ;;  %p7329_p9 = scmp.lt.s32.totalorder %s78_s25, %s78_s25 }
  0x1b   :  { %p7325_p8 = scmp.ne.s32.totalorder %s78_s25, %s7324_s19  ;;  %p7330_p10 = scmp.lt.s32.totalorder %s7324_s19, %s7324_s19 }
  0x1d   :  { %p7331_p11 = por %p7330_p10, %p7329_p9 }
  0x1f   :  { %p7332_p12 = pnand %p7331_p11, %p7325_p8 }
  0x21   :  { %7335 = shalt.err (!%p7332_p12)
}
  0x22   :  { %s7505_s20 = smov [#allocation10]   ;;  %s97_s24 = sshll.u32 %s11195_s7, 4  ;;  %s98_s24 = int_to_ptr.vmem [resolvable:$true] %s97_s24 }
  0x23   :  { %80 = dma.vmem_to_smem %s78_s25, 16, %s7505_s20, [#allocation11]  }
  0x24   :  { %s117_s28 = sshll.u32 %s11197_s9, 4  ;;  %s7336_s1 = scalar_lea.vmem %s98_s24, 16  ;;  %s118_s28 = int_to_ptr.vmem [resolvable:$true] %s117_s28 }
  0x25   :  { %p7337_p13 = scmp.ne.s32.totalorder %s98_s24, %s7336_s1  ;;  %p7341_p0 = scmp.lt.s32.totalorder %s98_s24, %s98_s24 }
  0x26   :  { %p7342_p1 = scmp.lt.s32.totalorder %s7336_s1, %s7336_s1 }
  0x28   :  { %p7343_p2 = por %p7342_p1, %p7341_p0 }
  0x2a   :  { %p7344_p3 = pnand %p7343_p2, %p7337_p13 }
  0x2c   :  { %7347 = shalt.err (!%p7344_p3)
}
  0x2d   :  { %s7506_s22 = smov [#allocation13]   ;;  %s7348_s25 = scalar_lea.vmem %s118_s28, 16 }
  0x2e   :  { %100 = dma.vmem_to_smem %s98_s24, 16, %s7506_s22, [#allocation14]  }
  0x2f   :  { %p7349_p4 = scmp.ne.s32.totalorder %s118_s28, %s7348_s25  ;;  %p7353_p5 = scmp.lt.s32.totalorder %s118_s28, %s118_s28 }
  0x30   :  { %p7354_p6 = scmp.lt.s32.totalorder %s7348_s25, %s7348_s25 }
  0x32   :  { %p7355_p7 = por %p7354_p6, %p7353_p5 }
  0x34   :  { %p7356_p8 = pnand %p7355_p7, %p7349_p4 }
  0x36   :  { %7359 = shalt.err (!%p7356_p8)
}
  0x37   :  { %s7507_s7 = smov [#allocation16]   ;;  %s7508_s9 = smov [#allocation2]  }
  0x38   :  { %120 = dma.vmem_to_smem %s118_s28, 16, %s7507_s7, [#allocation17]  }
  0x39   :  { %s31_s29 = sshll.u32 %s7508_s9, 4  ;;  %s7509_s30 = smov [#allocation8]   ;;  %s32_s29 = int_to_ptr.vmem [resolvable:$true] %s31_s29 }
  0x3a   :  { %s54_s13 = sshll.u32 %s7509_s30, 4  ;;  %s7360_s5 = scalar_lea.hbm %s11188_s0, 384  ;;  %s7610_s13 = int_to_ptr.vmem [resolvable:$true] %s54_s13 }
  0x3b   :  { %p7361_p9 = scmp.ne.s32.totalorder %s11188_s0, %s7360_s5  ;;  %p7364_p10 = scmp.lt.u32.totalorder %s7360_s5, %s11188_s0 }
  0x3d   :  { %p7366_p11 = pnand %p7364_p10, %p7361_p9 }
  0x3f   :  { %7369 = shalt.err (!%p7366_p11)
}
  0x40   :  { %s7370_s20 = scalar_lea.vmem %s32_s29, 384  ;;  %p7375_p13 = scmp.lt.s32.totalorder %s32_s29, %s32_s29 }
  0x41   :  { %p7371_p12 = scmp.ne.s32.totalorder %s32_s29, %s7370_s20  ;;  %p7376_p0 = scmp.lt.s32.totalorder %s7370_s20, %s7370_s20 }
  0x43   :  { %p7377_p1 = por %p7376_p0, %p7375_p13 }
  0x45   :  { %p7378_p2 = pnand %p7377_p1, %p7371_p12 }
  0x47   :  { %7381 = shalt.err (!%p7378_p2)
}
  0x48   :  { %34 = dma.hbm_to_vmem [thread:$0]  %s11188_s0, 384, %s32_s29, [#allocation3]  }
  0x49   :  { %s7382_s27 = scalar_lea.hbm %s11191_s3, 18432 }
  0x4a   :  { %p7383_p3 = scmp.ne.s32.totalorder %s11191_s3, %s7382_s27  ;;  %p7386_p4 = scmp.lt.u32.totalorder %s7382_s27, %s11191_s3 }
  0x4c   :  { %p7388_p5 = pnand %p7386_p4, %p7383_p3 }
  0x4e   :  { %7391 = shalt.err (!%p7388_p5)
}
  0x4f   :  { %s7392_s7 = scalar_lea.vmem %s7610_s13, 18432  ;;  %p7397_p7 = scmp.lt.s32.totalorder %s7610_s13, %s7610_s13 }
  0x50   :  { %p7393_p6 = scmp.ne.s32.totalorder %s7610_s13, %s7392_s7  ;;  %p7398_p8 = scmp.lt.s32.totalorder %s7392_s7, %s7392_s7 }
  0x52   :  { %p7399_p9 = por %p7398_p8, %p7397_p7 }
  0x54   :  { %p7400_p10 = pnand %p7399_p9, %p7393_p6 }
  0x56   :  { %7403 = shalt.err (!%p7400_p10)
}
  0x57   :  { %s7510_s0 = smov 384   ;;  %s7511_s9 = smov 24  }
  0x58   :  { %60 = dma.hbm_to_vmem [thread:$0]  %s11191_s3, 18432, %s7610_s13, [#allocation7], %s7510_s0, %s7510_s0, %s7511_s9  }
  0x59   :  { %s67_s5 = sshll.u32 %s11192_s4, 4  ;;  %s87_s18 = sshll.u32 %s11194_s6, 4  ;;  %s68_s5 = int_to_ptr.vmem [resolvable:$true] %s67_s5  ;;  %s88_s18 = int_to_ptr.vmem [resolvable:$true] %s87_s18 }
  0x5a   :  { %s7404_s19 = scalar_lea.vmem %s68_s5, 16  ;;  %p7409_p12 = scmp.lt.s32.totalorder %s68_s5, %s68_s5 }
  0x5b   :  { %p7405_p11 = scmp.ne.s32.totalorder %s68_s5, %s7404_s19  ;;  %p7410_p13 = scmp.lt.s32.totalorder %s7404_s19, %s7404_s19 }
  0x5d   :  { %p7411_p0 = por %p7410_p13, %p7409_p12 }
  0x5f   :  { %p7412_p1 = pnand %p7411_p0, %p7405_p11 }
  0x61   :  { %7415 = shalt.err (!%p7412_p1)
}
  0x62   :  { %s7512_s20 = smov [#allocation9]   ;;  %s7416_s3 = scalar_lea.vmem %s88_s18, 32 }
  0x63   :  { %70 = dma.vmem_to_smem %s68_s5, 16, %s7512_s20, [#allocation5]  }
  0x64   :  { %p7417_p2 = scmp.ne.s32.totalorder %s88_s18, %s7416_s3  ;;  %p7421_p3 = scmp.lt.s32.totalorder %s88_s18, %s88_s18 }
  0x65   :  { %p7422_p4 = scmp.lt.s32.totalorder %s7416_s3, %s7416_s3 }
  0x67   :  { %p7423_p5 = por %p7422_p4, %p7421_p3 }
  0x69   :  { %p7424_p6 = pnand %p7423_p5, %p7417_p2 }
  0x6b   :  { %7427 = shalt.err (!%p7424_p6)
}
  0x6c   :  { %s7513_s4 = smov [#allocation12]   ;;  %s107_s21 = sshll.u32 %s11196_s8, 4  ;;  %s108_s21 = int_to_ptr.vmem [resolvable:$true] %s107_s21 }
  0x6d   :  { %90 = dma.vmem_to_smem %s88_s18, 32, %s7513_s4, [#allocation11]  }
  0x6e   :  { %s127_s26 = sshll.u32 %s11198_s10, 4  ;;  %s7428_s27 = scalar_lea.vmem %s108_s21, 32  ;;  %s128_s26 = int_to_ptr.vmem [resolvable:$true] %s127_s26 }
  0x6f   :  { %p7429_p7 = scmp.ne.s32.totalorder %s108_s21, %s7428_s27  ;;  %p7433_p8 = scmp.lt.s32.totalorder %s108_s21, %s108_s21 }
  0x70   :  { %p7434_p9 = scmp.lt.s32.totalorder %s7428_s27, %s7428_s27 }
  0x72   :  { %p7435_p10 = por %p7434_p9, %p7433_p8 }
  0x74   :  { %p7436_p11 = pnand %p7435_p10, %p7429_p7 }
  0x76   :  { %7439 = shalt.err (!%p7436_p11)
}
  0x77   :  { %s7514_s28 = smov [#allocation15]   ;;  %s7440_s1 = scalar_lea.vmem %s128_s26, 16 }
  0x78   :  { %110 = dma.vmem_to_smem %s108_s21, 32, %s7514_s28, [#allocation14]  }
  0x79   :  { %p7441_p12 = scmp.ne.s32.totalorder %s128_s26, %s7440_s1  ;;  %p7445_p13 = scmp.lt.s32.totalorder %s128_s26, %s128_s26 }
  0x7a   :  { %p7446_p0 = scmp.lt.s32.totalorder %s7440_s1, %s7440_s1 }
  0x7c   :  { %p7447_p1 = por %p7446_p0, %p7445_p13 }
  0x7e   :  { %p7448_p2 = pnand %p7447_p1, %p7441_p12 }
  0x80   :  { %7451 = shalt.err (!%p7448_p2)
}
  0x81   :  { %s7515_s8 = smov [#allocation18]   ;;  %s137_s25 = sshll.u32 %s11199_s11, 4  ;;  %s138_s25 = int_to_ptr.vmem [resolvable:$true] %s137_s25 }
  0x82   :  { %130 = dma.vmem_to_smem %s128_s26, 16, %s7515_s8, [#allocation17]  }
  0x83   :  { %s7452_s7 = scalar_lea.vmem %s138_s25, 16  ;;  %p7457_p4 = scmp.lt.s32.totalorder %s138_s25, %s138_s25 }
  0x84   :  { %p7453_p3 = scmp.ne.s32.totalorder %s138_s25, %s7452_s7  ;;  %p7458_p5 = scmp.lt.s32.totalorder %s7452_s7, %s7452_s7 }
  0x86   :  { %p7459_p6 = por %p7458_p5, %p7457_p4 }
  0x88   :  { %p7460_p7 = pnand %p7459_p6, %p7453_p3 }
  0x8a   :  { %7463 = shalt.err (!%p7460_p7)
}
  0x8b   :  { %s7516_s0 = smov [#allocation19]  }
  0x8c   :  { %140 = dma.vmem_to_smem %s138_s25, 16, %s7516_s0, [#allocation20]  }
  0x8d   :  { %7486 = dma.done.wait [#allocation3], 384  }
  0x8e   :  { %7487 = vsyncadd [#allocation3], 4294966912 }
  0x8f   :  { %7488 = dma.done.wait [#allocation7], 49152  }
  0x90   :  { %7489 = vsyncadd [#allocation7], 4294918144 }
  0x91   :  { %7490 = dma.done.wait [#allocation5], 16  }
  0x92   :  { %7491 = vsyncadd [#allocation5], 4294967280 }
  0x93   :  { %7492 = dma.done.wait [#allocation11], 48  }
  0x94   :  { %7493 = vsyncadd [#allocation11], 4294967248 }
  0x95   :  { %7494 = dma.done.wait [#allocation14], 48  }
  0x96   :  { %7495 = vsyncadd [#allocation14], 4294967248 }
  0x97   :  { %7496 = dma.done.wait [#allocation17], 32  }
  0x98   :  { %7497 = vsyncadd [#allocation17], 4294967264 }
  0x99   :  { %7498 = dma.done.wait [#allocation20], 16  }
  0x9a   :  { %7499 = vsyncadd [#allocation20], 4294967280 }
  0x9b   :  { %174 = sfence }
  0x9c   :  { %v6793_v0 = vld [vmem:[#allocation6 + $0x4] ss:$40 sps:$4 sm:$0xff]   ;;  %v6797_v2 = vld [vmem:[#allocation6] ss:$40 sps:$4 sm:$0xff]   ;;  %v177_v5 = vld [vmem:[#allocation2 + $0x8] sm:$0xff]  ;;  %s11208_s11 = smov 1  }
  0x9d   :  { %v6795_v1 = vld [vmem:[#allocation6 + $0xc] ss:$40 sps:$4 sm:$0xff]   ;;  %1622 = vmatprep.subr.bf16.mxu0 %v6793_v0  ;;  %v6798_v3 = vld [vmem:[#allocation6 + $0x8] ss:$40 sps:$4 sm:$0xff]   ;;  %v7658_v6 = vld [vmem:[#allocation2 + $0x10] sm:$0xff]  ;;  %v7660_v7 = vpack.c.bf16 %v177_v5, %v177_v5  ;;  %s11201_s9 = smov 127  }
  0x9e   :  { %v7656_v4 = vld [vmem:[#allocation2] sm:$0xff]  ;;  %1704 = vmatprep.subr.bf16.mxu1 %v6795_v1  ;;  %1623 = vmatpush1.bf16.msra.mxu0 %v6797_v2  ;;  %v6799_v9 = vld [vmem:[#allocation6 + $0x54] ss:$40 sps:$4 sm:$0xff]   ;;  %v6803_v11 = vld [vmem:[#allocation6 + $0x50] ss:$40 sps:$4 sm:$0xff]   ;;  %s7749_s14 = sld [smem:[#allocation9 + $0x4]] }
  0x9f   :  { %1705 = vmatpush1.bf16.msra.mxu1 %v6798_v3  ;;  %v2032_v8 = vadd.f32 %v177_v5, %v7656_v4  ;;  %v6801_v10 = vld [vmem:[#allocation6 + $0x5c] ss:$40 sps:$4 sm:$0xff]   ;;  %1624 = vmatprep.subr.bf16.mxu0 %v6799_v9  ;;  %v6804_v13 = vld [vmem:[#allocation6 + $0x58] ss:$40 sps:$4 sm:$0xff]   ;;  %v6807_v15 = vld [vmem:[#allocation6 + $0xac] ss:$40 sps:$4 sm:$0xff]  }
  0xa0   :  { %1654 = vmatprep.mubr.bf16.mxu0 %v7660_v7  ;;  %1706 = vmatprep.subr.bf16.mxu1 %v6801_v10  ;;  %v6805_v14 = vld [vmem:[#allocation6 + $0xa4] ss:$40 sps:$4 sm:$0xff]   ;;  %v6809_v16 = vld [vmem:[#allocation6 + $0xa0] ss:$40 sps:$4 sm:$0xff]   ;;  %v6811_v18 = vld [vmem:[#allocation6 + $0xf4] ss:$40 sps:$4 sm:$0xff]  }
  0xa1   :  { %v2033_v12 = vadd.f32 %v2032_v8, %v7658_v6  ;;  %1736 = vmatprep.mubr.bf16.mxu1 %v7660_v7  ;;  %v6810_v17 = vld [vmem:[#allocation6 + $0xa8] ss:$40 sps:$4 sm:$0xff]   ;;  %v6813_v19 = vld [vmem:[#allocation6 + $0xfc] ss:$40 sps:$4 sm:$0xff]   ;;  %v6816_v21 = vld [vmem:[#allocation6 + $0xf8] ss:$40 sps:$4 sm:$0xff]  }
  0xa2   :  { %1625 = vmatpush1.bf16.msra.mxu0 %v6803_v11  ;;  %v6815_v20 = vld [vmem:[#allocation6 + $0xf0] ss:$40 sps:$4 sm:$0xff]   ;;  %v6817_v22 = vld [vmem:[#allocation6 + $0x144] ss:$40 sps:$4 sm:$0xff]   ;;  %v6821_v24 = vld [vmem:[#allocation6 + $0x140] ss:$40 sps:$4 sm:$0xff]   ;;  %v7668_v11 = vpack.c.bf16 %v7656_v4, %v7656_v4 }
  0xa3   :  { %2034 = vadd.xlane.f32.xlu0 %v2033_v12  ;;  %1707 = vmatpush1.bf16.msra.mxu1 %v6804_v13  ;;  %v6819_v23 = vld [vmem:[#allocation6 + $0x14c] ss:$40 sps:$4 sm:$0xff]   ;;  %v6822_v25 = vld [vmem:[#allocation6 + $0x148] ss:$40 sps:$4 sm:$0xff]   ;;  %v6825_v27 = vld [vmem:[#allocation6 + $0x19c] ss:$40 sps:$4 sm:$0xff]  }
  0xa4   :  { %1626 = vmatprep.subr.bf16.mxu0 %v6805_v14  ;;  %1708 = vmatprep.subr.bf16.mxu1 %v6807_v15  ;;  %v6823_v26 = vld [vmem:[#allocation6 + $0x194] ss:$40 sps:$4 sm:$0xff]   ;;  %v6827_v28 = vld [vmem:[#allocation6 + $0x190] ss:$40 sps:$4 sm:$0xff]   ;;  %v6829_v30 = vld [vmem:[#allocation6 + $0x1e4] ss:$40 sps:$4 sm:$0xff]  }
  0xa5   :  { %v6828_v29 = vld [vmem:[#allocation6 + $0x198] ss:$40 sps:$4 sm:$0xff]   ;;  %v6831_v31 = vld [vmem:[#allocation6 + $0x1ec] ss:$40 sps:$4 sm:$0xff]   ;;  %v6834_v33 = vld [vmem:[#allocation6 + $0x1e8] ss:$40 sps:$4 sm:$0xff]  }
  0xa6   :  { %1627 = vmatpush1.bf16.msra.mxu0 %v6809_v16  ;;  %v6833_v32 = vld [vmem:[#allocation6 + $0x1e0] ss:$40 sps:$4 sm:$0xff]   ;;  %v6835_v34 = vld [vmem:[#allocation6 + $0x234] ss:$40 sps:$4 sm:$0xff]   ;;  %v6839_v36 = vld [vmem:[#allocation6 + $0x230] ss:$40 sps:$4 sm:$0xff]  }
  0xa7   :  { %1709 = vmatpush1.bf16.msra.mxu1 %v6810_v17  ;;  %1628 = vmatprep.subr.bf16.mxu0 %v6811_v18  ;;  %v6837_v35 = vld [vmem:[#allocation6 + $0x23c] ss:$40 sps:$4 sm:$0xff]   ;;  %v6840_v37 = vld [vmem:[#allocation6 + $0x238] ss:$40 sps:$4 sm:$0xff]   ;;  %v6843_v39 = vld [vmem:[#allocation6 + $0x28c] ss:$40 sps:$4 sm:$0xff]  }
  0xa8   :  { %1710 = vmatprep.subr.bf16.mxu1 %v6813_v19  ;;  %v6841_v38 = vld [vmem:[#allocation6 + $0x284] ss:$40 sps:$4 sm:$0xff]   ;;  %v6845_v40 = vld [vmem:[#allocation6 + $0x280] ss:$40 sps:$4 sm:$0xff]   ;;  %v6847_v42 = vld [vmem:[#allocation6 + $0x2d4] ss:$40 sps:$4 sm:$0xff]  }
  0xa9   :  { %v6846_v41 = vld [vmem:[#allocation6 + $0x288] ss:$40 sps:$4 sm:$0xff]   ;;  %v6849_v43 = vld [vmem:[#allocation6 + $0x2dc] ss:$40 sps:$4 sm:$0xff]   ;;  %v6852_v45 = vld [vmem:[#allocation6 + $0x2d8] ss:$40 sps:$4 sm:$0xff]  }
  0xaa   :  { %1629 = vmatpush1.bf16.msra.mxu0 %v6815_v20  ;;  %v6851_v44 = vld [vmem:[#allocation6 + $0x2d0] ss:$40 sps:$4 sm:$0xff]   ;;  %v6853_v46 = vld [vmem:[#allocation6 + $0x324] ss:$40 sps:$4 sm:$0xff]   ;;  %v6857_v48 = vld [vmem:[#allocation6 + $0x320] ss:$40 sps:$4 sm:$0xff]  }
  0xab   :  { %1711 = vmatpush1.bf16.msra.mxu1 %v6816_v21  ;;  %1630 = vmatprep.subr.bf16.mxu0 %v6817_v22  ;;  %v6855_v47 = vld [vmem:[#allocation6 + $0x32c] ss:$40 sps:$4 sm:$0xff]   ;;  %v6858_v49 = vld [vmem:[#allocation6 + $0x328] ss:$40 sps:$4 sm:$0xff]   ;;  %v6861_v51 = vld [vmem:[#allocation6 + $0x37c] ss:$40 sps:$4 sm:$0xff]  }
  0xac   :  { %1712 = vmatprep.subr.bf16.mxu1 %v6819_v23  ;;  %v6859_v50 = vld [vmem:[#allocation6 + $0x374] ss:$40 sps:$4 sm:$0xff]   ;;  %v6863_v52 = vld [vmem:[#allocation6 + $0x370] ss:$40 sps:$4 sm:$0xff]   ;;  %v6865_v54 = vld [vmem:[#allocation6 + $0x3c4] ss:$40 sps:$4 sm:$0xff]  }
  0xad   :  { %v6864_v53 = vld [vmem:[#allocation6 + $0x378] ss:$40 sps:$4 sm:$0xff]   ;;  %v6867_v55 = vld [vmem:[#allocation6 + $0x3cc] ss:$40 sps:$4 sm:$0xff]   ;;  %v6870_v57 = vld [vmem:[#allocation6 + $0x3c8] ss:$40 sps:$4 sm:$0xff]  }
  0xae   :  { %1631 = vmatpush1.bf16.msra.mxu0 %v6821_v24  ;;  %v6869_v56 = vld [vmem:[#allocation6 + $0x3c0] ss:$40 sps:$4 sm:$0xff]   ;;  %v6871_v58 = vld [vmem:[#allocation6 + $0x414] ss:$40 sps:$4 sm:$0xff]   ;;  %v6875_v60 = vld [vmem:[#allocation6 + $0x410] ss:$40 sps:$4 sm:$0xff]  }
  0xaf   :  { %1713 = vmatpush1.bf16.msra.mxu1 %v6822_v25  ;;  %1632 = vmatprep.subr.bf16.mxu0 %v6823_v26  ;;  %v6873_v59 = vld [vmem:[#allocation6 + $0x41c] ss:$40 sps:$4 sm:$0xff]   ;;  %v6876_v61 = vld [vmem:[#allocation6 + $0x418] ss:$40 sps:$4 sm:$0xff]   ;;  %v6879_v63 = vld [vmem:[#allocation6 + $0x46c] ss:$40 sps:$4 sm:$0xff]  }
  0xb0   :  { %1714 = vmatprep.subr.bf16.mxu1 %v6825_v27  ;;  %v6877_v62 = vld [vmem:[#allocation6 + $0x464] ss:$40 sps:$4 sm:$0xff]   ;;  %v6881_v0 = vld [vmem:[#allocation6 + $0x460] ss:$40 sps:$4 sm:$0xff]   ;;  %v6883_v2 = vld [vmem:[#allocation6 + $0x4b4] ss:$40 sps:$4 sm:$0xff]  }
  0xb1   :  { %v6882_v1 = vld [vmem:[#allocation6 + $0x468] ss:$40 sps:$4 sm:$0xff]   ;;  %v6885_v3 = vld [vmem:[#allocation6 + $0x4bc] ss:$40 sps:$4 sm:$0xff]   ;;  %v6888_v8 = vld [vmem:[#allocation6 + $0x4b8] ss:$40 sps:$4 sm:$0xff]  }
  0xb2   :  { %1633 = vmatpush1.bf16.msra.mxu0 %v6827_v28  ;;  %v6887_v5 = vld [vmem:[#allocation6 + $0x4b0] ss:$40 sps:$4 sm:$0xff]   ;;  %v6891_v9 = vld [vmem:[#allocation6 + $0x504] ss:$40 sps:$4 sm:$0xff]   ;;  %v6889_v12 = vld [vmem:[#allocation6 + $0x500] ss:$40 sps:$4 sm:$0xff]  }
  0xb3   :  { %1715 = vmatpush1.bf16.msra.mxu1 %v6828_v29  ;;  %1634 = vmatprep.subr.bf16.mxu0 %v6829_v30  ;;  %v6894_v10 = vld [vmem:[#allocation6 + $0x50c] ss:$40 sps:$4 sm:$0xff]   ;;  %v6892_v13 = vld [vmem:[#allocation6 + $0x508] ss:$40 sps:$4 sm:$0xff]   ;;  %v6900_v15 = vld [vmem:[#allocation6 + $0x55c] ss:$40 sps:$4 sm:$0xff]  }
  0xb4   :  { %1716 = vmatprep.subr.bf16.mxu1 %v6831_v31  ;;  %v6897_v14 = vld [vmem:[#allocation6 + $0x554] ss:$40 sps:$4 sm:$0xff]   ;;  %v6895_v16 = vld [vmem:[#allocation6 + $0x550] ss:$40 sps:$4 sm:$0xff]   ;;  %v6903_v18 = vld [vmem:[#allocation6 + $0x5a4] ss:$40 sps:$4 sm:$0xff]  }
  0xb5   :  { %v6898_v17 = vld [vmem:[#allocation6 + $0x558] ss:$40 sps:$4 sm:$0xff]   ;;  %v6906_v4 = vld [vmem:[#allocation6 + $0x5ac] ss:$40 sps:$4 sm:$0xff]   ;;  %v11286_v19 = vmov 0   ;;  %s7751_s15 = sld [smem:[#allocation9]] }
  0xb6   :  { %1635 = vmatpush1.bf16.msra.mxu0 %v6833_v32  ;;  %v6901_v20 = vld [vmem:[#allocation6 + $0x5a0] ss:$40 sps:$4 sm:$0xff]   ;;  %v6909_v22 = vld [vmem:[#allocation6 + $0x5f4] ss:$40 sps:$4 sm:$0xff]   ;;  %v6907_v24 = vld [vmem:[#allocation6 + $0x5f0] ss:$40 sps:$4 sm:$0xff]  }
  0xb7   :  { %1717 = vmatpush1.bf16.msra.mxu1 %v6834_v33  ;;  %1636 = vmatprep.subr.bf16.mxu0 %v6835_v34  ;;  %v6904_v21 = vld [vmem:[#allocation6 + $0x5a8] ss:$40 sps:$4 sm:$0xff]   ;;  %v6912_v23 = vld [vmem:[#allocation6 + $0x5fc] ss:$40 sps:$4 sm:$0xff]   ;;  %v6910_v25 = vld [vmem:[#allocation6 + $0x5f8] ss:$40 sps:$4 sm:$0xff]  }
  0xb8   :  { %1718 = vmatprep.subr.bf16.mxu1 %v6837_v35  ;;  %v6915_v26 = vld [vmem:[#allocation6 + $0x644] ss:$40 sps:$4 sm:$0xff]   ;;  %v6913_v28 = vld [vmem:[#allocation6 + $0x640] ss:$40 sps:$4 sm:$0xff]   ;;  %v6921_v30 = vld [vmem:[#allocation6 + $0x694] ss:$40 sps:$4 sm:$0xff]  }
  0xb9   :  { %v6918_v27 = vld [vmem:[#allocation6 + $0x64c] ss:$40 sps:$4 sm:$0xff]   ;;  %v6916_v29 = vld [vmem:[#allocation6 + $0x648] ss:$40 sps:$4 sm:$0xff]   ;;  %v6924_v31 = vld [vmem:[#allocation6 + $0x69c] ss:$40 sps:$4 sm:$0xff]  }
  0xba   :  { %1637 = vmatpush1.bf16.msra.mxu0 %v6839_v36  ;;  %v6919_v32 = vld [vmem:[#allocation6 + $0x690] ss:$40 sps:$4 sm:$0xff]   ;;  %v6927_v34 = vld [vmem:[#allocation6 + $0x6e4] ss:$40 sps:$4 sm:$0xff]   ;;  %v6925_v36 = vld [vmem:[#allocation6 + $0x6e0] ss:$40 sps:$4 sm:$0xff]  }
  0xbb   :  { %1719 = vmatpush1.bf16.msra.mxu1 %v6840_v37  ;;  %1638 = vmatprep.subr.bf16.mxu0 %v6841_v38  ;;  %v6922_v33 = vld [vmem:[#allocation6 + $0x698] ss:$40 sps:$4 sm:$0xff]   ;;  %v6930_v35 = vld [vmem:[#allocation6 + $0x6ec] ss:$40 sps:$4 sm:$0xff]   ;;  %v6928_v37 = vld [vmem:[#allocation6 + $0x6e8] ss:$40 sps:$4 sm:$0xff]  }
  0xbc   :  { %1720 = vmatprep.subr.bf16.mxu1 %v6843_v39  ;;  %v6933_v38 = vld [vmem:[#allocation6 + $0x734] ss:$40 sps:$4 sm:$0xff]   ;;  %s7753_s5 = sld [smem:[#allocation9 + $0x3]]  ;;  %s7755_s16 = sld [smem:[#allocation9 + $0x7]]  ;;  %vm7522_vm2 = vmmov 0  }
  0xbd   :  { %v6936_v39 = vld [vmem:[#allocation6 + $0x73c] ss:$40 sps:$4 sm:$0xff]   ;;  %s7757_s17 = sld [smem:[#allocation9 + $0x9]]  ;;  %s7759_s18 = sld [smem:[#allocation9 + $0xa]] }
  0xbe   :  { %1639 = vmatpush1.bf16.msra.mxu0 %v6845_v40  ;;  %v6931_v40 = vld [vmem:[#allocation6 + $0x730] ss:$40 sps:$4 sm:$0xff]   ;;  %s7761_s19 = sld [smem:[#allocation9 + $0xd]]  ;;  %s7765_s20 = sld [smem:[#allocation9 + $0x6]] }
  0xbf   :  { %1721 = vmatpush1.bf16.msra.mxu1 %v6846_v41  ;;  %1640 = vmatprep.subr.bf16.mxu0 %v6847_v42  ;;  %v6934_v41 = vld [vmem:[#allocation6 + $0x738] ss:$40 sps:$4 sm:$0xff]   ;;  %v6939_v42 = vld [vmem:[#allocation6 + $0x14] ss:$40 sps:$4 sm:$0xff]   ;;  %s7767_s3 = sld [smem:[#allocation9 + $0x10]]  ;;  %s7769_s4 = sld [smem:[#allocation9 + $0xc]] }
  0xc0   :  { %1722 = vmatprep.subr.bf16.mxu1 %v6849_v43  ;;  %v6942_v43 = vld [vmem:[#allocation6 + $0x1c] ss:$40 sps:$4 sm:$0xff]   ;;  %s7771_s6 = sld [smem:[#allocation9 + $0x2]]  ;;  %s7773_s13 = sld [smem:[#allocation9 + $0x5]] }
  0xc1   :  { %s7775_s21 = sld [smem:[#allocation9 + $0xb]]  ;;  %s7777_s23 = sld [smem:[#allocation9 + $0xf]] }
  0xc2   :  { %1641 = vmatpush1.bf16.msra.mxu0 %v6851_v44  ;;  %v7676_v44 = vpack.c.bf16 %v7658_v6, %v7658_v6  ;;  %v6954_v6 = vld [vmem:[#allocation6 + $0xbc] ss:$40 sps:$4 sm:$0xff]   ;;  %s7779_s24 = sld [smem:[#allocation9 + $0xe]]  ;;  %s7784_s26 = sld [smem:[#allocation10]] }
  0xc3   :  { %1723 = vmatpush1.bf16.msra.mxu1 %v6852_v45  ;;  %1642 = vmatprep.subr.bf16.mxu0 %v6853_v46  ;;  %v6937_v45 = vld [vmem:[#allocation6 + $0x10] ss:$40 sps:$4 sm:$0xff]   ;;  %s7788_s27 = sld [smem:[#allocation10 + $0x1]]  ;;  %s7790_s28 = sld [smem:[#allocation9 + $0x8]] }
  0xc4   :  { %1724 = vmatprep.subr.bf16.mxu1 %v6855_v47  ;;  %v6940_v46 = vld [vmem:[#allocation6 + $0x18] ss:$40 sps:$4 sm:$0xff]   ;;  %v6945_v47 = vld [vmem:[#allocation6 + $0x64] ss:$40 sps:$4 sm:$0xff]   ;;  %s7795_s1 = sld [smem:[#allocation9 + $0x13]]  ;;  %s7808_s10 = sld [smem:[#allocation9 + $0x11]] }
  0xc5   :  { %s7806_s8 = sld [smem:[#allocation10 + $0x3]]  ;;  %s7812_s22 = sld [smem:[#allocation9 + $0x12]] }
  0xc6   :  { %1643 = vmatpush1.bf16.msra.mxu0 %v6857_v48  ;;  %v6948_v48 = vld [vmem:[#allocation6 + $0x6c] ss:$40 sps:$4 sm:$0xff]   ;;  %s7825_s25 = sld [smem:[#allocation10 + $0x4]]  ;;  %s7832_s0 = sld [smem:[#allocation9 + $0x15]] }
  0xc7   :  { %1725 = vmatpush1.bf16.msra.mxu1 %v6858_v49  ;;  %1644 = vmatprep.subr.bf16.mxu0 %v6859_v50  ;;  %v6943_v49 = vld [vmem:[#allocation6 + $0x60] ss:$40 sps:$4 sm:$0xff]   ;;  %s7827_s7 = sld [smem:[#allocation9 + $0x14]]  ;;  %s7834_s29 = sld [smem:[#allocation9 + $0x16]] }
  0xc8   :  { %1726 = vmatprep.subr.bf16.mxu1 %v6861_v51  ;;  %v6946_v50 = vld [vmem:[#allocation6 + $0x68] ss:$40 sps:$4 sm:$0xff]   ;;  %v6951_v51 = vld [vmem:[#allocation6 + $0xb4] ss:$40 sps:$4 sm:$0xff]   ;;  %s7840_s30 = sld [smem:[#allocation10 + $0x2]] }
  0xc9   :  { %s7981_s12 = sld [smem:[#allocation12 + $0x82]] }
  0xca   :  { %1645 = vmatpush1.bf16.msra.mxu0 %v6863_v52  ;;  %v6949_v52 = vld [vmem:[#allocation6 + $0xb0] ss:$40 sps:$4 sm:$0xff]  }
  0xcb   :  { %1727 = vmatpush1.bf16.msra.mxu1 %v6864_v53  ;;  %1646 = vmatprep.subr.bf16.mxu0 %v6865_v54  ;;  %v6952_v53 = vld [vmem:[#allocation6 + $0xb8] ss:$40 sps:$4 sm:$0xff]   ;;  %v6957_v54 = vld [vmem:[#allocation6 + $0x104] ss:$40 sps:$4 sm:$0xff]  }
  0xcc   :  { %1728 = vmatprep.subr.bf16.mxu1 %v6867_v55  ;;  %v6960_v55 = vld [vmem:[#allocation6 + $0x10c] ss:$40 sps:$4 sm:$0xff]  }
  0xce   :  { %1647 = vmatpush1.bf16.msra.mxu0 %v6869_v56  ;;  %v6955_v56 = vld [vmem:[#allocation6 + $0x100] ss:$40 sps:$4 sm:$0xff]  }
  0xcf   :  { %1729 = vmatpush1.bf16.msra.mxu1 %v6870_v57  ;;  %1648 = vmatprep.subr.bf16.mxu0 %v6871_v58  ;;  %v6958_v57 = vld [vmem:[#allocation6 + $0x108] ss:$40 sps:$4 sm:$0xff]   ;;  %v6963_v58 = vld [vmem:[#allocation6 + $0x154] ss:$40 sps:$4 sm:$0xff]   ;;  %11582 = sst [smem:[#allocation68_spill]] %s7981_s12 }
  0xd0   :  { %1730 = vmatprep.subr.bf16.mxu1 %v6873_v59  ;;  %v6966_v59 = vld [vmem:[#allocation6 + $0x15c] ss:$40 sps:$4 sm:$0xff]   ;;  %s7999_s12 = sld [smem:[#allocation12 + $0x6d]] }
  0xd2   :  { %1649 = vmatpush1.bf16.msra.mxu0 %v6875_v60  ;;  %v6961_v60 = vld [vmem:[#allocation6 + $0x150] ss:$40 sps:$4 sm:$0xff]  }
  0xd3   :  { %1731 = vmatpush1.bf16.msra.mxu1 %v6876_v61  ;;  %1650 = vmatprep.subr.bf16.mxu0 %v6877_v62  ;;  %v6964_v61 = vld [vmem:[#allocation6 + $0x158] ss:$40 sps:$4 sm:$0xff]   ;;  %v6969_v62 = vld [vmem:[#allocation6 + $0x1a4] ss:$40 sps:$4 sm:$0xff]  }
  0xd4   :  { %1732 = vmatprep.subr.bf16.mxu1 %v6879_v63  ;;  %v6972_v63 = vld [vmem:[#allocation6 + $0x1ac] ss:$40 sps:$4 sm:$0xff]  }
  0xd6   :  { %1651 = vmatpush1.bf16.msra.mxu0 %v6881_v0  ;;  %v6967_v0 = vld [vmem:[#allocation6 + $0x1a0] ss:$40 sps:$4 sm:$0xff]   ;;  %11589 = sst [smem:[#allocation75_spill]] %s7999_s12  ;;  %s8072_s12 = sld [smem:[#allocation12 + $0x1a]] }
  0xd7   :  { %1733 = vmatpush1.bf16.msra.mxu1 %v6882_v1  ;;  %1652 = vmatprep.subr.bf16.mxu0 %v6883_v2  ;;  %v6970_v1 = vld [vmem:[#allocation6 + $0x1a8] ss:$40 sps:$4 sm:$0xff]   ;;  %v6975_v2 = vld [vmem:[#allocation6 + $0x1f4] ss:$40 sps:$4 sm:$0xff]  }
  0xd8   :  { %1734 = vmatprep.subr.bf16.mxu1 %v6885_v3  ;;  %v6978_v3 = vld [vmem:[#allocation6 + $0x1fc] ss:$40 sps:$4 sm:$0xff]  }
  0xda   :  { %1653 = vmatpush1.bf16.msra.mxu0 %v6887_v5  ;;  %v6973_v5 = vld [vmem:[#allocation6 + $0x1f0] ss:$40 sps:$4 sm:$0xff]  }
  0xdb   :  { %1735 = vmatpush1.bf16.msra.mxu1 %v6888_v8  ;;  %1663 = vmatprep.subr.bf16.mxu0 %v6891_v9  ;;  %v6976_v8 = vld [vmem:[#allocation6 + $0x1f8] ss:$40 sps:$4 sm:$0xff]   ;;  %v6981_v9 = vld [vmem:[#allocation6 + $0x244] ss:$40 sps:$4 sm:$0xff]  }
  0xdc   :  { %1745 = vmatprep.subr.bf16.mxu1 %v6894_v10  ;;  %v6984_v10 = vld [vmem:[#allocation6 + $0x24c] ss:$40 sps:$4 sm:$0xff]   ;;  %11620 = sst [smem:[#allocation106_spill]] %s8072_s12  ;;  %s8088_s12 = sld [smem:[#allocation12 + $0x18]] }
  0xdd   :  { %1655 = vmatmul.mubr.bf16.vlgmr.msra.gmra.mrb[0].mxu0 %v7668_v11 }
  0xde   :  { %1664 = vmatpush1.bf16.msra.mxu0 %v6889_v12  ;;  %1737 = vmatmul.mubr.bf16.vlgmr.msra.gmra.mrb[0].mxu1 %v7668_v11  ;;  %v6979_v12 = vld [vmem:[#allocation6 + $0x240] ss:$40 sps:$4 sm:$0xff]  }
  0xdf   :  { %1746 = vmatpush1.bf16.msra.mxu1 %v6892_v13  ;;  %1665 = vmatprep.subr.bf16.mxu0 %v6897_v14  ;;  %v6982_v13 = vld [vmem:[#allocation6 + $0x248] ss:$40 sps:$4 sm:$0xff]   ;;  %v6987_v14 = vld [vmem:[#allocation6 + $0x294] ss:$40 sps:$4 sm:$0xff]  }
  0xe0   :  { %1747 = vmatprep.subr.bf16.mxu1 %v6900_v15  ;;  %1695 = vmatprep.mubr.bf16.mxu0 %v11286_v19  ;;  %v6990_v15 = vld [vmem:[#allocation6 + $0x29c] ss:$40 sps:$4 sm:$0xff]  }
  0xe1   :  { %1777 = vmatprep.mubr.bf16.mxu1 %v11286_v19 }
  0xe2   :  { %1666 = vmatpush1.bf16.msra.mxu0 %v6895_v16  ;;  %v6985_v16 = vld [vmem:[#allocation6 + $0x290] ss:$40 sps:$4 sm:$0xff]   ;;  %11628 = sst [smem:[#allocation114_spill]] %s8088_s12  ;;  %s8246_s12 = sld [smem:[#allocation12 + $0x1e]] }
  0xe3   :  { %1748 = vmatpush1.bf16.msra.mxu1 %v6898_v17  ;;  %1667 = vmatprep.subr.bf16.mxu0 %v6903_v18  ;;  %v6988_v17 = vld [vmem:[#allocation6 + $0x298] ss:$40 sps:$4 sm:$0xff]   ;;  %v6993_v18 = vld [vmem:[#allocation6 + $0x2e4] ss:$40 sps:$4 sm:$0xff]  }
  0xe4   :  { %1749 = vmatprep.subr.bf16.mxu1 %v6906_v4  ;;  %v6996_v4 = vld [vmem:[#allocation6 + $0x2ec] ss:$40 sps:$4 sm:$0xff]  }
  0xe6   :  { %1668 = vmatpush1.bf16.msra.mxu0 %v6901_v20  ;;  %v6991_v20 = vld [vmem:[#allocation6 + $0x2e0] ss:$40 sps:$4 sm:$0xff]  }
  0xe7   :  { %1750 = vmatpush1.bf16.msra.mxu1 %v6904_v21  ;;  %1669 = vmatprep.subr.bf16.mxu0 %v6909_v22  ;;  %v6994_v21 = vld [vmem:[#allocation6 + $0x2e8] ss:$40 sps:$4 sm:$0xff]   ;;  %v6999_v22 = vld [vmem:[#allocation6 + $0x334] ss:$40 sps:$4 sm:$0xff]  }
  0xe8   :  { %1751 = vmatprep.subr.bf16.mxu1 %v6912_v23  ;;  %v7002_v23 = vld [vmem:[#allocation6 + $0x33c] ss:$40 sps:$4 sm:$0xff]  }
  0xea   :  { %1670 = vmatpush1.bf16.msra.mxu0 %v6907_v24  ;;  %v6997_v24 = vld [vmem:[#allocation6 + $0x330] ss:$40 sps:$4 sm:$0xff]  }
  0xeb   :  { %1752 = vmatpush1.bf16.msra.mxu1 %v6910_v25  ;;  %1671 = vmatprep.subr.bf16.mxu0 %v6915_v26  ;;  %v7000_v25 = vld [vmem:[#allocation6 + $0x338] ss:$40 sps:$4 sm:$0xff]   ;;  %v7005_v26 = vld [vmem:[#allocation6 + $0x384] ss:$40 sps:$4 sm:$0xff]  }
  0xec   :  { %1753 = vmatprep.subr.bf16.mxu1 %v6918_v27  ;;  %v7008_v27 = vld [vmem:[#allocation6 + $0x38c] ss:$40 sps:$4 sm:$0xff]  }
  0xee   :  { %1672 = vmatpush1.bf16.msra.mxu0 %v6913_v28  ;;  %v7003_v28 = vld [vmem:[#allocation6 + $0x380] ss:$40 sps:$4 sm:$0xff]  }
  0xef   :  { %1754 = vmatpush1.bf16.msra.mxu1 %v6916_v29  ;;  %1673 = vmatprep.subr.bf16.mxu0 %v6921_v30  ;;  %v7006_v29 = vld [vmem:[#allocation6 + $0x388] ss:$40 sps:$4 sm:$0xff]   ;;  %v7011_v30 = vld [vmem:[#allocation6 + $0x3d4] ss:$40 sps:$4 sm:$0xff]  }
  0xf0   :  { %1755 = vmatprep.subr.bf16.mxu1 %v6924_v31  ;;  %v7014_v31 = vld [vmem:[#allocation6 + $0x3dc] ss:$40 sps:$4 sm:$0xff]  }
  0xf2   :  { %1674 = vmatpush1.bf16.msra.mxu0 %v6919_v32  ;;  %v7009_v32 = vld [vmem:[#allocation6 + $0x3d0] ss:$40 sps:$4 sm:$0xff]  }
  0xf3   :  { %1756 = vmatpush1.bf16.msra.mxu1 %v6922_v33  ;;  %1675 = vmatprep.subr.bf16.mxu0 %v6927_v34  ;;  %v7012_v33 = vld [vmem:[#allocation6 + $0x3d8] ss:$40 sps:$4 sm:$0xff]   ;;  %v7017_v34 = vld [vmem:[#allocation6 + $0x424] ss:$40 sps:$4 sm:$0xff]  }
  0xf4   :  { %1757 = vmatprep.subr.bf16.mxu1 %v6930_v35  ;;  %v7020_v35 = vld [vmem:[#allocation6 + $0x42c] ss:$40 sps:$4 sm:$0xff]  }
  0xf6   :  { %1676 = vmatpush1.bf16.msra.mxu0 %v6925_v36  ;;  %v7015_v36 = vld [vmem:[#allocation6 + $0x420] ss:$40 sps:$4 sm:$0xff]  }
  0xf7   :  { %1758 = vmatpush1.bf16.msra.mxu1 %v6928_v37  ;;  %1677 = vmatprep.subr.bf16.mxu0 %v6933_v38  ;;  %v7018_v37 = vld [vmem:[#allocation6 + $0x428] ss:$40 sps:$4 sm:$0xff]  }
  0xf8   :  { %1759 = vmatprep.subr.bf16.mxu1 %v6936_v39  ;;  %v7023_v39 = vld [vmem:[#allocation6 + $0x474] ss:$40 sps:$4 sm:$0xff]  }
  0xfa   :  { %1678 = vmatpush1.bf16.msra.mxu0 %v6931_v40 }
  0xfb   :  { %1760 = vmatpush1.bf16.msra.mxu1 %v6934_v41  ;;  %1786 = vmatprep.subr.bf16.mxu0 %v6939_v42  ;;  %v7026_v41 = vld [vmem:[#allocation6 + $0x47c] ss:$40 sps:$4 sm:$0xff]   ;;  %v7021_v42 = vld [vmem:[#allocation6 + $0x470] ss:$40 sps:$4 sm:$0xff]  }
  0xfc   :  { %1868 = vmatprep.subr.bf16.mxu1 %v6942_v43  ;;  %v7024_v43 = vld [vmem:[#allocation6 + $0x478] ss:$40 sps:$4 sm:$0xff]  }
  0xfd   :  { %1696 = vmatmul.mubr.bf16.vlgmr.msra.gmra.mrb[0].mxu0 %v7676_v44 }
  0xfe   :  { %1778 = vmatmul.mubr.bf16.vlgmr.msra.gmra.mrb[0].mxu1 %v7676_v44  ;;  %1787 = vmatpush1.bf16.msra.mxu0 %v6937_v45  ;;  %v7299_v45 = vld [vmem:[#allocation2] sm:$0xff] }
  0xff   :  { %1869 = vmatpush1.bf16.msra.mxu1 %v6940_v46  ;;  %1788 = vmatprep.subr.bf16.mxu0 %v6945_v47  ;;  %v7300_v47 = vld [vmem:[#allocation2 + $0x8] sm:$0xff] }
 0x100   :  { %1870 = vmatprep.subr.bf16.mxu1 %v6948_v48  ;;  %1818 = vmatprep.mubr.bf16.mxu0 %v7660_v7 }
 0x101   :  { %1900 = vmatprep.mubr.bf16.mxu1 %v7660_v7 }
 0x102   :  { %1789 = vmatpush1.bf16.msra.mxu0 %v6943_v49  ;;  %v7301_v49 = vld [vmem:[#allocation2 + $0x10] sm:$0xff] }
 0x103   :  { %1871 = vmatpush1.bf16.msra.mxu1 %v6946_v50  ;;  %1790 = vmatprep.subr.bf16.mxu0 %v6951_v51  ;;  %v7029_v51 = vld [vmem:[#allocation6 + $0x4c4] ss:$40 sps:$4 sm:$0xff]  }
 0x104   :  { %1872 = vmatprep.subr.bf16.mxu1 %v6954_v6 }
 0x106   :  { %1791 = vmatpush1.bf16.msra.mxu0 %v6949_v52 }
 0x107   :  { %1873 = vmatpush1.bf16.msra.mxu1 %v6952_v53  ;;  %1792 = vmatprep.subr.bf16.mxu0 %v6957_v54  ;;  %v7032_v53 = vld [vmem:[#allocation6 + $0x4cc] ss:$40 sps:$4 sm:$0xff]  }
 0x108   :  { %1874 = vmatprep.subr.bf16.mxu1 %v6960_v55 }
 0x10a   :  { %1793 = vmatpush1.bf16.msra.mxu0 %v6955_v56  ;;  %v7027_v56 = vld [vmem:[#allocation6 + $0x4c0] ss:$40 sps:$4 sm:$0xff]  }
 0x10b   :  { %1875 = vmatpush1.bf16.msra.mxu1 %v6958_v57  ;;  %1794 = vmatprep.subr.bf16.mxu0 %v6963_v58  ;;  %v7030_v57 = vld [vmem:[#allocation6 + $0x4c8] ss:$40 sps:$4 sm:$0xff]   ;;  %v7035_v58 = vld [vmem:[#allocation6 + $0x514] ss:$40 sps:$4 sm:$0xff]  }
 0x10c   :  { %1876 = vmatprep.subr.bf16.mxu1 %v6966_v59 }
 0x10e   :  { %1795 = vmatpush1.bf16.msra.mxu0 %v6961_v60  ;;  %v7038_v60 = vld [vmem:[#allocation6 + $0x51c] ss:$40 sps:$4 sm:$0xff]  }
 0x10f   :  { %1877 = vmatpush1.bf16.msra.mxu1 %v6964_v61  ;;  %1796 = vmatprep.subr.bf16.mxu0 %v6969_v62  ;;  %v7033_v61 = vld [vmem:[#allocation6 + $0x510] ss:$40 sps:$4 sm:$0xff]  }
 0x110   :  { %1878 = vmatprep.subr.bf16.mxu1 %v6972_v63  ;;  %v7036_v62 = vld [vmem:[#allocation6 + $0x518] ss:$40 sps:$4 sm:$0xff]   ;;  %v7041_v63 = vld [vmem:[#allocation6 + $0x564] ss:$40 sps:$4 sm:$0xff]  }
 0x112   :  { %1797 = vmatpush1.bf16.msra.mxu0 %v6967_v0  ;;  %v7044_v0 = vld [vmem:[#allocation6 + $0x56c] ss:$40 sps:$4 sm:$0xff]  }
 0x113   :  { %1879 = vmatpush1.bf16.msra.mxu1 %v6970_v1  ;;  %1798 = vmatprep.subr.bf16.mxu0 %v6975_v2  ;;  %v7039_v1 = vld [vmem:[#allocation6 + $0x560] ss:$40 sps:$4 sm:$0xff]  }
 0x114   :  { %1880 = vmatprep.subr.bf16.mxu1 %v6978_v3  ;;  %v7042_v2 = vld [vmem:[#allocation6 + $0x568] ss:$40 sps:$4 sm:$0xff]   ;;  %v7047_v3 = vld [vmem:[#allocation6 + $0x5b4] ss:$40 sps:$4 sm:$0xff]  }
 0x116   :  { %1799 = vmatpush1.bf16.msra.mxu0 %v6973_v5  ;;  %v7050_v5 = vld [vmem:[#allocation6 + $0x5bc] ss:$40 sps:$4 sm:$0xff]  }
 0x117   :  { %1881 = vmatpush1.bf16.msra.mxu1 %v6976_v8  ;;  %1800 = vmatprep.subr.bf16.mxu0 %v6981_v9  ;;  %v7045_v8 = vld [vmem:[#allocation6 + $0x5b0] ss:$40 sps:$4 sm:$0xff]  }
 0x118   :  { %1882 = vmatprep.subr.bf16.mxu1 %v6984_v10  ;;  %v7048_v9 = vld [vmem:[#allocation6 + $0x5b8] ss:$40 sps:$4 sm:$0xff]   ;;  %v7053_v10 = vld [vmem:[#allocation6 + $0x604] ss:$40 sps:$4 sm:$0xff]  }
 0x11a   :  { %1801 = vmatpush1.bf16.msra.mxu0 %v6979_v12  ;;  %v7056_v12 = vld [vmem:[#allocation6 + $0x60c] ss:$40 sps:$4 sm:$0xff]  }
 0x11b   :  { %1883 = vmatpush1.bf16.msra.mxu1 %v6982_v13  ;;  %1802 = vmatprep.subr.bf16.mxu0 %v6987_v14  ;;  %v7051_v13 = vld [vmem:[#allocation6 + $0x600] ss:$40 sps:$4 sm:$0xff]  }
 0x11c   :  { %1884 = vmatprep.subr.bf16.mxu1 %v6990_v15  ;;  %v7054_v14 = vld [vmem:[#allocation6 + $0x608] ss:$40 sps:$4 sm:$0xff]   ;;  %v7059_v15 = vld [vmem:[#allocation6 + $0x654] ss:$40 sps:$4 sm:$0xff]  }
 0x11e   :  { %1803 = vmatpush1.bf16.msra.mxu0 %v6985_v16  ;;  %v7062_v16 = vld [vmem:[#allocation6 + $0x65c] ss:$40 sps:$4 sm:$0xff]  }
 0x11f   :  { %1885 = vmatpush1.bf16.msra.mxu1 %v6988_v17  ;;  %1804 = vmatprep.subr.bf16.mxu0 %v6993_v18  ;;  %v7057_v17 = vld [vmem:[#allocation6 + $0x650] ss:$40 sps:$4 sm:$0xff]  }
 0x120   :  { %1886 = vmatprep.subr.bf16.mxu1 %v6996_v4  ;;  %v7060_v18 = vld [vmem:[#allocation6 + $0x658] ss:$40 sps:$4 sm:$0xff]   ;;  %v7065_v4 = vld [vmem:[#allocation6 + $0x6a4] ss:$40 sps:$4 sm:$0xff]  }
 0x122   :  { %1805 = vmatpush1.bf16.msra.mxu0 %v6991_v20  ;;  %v7068_v20 = vld [vmem:[#allocation6 + $0x6ac] ss:$40 sps:$4 sm:$0xff]  }
 0x123   :  { %1887 = vmatpush1.bf16.msra.mxu1 %v6994_v21  ;;  %1806 = vmatprep.subr.bf16.mxu0 %v6999_v22  ;;  %v7063_v21 = vld [vmem:[#allocation6 + $0x6a0] ss:$40 sps:$4 sm:$0xff]  }
 0x124   :  { %1888 = vmatprep.subr.bf16.mxu1 %v7002_v23  ;;  %v7066_v22 = vld [vmem:[#allocation6 + $0x6a8] ss:$40 sps:$4 sm:$0xff]   ;;  %v7071_v23 = vld [vmem:[#allocation6 + $0x6f4] ss:$40 sps:$4 sm:$0xff]  }
 0x126   :  { %1807 = vmatpush1.bf16.msra.mxu0 %v6997_v24  ;;  %v7074_v24 = vld [vmem:[#allocation6 + $0x6fc] ss:$40 sps:$4 sm:$0xff]  }
 0x127   :  { %1889 = vmatpush1.bf16.msra.mxu1 %v7000_v25  ;;  %1808 = vmatprep.subr.bf16.mxu0 %v7005_v26  ;;  %v7069_v25 = vld [vmem:[#allocation6 + $0x6f0] ss:$40 sps:$4 sm:$0xff]  }
 0x128   :  { %1890 = vmatprep.subr.bf16.mxu1 %v7008_v27  ;;  %v7072_v26 = vld [vmem:[#allocation6 + $0x6f8] ss:$40 sps:$4 sm:$0xff]   ;;  %v7077_v27 = vld [vmem:[#allocation6 + $0x744] ss:$40 sps:$4 sm:$0xff]  }
 0x12a   :  { %1809 = vmatpush1.bf16.msra.mxu0 %v7003_v28  ;;  %v7080_v28 = vld [vmem:[#allocation6 + $0x74c] ss:$40 sps:$4 sm:$0xff]  }
 0x12b   :  { %1891 = vmatpush1.bf16.msra.mxu1 %v7006_v29  ;;  %1810 = vmatprep.subr.bf16.mxu0 %v7011_v30  ;;  %v7075_v29 = vld [vmem:[#allocation6 + $0x740] ss:$40 sps:$4 sm:$0xff]  }
 0x12c   :  { %1892 = vmatprep.subr.bf16.mxu1 %v7014_v31  ;;  %v7078_v30 = vld [vmem:[#allocation6 + $0x748] ss:$40 sps:$4 sm:$0xff]   ;;  %v7083_v31 = vld [vmem:[#allocation6 + $0x24] ss:$40 sps:$4 sm:$0xff]  }
 0x12e   :  { %1811 = vmatpush1.bf16.msra.mxu0 %v7009_v32  ;;  %v7081_v32 = vld [vmem:[#allocation6 + $0x20] ss:$40 sps:$4 sm:$0xff]  }
 0x12f   :  { %1893 = vmatpush1.bf16.msra.mxu1 %v7012_v33  ;;  %1812 = vmatprep.subr.bf16.mxu0 %v7017_v34  ;;  %v7086_v33 = vld [vmem:[#allocation6 + $0x74] ss:$40 sps:$4 sm:$0xff]   ;;  %v7084_v34 = vld [vmem:[#allocation6 + $0x70] ss:$40 sps:$4 sm:$0xff]  }
 0x130   :  { %v2035_v38 = vpop.xlane.xlu0 %2034  ;;  %1894 = vmatprep.subr.bf16.mxu1 %v7020_v35  ;;  %v7089_v35 = vld [vmem:[#allocation6 + $0xc4] ss:$40 sps:$4 sm:$0xff]  }
 0x131   :  { %v7682_v40 = vmul.f32 0.0026041667, %v2035_v38  ;;  %v7090_v38 = vld [vmem:[#allocation6 + $0x110] ss:$40 sps:$4 sm:$0xff]  }
 0x132   :  { %1813 = vmatpush1.bf16.msra.mxu0 %v7015_v36  ;;  %v7087_v36 = vld [vmem:[#allocation6 + $0xc0] ss:$40 sps:$4 sm:$0xff]  }
 0x133   :  { %11544 = vst [vmem:[#allocation30_spill] sm:$0xff] %v7682_v40  ;;  %v2038_v46 = vsub.f32 %v7299_v45, %v7682_v40  ;;  %v2039_v48 = vsub.f32 %v7300_v47, %v7682_v40  ;;  %v2040_v50 = vsub.f32 %v7301_v49, %v7682_v40  ;;  %1895 = vmatpush1.bf16.msra.mxu1 %v7018_v37  ;;  %v7092_v37 = vld [vmem:[#allocation6 + $0x114] ss:$40 sps:$4 sm:$0xff]   ;;  %v7101_v45 = vld [vmem:[#allocation6 + $0x204] ss:$40 sps:$4 sm:$0xff]  }
 0x134   :  { %1814 = vmatprep.subr.bf16.mxu0 %v7023_v39  ;;  %1896 = vmatprep.subr.bf16.mxu1 %v7026_v41  ;;  %v7095_v39 = vld [vmem:[#allocation6 + $0x164] ss:$40 sps:$4 sm:$0xff]   ;;  %v7093_v41 = vld [vmem:[#allocation6 + $0x160] ss:$40 sps:$4 sm:$0xff]   ;;  %v7102_v47 = vld [vmem:[#allocation6 + $0x250] ss:$40 sps:$4 sm:$0xff]  }
 0x135   :  { %v2041_v6 = vmul.f32 %v2038_v46, %v2038_v46  ;;  %v2042_v52 = vmul.f32 %v2039_v48, %v2039_v48  ;;  %v2043_v54 = vmul.f32 %v2040_v50, %v2040_v50  ;;  %v7099_v46 = vld [vmem:[#allocation6 + $0x200] ss:$40 sps:$4 sm:$0xff]   ;;  %v7107_v48 = vld [vmem:[#allocation6 + $0x2a4] ss:$40 sps:$4 sm:$0xff]   ;;  %v7110_v50 = vld [vmem:[#allocation6 + $0x2f4] ss:$40 sps:$4 sm:$0xff]  }
 0x136   :  { %1815 = vmatpush1.bf16.msra.mxu0 %v7021_v42  ;;  %v7098_v42 = vld [vmem:[#allocation6 + $0x1b4] ss:$40 sps:$4 sm:$0xff]   ;;  %v7105_v49 = vld [vmem:[#allocation6 + $0x2a0] ss:$40 sps:$4 sm:$0xff]  }
 0x137   :  { %v2044_v55 = vadd.f32 %v2042_v52, %v2041_v6  ;;  %1897 = vmatpush1.bf16.msra.mxu1 %v7024_v43  ;;  %1816 = vmatprep.subr.bf16.mxu0 %v7029_v51  ;;  %v7096_v43 = vld [vmem:[#allocation6 + $0x1b0] ss:$40 sps:$4 sm:$0xff]   ;;  %v7113_v6 = vld [vmem:[#allocation6 + $0x344] ss:$40 sps:$4 sm:$0xff]   ;;  %v7111_v52 = vld [vmem:[#allocation6 + $0x340] ss:$40 sps:$4 sm:$0xff]  }
 0x138   :  { %1898 = vmatprep.subr.bf16.mxu1 %v7032_v53  ;;  %v7108_v51 = vld [vmem:[#allocation6 + $0x2f0] ss:$40 sps:$4 sm:$0xff]   ;;  %v7116_v53 = vld [vmem:[#allocation6 + $0x394] ss:$40 sps:$4 sm:$0xff]  }
 0x139   :  { %v2045_v59 = vadd.f32 %v2044_v55, %v2043_v54  ;;  %v7114_v54 = vld [vmem:[#allocation6 + $0x390] ss:$40 sps:$4 sm:$0xff]   ;;  %v7119_v55 = vld [vmem:[#allocation6 + $0x3e4] ss:$40 sps:$4 sm:$0xff]  }
 0x13a   :  { %1817 = vmatpush1.bf16.msra.mxu0 %v7027_v56  ;;  %v7117_v56 = vld [vmem:[#allocation6 + $0x3e0] ss:$40 sps:$4 sm:$0xff]  }
 0x13b   :  { %2046 = vadd.xlane.f32.xlu0 %v2045_v59  ;;  %1899 = vmatpush1.bf16.msra.mxu1 %v7030_v57  ;;  %v7122_v57 = vld [vmem:[#allocation6 + $0x434] ss:$40 sps:$4 sm:$0xff]   ;;  %v7125_v59 = vld [vmem:[#allocation6 + $0x484] ss:$40 sps:$4 sm:$0xff]  }
 0x13c   :  { %1827 = vmatprep.subr.bf16.mxu0 %v7035_v58  ;;  %1909 = vmatprep.subr.bf16.mxu1 %v7038_v60  ;;  %v7120_v58 = vld [vmem:[#allocation6 + $0x430] ss:$40 sps:$4 sm:$0xff]   ;;  %v7123_v60 = vld [vmem:[#allocation6 + $0x480] ss:$40 sps:$4 sm:$0xff]  }
 0x13d   :  { %1819 = vmatmul.mubr.bf16.vlgmr.msra.gmra.mrb[4].mxu0 %v7668_v11 }
 0x13e   :  { %1828 = vmatpush1.bf16.msra.mxu0 %v7033_v61  ;;  %1901 = vmatmul.mubr.bf16.vlgmr.msra.gmra.mrb[4].mxu1 %v7668_v11  ;;  %v7128_v61 = vld [vmem:[#allocation6 + $0x4d4] ss:$40 sps:$4 sm:$0xff]  }
 0x13f   :  { %1910 = vmatpush1.bf16.msra.mxu1 %v7036_v62  ;;  %1829 = vmatprep.subr.bf16.mxu0 %v7041_v63  ;;  %v7126_v62 = vld [vmem:[#allocation6 + $0x4d0] ss:$40 sps:$4 sm:$0xff]   ;;  %v7131_v63 = vld [vmem:[#allocation6 + $0x524] ss:$40 sps:$4 sm:$0xff]  }
 0x140   :  { %1911 = vmatprep.subr.bf16.mxu1 %v7044_v0  ;;  %1859 = vmatprep.mubr.bf16.mxu0 %v11286_v19  ;;  %v7129_v0 = vld [vmem:[#allocation6 + $0x520] ss:$40 sps:$4 sm:$0xff]  }
 0x141   :  { %1941 = vmatprep.mubr.bf16.mxu1 %v11286_v19 }
 0x142   :  { %1830 = vmatpush1.bf16.msra.mxu0 %v7039_v1  ;;  %v7134_v1 = vld [vmem:[#allocation6 + $0x574] ss:$40 sps:$4 sm:$0xff]  }
 0x143   :  { %1912 = vmatpush1.bf16.msra.mxu1 %v7042_v2  ;;  %1831 = vmatprep.subr.bf16.mxu0 %v7047_v3  ;;  %v7132_v2 = vld [vmem:[#allocation6 + $0x570] ss:$40 sps:$4 sm:$0xff]   ;;  %v7137_v3 = vld [vmem:[#allocation6 + $0x5c4] ss:$40 sps:$4 sm:$0xff]  }
 0x144   :  { %1913 = vmatprep.subr.bf16.mxu1 %v7050_v5  ;;  %v7135_v5 = vld [vmem:[#allocation6 + $0x5c0] ss:$40 sps:$4 sm:$0xff]  }
 0x146   :  { %1832 = vmatpush1.bf16.msra.mxu0 %v7045_v8  ;;  %v7140_v8 = vld [vmem:[#allocation6 + $0x614] ss:$40 sps:$4 sm:$0xff]  }
 0x147   :  { %1914 = vmatpush1.bf16.msra.mxu1 %v7048_v9  ;;  %1833 = vmatprep.subr.bf16.mxu0 %v7053_v10  ;;  %v7138_v9 = vld [vmem:[#allocation6 + $0x610] ss:$40 sps:$4 sm:$0xff]   ;;  %v7143_v10 = vld [vmem:[#allocation6 + $0x664] ss:$40 sps:$4 sm:$0xff]  }
 0x148   :  { %1915 = vmatprep.subr.bf16.mxu1 %v7056_v12  ;;  %v7141_v12 = vld [vmem:[#allocation6 + $0x660] ss:$40 sps:$4 sm:$0xff]  }
 0x14a   :  { %1834 = vmatpush1.bf16.msra.mxu0 %v7051_v13  ;;  %v7146_v13 = vld [vmem:[#allocation6 + $0x6b4] ss:$40 sps:$4 sm:$0xff]  }
 0x14b   :  { %1916 = vmatpush1.bf16.msra.mxu1 %v7054_v14  ;;  %1835 = vmatprep.subr.bf16.mxu0 %v7059_v15  ;;  %v7149_v14 = vld [vmem:[#allocation6 + $0x704] ss:$40 sps:$4 sm:$0xff]   ;;  %v7147_v15 = vld [vmem:[#allocation6 + $0x700] ss:$40 sps:$4 sm:$0xff]  }
 0x14c   :  { %1917 = vmatprep.subr.bf16.mxu1 %v7062_v16  ;;  %v7152_v16 = vld [vmem:[#allocation6 + $0x754] ss:$40 sps:$4 sm:$0xff]  }
 0x14e   :  { %1836 = vmatpush1.bf16.msra.mxu0 %v7057_v17  ;;  %v7150_v17 = vld [vmem:[#allocation6 + $0x750] ss:$40 sps:$4 sm:$0xff]  }
 0x14f   :  { %1918 = vmatpush1.bf16.msra.mxu1 %v7060_v18  ;;  %1837 = vmatprep.subr.bf16.mxu0 %v7065_v4 }
 0x150   :  { %1919 = vmatprep.subr.bf16.mxu1 %v7068_v20 }
 0x152   :  { %1838 = vmatpush1.bf16.msra.mxu0 %v7063_v21 }
 0x153   :  { %1920 = vmatpush1.bf16.msra.mxu1 %v7066_v22  ;;  %1839 = vmatprep.subr.bf16.mxu0 %v7071_v23 }
 0x154   :  { %1921 = vmatprep.subr.bf16.mxu1 %v7074_v24 }
 0x156   :  { %1840 = vmatpush1.bf16.msra.mxu0 %v7069_v25 }
 0x157   :  { %1922 = vmatpush1.bf16.msra.mxu1 %v7072_v26  ;;  %1841 = vmatprep.subr.bf16.mxu0 %v7077_v27 }
 0x158   :  { %1923 = vmatprep.subr.bf16.mxu1 %v7080_v28 }
 0x15a   :  { %1842 = vmatpush1.bf16.msra.mxu0 %v7075_v29 }
 0x15b   :  { %1924 = vmatpush1.bf16.msra.mxu1 %v7078_v30  ;;  %1950 = vmatprep.subr.bf16.mxu0 %v7083_v31  ;;  %v2055_v31 = vlaneseq }
 0x15d   :  { %1860 = vmatmul.mubr.bf16.vlgmr.msra.gmra.mrb[4].mxu0 %v7676_v44 }
 0x15e   :  { %1942 = vmatmul.mubr.bf16.vlgmr.msra.gmra.mrb[4].mxu1 %v7676_v44  ;;  %1951 = vmatpush1.bf16.msra.mxu0 %v7081_v32  ;;  %v7716_v32 = vshrl.u32 %v2055_v31, 7 }
 0x15f   :  { %1952 = vmatprep.subr.bf16.mxu0 %v7086_v33  ;;  %1982 = vmatprep.mubr.bf16.mxu0 %v7660_v7  ;;  %v7104_v7 = vld [vmem:[#allocation6 + $0x254] ss:$40 sps:$4 sm:$0xff]  }
 0x160   :  { %v7719_v33 = vsub.s32 0, %v7716_v32 }
 0x162   :  { %1953 = vmatpush1.bf16.msra.mxu0 %v7084_v34  ;;  %v7724_v34 = vld [vmem:[%s11190_s2] sm:$0x3f]  ;;  %s7747_s2 = sld [smem:[#allocation9 + $0x1]] }
 0x163   :  { %1954 = vmatprep.subr.bf16.mxu0 %v7089_v35  ;;  %v7727_v35 = vsub.s32 1, %v7716_v32 }
 0x166   :  { %1955 = vmatpush1.bf16.msra.mxu0 %v7087_v36  ;;  %v2058_v36 = vrot.slane %v7724_v34, %v7719_v33 }
 0x167   :  { %1956 = vmatprep.subr.bf16.mxu0 %v7092_v37  ;;  %v2094_v37 = vrot.slane %v7724_v34, %v7727_v35 }
 0x16a   :  { %1957 = vmatpush1.bf16.msra.mxu0 %v7090_v38  ;;  %v2073_v38 = vrot.slane %v2058_v36, %v7719_v33 }
 0x16b   :  { %1958 = vmatprep.subr.bf16.mxu0 %v7095_v39  ;;  %v2109_v39 = vrot.slane %v2094_v37, %v7727_v35 }
 0x16e   :  { %1959 = vmatpush1.bf16.msra.mxu0 %v7093_v41  ;;  %v2082_v41 = vmul.f32 %v2073_v38, %v7682_v40  ;;  %v2163_v38 = vstv %s7784_s26  ;;  %s7936_s26 = sld [smem:[#allocation12 + $0x64]] }
 0x16f   :  { %1960 = vmatprep.subr.bf16.mxu0 %v7098_v42 }
 0x172   :  { %1961 = vmatpush1.bf16.msra.mxu0 %v7096_v43 }
 0x173   :  { %1962 = vmatprep.subr.bf16.mxu0 %v7101_v45 }
 0x174   :  { %11565 = sst [smem:[#allocation51_spill]] %s7936_s26 }
 0x176   :  { %1963 = vmatpush1.bf16.msra.mxu0 %v7099_v46 }
 0x177   :  { %1964 = vmatprep.subr.bf16.mxu0 %v7104_v7  ;;  %v2118_v7 = vmul.f32 %v2109_v39, %v7682_v40  ;;  %v2178_v39 = vstv %s7788_s27  ;;  %s7938_s27 = sld [smem:[#allocation12 + $0x7c]] }
 0x17a   :  { %1965 = vmatpush1.bf16.msra.mxu0 %v7102_v47 }
 0x17b   :  { %1966 = vmatprep.subr.bf16.mxu0 %v7107_v48 }
 0x17d   :  { %11566 = sst [smem:[#allocation52_spill]] %s7938_s27 }
 0x17e   :  { %1967 = vmatpush1.bf16.msra.mxu0 %v7105_v49 }
 0x17f   :  { %1968 = vmatprep.subr.bf16.mxu0 %v7110_v50 }
 0x182   :  { %1969 = vmatpush1.bf16.msra.mxu0 %v7108_v51 }
 0x183   :  { %1970 = vmatprep.subr.bf16.mxu0 %v7113_v6 }
 0x186   :  { %1971 = vmatpush1.bf16.msra.mxu0 %v7111_v52 }
 0x187   :  { %1972 = vmatprep.subr.bf16.mxu0 %v7116_v53 }
 0x18a   :  { %1973 = vmatpush1.bf16.msra.mxu0 %v7114_v54 }
 0x18b   :  { %1974 = vmatprep.subr.bf16.mxu0 %v7119_v55  ;;  %v7763_v55 = vand.u32 127, %v2055_v31 }
 0x18d   :  { %vm2143_vm0 = vcmp.eq.s32.totalorder %v7763_v55, 0  ;;  %vm2144_vm1 = vcmp.eq.s32.totalorder %v7763_v55, 127  ;;  %v4346_v55 = vld [vmem:[#allocation8 + $0x1a8] sm:$0xff] }
 0x18e   :  { %1975 = vmatpush1.bf16.msra.mxu0 %v7117_v56  ;;  %v2152_v56 = vstv %s7751_s15  ;;  %s7856_s15 = sld [smem:[#allocation10 + $0x6]] }
 0x18f   :  { %1976 = vmatprep.subr.bf16.mxu0 %v7122_v57  ;;  %v2167_v57 = vstv %s7753_s5  ;;  %s5822_s5 = sld [smem:[#allocation10 + $0x7]] }
 0x192   :  { %1977 = vmatpush1.bf16.msra.mxu0 %v7120_v58  ;;  %v2155_v58 = vstv %s7747_s2  ;;  %s7846_s2 = sld [smem:[#allocation10 + $0x5]] }
 0x193   :  { %1978 = vmatprep.subr.bf16.mxu0 %v7125_v59  ;;  %v2197_v59 = vstv %s7757_s17  ;;  %s7910_s17 = sld [smem:[#allocation12 + $0x19]] }
 0x196   :  { %1979 = vmatpush1.bf16.msra.mxu0 %v7123_v60 }
 0x197   :  { %1980 = vmatprep.subr.bf16.mxu0 %v7128_v61  ;;  %v2170_v61 = vstv %s7749_s14  ;;  %s7848_s14 = sld [smem:[#allocation9 + $0x17]] }
 0x199   :  { %11554 = sst [smem:[#allocation40_spill]] %s7910_s17 }
 0x19a   :  { %1981 = vmatpush1.bf16.msra.mxu0 %v7126_v62  ;;  %v2185_v62 = vstv %s7755_s16  ;;  %s7908_s16 = sld [smem:[#allocation12 + $0x1]] }
 0x19b   :  { %1991 = vmatprep.subr.bf16.mxu0 %v7131_v63  ;;  %v2200_v63 = vstv %s7759_s18  ;;  %s7912_s18 = sld [smem:[#allocation12 + $0x31]] }
 0x19d   :  { %1983 = vmatmul.mubr.bf16.vlgmr.msra.gmra.mrb[8].mxu0 %v7668_v11  ;;  %v7144_v11 = vld [vmem:[#allocation6 + $0x6b0] ss:$40 sps:$4 sm:$0xff]  }
 0x19e   :  { %1992 = vmatpush1.bf16.msra.mxu0 %v7129_v0  ;;  %2023 = vmatprep.mubr.bf16.mxu0 %v11286_v19 }
 0x19f   :  { %1993 = vmatprep.subr.bf16.mxu0 %v7134_v1  ;;  %v2215_v1 = vstv %s7761_s19  ;;  %s7914_s19 = sld [smem:[#allocation12 + $0x49]] }
 0x1a0   :  { %11553 = sst [smem:[#allocation39_spill]] %s7908_s16 }
 0x1a1   :  { %11555 = sst [smem:[#allocation41_spill]] %s7912_s18 }
 0x1a2   :  { %1994 = vmatpush1.bf16.msra.mxu0 %v7132_v2  ;;  %v2230_v2 = vstv %s7767_s3  ;;  %s7920_s3 = sld [smem:[#allocation12 + $0x79]] }
 0x1a3   :  { %1995 = vmatprep.subr.bf16.mxu0 %v7137_v3 }
 0x1a5   :  { %11556 = sst [smem:[#allocation42_spill]] %s7914_s19 }
 0x1a6   :  { %1996 = vmatpush1.bf16.msra.mxu0 %v7135_v5 }
 0x1a7   :  { %1997 = vmatprep.subr.bf16.mxu0 %v7140_v8  ;;  %v2212_v8 = vstv %s7769_s4  ;;  %s7922_s4 = sld [smem:[#allocation12 + $0x91]] }
 0x1a8   :  { %11558 = sst [smem:[#allocation44_spill]] %s7920_s3 }
 0x1a9   :  { %11725 = sst [smem:[#allocation44_spill]] %s8246_s12  ;;  %s8436_s12 = sld [smem:[#allocation12 + $0x2c]] }
 0x1aa   :  { %1998 = vmatpush1.bf16.msra.mxu0 %v7138_v9 }
 0x1ab   :  { %1999 = vmatprep.subr.bf16.mxu0 %v7143_v10  ;;  %v2159_v10 = vstv %s7771_s6  ;;  %s7924_s6 = sld [smem:[#allocation12 + $0xa9]] }
 0x1ad   :  { %11559 = sst [smem:[#allocation45_spill]] %s7922_s4 }
 0x1ae   :  { %2000 = vmatpush1.bf16.msra.mxu0 %v7141_v12 }
 0x1af   :  { %2001 = vmatprep.subr.bf16.mxu0 %v7146_v13 }
 0x1b1   :  { %11560 = sst [smem:[#allocation46_spill]] %s7924_s6 }
 0x1b2   :  { %2002 = vmatpush1.bf16.msra.mxu0 %v7144_v11  ;;  %v2174_v11 = vstv %s7773_s13  ;;  %s7926_s13 = sld [smem:[#allocation12 + $0x4]] }
 0x1b3   :  { %2003 = vmatprep.subr.bf16.mxu0 %v7149_v14  ;;  %v2204_v14 = vstv %s7775_s21  ;;  %s7928_s21 = sld [smem:[#allocation12 + $0x1c]] }
 0x1b6   :  { %2004 = vmatpush1.bf16.msra.mxu0 %v7147_v15 }
 0x1b7   :  { %2005 = vmatprep.subr.bf16.mxu0 %v7152_v16  ;;  %v2182_v16 = vstv %s7765_s20  ;;  %s7918_s20 = sld [smem:[#allocation12 + $0x61]] }
 0x1b8   :  { %11561 = sst [smem:[#allocation47_spill]] %s7926_s13 }
 0x1b9   :  { %11562 = sst [smem:[#allocation48_spill]] %s7928_s21 }
 0x1ba   :  { %2006 = vmatpush1.bf16.msra.mxu0 %v7150_v17  ;;  %v2227_v17 = vstv %s7777_s23  ;;  %s7930_s23 = sld [smem:[#allocation12 + $0x34]] }
 0x1bd   :  { %2024 = vmatmul.mubr.bf16.vlgmr.msra.gmra.mrb[8].mxu0 %v7676_v44  ;;  %11557 = sst [smem:[#allocation43_spill]] %s7918_s20 }
 0x1c0   :  { %11563 = sst [smem:[#allocation49_spill]] %s7930_s23 }
 0x1c8   :  { %v2047_v18 = vpop.xlane.xlu0 %2046 }
 0x1c9   :  { %v2049_v4 = vmul.f32 0.002610966, %v2047_v18 }
 0x1cb   :  { %v7697_v20 = vadd.f32 1e-08, %v2049_v4  ;;  %v2219_v4 = vstv %s7779_s24  ;;  %s7932_s24 = sld [smem:[#allocation12 + $0x4c]] }
 0x1cd   :  { %11545 = vst [vmem:[#allocation31_spill] sm:$0xff] %v7697_v20  ;;  %7249 = vrsqrt.f32 %v7697_v20 }
 0x1d0   :  { %v1697_v21 = vpop.f32.mrb[0].mxu0 }
 0x1d1   :  { %v7700_v22 = vpop.f32.mrb[0].mxu1  ;;  %v7702_v23 = vpop.f32.mrb[1].mxu0  ;;  %v2133_v29 = vsub.f32 %v1697_v21, %v7682_v40  ;;  %11564 = sst [smem:[#allocation50_spill]] %s7932_s24 }
 0x1d2   :  { %11546 = vst [vmem:[#allocation32_spill] sm:$0xff] %v7700_v22  ;;  %11547 = vst [vmem:[#allocation33_spill] sm:$0xff] %v7702_v23  ;;  %v7704_v24 = vpop.f32.mrb[1].mxu1  ;;  %v1701_v25 = vpop.f32.mrb[2].mxu0 }
 0x1d3   :  { %11548 = vst [vmem:[#allocation34_spill] sm:$0xff] %v7704_v24  ;;  %v1702_v26 = vpop.f32.mrb[3].mxu0  ;;  %v1783_v27 = vpop.f32.mrb[2].mxu1 }
 0x1d4   :  { %v1784_v28 = vpop.f32.mrb[3].mxu1 }
 0x1d7   :  { %v7707_v44 = vpop.eup %7249 }
 0x1d8   :  { %11549 = vst [vmem:[#allocation35_spill] sm:$0xff] %v7707_v44  ;;  %v7710_v30 = vmul.f32 %v7707_v44, %v2133_v29 }
 0x1da   :  { %2145 = vrot.lane.b32.xlu1 %v7710_v30, %s11208_s11  ;;  %v2156_v12 = vmul.f32 %v2155_v58, %v7710_v30  ;;  %v2171_v13 = vmul.f32 %v2170_v61, %v7710_v30  ;;  %v2201_v18 = vmul.f32 %v2200_v63, %v7710_v30  ;;  %v2216_v37 = vmul.f32 %v2215_v1, %v7710_v30 }
 0x1de   :  { %2148 = vrot.lane.b32.xlu1 %v7710_v30, %s11201_s9 }
 0x230   :  { %v1861_v42 = vpop.f32.mrb[4].mxu0 }
 0x231   :  { %v2085_v43 = vsub.f32 %v1861_v42, %v2082_v41  ;;  %v7736_v45 = vpop.f32.mrb[4].mxu1  ;;  %v7738_v46 = vpop.f32.mrb[5].mxu0  ;;  %v2189_v41 = vstv %s7790_s28  ;;  %s7940_s28 = sld [smem:[#allocation12 + $0x94]] }
 0x232   :  { %v1945_v47 = vpop.f32.mrb[5].mxu1  ;;  %v1865_v48 = vpop.f32.mrb[6].mxu0 }
 0x233   :  { %v7741_v49 = vand.u32 2147483647, %v2085_v43  ;;  %v2121_v50 = vsub.f32 %v1945_v47, %v2118_v7  ;;  %v1866_v51 = vpop.f32.mrb[7].mxu0  ;;  %v1947_v6 = vpop.f32.mrb[6].mxu1  ;;  %v2245_v48 = vstv %s7795_s1  ;;  %s7942_s1 = sld [smem:[#allocation12 + $0xac]] }
 0x234   :  { %v1948_v52 = vpop.f32.mrb[7].mxu1  ;;  %v2208_v51 = vstv %s7806_s8  ;;  %v2234_v6 = vstv %s7808_s10  ;;  %s7945_s8 = sld [smem:[#allocation12 + $0x7]] }
 0x235   :  { %11550 = vst [vmem:[#allocation36_spill] sm:$0xff] %v7741_v49  ;;  %v7743_v53 = vand.u32 2147483647, %v2121_v50  ;;  %v2242_v52 = vstv %s7812_s22  ;;  %s7947_s10 = sld [smem:[#allocation12 + $0x1f]] }
 0x236   :  { %s7950_s22 = sld [smem:[#allocation12 + $0x37]] }
 0x237   :  { %11551 = vst [vmem:[#allocation37_spill] sm:$0xff] %v7743_v53  ;;  %11567 = sst [smem:[#allocation53_spill]] %s7940_s28 }
 0x239   :  { %11568 = sst [smem:[#allocation54_spill]] %s7942_s1 }
 0x23a   :  { %11569 = sst [smem:[#allocation55_spill]] %s7945_s8 }
 0x23b   :  { %11570 = sst [smem:[#allocation56_spill]] %s7947_s10 }
 0x23c   :  { %11571 = sst [smem:[#allocation57_spill]] %s7950_s22 }
 0x24c   :  { %v2146_v60 = vpop.permute.xlu1 %2145 }
 0x24d   :  { %v7800_v0 = vsel %vm2143_vm0, %v7710_v30, %v2146_v60  ;;  %v2231_v60 = vmul.f32 %v2230_v2, %v7710_v30  ;;  %v2246_v2 = vmul.f32 %v2245_v48, %v7710_v30 }
 0x24e   :  { %v2153_v3 = vmul.f32 %v2152_v56, %v7800_v0  ;;  %v2168_v5 = vmul.f32 %v2167_v57, %v7800_v0  ;;  %v2198_v9 = vmul.f32 %v2197_v59, %v7800_v0  ;;  %v2213_v26 = vmul.f32 %v2212_v8, %v7800_v0 }
 0x24f   :  { %v2183_v50 = vmul.f32 %v2182_v16, %v7800_v0  ;;  %v2228_v57 = vmul.f32 %v2227_v17, %v7800_v0  ;;  %v2186_v59 = vmul.f32 %v2185_v62, %v7710_v30  ;;  %v2243_v62 = vmul.f32 %v2242_v52, %v7800_v0 }
 0x250   :  { %v2149_v15 = vpop.permute.xlu1 %2148  ;;  %v2157_v21 = vadd.f32 %v2156_v12, %v2153_v3  ;;  %v2172_v25 = vadd.f32 %v2171_v13, %v2168_v5  ;;  %v2202_v28 = vadd.f32 %v2201_v18, %v2198_v9  ;;  %v2217_v56 = vadd.f32 %v2216_v37, %v2213_v26 }
 0x251   :  { %v2150_v27 = vsel %vm2144_vm1, %v7710_v30, %v2149_v15  ;;  %v2187_v8 = vadd.f32 %v2186_v59, %v2183_v50  ;;  %v2223_v9 = vstv %s7825_s25  ;;  %v2257_v12 = vstv %s7832_s0  ;;  %s7952_s25 = sld [smem:[#allocation12 + $0x4f]] }
 0x252   :  { %v2160_v29 = vmul.f32 %v2159_v10, %v2150_v27  ;;  %v2175_v31 = vmul.f32 %v2174_v11, %v2150_v27  ;;  %v2205_v36 = vmul.f32 %v2204_v14, %v2150_v27  ;;  %v2220_v47 = vmul.f32 %v2219_v4, %v2150_v27  ;;  %s7959_s0 = sld [smem:[#allocation12 + $0x7f]] }
 0x253   :  { %v2190_v63 = vmul.f32 %v2189_v41, %v2150_v27  ;;  %v2235_v5 = vmul.f32 %v2234_v6, %v2150_v27  ;;  %v2249_v10 = vstv %s7827_s7  ;;  %v2260_v13 = vstv %s7834_s29  ;;  %s7957_s7 = sld [smem:[#allocation12 + $0x67]] }
 0x254   :  { %v2161_v42 = vadd.f32 %v2160_v29, %v2157_v21  ;;  %v2176_v43 = vadd.f32 %v2175_v31, %v2172_v25  ;;  %v2206_v7 = vadd.f32 %v2205_v36, %v2202_v28  ;;  %v2221_v3 = vadd.f32 %v2220_v47, %v2217_v56  ;;  %s7962_s29 = sld [smem:[#allocation12 + $0x97]] }
 0x255   :  { %v2232_v11 = vadd.f32 %v2231_v60, %v2228_v57  ;;  %v2193_v14 = vstv %s7840_s30  ;;  %v2191_v15 = vadd.f32 %v2190_v63, %v2187_v8  ;;  %v2250_v18 = vmul.f32 %v2249_v10, %v2150_v27  ;;  %s7964_s30 = sld [smem:[#allocation12 + $0xaf]] }
 0x256   :  { %v2164_v58 = vadd.f32 %v2163_v38, %v2161_v42  ;;  %v2179_v61 = vadd.f32 %v2178_v39, %v2176_v43  ;;  %v2209_v1 = vadd.f32 %v2208_v51, %v2206_v7  ;;  %v2224_v16 = vadd.f32 %v2223_v9, %v2221_v3 }
 0x257   :  { %v2236_v17 = vadd.f32 %v2235_v5, %v2232_v11  ;;  %v2238_v4 = vstv %s7846_s2  ;;  %v2264_v21 = vstv %s7848_s14  ;;  %v2247_v25 = vadd.f32 %v2246_v2, %v2243_v62  ;;  %11572 = sst [smem:[#allocation58_spill]] %s7952_s25  ;;  %s7967_s2 = sld [smem:[#allocation12 + $0xa]] }
 0x258   :  { %7251 = vtanh.f32 %v2164_v58  ;;  %v2258_v26 = vmul.f32 %v2257_v12, %v7800_v0  ;;  %v2261_v28 = vmul.f32 %v2260_v13, %v7710_v30  ;;  %v2194_v29 = vadd.f32 %v2193_v14, %v2191_v15  ;;  %11574 = sst [smem:[#allocation60_spill]] %s7959_s0  ;;  %s7969_s14 = sld [smem:[#allocation12 + $0x22]] }
 0x259   :  { %7253 = vtanh.f32 %v2179_v61  ;;  %v2239_v31 = vadd.f32 %v2238_v4, %v2236_v17  ;;  %v2251_v36 = vadd.f32 %v2250_v18, %v2247_v25  ;;  %v2265_v37 = vmul.f32 %v2264_v21, %v2150_v27  ;;  %11573 = sst [smem:[#allocation59_spill]] %s7957_s7 }
 0x25a   :  { %7255 = vtanh.f32 %v2209_v1  ;;  %v2253_v38 = vstv %s7856_s15  ;;  %v2262_v41 = vadd.f32 %v2261_v28, %v2258_v26  ;;  %v2268_v43 = vstv %s5822_s5  ;;  %11575 = sst [smem:[#allocation61_spill]] %s7962_s29  ;;  %s7972_s15 = sld [smem:[#allocation12 + $0x3a]] }
 0x25b   :  { %7257 = vtanh.f32 %v2224_v16  ;;  %v2254_v0 = vadd.f32 %v2253_v38, %v2251_v36  ;;  %v2061_v52 = vsub.s32 2, %v7716_v32  ;;  %v2065_v56 = vsub.s32 4, %v7716_v32  ;;  %11576 = sst [smem:[#allocation62_spill]] %s7964_s30  ;;  %s7974_s5 = sld [smem:[#allocation12 + $0x52]] }
 0x25c   :  { %7259 = vtanh.f32 %v2194_v29  ;;  %v2266_v42 = vadd.f32 %v2265_v37, %v2262_v41  ;;  %v2097_v57 = vsub.s32 3, %v7716_v32  ;;  %v2101_v58 = vsub.s32 5, %v7716_v32  ;;  %s7996_s30 = sld [smem:[#allocation12 + $0x55]]  ;;  %s8076_s29 = sld [smem:[#allocation12 + $0x4a]] }
 0x25d   :  { %7261 = vtanh.f32 %v2239_v31  ;;  %v2062_v59 = vrot.slane %v7724_v34, %v2061_v52  ;;  %11577 = sst [smem:[#allocation63_spill]] %s7967_s2  ;;  %v2066_v60 = vrot.slane %v7724_v34, %v2065_v56  ;;  %s7984_s2 = sld [smem:[#allocation12 + $0x9a]]  ;;  %v2323_v4 = vstv %s7908_s16 }
 0x25e   :  { %7263 = vtanh.f32 %v2254_v0  ;;  %v2269_v27 = vadd.f32 %v2268_v43, %v2266_v42  ;;  %11578 = sst [smem:[#allocation64_spill]] %s7969_s14  ;;  %v2098_v32 = vrot.slane %v7724_v34, %v2097_v57  ;;  %v2102_v61 = vrot.slane %v7724_v34, %v2101_v58  ;;  %s7986_s14 = sld [smem:[#allocation12 + $0xb2]] }
 0x25f   :  { %v2077_v63 = vrot.slane %v2062_v59, %v7719_v33  ;;  %v2081_v1 = vrot.slane %v2066_v60, %v7719_v33  ;;  %v2422_v21 = vstv %s7910_s17  ;;  %v2521_v25 = vstv %s7912_s18  ;;  %s8104_s16 = sld [smem:[#allocation12 + $0x90]]  ;;  %s8120_s18 = sld [smem:[#allocation12 + $0x33]] }
 0x260   :  { %7265 = vtanh.f32 %v2269_v27  ;;  %11579 = sst [smem:[#allocation65_spill]] %s7972_s15  ;;  %s7989_s15 = sld [smem:[#allocation12 + $0xd]]  ;;  %v2113_v3 = vrot.slane %v2098_v32, %v7727_v35  ;;  %v2117_v34 = vrot.slane %v2102_v61, %v7727_v35  ;;  %v2620_v26 = vstv %s7914_s19 }
 0x261   :  { %11580 = sst [smem:[#allocation66_spill]] %s7974_s5  ;;  %s7991_s5 = sld [smem:[#allocation12 + $0x25]]  ;;  %v2083_v5 = vmul.f32 %v2077_v63, %v7682_v40  ;;  %v2084_v33 = vmul.f32 %v2081_v1, %v7682_v40  ;;  %v2719_v28 = vstv %s7918_s20  ;;  %v2818_v29 = vstv %s7920_s3 }
 0x262   :  { %v7868_v39 = vpop.eup %7251  ;;  %11588 = sst [smem:[#allocation74_spill]] %s7996_s30  ;;  %s8014_s30 = sld [smem:[#allocation12 + $0x40]]  ;;  %v2119_v35 = vmul.f32 %v2113_v3, %v7682_v40  ;;  %v2120_v12 = vmul.f32 %v2117_v34, %v7682_v40  ;;  %v2917_v31 = vstv %s7922_s4  ;;  %v3016_v36 = vstv %s7924_s6 }
 0x263   :  { %2274 = vrot.lane.b32.xlu1 %v7868_v39, %s11201_s9  ;;  %2271 = vrot.lane.b32.xlu0 %v7868_v39, %s11208_s11  ;;  %v7874_v30 = vpop.eup %7253  ;;  %11583 = sst [smem:[#allocation69_spill]] %s7984_s2  ;;  %s8006_s2 = sld [smem:[#allocation12 + $0xb5]]  ;;  %v2086_v8 = vsub.f32 %v7738_v46, %v2083_v5  ;;  %v2087_v9 = vsub.f32 %v7736_v45, %v2084_v33  ;;  %v2335_v37 = vstv %s7926_s13  ;;  %v2434_v38 = vstv %s7928_s21 }
 0x264   :  { %v7876_v7 = vpop.eup %7255  ;;  %11584 = sst [smem:[#allocation70_spill]] %s7986_s14  ;;  %s8004_s14 = sld [smem:[#allocation12 + $0x9d]]  ;;  %v2533_v41 = vstv %s7930_s23  ;;  %v2632_v0 = vstv %s7932_s24  ;;  %v2731_v42 = vstv %s7936_s26  ;;  %v2830_v43 = vstv %s7938_s27 }
 0x265   :  { %v7882_v47 = vpop.eup %7257  ;;  %v8038_v45 = vand.u32 2147483647, %v2086_v8  ;;  %v8044_v14 = vand.u32 2147483647, %v2087_v9  ;;  %11622 = sst [smem:[#allocation108_spill]] %s8076_s29  ;;  %s8092_s29 = sld [smem:[#allocation12 + $0x30]]  ;;  %v2929_v27 = vstv %s7940_s28  ;;  %v3028_v52 = vstv %s7942_s1 }
 0x266   :  { %v7888_v48 = vpop.eup %7259  ;;  %11585 = sst [smem:[#allocation71_spill]] %s7989_s15  ;;  %s8112_s19 = sld [smem:[#allocation12 + $0x3]]  ;;  %v2347_v56 = vstv %s7945_s8  ;;  %v2446_v57 = vstv %s7947_s10  ;;  %v2545_v58 = vstv %s7950_s22  ;;  %v2644_v59 = vstv %s7952_s25 }
 0x267   :  { %2277 = vrot.lane.b32.xlu1 %v7874_v30, %s11208_s11  ;;  %2292 = vrot.lane.b32.xlu0 %v7876_v7, %s11201_s9  ;;  %v7890_v50 = vpop.eup %7261  ;;  %11586 = sst [smem:[#allocation72_spill]] %s7991_s5  ;;  %s8009_s5 = sld [smem:[#allocation12 + $0x10]]  ;;  %11605 = vst [vmem:[#allocation91_spill] sm:$0xff] %v8038_v45  ;;  %11608 = vst [vmem:[#allocation94_spill] sm:$0xff] %v8044_v14  ;;  %v2743_v60 = vstv %s7957_s7  ;;  %v2842_v32 = vstv %s7959_s0  ;;  %v8325_v54 = vmul.f32 %v7874_v30, %v2533_v41 }
 0x268   :  { %v7896_v51 = vpop.eup %7263  ;;  %s8011_s15 = sld [smem:[#allocation12 + $0x28]]  ;;  %11595 = sst [smem:[#allocation81_spill]] %s8014_s30  ;;  %v8330_v18 = vmul.f32 %v7874_v30, %v2632_v0  ;;  %v8346_v41 = vmul.f32 %v7874_v30, %v2830_v43  ;;  %v8389_v0 = vmul.f32 %v7888_v48, %v2545_v58  ;;  %v8405_v43 = vmul.f32 %v7888_v48, %v2743_v60 }
 0x269   :  { %11592 = sst [smem:[#allocation78_spill]] %s8006_s2  ;;  %s8032_s30 = sld [smem:[#allocation12 + $0x2b]]  ;;  %v8412_v58 = vmul.f32 %v7888_v48, %v2842_v32 }
 0x26a   :  { %v7902_v6 = vpop.eup %7265  ;;  %11591 = sst [smem:[#allocation77_spill]] %s8004_s14  ;;  %s8022_s14 = sld [smem:[#allocation12 + $0x88]] }
 0x26b   :  { %2280 = vrot.lane.b32.xlu1 %v7874_v30, %s11201_s9  ;;  %2298 = vrot.lane.b32.xlu0 %v7882_v47, %s11201_s9  ;;  %11552 = vst [vmem:[#allocation38_spill] sm:$0xff] %v7902_v6  ;;  %s8034_s2 = sld [smem:[#allocation12 + $0x43]]  ;;  %11629 = sst [smem:[#allocation115_spill]] %s8092_s29 }
 0x26c   :  { %11633 = sst [smem:[#allocation119_spill]] %s8104_s16  ;;  %s8107_s17 = sld [smem:[#allocation12 + $0xa8]] }
 0x26d   :  { %11593 = sst [smem:[#allocation79_spill]] %s8009_s5  ;;  %s8114_s20 = sld [smem:[#allocation12 + $0x1b]] }
 0x26e   :  { %11594 = sst [smem:[#allocation80_spill]] %s8011_s15  ;;  %s8026_s15 = sld [smem:[#allocation12 + $0xa0]] }
 0x26f   :  { %2283 = vrot.lane.b32.xlu1 %v7888_v48, %s11208_s11  ;;  %2304 = vrot.lane.b32.xlu0 %v7890_v50, %s11201_s9  ;;  %s8028_s5 = sld [smem:[#allocation12 + $0xb8]]  ;;  %11602 = sst [smem:[#allocation88_spill]] %s8032_s30 }
 0x270   :  { %11598 = sst [smem:[#allocation84_spill]] %s8022_s14  ;;  %s8042_s14 = sld [smem:[#allocation12 + $0x73]] }
 0x271   :  { %11603 = sst [smem:[#allocation89_spill]] %s8034_s2  ;;  %s8052_s30 = sld [smem:[#allocation12 + $0xa3]] }
 0x272   :  { %s8054_s2 = sld [smem:[#allocation12 + $0xbb]]  ;;  %11634 = sst [smem:[#allocation120_spill]] %s8107_s17 }
 0x273   :  { %2286 = vrot.lane.b32.xlu1 %v7888_v48, %s11201_s9  ;;  %2310 = vrot.lane.b32.xlu0 %v7896_v51, %s11201_s9  ;;  %11635 = sst [smem:[#allocation121_spill]] %s8112_s19  ;;  %s11638_s4 = sld [smem:[#allocation62_spill]] }
 0x274   :  { %11599 = sst [smem:[#allocation85_spill]] %s8026_s15  ;;  %s11640_s17 = sld [smem:[#allocation63_spill]] }
 0x275   :  { %11600 = sst [smem:[#allocation86_spill]] %s8028_s5  ;;  %s8048_s5 = sld [smem:[#allocation12 + $0x8b]] }
 0x276   :  { %11607 = sst [smem:[#allocation93_spill]] %s8042_s14  ;;  %s8060_s14 = sld [smem:[#allocation12 + $0x2e]] }
 0x277   :  { %2289 = vrot.lane.b32.xlu1 %v7876_v7, %s11208_s11  ;;  %2316 = vrot.lane.b32.xlu0 %v7902_v6, %s11201_s9  ;;  %s7979_s9 = sld [smem:[#allocation12 + $0x6a]]  ;;  %11611 = sst [smem:[#allocation97_spill]] %s8052_s30 }
 0x278   :  { %11612 = sst [smem:[#allocation98_spill]] %s8054_s2  ;;  %s8066_s15 = sld [smem:[#allocation12 + $0x76]] }
 0x279   :  { %s8068_s30 = sld [smem:[#allocation12 + $0x8e]]  ;;  %s8070_s2 = sld [smem:[#allocation12 + $0x2]]  ;;  %v3040_v63 = vstv %s11638_s4 }
 0x27a   :  { %11636 = sst [smem:[#allocation122_spill]] %s8114_s20  ;;  %s11637_s3 = sld [smem:[#allocation61_spill]]  ;;  %v2359_v1 = vstv %s11640_s17  ;;  %v8428_v60 = vmul.f32 %v7888_v48, %v3040_v63 }
 0x27b   :  { %2295 = vrot.lane.b32.xlu1 %v7882_v47, %s11208_s11  ;;  %11610 = sst [smem:[#allocation96_spill]] %s8048_s5  ;;  %s8064_s5 = sld [smem:[#allocation12 + $0x5e]] }
 0x27c   :  { %11614 = sst [smem:[#allocation100_spill]] %s8060_s14  ;;  %s8078_s14 = sld [smem:[#allocation12 + $0x62]] }
 0x27d   :  { %11581 = sst [smem:[#allocation67_spill]] %s7979_s9  ;;  %s8001_s9 = sld [smem:[#allocation12 + $0x85]] }
 0x27e   :  { %11617 = sst [smem:[#allocation103_spill]] %s8066_s15  ;;  %s8082_s15 = sld [smem:[#allocation12 + $0x92]] }
 0x27f   :  { %2301 = vrot.lane.b32.xlu1 %v7890_v50, %s11208_s11  ;;  %11618 = sst [smem:[#allocation104_spill]] %s8068_s30  ;;  %s8086_s30 = sld [smem:[#allocation12]] }
 0x280   :  { %11619 = sst [smem:[#allocation105_spill]] %s8070_s2  ;;  %s8122_s6 = sld [smem:[#allocation12 + $0x4b]]  ;;  %v2941_v61 = vstv %s11637_s3 }
 0x281   :  { %11616 = sst [smem:[#allocation102_spill]] %s8064_s5  ;;  %s8084_s5 = sld [smem:[#allocation12 + $0xaa]] }
 0x282   :  { %11623 = sst [smem:[#allocation109_spill]] %s8078_s14  ;;  %s8094_s14 = sld [smem:[#allocation12 + $0x48]] }
 0x283   :  { %2307 = vrot.lane.b32.xlu1 %v7896_v51, %s11208_s11  ;;  %11590 = sst [smem:[#allocation76_spill]] %s8001_s9  ;;  %s8020_s9 = sld [smem:[#allocation12 + $0x70]] }
 0x284   :  { %11625 = sst [smem:[#allocation111_spill]] %s8082_s15  ;;  %s11642_s13 = sld [smem:[#allocation64_spill]] }
 0x285   :  { %11627 = sst [smem:[#allocation113_spill]] %s8086_s30  ;;  %s8101_s30 = sld [smem:[#allocation12 + $0x78]] }
 0x286   :  { %11639 = sst [smem:[#allocation123_spill]] %s8120_s18  ;;  %s11643_s21 = sld [smem:[#allocation65_spill]] }
 0x287   :  { %2313 = vrot.lane.b32.xlu1 %v7902_v6, %s11208_s11  ;;  %s7994_s11 = sld [smem:[#allocation12 + $0x3d]]  ;;  %11641 = sst [smem:[#allocation124_spill]] %s8122_s6 }
 0x288   :  { %11626 = sst [smem:[#allocation112_spill]] %s8084_s5  ;;  %s8098_s5 = sld [smem:[#allocation12 + $0x60]] }
 0x289   :  { %11597 = sst [smem:[#allocation83_spill]] %s8020_s9  ;;  %s8036_s9 = sld [smem:[#allocation12 + $0x5b]] }
 0x28a   :  { %11630 = sst [smem:[#allocation116_spill]] %s8094_s14  ;;  %s11644_s19 = sld [smem:[#allocation66_spill]]  ;;  %v2458_v3 = vstv %s11642_s13 }
 0x28b   :  { %11632 = sst [smem:[#allocation118_spill]] %s8101_s30  ;;  %s11646_s23 = sld [smem:[#allocation67_spill]]  ;;  %v8446_v63 = vmul.f32 %v7876_v7, %v2458_v3 }
 0x28c   :  { %s8128_s20 = sld [smem:[#allocation12 + $0x63]]  ;;  %s11648_s26 = sld [smem:[#allocation68_spill]]  ;;  %v2557_v34 = vstv %s11643_s21 }
 0x28d   :  { %11587 = sst [smem:[#allocation73_spill]] %s7994_s11  ;;  %s8016_s11 = sld [smem:[#allocation12 + $0x58]] }
 0x28e   :  { %11631 = sst [smem:[#allocation117_spill]] %s8098_s5  ;;  %s8130_s24 = sld [smem:[#allocation12 + $0x7b]] }
 0x28f   :  { %11604 = sst [smem:[#allocation90_spill]] %s8036_s9  ;;  %s8058_s9 = sld [smem:[#allocation12 + $0x16]] }
 0x290   :  { %v2025_v10 = vpop.f32.mrb[8].mxu0  ;;  %s11649_s27 = sld [smem:[#allocation69_spill]]  ;;  %s11650_s18 = sld [smem:[#allocation70_spill]]  ;;  %v2656_v5 = vstv %s11644_s19 }
 0x291   :  { %v2122_v13 = vsub.f32 %v2025_v10, %v2119_v35  ;;  %v2027_v11 = vpop.f32.mrb[9].mxu0  ;;  %s8136_s6 = sld [smem:[#allocation12 + $0x93]]  ;;  %s11652_s28 = sld [smem:[#allocation71_spill]]  ;;  %v2755_v33 = vstv %s11646_s23 }
 0x292   :  { %v2123_v46 = vsub.f32 %v2027_v11, %v2120_v12  ;;  %v2029_v62 = vpop.f32.mrb[10].mxu0  ;;  %11645 = sst [smem:[#allocation125_spill]] %s8128_s20  ;;  %s8138_s1 = sld [smem:[#allocation12 + $0xab]]  ;;  %v2854_v8 = vstv %s11648_s26  ;;  %v8473_v32 = vmul.f32 %v7876_v7, %v2755_v33 }
 0x293   :  { %11596 = sst [smem:[#allocation82_spill]] %s8016_s11  ;;  %v8040_v2 = vand.u32 2147483647, %v2122_v13  ;;  %v2030_v17 = vpop.f32.mrb[11].mxu0  ;;  %s11654_s8 = sld [smem:[#allocation72_spill]]  ;;  %v8256_v13 = vmul.f32 %v7868_v39, %v2422_v21  ;;  %v8267_v62 = vmul.f32 %v7868_v39, %v2521_v25  ;;  %v8277_v21 = vmul.f32 %v7868_v39, %v2719_v28 }
 0x294   :  { %s8030_s11 = sld [smem:[#allocation12 + $0x13]]  ;;  %v8046_v15 = vand.u32 2147483647, %v2123_v46  ;;  %s8178_s20 = sld [smem:[#allocation12 + $0x1d]]  ;;  %v8251_v17 = vmul.f32 %v7868_v39, %v2323_v4  ;;  %v8272_v4 = vmul.f32 %v7868_v39, %v2620_v26  ;;  %v8287_v25 = vmul.f32 %v7868_v39, %v2818_v29 }
 0x295   :  { %11606 = vst [vmem:[#allocation92_spill] sm:$0xff] %v8040_v2  ;;  %11613 = sst [smem:[#allocation99_spill]] %s8058_s9  ;;  %s8074_s9 = sld [smem:[#allocation12 + $0x32]]  ;;  %v8292_v26 = vmul.f32 %v7868_v39, %v2917_v31  ;;  %v8297_v28 = vmul.f32 %v7868_v39, %v3016_v36  ;;  %v8315_v31 = vmul.f32 %v7874_v30, %v2335_v37  ;;  %v8320_v36 = vmul.f32 %v7874_v30, %v2434_v38 }
 0x296   :  { %11609 = vst [vmem:[#allocation95_spill] sm:$0xff] %v8046_v15  ;;  %11647 = sst [smem:[#allocation126_spill]] %s8130_s24  ;;  %v2953_v35 = vstv %s11649_s27  ;;  %v3052_v9 = vstv %s11650_s18  ;;  %s8200_s26 = sld [smem:[#allocation12 + $0x95]]  ;;  %v8341_v38 = vmul.f32 %v7874_v30, %v2731_v42  ;;  %v8357_v29 = vmul.f32 %v7874_v30, %v2929_v27 }
 0x297   :  { %11651 = sst [smem:[#allocation127_spill]] %s8136_s6  ;;  %s8144_s24 = sld [smem:[#allocation12 + $0xb]]  ;;  %v2371_v10 = vstv %s11652_s28  ;;  %v8362_v42 = vmul.f32 %v7874_v30, %v3028_v52  ;;  %v8373_v37 = vmul.f32 %v7888_v48, %v2347_v56  ;;  %v8380_v27 = vmul.f32 %v7888_v48, %v2446_v57 }
 0x298   :  { %11653 = sst [smem:[#allocation128_spill]] %s8138_s1  ;;  %s8146_s25 = sld [smem:[#allocation12 + $0x23]]  ;;  %v8396_v56 = vmul.f32 %v7888_v48, %v2644_v59  ;;  %v8421_v46 = vmul.f32 %v7888_v48, %v2941_v61  ;;  %v8441_v61 = vmul.f32 %v7876_v7, %v2359_v1  ;;  %v8457_v59 = vmul.f32 %v7876_v7, %v2557_v34 }
 0x299   :  { %s8152_s1 = sld [smem:[#allocation12 + $0x3b]]  ;;  %v2470_v12 = vstv %s11654_s8  ;;  %s8186_s6 = sld [smem:[#allocation12 + $0x4d]]  ;;  %v8462_v1 = vmul.f32 %v7876_v7, %v2656_v5  ;;  %v8478_v34 = vmul.f32 %v7876_v7, %v2854_v8  ;;  %v8489_v52 = vmul.f32 %v7876_v7, %v2953_v35 }
 0x29a   :  { %11601 = sst [smem:[#allocation87_spill]] %s8030_s11  ;;  %s8062_s11 = sld [smem:[#allocation12 + $0x46]]  ;;  %v8494_v33 = vmul.f32 %v7876_v7, %v3052_v9  ;;  %v8505_v3 = vmul.f32 %v7882_v47, %v2371_v10  ;;  %v8510_v35 = vmul.f32 %v7882_v47, %v2470_v12 }
 0x29b   :  { %11621 = sst [smem:[#allocation107_spill]] %s8074_s9  ;;  %s8154_s4 = sld [smem:[#allocation12 + $0x53]] }
 0x29c   :  { %s8162_s19 = sld [smem:[#allocation12 + $0x83]]  ;;  %11683 = sst [smem:[#allocation138_spill]] %s8178_s20  ;;  %11804 = vst [vmem:[#allocation149_spill] sm:$0xff] %v8494_v33  ;;  %11810 = vst [vmem:[#allocation150_spill] sm:$0xff] %v8505_v3 }
 0x29d   :  { %11657 = sst [smem:[#allocation129_spill]] %s8144_s24  ;;  %s8170_s18 = sld [smem:[#allocation12 + $0xb3]]  ;;  %11811 = vst [vmem:[#allocation151_spill] sm:$0xff] %v8510_v35 }
 0x29e   :  { %11659 = sst [smem:[#allocation130_spill]] %s8146_s25  ;;  %s8160_s25 = sld [smem:[#allocation12 + $0x6b]] }
 0x29f   :  { %11663 = sst [smem:[#allocation131_spill]] %s8152_s1  ;;  %s8192_s20 = sld [smem:[#allocation12 + $0x65]] }
 0x2a0   :  { %11615 = sst [smem:[#allocation101_spill]] %s8062_s11  ;;  %s8194_s24 = sld [smem:[#allocation12 + $0x7d]] }
 0x2a1   :  { %s8080_s11 = sld [smem:[#allocation12 + $0x7a]]  ;;  %11665 = sst [smem:[#allocation132_spill]] %s8154_s4 }
 0x2a2   :  { %11671 = sst [smem:[#allocation134_spill]] %s8162_s19  ;;  %s8176_s19 = sld [smem:[#allocation12 + $0x5]] }
 0x2a3   :  { %s8168_s4 = sld [smem:[#allocation12 + $0x9b]]  ;;  %11677 = sst [smem:[#allocation136_spill]] %s8170_s18 }
 0x2a4   :  { %11669 = sst [smem:[#allocation133_spill]] %s8160_s25  ;;  %s8184_s18 = sld [smem:[#allocation12 + $0x35]] }
 0x2a5   :  { %11689 = sst [smem:[#allocation140_spill]] %s8186_s6  ;;  %s8202_s27 = sld [smem:[#allocation12 + $0xad]] }
 0x2a6   :  { %11693 = sst [smem:[#allocation141_spill]] %s8192_s20  ;;  %s8208_s8 = sld [smem:[#allocation12 + $0xe]] }
 0x2a7   :  { %11624 = sst [smem:[#allocation110_spill]] %s8080_s11  ;;  %s8210_s25 = sld [smem:[#allocation12 + $0x26]] }
 0x2a8   :  { %11681 = sst [smem:[#allocation137_spill]] %s8176_s19  ;;  %s8332_s16 = sld [smem:[#allocation12 + $0x41]] }
 0x2a9   :  { %11675 = sst [smem:[#allocation135_spill]] %s8168_s4  ;;  %s8220_s4 = sld [smem:[#allocation12 + $0x3e]] }
 0x2aa   :  { %11687 = sst [smem:[#allocation139_spill]] %s8184_s18  ;;  %s8222_s3 = sld [smem:[#allocation12 + $0x56]] }
 0x2ab   :  { %11695 = sst [smem:[#allocation142_spill]] %s8194_s24  ;;  %s8228_s21 = sld [smem:[#allocation12 + $0x6e]] }
 0x2ac   :  { %11699 = sst [smem:[#allocation143_spill]] %s8200_s26  ;;  %s8230_s23 = sld [smem:[#allocation12 + $0x86]] }
 0x2ad   :  { %11700 = sst [smem:[#allocation144_spill]] %s8202_s27  ;;  %s8236_s7 = sld [smem:[#allocation12 + $0x9e]] }
 0x2ae   :  { %11703 = sst [smem:[#allocation145_spill]] %s8208_s8  ;;  %s8334_s30 = sld [smem:[#allocation12 + $0x59]] }
 0x2af   :  { %11704 = sst [smem:[#allocation146_spill]] %s8210_s25  ;;  %s8238_s11 = sld [smem:[#allocation12 + $0xb6]] }
 0x2b0   :  { %11706 = sst [smem:[#allocation147_spill]] %s8220_s4  ;;  %s8260_s0 = sld [smem:[#allocation12 + $0x36]] }
 0x2b1   :  { %11707 = sst [smem:[#allocation148_spill]] %s8222_s3  ;;  %s8262_s29 = sld [smem:[#allocation12 + $0x4e]] }
 0x2b2   :  { %11711 = sst [smem:[#allocation39_spill]] %s8228_s21  ;;  %s8280_s2 = sld [smem:[#allocation12 + $0x66]] }
 0x2b3   :  { %11713 = sst [smem:[#allocation40_spill]] %s8230_s23  ;;  %s8244_s23 = sld [smem:[#allocation12 + $0x6]] }
 0x2b4   :  { %11717 = sst [smem:[#allocation41_spill]] %s8236_s7  ;;  %s8300_s15 = sld [smem:[#allocation12 + $0x96]] }
 0x2b5   :  { %11719 = sst [smem:[#allocation42_spill]] %s8238_s11  ;;  %s8310_s11 = sld [smem:[#allocation12 + $0x29]] }
 0x2b6   :  { %11729 = sst [smem:[#allocation45_spill]] %s8260_s0  ;;  %s8364_s28 = sld [smem:[#allocation12 + $0xa1]] }
 0x2b7   :  { %11731 = sst [smem:[#allocation46_spill]] %s8262_s29  ;;  %s8282_s29 = sld [smem:[#allocation12 + $0x7e]] }
 0x2b8   :  { %11735 = sst [smem:[#allocation47_spill]] %s8280_s2  ;;  %s8434_s14 = sld [smem:[#allocation12 + $0x14]] }
 0x2b9   :  { %11723 = sst [smem:[#allocation43_spill]] %s8244_s23  ;;  %s8308_s23 = sld [smem:[#allocation12 + $0x11]] }
 0x2ba   :  { %11741 = sst [smem:[#allocation49_spill]] %s8300_s15  ;;  %s8375_s10 = sld [smem:[#allocation12 + $0x8]] }
 0x2bb   :  { %11749 = sst [smem:[#allocation52_spill]] %s8310_s11  ;;  %s8348_s11 = sld [smem:[#allocation12 + $0x71]] }
 0x2bc   :  { %11753 = sst [smem:[#allocation53_spill]] %s8332_s16  ;;  %s8350_s16 = sld [smem:[#allocation12 + $0x89]] }
 0x2bd   :  { %11737 = sst [smem:[#allocation48_spill]] %s8282_s29  ;;  %s8302_s29 = sld [smem:[#allocation12 + $0xae]] }
 0x2be   :  { %11755 = sst [smem:[#allocation54_spill]] %s8334_s30  ;;  %s8382_s22 = sld [smem:[#allocation12 + $0x20]] }
 0x2bf   :  { %11747 = sst [smem:[#allocation51_spill]] %s8308_s23  ;;  %s8391_s13 = sld [smem:[#allocation12 + $0x38]] }
 0x2c0   :  { %11765 = sst [smem:[#allocation57_spill]] %s8364_s28  ;;  %s8398_s9 = sld [smem:[#allocation12 + $0x50]] }
 0x2c1   :  { %11759 = sst [smem:[#allocation55_spill]] %s8348_s11  ;;  %s8366_s11 = sld [smem:[#allocation12 + $0xb9]] }
 0x2c2   :  { %11761 = sst [smem:[#allocation56_spill]] %s8350_s16  ;;  %s8407_s23 = sld [smem:[#allocation12 + $0x68]] }
 0x2c3   :  { %11743 = sst [smem:[#allocation50_spill]] %s8302_s29  ;;  %s8414_s30 = sld [smem:[#allocation12 + $0x80]] }
 0x2c4   :  { %11769 = sst [smem:[#allocation59_spill]] %s8375_s10  ;;  %s8423_s19 = sld [smem:[#allocation12 + $0x98]] }
 0x2c5   :  { %11772 = sst [smem:[#allocation60_spill]] %s8382_s22  ;;  %s8430_s16 = sld [smem:[#allocation12 + $0xb0]] }
 0x2c6   :  { %11774 = sst [smem:[#allocation61_spill]] %s8391_s13  ;;  %s8450_s24 = sld [smem:[#allocation12 + $0x44]] }
 0x2c7   :  { %11767 = sst [smem:[#allocation58_spill]] %s8366_s11  ;;  %s8452_s2 = sld [smem:[#allocation12 + $0x5c]] }
 0x2c8   :  { %11775 = sst [smem:[#allocation62_spill]] %s8398_s9  ;;  %s8466_s27 = sld [smem:[#allocation12 + $0x74]] }
 0x2c9   :  { %11778 = sst [smem:[#allocation63_spill]] %s8407_s23  ;;  %s11798_s17 = sld [smem:[#allocation73_spill]] }
 0x2ca   :  { %11779 = sst [smem:[#allocation64_spill]] %s8414_s30  ;;  %s11799_s8 = sld [smem:[#allocation74_spill]] }
 0x2cb   :  { %11782 = sst [smem:[#allocation65_spill]] %s8423_s19  ;;  %s8482_s25 = sld [smem:[#allocation12 + $0xa4]] }
 0x2cc   :  { %11783 = sst [smem:[#allocation66_spill]] %s8430_s16  ;;  %s11805_s18 = sld [smem:[#allocation75_spill]] }
 0x2cd   :  { %11786 = sst [smem:[#allocation67_spill]] %s8434_s14  ;;  %s11806_s4 = sld [smem:[#allocation76_spill]] }
 0x2ce   :  { %11787 = sst [smem:[#allocation68_spill]] %s8436_s12  ;;  %s8498_s3 = sld [smem:[#allocation12 + $0x21]] }
 0x2cf   :  { %11790 = sst [smem:[#allocation69_spill]] %s8450_s24  ;;  %s8468_s24 = sld [smem:[#allocation12 + $0x8c]]  ;;  %v11817_v5 = vstv %s11798_s17 }
 0x2d0   :  { %11791 = sst [smem:[#allocation70_spill]] %s8452_s2  ;;  %s11812_s20 = sld [smem:[#allocation77_spill]]  ;;  %v8521_v57 = vmul.f32 %v7882_v47, %v11817_v5  ;;  %v11820_v10 = vstv %s11799_s8 }
 0x2d1   :  { %11795 = sst [smem:[#allocation71_spill]] %s8466_s27  ;;  %s8484_s27 = sld [smem:[#allocation12 + $0x9]]  ;;  %v8526_v16 = vmul.f32 %v7882_v47, %v11820_v10 }
 0x2d2   :  { %11800 = sst [smem:[#allocation73_spill]] %s8482_s25  ;;  %s8500_s25 = sld [smem:[#allocation12 + $0x39]]  ;;  %11819 = vst [vmem:[#allocation152_spill] sm:$0xff] %v8521_v57  ;;  %v11826_v8 = vstv %s11805_s18 }
 0x2d3   :  { %s11813_s21 = sld [smem:[#allocation78_spill]]  ;;  %s8514_s5 = sld [smem:[#allocation12 + $0x51]]  ;;  %11821 = vst [vmem:[#allocation153_spill] sm:$0xff] %v8526_v16  ;;  %v8537_v19 = vmul.f32 %v7882_v47, %v11826_v8  ;;  %v11828_v5 = vstv %s11806_s4 }
 0x2d4   :  { %11807 = sst [smem:[#allocation75_spill]] %s8498_s3  ;;  %s8516_s3 = sld [smem:[#allocation12 + $0x69]]  ;;  %v8542_v11 = vmul.f32 %v7882_v47, %v11828_v5 }
 0x2d5   :  { %11796 = sst [smem:[#allocation72_spill]] %s8468_s24  ;;  %s11822_s26 = sld [smem:[#allocation79_spill]]  ;;  %11827 = vst [vmem:[#allocation154_spill] sm:$0xff] %v8537_v19 }
 0x2d6   :  { %s11823_s7 = sld [smem:[#allocation80_spill]]  ;;  %11829 = vst [vmem:[#allocation155_spill] sm:$0xff] %v8542_v11  ;;  %s11830_s8 = sld [smem:[#allocation81_spill]]  ;;  %v11835_v9 = vstv %s11812_s20 }
 0x2d7   :  { %11802 = sst [smem:[#allocation74_spill]] %s8484_s27  ;;  %s8530_s0 = sld [smem:[#allocation12 + $0x81]]  ;;  %v8553_v24 = vmul.f32 %v7882_v47, %v11835_v9 }
 0x2d8   :  { %s11831_s17 = sld [smem:[#allocation82_spill]]  ;;  %s8546_s1 = sld [smem:[#allocation12 + $0xb1]] }
 0x2d9   :  { %11814 = sst [smem:[#allocation76_spill]] %s8514_s5  ;;  %s8532_s5 = sld [smem:[#allocation12 + $0x99]]  ;;  %11837 = vst [vmem:[#allocation156_spill] sm:$0xff] %v8553_v24  ;;  %v11838_v8 = vstv %s11813_s21 }
 0x2da   :  { %11816 = sst [smem:[#allocation77_spill]] %s8516_s3  ;;  %v8558_v20 = vmul.f32 %v7882_v47, %v11838_v8  ;;  %s11840_s4 = sld [smem:[#allocation83_spill]] }
 0x2db   :  { %s11841_s24 = sld [smem:[#allocation84_spill]]  ;;  %s8562_s11 = sld [smem:[#allocation12 + $0x2f]]  ;;  %v11845_v12 = vstv %s11822_s26 }
 0x2dc   :  { %11839 = vst [vmem:[#allocation157_spill] sm:$0xff] %v8558_v20  ;;  %v8569_v22 = vmul.f32 %v7890_v50, %v11845_v12  ;;  %v11848_v9 = vstv %s11823_s7  ;;  %s11850_s21 = sld [smem:[#allocation85_spill]]  ;;  %s11851_s27 = sld [smem:[#allocation86_spill]]  ;;  %v11855_v10 = vstv %s11830_s8 }
 0x2dd   :  { %11824 = sst [smem:[#allocation78_spill]] %s8530_s0  ;;  %v8574_v23 = vmul.f32 %v7890_v50, %v11848_v9  ;;  %s8578_s6 = sld [smem:[#allocation12 + $0xc]]  ;;  %v8585_v40 = vmul.f32 %v7890_v50, %v11855_v10 }
 0x2de   :  { %11832 = sst [smem:[#allocation80_spill]] %s8546_s1  ;;  %s8548_s0 = sld [smem:[#allocation12 + $0x17]]  ;;  %11847 = vst [vmem:[#allocation158_spill] sm:$0xff] %v8569_v22  ;;  %v11858_v12 = vstv %s11831_s17 }
 0x2df   :  { %11825 = sst [smem:[#allocation79_spill]] %s8532_s5  ;;  %s8564_s1 = sld [smem:[#allocation12 + $0x47]]  ;;  %11849 = vst [vmem:[#allocation159_spill] sm:$0xff] %v8574_v23  ;;  %11857 = vst [vmem:[#allocation160_spill] sm:$0xff] %v8585_v40  ;;  %v8590_v15 = vmul.f32 %v7890_v50, %v11858_v12 }
 0x2e0   :  { %s11860_s7 = sld [smem:[#allocation87_spill]]  ;;  %s11861_s15 = sld [smem:[#allocation88_spill]]  ;;  %v11863_v5 = vstv %s11840_s4 }
 0x2e1   :  { %11842 = sst [smem:[#allocation82_spill]] %s8562_s11  ;;  %s8580_s11 = sld [smem:[#allocation12 + $0x24]]  ;;  %11859 = vst [vmem:[#allocation161_spill] sm:$0xff] %v8590_v15  ;;  %v8601_v14 = vmul.f32 %v7890_v50, %v11863_v5  ;;  %v11866_v10 = vstv %s11841_s24 }
 0x2e2   :  { %s8594_s29 = sld [smem:[#allocation12 + $0x3c]]  ;;  %v8606_v2 = vmul.f32 %v7890_v50, %v11866_v10  ;;  %s11868_s17 = sld [smem:[#allocation89_spill]]  ;;  %v11872_v8 = vstv %s11850_s21  ;;  %v11874_v5 = vstv %s11851_s27 }
 0x2e3   :  { %11852 = sst [smem:[#allocation84_spill]] %s8578_s6  ;;  %s8596_s6 = sld [smem:[#allocation12 + $0x54]]  ;;  %11865 = vst [vmem:[#allocation162_spill] sm:$0xff] %v8601_v14  ;;  %v8617_v45 = vmul.f32 %v7890_v50, %v11872_v8  ;;  %v8622_v44 = vmul.f32 %v7890_v50, %v11874_v5 }
 0x2e4   :  { %11834 = sst [smem:[#allocation81_spill]] %s8548_s0  ;;  %11867 = vst [vmem:[#allocation163_spill] sm:$0xff] %v8606_v2  ;;  %s11869_s2 = sld [smem:[#allocation90_spill]] }
 0x2e5   :  { %11844 = sst [smem:[#allocation83_spill]] %s8564_s1  ;;  %11873 = vst [vmem:[#allocation164_spill] sm:$0xff] %v8617_v45  ;;  %11875 = vst [vmem:[#allocation165_spill] sm:$0xff] %v8622_v44  ;;  %s11877_s4 = sld [smem:[#allocation96_spill]] }
 0x2e6   :  { %s8610_s18 = sld [smem:[#allocation12 + $0x6c]]  ;;  %v11880_v9 = vstv %s11860_s7  ;;  %v11882_v8 = vstv %s11861_s15  ;;  %s11884_s27 = sld [smem:[#allocation97_spill]] }
 0x2e7   :  { %11854 = sst [smem:[#allocation85_spill]] %s8580_s11  ;;  %s11876_s24 = sld [smem:[#allocation93_spill]]  ;;  %v8633_v53 = vmul.f32 %v7896_v51, %v11880_v9  ;;  %v8638_v49 = vmul.f32 %v7896_v51, %v11882_v8 }
 0x2e8   :  { %11862 = sst [smem:[#allocation86_spill]] %s8594_s29  ;;  %s8612_s29 = sld [smem:[#allocation12 + $0x84]]  ;;  %v11887_v12 = vstv %s11868_s17 }
 0x2e9   :  { %s8626_s20 = sld [smem:[#allocation12 + $0x9c]]  ;;  %11881 = vst [vmem:[#allocation166_spill] sm:$0xff] %v8633_v53  ;;  %11883 = vst [vmem:[#allocation167_spill] sm:$0xff] %v8638_v49  ;;  %s11885_s21 = sld [smem:[#allocation99_spill]]  ;;  %v8649_v44 = vmul.f32 %v7896_v51, %v11887_v12 }
 0x2ea   :  { %s8628_s5 = sld [smem:[#allocation12 + $0xb4]]  ;;  %s8642_s26 = sld [smem:[#allocation12 + $0xf]]  ;;  %v11889_v9 = vstv %s11869_s2 }
 0x2eb   :  { %s8644_s0 = sld [smem:[#allocation12 + $0x27]]  ;;  %11888 = vst [vmem:[#allocation168_spill] sm:$0xff] %v8649_v44  ;;  %v8654_v53 = vmul.f32 %v7896_v51, %v11889_v9  ;;  %s11891_s15 = sld [smem:[#allocation100_spill]]  ;;  %v11896_v12 = vstv %s11877_s4 }
 0x2ec   :  { %11870 = sst [smem:[#allocation87_spill]] %s8610_s18  ;;  %s11892_s7 = sld [smem:[#allocation101_spill]]  ;;  %v8670_v44 = vmul.f32 %v7896_v51, %v11896_v12  ;;  %v11901_v5 = vstv %s11884_s27 }
 0x2ed   :  { %11890 = vst [vmem:[#allocation169_spill] sm:$0xff] %v8654_v53  ;;  %s8658_s8 = sld [smem:[#allocation12 + $0x3f]]  ;;  %v11894_v10 = vstv %s11876_s24  ;;  %s11898_s2 = sld [smem:[#allocation102_spill]]  ;;  %v8681_v53 = vmul.f32 %v7896_v51, %v11901_v5 }
 0x2ee   :  { %11871 = sst [smem:[#allocation88_spill]] %s8612_s29  ;;  %s8660_s28 = sld [smem:[#allocation12 + $0x57]]  ;;  %v8665_v49 = vmul.f32 %v7896_v51, %v11894_v10  ;;  %11897 = vst [vmem:[#allocation171_spill] sm:$0xff] %v8670_v44 }
 0x2ef   :  { %11878 = sst [smem:[#allocation89_spill]] %s8626_s20  ;;  %s8674_s17 = sld [smem:[#allocation12 + $0x6f]]  ;;  %11903 = vst [vmem:[#allocation172_spill] sm:$0xff] %v8681_v53  ;;  %v11904_v10 = vstv %s11885_s21 }
 0x2f0   :  { %11879 = sst [smem:[#allocation90_spill]] %s8628_s5  ;;  %11895 = vst [vmem:[#allocation170_spill] sm:$0xff] %v8665_v49  ;;  %s8676_s22 = sld [smem:[#allocation12 + $0x87]]  ;;  %v8686_v49 = vmul.f32 %v7902_v6, %v11904_v10 }
 0x2f1   :  { %11886 = sst [smem:[#allocation93_spill]] %s8642_s26  ;;  %s8690_s9 = sld [smem:[#allocation12 + $0x9f]]  ;;  %v11911_v8 = vstv %s11891_s15 }
 0x2f2   :  { %11906 = vst [vmem:[#allocation173_spill] sm:$0xff] %v8686_v49  ;;  %v8697_v44 = vmul.f32 %v7902_v6, %v11911_v8  ;;  %v11914_v5 = vstv %s11892_s7  ;;  %s11915_s21 = sld [smem:[#allocation74_spill]]  ;;  %s8707_s30 = sld [smem:[#allocation12 + $0x12]] }
 0x2f3   :  { %11893 = sst [smem:[#allocation96_spill]] %s8658_s8  ;;  %v8702_v53 = vmul.f32 %v7902_v6, %v11914_v5  ;;  %v11921_v9 = vstv %s11898_s2  ;;  %s8720_s16 = sld [smem:[#allocation12 + $0x42]]  ;;  %v2272_v5 = vpop.permute.xlu0 %2271 }
 0x2f4   :  { %11913 = vst [vmem:[#allocation174_spill] sm:$0xff] %v8697_v44  ;;  %s11919_s23 = sld [smem:[#allocation76_spill]]  ;;  %v8714_v8 = vmul.f32 %v7902_v6, %v11921_v9  ;;  %s8728_s12 = sld [smem:[#allocation12 + $0x72]]  ;;  %v2275_v9 = vpop.permute.xlu1 %2274 }
 0x2f5   :  { %11899 = sst [smem:[#allocation97_spill]] %s8674_s17  ;;  %s8692_s17 = sld [smem:[#allocation12 + $0xb7]]  ;;  %11916 = vst [vmem:[#allocation175_spill] sm:$0xff] %v8702_v53  ;;  %v2276_v10 = vsel %vm2144_vm1, %v7868_v39, %v2275_v9 }
 0x2f6   :  { %11900 = sst [smem:[#allocation99_spill]] %s8676_s22  ;;  %s11917_s22 = sld [smem:[#allocation75_spill]]  ;;  %11922 = vst [vmem:[#allocation176_spill] sm:$0xff] %v8714_v8  ;;  %v2273_v8 = vsel %vm2143_vm0, %v7868_v39, %v2272_v5 }
 0x2f7   :  { %11908 = sst [smem:[#allocation100_spill]] %s8690_s9  ;;  %s8709_s9 = sld [smem:[#allocation12 + $0x2a]]  ;;  %v2293_v33 = vpop.permute.xlu0 %2292 }
 0x2f8   :  { %11918 = sst [smem:[#allocation102_spill]] %s8707_s30  ;;  %s8722_s30 = sld [smem:[#allocation12 + $0x5a]]  ;;  %v2278_v22 = vpop.permute.xlu1 %2277 }
 0x2f9   :  { %s11928_s2 = sld [smem:[#allocation84_spill]]  ;;  %s8730_s24 = sld [smem:[#allocation12 + $0x8a]] }
 0x2fa   :  { %11930 = sst [smem:[#allocation75_spill]] %s8728_s12  ;;  %s8740_s27 = sld [smem:[#allocation12 + $0xa2]] }
 0x2fb   :  { %11910 = sst [smem:[#allocation101_spill]] %s8692_s17  ;;  %s11934_s10 = sld [smem:[#allocation97_spill]] }
 0x2fc   :  { %s8742_s13 = sld [smem:[#allocation12 + $0xba]]  ;;  %s8748_s4 = sld [smem:[#allocation12 + $0x15]] }
 0x2fd   :  { %11920 = sst [smem:[#allocation74_spill]] %s8709_s9  ;;  %s11935_s7 = sld [smem:[#allocation99_spill]] }
 0x2fe   :  { %s8750_s17 = sld [smem:[#allocation12 + $0x2d]]  ;;  %s11936_s14 = sld [smem:[#allocation100_spill]] }
 0x2ff   :  { %11931 = sst [smem:[#allocation76_spill]] %s8730_s24  ;;  %s11938_s15 = sld [smem:[#allocation102_spill]] }
 0x300   :  { %11932 = sst [smem:[#allocation84_spill]] %s8740_s27  ;;  %s11940_s9 = sld [smem:[#allocation113_spill]] }
 0x301   :  { %s8756_s1 = sld [smem:[#allocation12 + $0x45]]  ;;  %s11941_s11 = sld [smem:[#allocation114_spill]] }
 0x302   :  { %11933 = sst [smem:[#allocation177_spill]] %s8742_s13  ;;  %s11942_s29 = sld [smem:[#allocation115_spill]] }
 0x303   :  { %s11943_s20 = sld [smem:[#allocation116_spill]]  ;;  %s11944_s18 = sld [smem:[#allocation117_spill]] }
 0x304   :  { %s11945_s5 = sld [smem:[#allocation118_spill]]  ;;  %s11946_s26 = sld [smem:[#allocation119_spill]] }
 0x305   :  { %s11947_s8 = sld [smem:[#allocation105_spill]]  ;;  %s11950_s19 = sld [smem:[#allocation106_spill]] }
 0x306   :  { %v11948_v45 = vstv %s11940_s9  ;;  %s11953_s3 = sld [smem:[#allocation120_spill]]  ;;  %s11955_s24 = sld [smem:[#allocation107_spill]] }
 0x307   :  { %v2321_v14 = vmul.f32 %v11948_v45, %v2273_v8  ;;  %v11949_v12 = vstv %s11941_s11  ;;  %s11957_s12 = sld [smem:[#allocation108_spill]]  ;;  %s11960_s9 = sld [smem:[#allocation109_spill]] }
 0x308   :  { %v2420_v15 = vmul.f32 %v11949_v12, %v2273_v8  ;;  %v11951_v53 = vstv %s11942_s29  ;;  %s11961_s29 = sld [smem:[#allocation110_spill]]  ;;  %s11963_s11 = sld [smem:[#allocation121_spill]] }
 0x309   :  { %v2519_v6 = vmul.f32 %v11951_v53, %v2273_v8  ;;  %v11952_v44 = vstv %s11943_s20  ;;  %v11954_v23 = vstv %s11944_s18  ;;  %v2325_v53 = vadd.f32 %v8251_v17, %v2321_v14  ;;  %s11966_s18 = sld [smem:[#allocation111_spill]]  ;;  %s8810_s20 = sld [smem:[#allocation12 + $0x5d]] }
 0x30a   :  { %v2618_v2 = vmul.f32 %v11952_v44, %v2273_v8  ;;  %v2717_v49 = vmul.f32 %v11954_v23, %v2273_v8  ;;  %v11956_v20 = vstv %s11945_s5  ;;  %v11958_v9 = vstv %s11946_s26  ;;  %s11965_s5 = sld [smem:[#allocation122_spill]]  ;;  %s8812_s26 = sld [smem:[#allocation12 + $0x75]] }
 0x30b   :  { %v2816_v39 = vmul.f32 %v11956_v20, %v2273_v8  ;;  %v2915_v24 = vmul.f32 %v11958_v9, %v2273_v8  ;;  %v11959_v19 = vstv %s11947_s8  ;;  %v2424_v44 = vadd.f32 %v8256_v13, %v2420_v15  ;;  %s8820_s8 = sld [smem:[#allocation13]]  ;;  %s11975_s13 = sld [smem:[#allocation125_spill]] }
 0x30c   :  { %v2328_v12 = vmul.f32 %v11959_v19, %v2276_v10  ;;  %v11962_v16 = vstv %s11950_s19  ;;  %v2523_v5 = vadd.f32 %v8267_v62, %v2519_v6  ;;  %v11964_v57 = vstv %s11953_s3  ;;  %s11970_s19 = sld [smem:[#allocation123_spill]]  ;;  %s11971_s3 = sld [smem:[#allocation124_spill]] }
 0x30d   :  { %v2427_v40 = vmul.f32 %v11962_v16, %v2276_v10  ;;  %v3014_v20 = vmul.f32 %v11964_v57, %v2273_v8  ;;  %v2279_v9 = vsel %vm2143_vm0, %v7874_v30, %v2278_v22  ;;  %v11968_v19 = vstv %s11955_s24  ;;  %s11976_s24 = sld [smem:[#allocation126_spill]]  ;;  %s11980_s27 = sld [smem:[#allocation112_spill]] }
 0x30e   :  { %v2526_v14 = vmul.f32 %v11968_v19, %v2276_v10  ;;  %v11969_v15 = vstv %s11957_s12  ;;  %v2622_v13 = vadd.f32 %v8272_v4, %v2618_v2  ;;  %v2721_v6 = vadd.f32 %v8277_v21, %v2717_v49  ;;  %s11978_s12 = sld [smem:[#allocation127_spill]] }
 0x30f   :  { %11967 = sst [smem:[#allocation97_spill]] %s8810_s20  ;;  %v2625_v16 = vmul.f32 %v11969_v15, %v2276_v10  ;;  %v11973_v62 = vstv %s11960_s9  ;;  %v11974_v22 = vstv %s11961_s29  ;;  %v2820_v8 = vadd.f32 %v8287_v25, %v2816_v39  ;;  %s11985_s9 = sld [smem:[#allocation128_spill]] }
 0x310   :  { %v2724_v17 = vmul.f32 %v11973_v62, %v2276_v10  ;;  %v2823_v57 = vmul.f32 %v11974_v22, %v2276_v10  ;;  %v2919_v23 = vadd.f32 %v8292_v26, %v2915_v24  ;;  %v2329_v19 = vadd.f32 %v2328_v12, %v2325_v53  ;;  %s11989_s29 = sld [smem:[#allocation129_spill]] }
 0x311   :  { %11972 = sst [smem:[#allocation99_spill]] %s8820_s8  ;;  %v11977_v11 = vstv %s11963_s11  ;;  %v2428_v2 = vadd.f32 %v2427_v40, %v2424_v44  ;;  %v11979_v4 = vstv %s11965_s5  ;;  %v11981_v21 = vstv %s11966_s18  ;;  %v2281_v40 = vpop.permute.xlu1 %2280  ;;  %s11990_s11 = sld [smem:[#allocation137_spill]] }
 0x312   :  { %v2332_v15 = vmul.f32 %v11977_v11, %v2279_v9  ;;  %v2431_v49 = vmul.f32 %v11979_v4, %v2279_v9  ;;  %v2922_v45 = vmul.f32 %v11981_v21, %v2276_v10  ;;  %v3018_v62 = vadd.f32 %v8297_v28, %v3014_v20  ;;  %s11992_s5 = sld [smem:[#allocation130_spill]]  ;;  %s11993_s18 = sld [smem:[#allocation131_spill]] }
 0x313   :  { %v2527_v35 = vadd.f32 %v2526_v14, %v2523_v5  ;;  %v11982_v3 = vstv %s11970_s19  ;;  %v2626_v25 = vadd.f32 %v2625_v16, %v2622_v13  ;;  %v11983_v24 = vstv %s11971_s3  ;;  %s11996_s19 = sld [smem:[#allocation132_spill]]  ;;  %s11997_s3 = sld [smem:[#allocation133_spill]] }
 0x314   :  { %v2530_v22 = vmul.f32 %v11982_v3, %v2279_v9  ;;  %v2629_v26 = vmul.f32 %v11983_v24, %v2279_v9  ;;  %v2725_v39 = vadd.f32 %v2724_v17, %v2721_v6  ;;  %v11984_v11 = vstv %s11975_s13  ;;  %s11991_s13 = sld [smem:[#allocation138_spill]]  ;;  %s12028_s8 = sld [smem:[#allocation50_spill]] }
 0x315   :  { %v2728_v12 = vmul.f32 %v11984_v11, %v2279_v9  ;;  %v2824_v53 = vadd.f32 %v2823_v57, %v2820_v8  ;;  %v11986_v44 = vstv %s11976_s24  ;;  %v2923_v21 = vadd.f32 %v2922_v45, %v2919_v23  ;;  %s11998_s24 = sld [smem:[#allocation134_spill]]  ;;  %v2284_v11 = vpop.permute.xlu1 %2283 }
 0x316   :  { %v2827_v4 = vmul.f32 %v11986_v44, %v2279_v9  ;;  %v11987_v28 = vstv %s11978_s12  ;;  %v11988_v20 = vstv %s11980_s27  ;;  %v2333_v14 = vadd.f32 %v2332_v15, %v2329_v19  ;;  %s11994_s27 = sld [smem:[#allocation139_spill]]  ;;  %s12000_s12 = sld [smem:[#allocation135_spill]] }
 0x317   :  { %v2926_v5 = vmul.f32 %v11987_v28, %v2279_v9  ;;  %v3021_v3 = vmul.f32 %v11988_v20, %v2276_v10  ;;  %v2432_v16 = vadd.f32 %v2431_v49, %v2428_v2  ;;  %v2294_v13 = vsel %vm2144_vm1, %v7876_v7, %v2293_v33 }
 0x318   :  { %v2531_v6 = vadd.f32 %v2530_v22, %v2527_v35  ;;  %v2282_v17 = vsel %vm2144_vm1, %v7874_v30, %v2281_v40  ;;  %v2700_v45 = vstv %s8810_s20  ;;  %v2630_v57 = vadd.f32 %v2629_v26, %v2626_v25  ;;  %s12001_s20 = sld [smem:[#allocation136_spill]] }
 0x319   :  { %v3022_v10 = vadd.f32 %v3021_v3, %v3018_v62  ;;  %v11995_v8 = vstv %s11985_s9  ;;  %v2729_v2 = vadd.f32 %v2728_v12, %v2725_v39  ;;  %v2828_v33 = vadd.f32 %v2827_v4, %v2824_v53  ;;  %s12005_s9 = sld [smem:[#allocation140_spill]] }
 0x31a   :  { %v3025_v19 = vmul.f32 %v11995_v8, %v2279_v9  ;;  %v2927_v35 = vadd.f32 %v2926_v5, %v2923_v21  ;;  %v11999_v49 = vstv %s11989_s29  ;;  %v2337_v30 = vadd.f32 %v8315_v31, %v2333_v14  ;;  %s12008_s29 = sld [smem:[#allocation141_spill]]  ;;  %v2299_v31 = vpop.permute.xlu0 %2298 }
 0x31b   :  { %v8860_v22 = vmul.f32 %v11999_v49, %v2294_v13  ;;  %v12002_v24 = vstv %s11990_s11  ;;  %v2436_v62 = vadd.f32 %v8320_v36, %v2432_v16  ;;  %v12003_v26 = vstv %s11991_s13  ;;  %s12009_s11 = sld [smem:[#allocation142_spill]]  ;;  %s12012_s13 = sld [smem:[#allocation143_spill]] }
 0x31c   :  { %v2340_v25 = vmul.f32 %v12002_v24, %v2282_v17  ;;  %v2439_v9 = vmul.f32 %v12003_v26, %v2282_v17  ;;  %v12004_v40 = vstv %s11992_s5  ;;  %v12006_v12 = vstv %s11993_s18  ;;  %s12014_s5 = sld [smem:[#allocation43_spill]]  ;;  %s12016_s18 = sld [smem:[#allocation44_spill]] }
 0x31d   :  { %v8870_v39 = vmul.f32 %v12004_v40, %v2294_v13  ;;  %v8874_v53 = vmul.f32 %v12006_v12, %v2294_v13  ;;  %v2535_v44 = vadd.f32 %v8325_v54, %v2531_v6  ;;  %v12007_v4 = vstv %s11994_s27  ;;  %s12018_s27 = sld [smem:[#allocation144_spill]] }
 0x31e   :  { %v2538_v21 = vmul.f32 %v12007_v4, %v2282_v17  ;;  %v3026_v28 = vadd.f32 %v3025_v19, %v3022_v10  ;;  %v12010_v5 = vstv %s11996_s19  ;;  %v12011_v20 = vstv %s11997_s3  ;;  %s12019_s19 = sld [smem:[#allocation45_spill]]  ;;  %s12020_s3 = sld [smem:[#allocation46_spill]] }
 0x31f   :  { %v8881_v36 = vmul.f32 %v12010_v5, %v2294_v13  ;;  %v8885_v3 = vmul.f32 %v12011_v20, %v2294_v13  ;;  %v12013_v14 = vstv %s11998_s24  ;;  %v12015_v8 = vstv %s12000_s12  ;;  %s12022_s24 = sld [smem:[#allocation47_spill]]  ;;  %s12026_s12 = sld [smem:[#allocation49_spill]] }
 0x320   :  { %v8889_v16 = vmul.f32 %v12013_v14, %v2294_v13  ;;  %v8893_v54 = vmul.f32 %v12015_v8, %v2294_v13  ;;  %v12017_v6 = vstv %s12001_s20  ;;  %v2634_v10 = vadd.f32 %v8330_v18, %v2630_v57  ;;  %s12024_s20 = sld [smem:[#allocation48_spill]] }
 0x321   :  { %v8897_v49 = vmul.f32 %v12017_v6, %v2294_v13  ;;  %v2285_v19 = vsel %vm2143_vm0, %v7888_v48, %v2284_v11  ;;  %v2341_v24 = vadd.f32 %v2340_v25, %v2337_v30  ;;  %v2440_v26 = vadd.f32 %v2439_v9, %v2436_v62 }
 0x322   :  { %v12021_v40 = vstv %s12005_s9  ;;  %v2733_v4 = vadd.f32 %v8341_v38, %v2729_v2  ;;  %v2539_v5 = vadd.f32 %v2538_v21, %v2535_v44  ;;  %v12023_v20 = vstv %s12008_s29  ;;  %s12034_s9 = sld [smem:[#allocation145_spill]]  ;;  %s12036_s29 = sld [smem:[#allocation146_spill]] }
 0x323   :  { %v2637_v12 = vmul.f32 %v12021_v40, %v2282_v17  ;;  %v2736_v13 = vmul.f32 %v12023_v20, %v2282_v17  ;;  %v2832_v14 = vadd.f32 %v8346_v41, %v2828_v33  ;;  %v12025_v18 = vstv %s12009_s11  ;;  %v2305_v33 = vpop.permute.xlu0 %2304  ;;  %s12039_s11 = sld [smem:[#allocation147_spill]] }
 0x324   :  { %v2835_v57 = vmul.f32 %v12025_v18, %v2282_v17  ;;  %v2931_v8 = vadd.f32 %v8357_v29, %v2927_v35  ;;  %v12027_v11 = vstv %s12012_s13  ;;  %v12029_v25 = vstv %s12014_s5  ;;  %s12041_s13 = sld [smem:[#allocation148_spill]]  ;;  %s12042_s5 = sld [smem:[#allocation59_spill]] }
 0x325   :  { %v2934_v30 = vmul.f32 %v12027_v11, %v2282_v17  ;;  %v2344_v62 = vmul.f32 %v12029_v25, %v2285_v19  ;;  %v12030_v9 = vstv %s12016_s18  ;;  %v3030_v38 = vadd.f32 %v8362_v42, %v3026_v28  ;;  %s12043_s18 = sld [smem:[#allocation60_spill]] }
 0x326   :  { %v2443_v6 = vmul.f32 %v12030_v9, %v2285_v19  ;;  %v12031_v2 = vstv %s12018_s27  ;;  %v12032_v21 = vstv %s12019_s19  ;;  %v12033_v20 = vstv %s12020_s3  ;;  %s12045_s27 = sld [smem:[#allocation61_spill]]  ;;  %s12048_s19 = sld [smem:[#allocation63_spill]] }
 0x327   :  { %v3033_v44 = vmul.f32 %v12031_v2, %v2282_v17  ;;  %v2542_v40 = vmul.f32 %v12032_v21, %v2285_v19  ;;  %v2641_v41 = vmul.f32 %v12033_v20, %v2285_v19  ;;  %v2638_v18 = vadd.f32 %v2637_v12, %v2634_v10  ;;  %v2287_v20 = vpop.permute.xlu1 %2286  ;;  %s12051_s3 = sld [smem:[#allocation64_spill]] }
 0x328   :  { %v2300_v29 = vsel %vm2144_vm1, %v7882_v47, %v2299_v31  ;;  %v12035_v35 = vstv %s12022_s24  ;;  %v12037_v25 = vstv %s12024_s20  ;;  %v2737_v15 = vadd.f32 %v2736_v13, %v2733_v4  ;;  %s12052_s24 = sld [smem:[#allocation65_spill]]  ;;  %s12054_s20 = sld [smem:[#allocation66_spill]] }
 0x329   :  { %v2740_v11 = vmul.f32 %v12035_v35, %v2285_v19  ;;  %v2839_v9 = vmul.f32 %v12037_v25, %v2285_v19  ;;  %v2836_v42 = vadd.f32 %v2835_v57, %v2832_v14  ;;  %v12038_v28 = vstv %s12026_s12  ;;  %s12055_s12 = sld [smem:[#allocation39_spill]] }
 0x32a   :  { %v2938_v17 = vmul.f32 %v12038_v28, %v2285_v19  ;;  %v12040_v2 = vstv %s12028_s8  ;;  %v2935_v23 = vadd.f32 %v2934_v30, %v2931_v8  ;;  %v2345_v10 = vadd.f32 %v2344_v62, %v2341_v24  ;;  %s12047_s8 = sld [smem:[#allocation62_spill]] }
 0x32b   :  { %v3037_v21 = vmul.f32 %v12040_v2, %v2285_v19  ;;  %v2444_v12 = vadd.f32 %v2443_v6, %v2440_v26  ;;  %v8939_v31 = vsel %vm2144_vm1, %v7890_v50, %v2305_v33  ;;  %v3034_v35 = vadd.f32 %v3033_v44, %v3030_v38 }
 0x32c   :  { %v12044_v4 = vstv %s12034_s9  ;;  %v2543_v14 = vadd.f32 %v2542_v40, %v2539_v5  ;;  %v2642_v57 = vadd.f32 %v2641_v41, %v2638_v18  ;;  %v12046_v25 = vstv %s12036_s29  ;;  %s12057_s9 = sld [smem:[#allocation40_spill]]  ;;  %s12058_s29 = sld [smem:[#allocation41_spill]] }
 0x32d   :  { %v8943_v13 = vmul.f32 %v12044_v4, %v2300_v29  ;;  %v8947_v19 = vmul.f32 %v12046_v25, %v2300_v29  ;;  %v2741_v24 = vadd.f32 %v2740_v11, %v2737_v15  ;;  %v2840_v8 = vadd.f32 %v2839_v9, %v2836_v42 }
 0x32e   :  { %v2288_v26 = vsel %vm2144_vm1, %v7888_v48, %v2287_v20  ;;  %v12049_v30 = vstv %s12039_s11  ;;  %v12050_v6 = vstv %s12041_s13  ;;  %v2939_v5 = vadd.f32 %v2938_v17, %v2935_v23  ;;  %s12060_s11 = sld [smem:[#allocation42_spill]]  ;;  %s12062_s13 = sld [smem:[#allocation51_spill]]  ;;  %v2290_v17 = vpop.permute.xlu1 %2289 }
 0x32f   :  { %v8954_v62 = vmul.f32 %v12049_v30, %v2300_v29  ;;  %v8958_v38 = vmul.f32 %v12050_v6, %v2300_v29  ;;  %v3038_v44 = vadd.f32 %v3037_v21, %v3034_v35  ;;  %v2349_v40 = vadd.f32 %v8373_v37, %v2345_v10 }
 0x330   :  { %v12053_v41 = vstv %s12042_s5  ;;  %v2448_v33 = vadd.f32 %v8380_v27, %v2444_v12  ;;  %v12056_v18 = vstv %s12043_s18  ;;  %v2547_v11 = vadd.f32 %v8389_v0, %v2543_v14  ;;  %s12070_s5 = sld [smem:[#allocation77_spill]]  ;;  %s12072_s18 = sld [smem:[#allocation78_spill]] }
 0x331   :  { %v2352_v15 = vmul.f32 %v12053_v41, %v2288_v26  ;;  %v2451_v48 = vmul.f32 %v12056_v18, %v2288_v26  ;;  %v12059_v9 = vstv %s12045_s27  ;;  %v2646_v23 = vadd.f32 %v8396_v56, %v2642_v57  ;;  %s12074_s27 = sld [smem:[#allocation79_spill]] }
 0x332   :  { %v2550_v42 = vmul.f32 %v12059_v9, %v2288_v26  ;;  %v12061_v28 = vstv %s12047_s8  ;;  %v2745_v2 = vadd.f32 %v8405_v43, %v2741_v24  ;;  %v12063_v21 = vstv %s12048_s19  ;;  %s12075_s8 = sld [smem:[#allocation80_spill]]  ;;  %s12076_s19 = sld [smem:[#allocation52_spill]] }
 0x333   :  { %v2649_v37 = vmul.f32 %v12061_v28, %v2288_v26  ;;  %v2748_v20 = vmul.f32 %v12063_v21, %v2288_v26  ;;  %v2844_v27 = vadd.f32 %v8412_v58, %v2840_v8  ;;  %v12064_v10 = vstv %s12051_s3  ;;  %s12082_s3 = sld [smem:[#allocation53_spill]] }
 0x334   :  { %v2847_v12 = vmul.f32 %v12064_v10, %v2288_v26  ;;  %v2943_v35 = vadd.f32 %v8421_v46, %v2939_v5  ;;  %v12065_v0 = vstv %s12052_s24  ;;  %v3042_v14 = vadd.f32 %v8428_v60, %v3038_v44  ;;  %s12084_s24 = sld [smem:[#allocation54_spill]] }
 0x335   :  { %v2946_v4 = vmul.f32 %v12065_v0, %v2288_v26  ;;  %v12066_v25 = vstv %s12054_s20  ;;  %v12067_v57 = vstv %s12055_s12  ;;  %v12068_v43 = vstv %s12057_s9  ;;  %s12087_s20 = sld [smem:[#allocation55_spill]]  ;;  %s12097_s12 = sld [smem:[#allocation86_spill]] }
 0x336   :  { %v3045_v56 = vmul.f32 %v12066_v25, %v2288_v26  ;;  %v8986_v30 = vmul.f32 %v12067_v57, %v2300_v29  ;;  %v8990_v24 = vmul.f32 %v12068_v43, %v2300_v29  ;;  %v12069_v58 = vstv %s12058_s29  ;;  %s12100_s9 = sld [smem:[#allocation87_spill]]  ;;  %s12102_s29 = sld [smem:[#allocation88_spill]] }
 0x337   :  { %v8994_v8 = vmul.f32 %v12069_v58, %v2300_v29  ;;  %v2291_v46 = vsel %vm2143_vm0, %v7876_v7, %v2290_v17  ;;  %v12071_v60 = vstv %s12060_s11  ;;  %v12073_v6 = vstv %s12062_s13  ;;  %s12106_s11 = sld [smem:[#allocation89_spill]]  ;;  %s12111_s13 = sld [smem:[#allocation93_spill]] }
 0x338   :  { %v9001_v26 = vmul.f32 %v12071_v60, %v2300_v29  ;;  %v9006_v5 = vmul.f32 %v12073_v6, %v8939_v31  ;;  %v2353_v44 = vadd.f32 %v2352_v15, %v2349_v40  ;;  %v2452_v41 = vadd.f32 %v2451_v48, %v2448_v33 }
 0x339   :  { %v2551_v18 = vadd.f32 %v2550_v42, %v2547_v11  ;;  %v2650_v9 = vadd.f32 %v2649_v37, %v2646_v23  ;;  %v2749_v28 = vadd.f32 %v2748_v20, %v2745_v2  ;;  %v2848_v21 = vadd.f32 %v2847_v12, %v2844_v27 }
 0x33a   :  { %v2947_v10 = vadd.f32 %v2946_v4, %v2943_v35  ;;  %v3046_v0 = vadd.f32 %v3045_v56, %v3042_v14  ;;  %v12077_v7 = vstv %s11915_s21  ;;  %v12078_v25 = vstv %s11917_s22  ;;  %s12088_s21 = sld [smem:[#allocation56_spill]]  ;;  %s12091_s22 = sld [smem:[#allocation58_spill]]  ;;  %v2311_v56 = vpop.permute.xlu0 %2310 }
 0x33b   :  { %v2356_v17 = vmul.f32 %v12077_v7, %v2291_v46  ;;  %v2455_v29 = vmul.f32 %v12078_v25, %v2291_v46  ;;  %v12079_v57 = vstv %s8500_s25  ;;  %v12080_v58 = vstv %s11919_s23  ;;  %s12089_s25 = sld [smem:[#allocation57_spill]]  ;;  %s12094_s23 = sld [smem:[#allocation85_spill]] }
 0x33c   :  { %v2554_v43 = vmul.f32 %v12079_v57, %v2291_v46  ;;  %v2653_v60 = vmul.f32 %v12080_v58, %v2291_v46  ;;  %v12081_v6 = vstv %s12070_s5  ;;  %v12083_v15 = vstv %s12072_s18  ;;  %s12148_s5 = sld [smem:[#allocation70_spill]]  ;;  %s12150_s18 = sld [smem:[#allocation71_spill]] }
 0x33d   :  { %v2752_v40 = vmul.f32 %v12081_v6, %v2291_v46  ;;  %v2851_v33 = vmul.f32 %v12083_v15, %v2291_v46  ;;  %v2357_v48 = vadd.f32 %v2356_v17, %v2353_v44  ;;  %v2456_v11 = vadd.f32 %v2455_v29, %v2452_v41  ;;  %v12101_v15 = vld [vmem:[#allocation149_spill] sm:$0xff] }
 0x33e   :  { %v12085_v42 = vstv %s12074_s27  ;;  %v12086_v37 = vstv %s12075_s8  ;;  %v2555_v20 = vadd.f32 %v2554_v43, %v2551_v18  ;;  %v2654_v27 = vadd.f32 %v2653_v60, %v2650_v9  ;;  %s12153_s27 = sld [smem:[#allocation76_spill]]  ;;  %s12164_s8 = sld [smem:[#allocation82_spill]] }
 0x33f   :  { %v2950_v23 = vmul.f32 %v12085_v42, %v2291_v46  ;;  %v3049_v2 = vmul.f32 %v12086_v37, %v2291_v46  ;;  %v2753_v12 = vadd.f32 %v2752_v40, %v2749_v28  ;;  %v2852_v35 = vadd.f32 %v2851_v33, %v2848_v21  ;;  %v2296_v21 = vpop.permute.xlu1 %2295 }
 0x340   :  { %v12090_v4 = vstv %s12076_s19  ;;  %v2361_v44 = vadd.f32 %v8441_v61, %v2357_v48  ;;  %v12092_v17 = vstv %s12082_s3  ;;  %v12093_v46 = vstv %s12084_s24  ;;  %s12165_s19 = sld [smem:[#allocation84_spill]]  ;;  %s9201_s3 = sld [smem:[#allocation12 + $0x5f]] }
 0x341   :  { %v9027_v14 = vmul.f32 %v12090_v4, %v8939_v31  ;;  %v2951_v41 = vadd.f32 %v2950_v23, %v2947_v10  ;;  %v3050_v7 = vadd.f32 %v3049_v2, %v3046_v0  ;;  %v9033_v25 = vmul.f32 %v12092_v17, %v8939_v31  ;;  %s9205_s24 = sld [smem:[#allocation12 + $0x8d]] }
 0x342   :  { %v9038_v18 = vmul.f32 %v12093_v46, %v8939_v31  ;;  %v2460_v9 = vadd.f32 %v8446_v63, %v2456_v11  ;;  %v2559_v28 = vadd.f32 %v8457_v59, %v2555_v20  ;;  %v12095_v29 = vstv %s12087_s20  ;;  %s9376_s20 = sld [smem:[#allocation15 + $0x79]] }
 0x343   :  { %v9045_v61 = vmul.f32 %v12095_v29, %v8939_v31  ;;  %v12096_v10 = vstv %s12088_s21  ;;  %v2658_v57 = vadd.f32 %v8462_v1, %v2654_v27  ;;  %v2757_v43 = vadd.f32 %v8473_v32, %v2753_v12  ;;  %v2302_v46 = vpop.permute.xlu1 %2301  ;;  %s9228_s21 = sld [smem:[#allocation12 + $0xbc]] }
 0x344   :  { %v9050_v0 = vmul.f32 %v12096_v10, %v8939_v31  ;;  %v12098_v63 = vstv %s12089_s25  ;;  %v12099_v59 = vstv %s12091_s22  ;;  %v9067_v6 = vsel %vm2144_vm1, %v7896_v51, %v2311_v56  ;;  %s12176_s25 = sld [smem:[#allocation177_spill]]  ;;  %s9230_s22 = sld [smem:[#allocation12 + $0x77]] }
 0x345   :  { %v9057_v58 = vmul.f32 %v12098_v63, %v8939_v31  ;;  %v9062_v60 = vmul.f32 %v12099_v59, %v8939_v31  ;;  %v2856_v40 = vadd.f32 %v8478_v34, %v2852_v35  ;;  %v2955_v1 = vadd.f32 %v8489_v52, %v2951_v41 }
 0x346   :  { %v3054_v32 = vadd.f32 %v12101_v15, %v3050_v7  ;;  %v2297_v33 = vsel %vm2143_vm0, %v7882_v47, %v2296_v21  ;;  %v2365_v31 = vadd.f32 %v8860_v22, %v2361_v44  ;;  %v12103_v48 = vstv %s11928_s2  ;;  %s12109_s2 = sld [smem:[#allocation90_spill]]  ;;  %v12118_v15 = vld [vmem:[#allocation154_spill] sm:$0xff] }
 0x347   :  { %v2368_v11 = vmul.f32 %v12103_v48, %v2297_v33  ;;  %v2464_v42 = vadd.f32 %v8870_v39, %v2460_v9  ;;  %v12104_v23 = vstv %s12094_s23  ;;  %v2563_v2 = vadd.f32 %v8874_v53, %v2559_v28  ;;  %v12113_v28 = vld [vmem:[#allocation151_spill] sm:$0xff]  ;;  %s9238_s23 = sld [smem:[#allocation12 + $0xa5]] }
 0x348   :  { %v2467_v37 = vmul.f32 %v12104_v23, %v2297_v33  ;;  %v12105_v34 = vstv %s12097_s12  ;;  %v2662_v52 = vadd.f32 %v8881_v36, %v2658_v57  ;;  %v12107_v27 = vstv %s8596_s6  ;;  %v12112_v36 = vld [vmem:[#allocation150_spill] sm:$0xff]  ;;  %v12115_v57 = vld [vmem:[#allocation152_spill] sm:$0xff]  ;;  %s12117_s6 = sld [smem:[#allocation96_spill]]  ;;  %s12181_s12 = sld [smem:[#allocation99_spill]] }
 0x349   :  { %v2566_v20 = vmul.f32 %v12105_v34, %v2297_v33  ;;  %v2665_v12 = vmul.f32 %v12107_v27, %v2297_v33  ;;  %v2761_v47 = vadd.f32 %v8885_v3, %v2757_v43  ;;  %v2369_v35 = vadd.f32 %v2368_v11, %v2365_v31  ;;  %12208 = sst [smem:[#allocation116_spill]] %s9376_s20 }
 0x34a   :  { %v2468_v4 = vadd.f32 %v2467_v37, %v2464_v42  ;;  %v12108_v22 = vstv %s12100_s9  ;;  %v2860_v44 = vadd.f32 %v8889_v16, %v2856_v40  ;;  %v12110_v7 = vstv %s12102_s29  ;;  %v12116_v16 = vld [vmem:[#allocation153_spill] sm:$0xff]  ;;  %v12120_v42 = vld [vmem:[#allocation155_spill] sm:$0xff]  ;;  %s9249_s9 = sld [smem:[#allocation13 + $0x3]]  ;;  %s12186_s29 = sld [smem:[#allocation73_spill]] }
 0x34b   :  { %v2764_v56 = vmul.f32 %v12108_v22, %v2297_v33  ;;  %v2567_v39 = vadd.f32 %v2566_v20, %v2563_v2  ;;  %v2666_v41 = vadd.f32 %v2665_v12, %v2662_v52  ;;  %v2863_v53 = vmul.f32 %v12110_v7, %v2297_v33 }
 0x34c   :  { %v2959_v17 = vadd.f32 %v8893_v54, %v2955_v1  ;;  %v2373_v9 = vadd.f32 %v12112_v36, %v2369_v35  ;;  %v2472_v21 = vadd.f32 %v12113_v28, %v2468_v4  ;;  %v12114_v29 = vstv %s12106_s11  ;;  %v2308_v28 = vpop.permute.xlu1 %2307  ;;  %s12187_s11 = sld [smem:[#allocation98_spill]] }
 0x34d   :  { %v2765_v3 = vadd.f32 %v2764_v56, %v2761_v47  ;;  %v2962_v10 = vmul.f32 %v12114_v29, %v2297_v33  ;;  %v2571_v43 = vadd.f32 %v12115_v57, %v2567_v39  ;;  %v2670_v63 = vadd.f32 %v12116_v16, %v2666_v41  ;;  %v12134_v16 = vld [vmem:[#allocation160_spill] sm:$0xff] }
 0x34e   :  { %v2864_v59 = vadd.f32 %v2863_v53, %v2860_v44  ;;  %v3058_v40 = vadd.f32 %v8897_v49, %v3054_v32  ;;  %v12119_v31 = vstv %s12109_s2  ;;  %v2303_v11 = vsel %vm2143_vm0, %v7890_v50, %v2302_v46  ;;  %v12122_v49 = vld [vmem:[#allocation156_spill] sm:$0xff]  ;;  %v12126_v44 = vld [vmem:[#allocation157_spill] sm:$0xff]  ;;  %s9255_s2 = sld [smem:[#allocation12 + $0x8f]] }
 0x34f   :  { %v2769_v54 = vadd.f32 %v12118_v15, %v2765_v3  ;;  %v2963_v1 = vadd.f32 %v2962_v10, %v2959_v17  ;;  %v3061_v48 = vmul.f32 %v12119_v31, %v2297_v33  ;;  %v2377_v37 = vadd.f32 %v8943_v13, %v2373_v9  ;;  %v2317_v13 = vpop.permute.xlu0 %2316  ;;  %v12128_v17 = vld [vmem:[#allocation158_spill] sm:$0xff] }
 0x350   :  { %v2868_v23 = vadd.f32 %v12120_v42, %v2864_v59  ;;  %v12121_v2 = vstv %s12111_s13  ;;  %v2476_v20 = vadd.f32 %v8947_v19, %v2472_v21  ;;  %v12123_v27 = vstv %s8644_s0  ;;  %s12132_s0 = sld [smem:[#allocation74_spill]]  ;;  %s9264_s13 = sld [smem:[#allocation12 + $0xa6]] }
 0x351   :  { %v2380_v34 = vmul.f32 %v12121_v2, %v2303_v11  ;;  %v2967_v32 = vadd.f32 %v12122_v49, %v2963_v1  ;;  %v3062_v52 = vadd.f32 %v3061_v48, %v3058_v40  ;;  %v2479_v12 = vmul.f32 %v12123_v27, %v2303_v11 }
 0x352   :  { %v2575_v33 = vadd.f32 %v8954_v62, %v2571_v43  ;;  %v12124_v35 = vstv %s12117_s6  ;;  %v2674_v4 = vadd.f32 %v8958_v38, %v2670_v63  ;;  %v12125_v22 = vstv %s8660_s28  ;;  %v12129_v38 = vld [vmem:[#allocation159_spill] sm:$0xff]  ;;  %s12131_s28 = sld [smem:[#allocation101_spill]]  ;;  %s9266_s6 = sld [smem:[#allocation12 + $0xbd]] }
 0x353   :  { %v2381_v47 = vadd.f32 %v2380_v34, %v2377_v37  ;;  %v2578_v50 = vmul.f32 %v12124_v35, %v2303_v11  ;;  %v2677_v56 = vmul.f32 %v12125_v22, %v2303_v11  ;;  %v3066_v39 = vadd.f32 %v12126_v44, %v3062_v52 }
 0x354   :  { %v2480_v19 = vadd.f32 %v2479_v12, %v2476_v20  ;;  %v2773_v41 = vadd.f32 %v8986_v30, %v2769_v54  ;;  %v12127_v7 = vstv %s11934_s10  ;;  %v2872_v9 = vadd.f32 %v8990_v24, %v2868_v23  ;;  %v12133_v30 = vld [vmem:[#allocation38_spill] sm:$0xff]  ;;  %s12135_s10 = sld [smem:[#allocation67_spill]]  ;;  %v12136_v24 = vld [vmem:[#allocation161_spill] sm:$0xff]  ;;  %v12138_v54 = vld [vmem:[#allocation162_spill] sm:$0xff] }
 0x355   :  { %v2776_v53 = vmul.f32 %v12127_v7, %v2303_v11  ;;  %v2385_v46 = vadd.f32 %v12128_v17, %v2381_v47  ;;  %v2579_v62 = vadd.f32 %v2578_v50, %v2575_v33  ;;  %v2678_v36 = vadd.f32 %v2677_v56, %v2674_v4  ;;  %v12140_v20 = vld [vmem:[#allocation163_spill] sm:$0xff]  ;;  %v2314_v17 = vpop.permute.xlu1 %2313 }
 0x356   :  { %v2484_v21 = vadd.f32 %v12129_v38, %v2480_v19  ;;  %v12130_v29 = vstv %s11935_s7  ;;  %v2971_v57 = vadd.f32 %v8994_v8, %v2967_v32  ;;  %v9134_v43 = vsel %vm2144_vm1, %v12133_v30, %v2317_v13  ;;  %s12144_s7 = sld [smem:[#allocation68_spill]] }
 0x357   :  { %v2777_v3 = vadd.f32 %v2776_v53, %v2773_v41  ;;  %v2875_v10 = vmul.f32 %v12130_v29, %v2303_v11  ;;  %v2583_v63 = vadd.f32 %v12134_v16, %v2579_v62  ;;  %v2682_v59 = vadd.f32 %v12136_v24, %v2678_v36  ;;  %v12156_v62 = vld [vmem:[#allocation167_spill] sm:$0xff]  ;;  %v12159_v29 = vld [vmem:[#allocation168_spill] sm:$0xff]  ;;  %v12162_v24 = vld [vmem:[#allocation169_spill] sm:$0xff] }
 0x358   :  { %v12137_v40 = vstv %s11936_s14  ;;  %v3070_v48 = vadd.f32 %v9001_v26, %v3066_v39  ;;  %v9145_v8 = vsel %vm2143_vm0, %v7896_v51, %v2308_v28  ;;  %v2389_v23 = vadd.f32 %v9006_v5, %v2385_v46  ;;  %s12141_s14 = sld [smem:[#allocation75_spill]]  ;;  %v12152_v39 = vld [vmem:[#allocation166_spill] sm:$0xff] }
 0x359   :  { %v2974_v15 = vmul.f32 %v12137_v40, %v2303_v11  ;;  %v2781_v1 = vadd.f32 %v12138_v54, %v2777_v3  ;;  %v2876_v31 = vadd.f32 %v2875_v10, %v2872_v9  ;;  %v12139_v37 = vstv %s11938_s15  ;;  %s12147_s15 = sld [smem:[#allocation69_spill]]  ;;  %v12166_v54 = vld [vmem:[#allocation165_spill] sm:$0xff] }
 0x35a   :  { %v2392_v2 = vmul.f32 %v12139_v37, %v9145_v8  ;;  %v2488_v34 = vadd.f32 %v9027_v14, %v2484_v21  ;;  %v12142_v32 = vstv %s12131_s28  ;;  %v12143_v26 = vstv %s12132_s0  ;;  %v12168_v37 = vld [vmem:[#allocation170_spill] sm:$0xff]  ;;  %s9276_s28 = sld [smem:[#allocation13 + $0x4]]  ;;  %s12195_s0 = sld [smem:[#allocation104_spill]] }
 0x35b   :  { %v2975_v42 = vadd.f32 %v2974_v15, %v2971_v57  ;;  %v2880_v49 = vadd.f32 %v12140_v20, %v2876_v31  ;;  %v3073_v52 = vmul.f32 %v12142_v32, %v2303_v11  ;;  %v2491_v27 = vmul.f32 %v12143_v26, %v9145_v8 }
 0x35c   :  { %v2587_v12 = vadd.f32 %v9033_v25, %v2583_v63  ;;  %v12145_v33 = vstv %s12135_s10  ;;  %v2393_v5 = vadd.f32 %v2392_v2, %v2389_v23  ;;  %v12146_v35 = vstv %s8720_s16  ;;  %v12151_v25 = vld [vmem:[#allocation164_spill] sm:$0xff]  ;;  %s9187_s16 = sld [smem:[#allocation13 + $0x1]]  ;;  %s9285_s10 = sld [smem:[#allocation12 + $0xa7]] }
 0x35d   :  { %v2400_v47 = vmul.f32 %v12145_v33, %v9067_v6  ;;  %v2590_v50 = vmul.f32 %v12146_v35, %v9145_v8  ;;  %v2686_v14 = vadd.f32 %v9038_v18, %v2682_v59  ;;  %v3074_v4 = vadd.f32 %v3073_v52, %v3070_v48 }
 0x35e   :  { %v2492_v22 = vadd.f32 %v2491_v27, %v2488_v34  ;;  %v12149_v11 = vstv %s8722_s30  ;;  %v2785_v13 = vadd.f32 %v9045_v61, %v2781_v1  ;;  %v2979_v44 = vadd.f32 %v12151_v25, %v2975_v42  ;;  %s12160_s30 = sld [smem:[#allocation81_spill]] }
 0x35f   :  { %v2689_v56 = vmul.f32 %v12149_v11, %v9145_v8  ;;  %v2397_v19 = vadd.f32 %v12152_v39, %v2393_v5  ;;  %v2591_v41 = vadd.f32 %v2590_v50, %v2587_v12  ;;  %v12154_v7 = vstv %s12141_s14  ;;  %v12177_v11 = vld [vmem:[#allocation173_spill] sm:$0xff]  ;;  %s9288_s14 = sld [smem:[#allocation12 + $0xbe]] }
 0x360   :  { %v2788_v53 = vmul.f32 %v12154_v7, %v9145_v8  ;;  %v12155_v18 = vstv %s12144_s7  ;;  %v2496_v36 = vadd.f32 %v12156_v62, %v2492_v22  ;;  %v2884_v28 = vadd.f32 %v9050_v0, %v2880_v49  ;;  %s9295_s7 = sld [smem:[#allocation13 + $0x5]] }
 0x361   :  { %v2499_v46 = vmul.f32 %v12155_v18, %v9067_v6  ;;  %v2690_v9 = vadd.f32 %v2689_v56, %v2686_v14  ;;  %v12157_v61 = vstv %s12147_s15  ;;  %v12158_v21 = vstv %s12148_s5  ;;  %v12182_v18 = vld [vmem:[#allocation175_spill] sm:$0xff]  ;;  %s9300_s15 = sld [smem:[#allocation12 + $0xbf]]  ;;  %s9306_s5 = sld [smem:[#allocation13 + $0x6]] }
 0x362   :  { %v2598_v38 = vmul.f32 %v12157_v61, %v9067_v6  ;;  %v2697_v3 = vmul.f32 %v12158_v21, %v9067_v6  ;;  %v2595_v10 = vadd.f32 %v12159_v29, %v2591_v41  ;;  %v2789_v57 = vadd.f32 %v2788_v53, %v2785_v13  ;;  %v12180_v41 = vld [vmem:[#allocation174_spill] sm:$0xff] }
 0x363   :  { %v12161_v16 = vstv %s12150_s18  ;;  %v2694_v59 = vadd.f32 %v12162_v24, %v2690_v9  ;;  %v12163_v0 = vstv %s12153_s27  ;;  %v9199_v15 = vsel %vm2143_vm0, %v12133_v30, %v2314_v17  ;;  %v12190_v24 = vld [vmem:[#allocation172_spill] sm:$0xff]  ;;  %s12198_s18 = smov 127   ;;  %s12199_s27 = smov 1  }
 0x364   :  { %v2796_v63 = vmul.f32 %v12161_v16, %v9067_v6  ;;  %v2887_v40 = vmul.f32 %v12163_v0, %v9145_v8  ;;  %v3078_v1 = vadd.f32 %v12166_v54, %v3074_v4  ;;  %v2983_v31 = vadd.f32 %v9057_v58, %v2979_v44  ;;  %v12178_v44 = vld [vmem:[#allocation171_spill] sm:$0xff] }
 0x365   :  { %v2401_v48 = vadd.f32 %v2400_v47, %v2397_v19  ;;  %v12167_v42 = vstv %s8748_s4  ;;  %v2793_v2 = vadd.f32 %v12168_v37, %v2789_v57  ;;  %v2500_v20 = vadd.f32 %v2499_v46, %v2496_v36  ;;  %s9226_s4 = sld [smem:[#allocation13 + $0x2]] }
 0x366   :  { %v2404_v23 = vmul.f32 %v12167_v42, %v9199_v15  ;;  %v2888_v34 = vadd.f32 %v2887_v40, %v2884_v28  ;;  %v12169_v49 = vstv %s8750_s17  ;;  %v12171_v52 = vstv %s12160_s30  ;;  %s12175_s17 = sld [smem:[#allocation72_spill]]  ;;  %s6020_s30 = sld [smem:[#allocation13 + $0x7]] }
 0x367   :  { %v2503_v32 = vmul.f32 %v12169_v49, %v9199_v15  ;;  %v2412_v26 = vmul.f32 %v12171_v52, %v9134_v43  ;;  %v2599_v12 = vadd.f32 %v2598_v38, %v2595_v10  ;;  %v12172_v58 = vstv %s8756_s1  ;;  %s12179_s1 = sld [smem:[#allocation83_spill]] }
 0x368   :  { %v2405_v27 = vadd.f32 %v2404_v23, %v2401_v48  ;;  %v2602_v33 = vmul.f32 %v12172_v58, %v9199_v15  ;;  %v12173_v47 = vstv %s12164_s8  ;;  %v12174_v35 = vstv %s12165_s19  ;;  %s9368_s8 = sld [smem:[#allocation15 + $0x19]] }
 0x369   :  { %v2511_v5 = vmul.f32 %v12173_v47, %v9134_v43  ;;  %v2986_v50 = vmul.f32 %v12174_v35, %v9145_v8  ;;  %v2504_v14 = vadd.f32 %v2503_v32, %v2500_v20  ;;  %v2698_v4 = vadd.f32 %v2697_v3, %v2694_v59  ;;  %s9370_s19 = sld [smem:[#allocation15 + $0x31]] }
 0x36a   :  { %v3082_v22 = vadd.f32 %v9062_v60, %v3078_v1  ;;  %v2409_v56 = vadd.f32 %v12177_v11, %v2405_v27  ;;  %v2603_v13 = vadd.f32 %v2602_v33, %v2599_v12  ;;  %v2701_v25 = vmul.f32 %v2700_v45, %v9199_v15 }
 0x36b   :  { %v2892_v39 = vadd.f32 %v12178_v44, %v2888_v34  ;;  %v2987_v19 = vadd.f32 %v2986_v50, %v2983_v31  ;;  %v2508_v7 = vadd.f32 %v12180_v41, %v2504_v14  ;;  %v2797_v53 = vadd.f32 %v2796_v63, %v2793_v2  ;;  %v12192_v31 = vld [vmem:[#allocation176_spill] sm:$0xff] }
 0x36c   :  { %v2514_v60 = vstv %s9187_s16  ;;  %v2413_v17 = vadd.f32 %v2412_v26, %v2409_v56  ;;  %v2607_v46 = vadd.f32 %v12182_v18, %v2603_v13  ;;  %v2702_v62 = vadd.f32 %v2701_v25, %v2698_v4  ;;  %s9366_s16 = sld [smem:[#allocation15 + $0x1]] }
 0x36d   :  { %v12183_v36 = vstv %s12175_s17  ;;  %v12184_v45 = vstv %s12176_s25  ;;  %v2512_v61 = vadd.f32 %v2511_v5, %v2508_v7  ;;  %v12185_v38 = vstv %s8812_s26  ;;  %s12191_s26 = sld [smem:[#allocation103_spill]]  ;;  %s9380_s17 = sld [smem:[#allocation15 + $0xa9]] }
 0x36e   :  { %v2895_v9 = vmul.f32 %v12183_v36, %v9067_v6  ;;  %v3085_v28 = vmul.f32 %v12184_v45, %v9145_v8  ;;  %v2800_v21 = vmul.f32 %v12185_v38, %v9199_v15  ;;  %v2708_v3 = vstv %s9201_s3  ;;  %12204 = sst [smem:[#allocation102_spill]] %s9368_s8  ;;  %s9372_s3 = sld [smem:[#allocation15 + $0x49]] }
 0x36f   :  { %v12188_v29 = vstv %s12179_s1  ;;  %v2898_v57 = vstv %s9205_s24  ;;  %v12189_v16 = vstv %s12181_s12  ;;  %v2991_v8 = vadd.f32 %v12190_v24, %v2987_v19  ;;  %12205 = sst [smem:[#allocation113_spill]] %s9370_s19  ;;  %s9374_s24 = sld [smem:[#allocation15 + $0x61]] }
 0x370   :  { %v2610_v10 = vmul.f32 %v12188_v29, %v9134_v43  ;;  %v2416_v63 = vadd.f32 %v12189_v16, %v2413_v17  ;;  %v3086_v59 = vadd.f32 %v3085_v28, %v3082_v22  ;;  %v2801_v0 = vadd.f32 %v2800_v21, %v2797_v53  ;;  %s9384_s25 = sld [smem:[#allocation15 + $0x1c]] }
 0x371   :  { %v2896_v40 = vadd.f32 %v2895_v9, %v2892_v39  ;;  %v2515_v54 = vadd.f32 %v2514_v60, %v2512_v61  ;;  %v2706_v48 = vadd.f32 %v12192_v31, %v2702_v62  ;;  %v12193_v42 = vstv %s12186_s29  ;;  %s9388_s1 = sld [smem:[#allocation15 + $0x4c]] }
 0x372   :  { %7267 = vtanh.f32 %v2416_v63  ;;  %v2611_v1 = vadd.f32 %v2610_v10, %v2607_v46  ;;  %v2994_v23 = vmul.f32 %v12193_v42, %v9067_v6  ;;  %v12194_v37 = vstv %s12187_s11  ;;  %12203 = sst [smem:[#allocation100_spill]] %s9366_s16  ;;  %s9392_s12 = sld [smem:[#allocation15 + $0x7c]] }
 0x373   :  { %v3089_v2 = vmul.f32 %v7896_v51, %v12194_v37  ;;  %v2613_v34 = vstv %s9226_s4  ;;  %v2899_v20 = vmul.f32 %v2898_v57, %v9199_v15  ;;  %v3092_v49 = vstv %s9228_s21  ;;  %s9378_s4 = sld [smem:[#allocation15 + $0x91]]  ;;  %12210 = sst [smem:[#allocation118_spill]] %s9380_s17 }
 0x374   :  { %v2807_v32 = vstv %s9230_s22  ;;  %v2709_v52 = vmul.f32 %v2708_v3, %v9134_v43  ;;  %v12196_v26 = vstv %s12191_s26  ;;  %v2997_v58 = vstv %s9238_s23  ;;  %12206 = sst [smem:[#allocation114_spill]] %s9372_s3  ;;  %s9382_s21 = sld [smem:[#allocation15 + $0x4]] }
 0x375   :  { %v2804_v27 = vmul.f32 %v12133_v30, %v12196_v26  ;;  %v3090_v12 = vadd.f32 %v3089_v2, %v3086_v59  ;;  %v2900_v51 = vadd.f32 %v2899_v20, %v2896_v40  ;;  %v2995_v33 = vadd.f32 %v2994_v23, %v2991_v8  ;;  %12207 = sst [smem:[#allocation115_spill]] %s9374_s24  ;;  %s9386_s22 = sld [smem:[#allocation15 + $0x34]] }
 0x376   :  { %7269 = vtanh.f32 %v2515_v54  ;;  %v2614_v47 = vadd.f32 %v2613_v34, %v2611_v1  ;;  %v2710_v5 = vadd.f32 %v2709_v52, %v2706_v48  ;;  %v3093_v50 = vmul.f32 %v3092_v49, %v9067_v6  ;;  %12212 = sst [smem:[#allocation105_spill]] %s9384_s25  ;;  %s9390_s23 = sld [smem:[#allocation15 + $0x64]] }
 0x377   :  { %v2805_v35 = vadd.f32 %v2804_v27, %v2801_v0  ;;  %v2712_v14 = vstv %s9249_s9  ;;  %v12197_v4 = vstv %s12195_s0  ;;  %v2906_v11 = vstv %s9255_s2  ;;  %12214 = sst [smem:[#allocation120_spill]] %s9388_s1  ;;  %s9394_s9 = sld [smem:[#allocation15 + $0x94]] }
 0x378   :  { %v2903_v22 = vmul.f32 %v12133_v30, %v12197_v4  ;;  %v2808_v56 = vmul.f32 %v2807_v32, %v9134_v43  ;;  %v2998_v13 = vmul.f32 %v2997_v58, %v9199_v15  ;;  %v3001_v25 = vstv %s9264_s13  ;;  %12216 = sst [smem:[#allocation108_spill]] %s9392_s12  ;;  %s9396_s29 = sld [smem:[#allocation15 + $0xac]] }
 0x379   :  { %v3096_v44 = vstv %s9266_s6  ;;  %v3094_v6 = vadd.f32 %v3093_v50, %v3090_v12  ;;  %7271 = vtanh.f32 %v2614_v47  ;;  %v2713_v19 = vadd.f32 %v2712_v14, %v2710_v5  ;;  %12209 = sst [smem:[#allocation117_spill]] %s9378_s4  ;;  %s9398_s11 = sld [smem:[#allocation15 + $0x7]] }
 0x37a   :  { %v2904_v39 = vadd.f32 %v2903_v22, %v2900_v51  ;;  %v2809_v41 = vadd.f32 %v2808_v56, %v2805_v35  ;;  %v2999_v7 = vadd.f32 %v2998_v13, %v2995_v33  ;;  %v2907_v53 = vmul.f32 %v2906_v11, %v9134_v43  ;;  %12211 = sst [smem:[#allocation119_spill]] %s9382_s21  ;;  %s9400_s2 = sld [smem:[#allocation15 + $0x1f]] }
 0x37b   :  { %v2811_v60 = vstv %s9276_s28  ;;  %v3002_v18 = vmul.f32 %v12133_v30, %v3001_v25  ;;  %v3097_v46 = vmul.f32 %v3096_v44, %v9199_v15  ;;  %v3005_v62 = vstv %s9285_s10  ;;  %12213 = sst [smem:[#allocation106_spill]] %s9386_s22 }
 0x37c   :  { %v9308_v17 = vpop.eup %7267  ;;  %v3100_v36 = vstv %s9288_s14  ;;  %v2908_v9 = vadd.f32 %v2907_v53, %v2904_v39  ;;  %7273 = vtanh.f32 %v2713_v19  ;;  %v2812_v45 = vadd.f32 %v2811_v60, %v2809_v41  ;;  %12215 = sst [smem:[#allocation107_spill]] %s9390_s23  ;;  %s9402_s13 = sld [smem:[#allocation15 + $0x37]] }
 0x37d   :  { %3114 = vrot.lane.b32.xlu0 %v9308_v17, %s12198_s18  ;;  %3111 = vrot.lane.b32.xlu1 %v9308_v17, %s12199_s27  ;;  %v3003_v28 = vadd.f32 %v3002_v18, %v2999_v7  ;;  %v3098_v61 = vadd.f32 %v3097_v46, %v3094_v6  ;;  %v2910_v38 = vstv %s9295_s7  ;;  %v3006_v15 = vmul.f32 %v3005_v62, %v9134_v43  ;;  %12217 = sst [smem:[#allocation109_spill]] %s9394_s9  ;;  %s9404_s26 = sld [smem:[#allocation15 + $0x4f]] }
 0x37e   :  { %v3101_v3 = vmul.f32 %v12133_v30, %v3100_v36  ;;  %v3104_v29 = vstv %s9300_s15  ;;  %7275 = vtanh.f32 %v2812_v45  ;;  %v2911_v10 = vadd.f32 %v2910_v38, %v2908_v9  ;;  %12218 = sst [smem:[#allocation110_spill]] %s9396_s29  ;;  %s9406_s6 = sld [smem:[#allocation15 + $0x67]] }
 0x37f   :  { %v3007_v57 = vadd.f32 %v3006_v15, %v3003_v28  ;;  %v3009_v63 = vstv %s9306_s5  ;;  %v3105_v8 = vmul.f32 %v3104_v29, %v9134_v43  ;;  %v3108_v0 = vstv %s6020_s30  ;;  %12219 = sst [smem:[#allocation121_spill]] %s9398_s11  ;;  %s9408_s28 = sld [smem:[#allocation15 + $0x7f]] }
 0x380   :  { %v9319_v21 = vpop.eup %7269  ;;  %v3102_v16 = vadd.f32 %v3101_v3, %v3098_v61  ;;  %7277 = vtanh.f32 %v2911_v10  ;;  %12220 = sst [smem:[#allocation122_spill]] %s9400_s2  ;;  %s9414_s14 = sld [smem:[#allocation15 + $0xa]]  ;;  %v3163_v42 = vstv %s9366_s16  ;;  %v3262_v23 = vstv %s9368_s8 }
 0x381   :  { %3120 = vrot.lane.b32.xlu0 %v9319_v21, %s12198_s18  ;;  %3117 = vrot.lane.b32.xlu1 %v9319_v21, %s12199_s27  ;;  %v3010_v30 = vadd.f32 %v3009_v63, %v3007_v57  ;;  %s9410_s0 = sld [smem:[#allocation15 + $0x97]]  ;;  %s9416_s7 = sld [smem:[#allocation15 + $0x22]]  ;;  %v3361_v37 = vstv %s9370_s19  ;;  %v3460_v2 = vstv %s9372_s3  ;;  %v9627_v61 = vmul.f32 %v9308_v17, %v3163_v42 }
 0x382   :  { %v3106_v59 = vadd.f32 %v3105_v8, %v3102_v16  ;;  %12221 = sst [smem:[#allocation111_spill]] %s9402_s13  ;;  %s9412_s10 = sld [smem:[#allocation15 + $0xaf]]  ;;  %v3559_v34 = vstv %s9374_s24  ;;  %v3658_v20 = vstv %s9376_s20  ;;  %v3757_v49 = vstv %s9378_s4 }
 0x383   :  { %v9329_v24 = vpop.eup %7271  ;;  %7279 = vtanh.f32 %v3010_v30  ;;  %12222 = sst [smem:[#allocation123_spill]] %s9404_s26  ;;  %s9418_s15 = sld [smem:[#allocation15 + $0x3a]]  ;;  %v3856_v32 = vstv %s9380_s17  ;;  %v3175_v52 = vstv %s9382_s21  ;;  %v3274_v26 = vstv %s9384_s25 }
 0x384   :  { %v3109_v43 = vadd.f32 %v3108_v0, %v3106_v59  ;;  %12223 = sst [smem:[#allocation124_spill]] %s9406_s6  ;;  %s9420_s5 = sld [smem:[#allocation15 + $0x52]]  ;;  %v3373_v27 = vstv %s9386_s22  ;;  %v3472_v12 = vstv %s9388_s1  ;;  %v3571_v58 = vstv %s9390_s23 }
 0x385   :  { %3126 = vrot.lane.b32.xlu0 %v9329_v24, %s12198_s18  ;;  %3123 = vrot.lane.b32.xlu1 %v9329_v24, %s12199_s27  ;;  %12224 = sst [smem:[#allocation125_spill]] %s9408_s28  ;;  %s9430_s28 = sld [smem:[#allocation15 + $0xd]]  ;;  %v3670_v51 = vstv %s9392_s12  ;;  %v3769_v33 = vstv %s9394_s9  ;;  %v9637_v36 = vmul.f32 %v9308_v17, %v3361_v37  ;;  %v9647_v42 = vmul.f32 %v9308_v17, %v3460_v2 }
 0x386   :  { %v9336_v40 = vpop.eup %7273  ;;  %7281 = vtanh.f32 %v3109_v43  ;;  %12227 = sst [smem:[#allocation112_spill]] %s9414_s14  ;;  %s9422_s30 = sld [smem:[#allocation15 + $0x6a]]  ;;  %v3868_v47 = vstv %s9396_s29  ;;  %v3187_v5 = vstv %s9398_s11  ;;  %v3286_v35 = vstv %s9400_s2 }
 0x387   :  { %12225 = sst [smem:[#allocation126_spill]] %s9410_s0  ;;  %s9428_s6 = sld [smem:[#allocation15 + $0xb2]]  ;;  %v3385_v50 = vstv %s9402_s13  ;;  %v3484_v14 = vstv %s9404_s26  ;;  %v9632_v43 = vmul.f32 %v9308_v17, %v3262_v23  ;;  %v9652_v23 = vmul.f32 %v9308_v17, %v3559_v34 }
 0x388   :  { %v9342_v54 = vpop.eup %7275  ;;  %12226 = sst [smem:[#allocation127_spill]] %s9412_s10  ;;  %s9432_s0 = sld [smem:[#allocation15 + $0x25]]  ;;  %v9657_v37 = vmul.f32 %v9308_v17, %v3658_v20  ;;  %v9662_v9 = vmul.f32 %v9308_v17, %v3757_v49  ;;  %v9671_v2 = vmul.f32 %v9308_v17, %v3856_v32  ;;  %v9686_v8 = vmul.f32 %v9319_v21, %v3175_v52 }
 0x389   :  { %3132 = vrot.lane.b32.xlu0 %v9336_v40, %s12198_s18  ;;  %3129 = vrot.lane.b32.xlu1 %v9336_v40, %s12199_s27  ;;  %12228 = sst [smem:[#allocation128_spill]] %s9416_s7  ;;  %s9434_s10 = sld [smem:[#allocation15 + $0x2]]  ;;  %v9696_v20 = vmul.f32 %v9319_v21, %v3274_v26  ;;  %v9702_v30 = vmul.f32 %v9319_v21, %v3373_v27  ;;  %v9712_v59 = vmul.f32 %v9319_v21, %v3472_v12 }
 0x38a   :  { %v9348_v1 = vpop.eup %7277  ;;  %12229 = sst [smem:[#allocation129_spill]] %s9418_s15  ;;  %s9436_s14 = sld [smem:[#allocation15 + $0x1a]]  ;;  %v9718_v34 = vmul.f32 %v9319_v21, %v3571_v58  ;;  %v9728_v52 = vmul.f32 %v9319_v21, %v3670_v51  ;;  %v9734_v26 = vmul.f32 %v9319_v21, %v3769_v33  ;;  %v9744_v27 = vmul.f32 %v9319_v21, %v3868_v47 }
 0x38b   :  { %12200 = vst [vmem:[#allocation149_spill] sm:$0xff] %v9348_v1  ;;  %12230 = sst [smem:[#allocation137_spill]] %s9420_s5  ;;  %s9438_s7 = sld [smem:[#allocation15 + $0x32]]  ;;  %v9749_v51 = vmul.f32 %v9329_v24, %v3187_v5  ;;  %v9754_v33 = vmul.f32 %v9329_v24, %v3286_v35  ;;  %v9763_v58 = vmul.f32 %v9329_v24, %v3385_v50  ;;  %v9768_v47 = vmul.f32 %v9329_v24, %v3484_v14 }
 0x38c   :  { %12231 = sst [smem:[#allocation138_spill]] %s9422_s30  ;;  %s9440_s15 = sld [smem:[#allocation15 + $0x4a]] }
 0x38d   :  { %3138 = vrot.lane.b32.xlu0 %v9342_v54, %s12198_s18  ;;  %3135 = vrot.lane.b32.xlu1 %v9342_v54, %s12199_s27  ;;  %v9354_v31 = vpop.eup %7279  ;;  %12234 = sst [smem:[#allocation139_spill]] %s9428_s6  ;;  %s9442_s5 = sld [smem:[#allocation15 + $0x62]] }
 0x38e   :  { %12201 = vst [vmem:[#allocation150_spill] sm:$0xff] %v9354_v31  ;;  %12235 = sst [smem:[#allocation132_spill]] %s9430_s28  ;;  %s9444_s30 = sld [smem:[#allocation15 + $0x7a]] }
 0x38f   :  { %12236 = sst [smem:[#allocation133_spill]] %s9432_s0  ;;  %s9450_s6 = sld [smem:[#allocation15 + $0x3d]] }
 0x390   :  { %v9360_v48 = vpop.eup %7281  ;;  %12237 = sst [smem:[#allocation134_spill]] %s9434_s10  ;;  %s9452_s28 = sld [smem:[#allocation15 + $0x55]] }
 0x391   :  { %3144 = vrot.lane.b32.xlu0 %v9348_v1, %s12198_s18  ;;  %3141 = vrot.lane.b32.xlu1 %v9348_v1, %s12199_s27  ;;  %12202 = vst [vmem:[#allocation151_spill] sm:$0xff] %v9360_v48  ;;  %12238 = sst [smem:[#allocation135_spill]] %s9436_s14  ;;  %s9454_s0 = sld [smem:[#allocation15 + $0x6d]] }
 0x392   :  { %12239 = sst [smem:[#allocation136_spill]] %s9438_s7  ;;  %s9528_s20 = sld [smem:[#allocation15 + $0x78]] }
 0x393   :  { %12240 = sst [smem:[#allocation140_spill]] %s9440_s15  ;;  %s9456_s10 = sld [smem:[#allocation15 + $0x85]] }
 0x394   :  { %12241 = sst [smem:[#allocation141_spill]] %s9442_s5  ;;  %s9458_s14 = sld [smem:[#allocation15 + $0x9d]] }
 0x395   :  { %3150 = vrot.lane.b32.xlu0 %v9354_v31, %s12198_s18  ;;  %3147 = vrot.lane.b32.xlu1 %v9354_v31, %s12199_s27  ;;  %12242 = sst [smem:[#allocation142_spill]] %s9444_s30  ;;  %s9460_s7 = sld [smem:[#allocation15 + $0xb5]] }
 0x396   :  { %12245 = sst [smem:[#allocation44_spill]] %s9450_s6  ;;  %s9462_s15 = sld [smem:[#allocation15 + $0x10]] }
 0x397   :  { %12246 = sst [smem:[#allocation144_spill]] %s9452_s28  ;;  %s9464_s5 = sld [smem:[#allocation15 + $0x28]] }
 0x398   :  { %12247 = sst [smem:[#allocation45_spill]] %s9454_s0  ;;  %s9466_s30 = sld [smem:[#allocation15 + $0x40]] }
 0x399   :  { %3156 = vrot.lane.b32.xlu0 %v9360_v48, %s12198_s18  ;;  %3153 = vrot.lane.b32.xlu1 %v9360_v48, %s12199_s27  ;;  %s9424_s27 = sld [smem:[#allocation15 + $0x82]]  ;;  %12248 = sst [smem:[#allocation46_spill]] %s9456_s10 }
 0x39a   :  { %s9426_s18 = sld [smem:[#allocation15 + $0x9a]]  ;;  %12249 = sst [smem:[#allocation47_spill]] %s9458_s14  ;;  %v3805_v63 = vstv %s9458_s14 }
 0x39b   :  { %12250 = sst [smem:[#allocation48_spill]] %s9460_s7  ;;  %s9470_s6 = sld [smem:[#allocation15 + $0x70]]  ;;  %v9897_v32 = vmul.f32 %v9342_v54, %v3805_v63 }
 0x39c   :  { %12251 = sst [smem:[#allocation49_spill]] %s9462_s15  ;;  %s9472_s28 = sld [smem:[#allocation15 + $0x88]] }
 0x39d   :  { %12252 = sst [smem:[#allocation50_spill]] %s9464_s5  ;;  %s9474_s0 = sld [smem:[#allocation15 + $0xa0]]  ;;  %12418 = vst [vmem:[#allocation158_spill] sm:$0xff] %v9897_v32 }
 0x39e   :  { %12253 = sst [smem:[#allocation145_spill]] %s9466_s30  ;;  %s9476_s10 = sld [smem:[#allocation15 + $0xb8]] }
 0x39f   :  { %12232 = sst [smem:[#allocation130_spill]] %s9424_s27  ;;  %s9446_s27 = sld [smem:[#allocation15 + $0x92]] }
 0x3a0   :  { %12233 = sst [smem:[#allocation131_spill]] %s9426_s18  ;;  %s9448_s18 = sld [smem:[#allocation15 + $0xaa]] }
 0x3a1   :  { %12255 = sst [smem:[#allocation147_spill]] %s9470_s6  ;;  %s9478_s7 = sld [smem:[#allocation15 + $0x13]] }
 0x3a2   :  { %12256 = sst [smem:[#allocation148_spill]] %s9472_s28  ;;  %s9480_s15 = sld [smem:[#allocation15 + $0x2b]] }
 0x3a3   :  { %12257 = sst [smem:[#allocation59_spill]] %s9474_s0  ;;  %s9482_s30 = sld [smem:[#allocation15 + $0x43]] }
 0x3a4   :  { %12258 = sst [smem:[#allocation60_spill]] %s9476_s10  ;;  %s9486_s5 = sld [smem:[#allocation15 + $0x73]] }
 0x3a5   :  { %12243 = sst [smem:[#allocation143_spill]] %s9446_s27  ;;  %s9488_s6 = sld [smem:[#allocation15 + $0x8b]] }
 0x3a6   :  { %12244 = sst [smem:[#allocation43_spill]] %s9448_s18  ;;  %s9468_s18 = sld [smem:[#allocation15 + $0x58]] }
 0x3a7   :  { %12259 = sst [smem:[#allocation61_spill]] %s9478_s7  ;;  %s9490_s28 = sld [smem:[#allocation15 + $0xa3]] }
 0x3a8   :  { %12260 = sst [smem:[#allocation62_spill]] %s9480_s15  ;;  %s9492_s10 = sld [smem:[#allocation15 + $0xbb]] }
 0x3a9   :  { %12261 = sst [smem:[#allocation63_spill]] %s9482_s30  ;;  %s9494_s7 = sld [smem:[#allocation15 + $0x16]] }
 0x3aa   :  { %12263 = sst [smem:[#allocation65_spill]] %s9486_s5  ;;  %s9496_s15 = sld [smem:[#allocation15 + $0x2e]] }
 0x3ab   :  { %12264 = sst [smem:[#allocation66_spill]] %s9488_s6  ;;  %s9500_s30 = sld [smem:[#allocation15 + $0x46]] }
 0x3ac   :  { %12254 = sst [smem:[#allocation146_spill]] %s9468_s18  ;;  %s9484_s18 = sld [smem:[#allocation15 + $0x5b]] }
 0x3ad   :  { %12265 = sst [smem:[#allocation39_spill]] %s9490_s28  ;;  %s9502_s5 = sld [smem:[#allocation15 + $0x5e]] }
 0x3ae   :  { %12266 = sst [smem:[#allocation40_spill]] %s9492_s10  ;;  %s9504_s6 = sld [smem:[#allocation15]] }
 0x3af   :  { %12267 = sst [smem:[#allocation41_spill]] %s9494_s7  ;;  %s9510_s7 = sld [smem:[#allocation15 + $0x76]] }
 0x3b0   :  { %12268 = sst [smem:[#allocation42_spill]] %s9496_s15  ;;  %s9512_s15 = sld [smem:[#allocation15 + $0x18]] }
 0x3b1   :  { %12269 = sst [smem:[#allocation51_spill]] %s9500_s30  ;;  %s9514_s30 = sld [smem:[#allocation15 + $0x30]] }
 0x3b2   :  { %12262 = sst [smem:[#allocation64_spill]] %s9484_s18  ;;  %s9522_s28 = sld [smem:[#allocation15 + $0x60]] }
 0x3b3   :  { %12270 = sst [smem:[#allocation77_spill]] %s9502_s5  ;;  %s9520_s5 = sld [smem:[#allocation15 + $0x48]] }
 0x3b4   :  { %12271 = sst [smem:[#allocation78_spill]] %s9504_s6  ;;  %s12276_s10 = sld [smem:[#allocation124_spill]] }
 0x3b5   :  { %12272 = sst [smem:[#allocation79_spill]] %s9510_s7  ;;  %s12278_s18 = sld [smem:[#allocation125_spill]] }
 0x3b6   :  { %12273 = sst [smem:[#allocation80_spill]] %s9512_s15  ;;  %s12279_s7 = sld [smem:[#allocation126_spill]] }
 0x3b7   :  { %12274 = sst [smem:[#allocation52_spill]] %s9514_s30  ;;  %s12280_s0 = sld [smem:[#allocation127_spill]] }
 0x3b8   :  { %12277 = sst [smem:[#allocation54_spill]] %s9522_s28  ;;  %s12282_s4 = sld [smem:[#allocation112_spill]] }
 0x3b9   :  { %12275 = sst [smem:[#allocation53_spill]] %s9520_s5  ;;  %s9530_s17 = sld [smem:[#allocation15 + $0x90]] }
 0x3ba   :  { %12281 = sst [smem:[#allocation55_spill]] %s9528_s20  ;;  %s12284_s21 = sld [smem:[#allocation128_spill]]  ;;  %v3583_v4 = vstv %s12276_s10 }
 0x3bb   :  { %s12285_s25 = sld [smem:[#allocation129_spill]]  ;;  %s9536_s3 = sld [smem:[#allocation15 + $0xa8]]  ;;  %v3682_v22 = vstv %s12278_s18  ;;  %v9773_v5 = vmul.f32 %v9329_v24, %v3583_v4 }
 0x3bc   :  { %s12286_s24 = sld [smem:[#allocation137_spill]]  ;;  %s12288_s22 = sld [smem:[#allocation138_spill]]  ;;  %v3781_v11 = vstv %s12279_s7  ;;  %v9783_v50 = vmul.f32 %v9329_v24, %v3682_v22 }
 0x3bd   :  { %s9538_s1 = sld [smem:[#allocation15 + $0x5]]  ;;  %s12290_s23 = sld [smem:[#allocation130_spill]]  ;;  %v3880_v56 = vstv %s12280_s0  ;;  %v9788_v14 = vmul.f32 %v9329_v24, %v3781_v11 }
 0x3be   :  { %s12291_s12 = sld [smem:[#allocation131_spill]]  ;;  %s9544_s8 = sld [smem:[#allocation15 + $0x1d]]  ;;  %v3199_v13 = vstv %s12282_s4  ;;  %v9793_v4 = vmul.f32 %v9329_v24, %v3880_v56 }
 0x3bf   :  { %12283 = sst [smem:[#allocation56_spill]] %s9530_s17  ;;  %s12292_s19 = sld [smem:[#allocation139_spill]]  ;;  %v9802_v12 = vmul.f32 %v9336_v40, %v3199_v13 }
 0x3c0   :  { %s12294_s9 = sld [smem:[#allocation132_spill]]  ;;  %s9546_s29 = sld [smem:[#allocation15 + $0x35]]  ;;  %v3298_v25 = vstv %s12284_s21 }
 0x3c1   :  { %12287 = sst [smem:[#allocation57_spill]] %s9536_s3  ;;  %s9552_s13 = sld [smem:[#allocation15 + $0x4d]]  ;;  %v3397_v44 = vstv %s12285_s25  ;;  %v9809_v22 = vmul.f32 %v9336_v40, %v3298_v25 }
 0x3c2   :  { %s12296_s11 = sld [smem:[#allocation133_spill]]  ;;  %s9554_s10 = sld [smem:[#allocation15 + $0x65]]  ;;  %v3496_v39 = vstv %s12286_s24  ;;  %v3595_v6 = vstv %s12288_s22  ;;  %v9816_v11 = vmul.f32 %v9336_v40, %v3397_v44 }
 0x3c3   :  { %12289 = sst [smem:[#allocation58_spill]] %s9538_s1  ;;  %v3694_v19 = vstv %s12290_s23  ;;  %s9560_s7 = sld [smem:[#allocation15 + $0x7d]]  ;;  %v9821_v56 = vmul.f32 %v9336_v40, %v3496_v39  ;;  %v9826_v13 = vmul.f32 %v9336_v40, %v3595_v6 }
 0x3c4   :  { %12293 = sst [smem:[#allocation85_spill]] %s9544_s8  ;;  %s9562_s0 = sld [smem:[#allocation15 + $0x95]]  ;;  %v3793_v41 = vstv %s12291_s12  ;;  %v9835_v25 = vmul.f32 %v9336_v40, %v3694_v19 }
 0x3c5   :  { %v3892_v7 = vstv %s12292_s19  ;;  %s12308_s21 = sld [smem:[#allocation44_spill]]  ;;  %s12311_s25 = sld [smem:[#allocation46_spill]]  ;;  %v9840_v44 = vmul.f32 %v9336_v40, %v3793_v41 }
 0x3c6   :  { %12295 = sst [smem:[#allocation86_spill]] %s9546_s29  ;;  %v3211_v53 = vstv %s12294_s9  ;;  %s12309_s4 = sld [smem:[#allocation144_spill]]  ;;  %v9845_v39 = vmul.f32 %v9336_v40, %v3892_v7 }
 0x3c7   :  { %12301 = sst [smem:[#allocation87_spill]] %s9552_s13  ;;  %s9572_s23 = sld [smem:[#allocation15 + $0xad]]  ;;  %v9850_v6 = vmul.f32 %v9342_v54, %v3211_v53 }
 0x3c8   :  { %12302 = sst [smem:[#allocation88_spill]] %s9554_s10  ;;  %v3310_v60 = vstv %s12296_s11  ;;  %s12310_s10 = sld [smem:[#allocation45_spill]] }
 0x3c9   :  { %12306 = sst [smem:[#allocation89_spill]] %s9560_s7  ;;  %s9574_s22 = sld [smem:[#allocation15 + $0x3]]  ;;  %12403 = vst [vmem:[#allocation152_spill] sm:$0xff] %v9850_v6  ;;  %v9859_v19 = vmul.f32 %v9342_v54, %v3310_v60 }
 0x3ca   :  { %12307 = sst [smem:[#allocation90_spill]] %s9562_s0  ;;  %s12318_s11 = sld [smem:[#allocation48_spill]] }
 0x3cb   :  { %s9580_s2 = sld [smem:[#allocation15 + $0x1b]]  ;;  %v3409_v38 = vstv %s12308_s21  ;;  %v3706_v29 = vstv %s12311_s25  ;;  %s12320_s27 = sld [smem:[#allocation49_spill]]  ;;  %12407 = vst [vmem:[#allocation153_spill] sm:$0xff] %v9859_v19 }
 0x3cc   :  { %s9582_s16 = sld [smem:[#allocation15 + $0x33]]  ;;  %v3508_v15 = vstv %s12309_s4  ;;  %s12325_s12 = sld [smem:[#allocation145_spill]]  ;;  %v9864_v41 = vmul.f32 %v9342_v54, %v3409_v38  ;;  %v9886_v38 = vmul.f32 %v9342_v54, %v3706_v29 }
 0x3cd   :  { %12312 = sst [smem:[#allocation93_spill]] %s9572_s23  ;;  %s9584_s3 = sld [smem:[#allocation15 + $0x4b]]  ;;  %v9869_v7 = vmul.f32 %v9342_v54, %v3508_v15 }
 0x3ce   :  { %s9586_s1 = sld [smem:[#allocation15 + $0x63]]  ;;  %v3607_v3 = vstv %s12310_s10  ;;  %s12326_s21 = sld [smem:[#allocation146_spill]]  ;;  %12408 = vst [vmem:[#allocation154_spill] sm:$0xff] %v9864_v41  ;;  %12413 = vst [vmem:[#allocation157_spill] sm:$0xff] %v9886_v38 }
 0x3cf   :  { %12313 = sst [smem:[#allocation96_spill]] %s9574_s22  ;;  %s12321_s29 = sld [smem:[#allocation50_spill]]  ;;  %12409 = vst [vmem:[#allocation155_spill] sm:$0xff] %v9869_v7  ;;  %v9881_v60 = vmul.f32 %v9342_v54, %v3607_v3 }
 0x3d0   :  { %s9595_s9 = sld [smem:[#allocation15 + $0x7b]]  ;;  %s9605_s25 = sld [smem:[#allocation15 + $0x8]]  ;;  %v3904_v0 = vstv %s12318_s11 }
 0x3d1   :  { %12314 = sst [smem:[#allocation101_spill]] %s9580_s2  ;;  %s9597_s19 = sld [smem:[#allocation15 + $0x93]]  ;;  %v3223_v28 = vstv %s12320_s27  ;;  %12412 = vst [vmem:[#allocation156_spill] sm:$0xff] %v9881_v60  ;;  %v9902_v3 = vmul.f32 %v9342_v54, %v3904_v0 }
 0x3d2   :  { %12315 = sst [smem:[#allocation74_spill]] %s9582_s16  ;;  %s9610_s24 = sld [smem:[#allocation15 + $0x20]]  ;;  %v3421_v62 = vstv %s12325_s12  ;;  %v9913_v49 = vmul.f32 %v9348_v1, %v3223_v28 }
 0x3d3   :  { %12316 = sst [smem:[#allocation67_spill]] %s9584_s3  ;;  %s9603_s10 = sld [smem:[#allocation15 + $0xab]]  ;;  %12419 = vst [vmem:[#allocation159_spill] sm:$0xff] %v9902_v3  ;;  %v9929_v15 = vmul.f32 %v9348_v1, %v3421_v62 }
 0x3d4   :  { %12317 = sst [smem:[#allocation75_spill]] %s9586_s1  ;;  %s9612_s14 = sld [smem:[#allocation15 + $0x38]]  ;;  %v3520_v46 = vstv %s12326_s21  ;;  %12426 = vst [vmem:[#allocation38_spill] sm:$0xff] %v9913_v49 }
 0x3d5   :  { %v3322_v45 = vstv %s12321_s29  ;;  %s9640_s8 = sld [smem:[#allocation15 + $0x80]]  ;;  %s9676_s28 = sld [smem:[#allocation15 + $0x1e]]  ;;  %12431 = vst [vmem:[#allocation161_spill] sm:$0xff] %v9929_v15  ;;  %v9934_v28 = vmul.f32 %v9348_v1, %v3520_v46 }
 0x3d6   :  { %12323 = sst [smem:[#allocation68_spill]] %s9595_s9  ;;  %s9620_s9 = sld [smem:[#allocation15 + $0x68]]  ;;  %v9918_v63 = vmul.f32 %v9348_v1, %v3322_v45 }
 0x3d7   :  { %12324 = sst [smem:[#allocation69_spill]] %s9597_s19  ;;  %s9642_s26 = sld [smem:[#allocation15 + $0x98]]  ;;  %12432 = vst [vmem:[#allocation162_spill] sm:$0xff] %v9934_v28 }
 0x3d8   :  { %12330 = sst [smem:[#allocation71_spill]] %s9605_s25  ;;  %s9666_s19 = sld [smem:[#allocation15 + $0x6]]  ;;  %12427 = vst [vmem:[#allocation160_spill] sm:$0xff] %v9918_v63 }
 0x3d9   :  { %12328 = sst [smem:[#allocation70_spill]] %s9603_s10  ;;  %s9618_s10 = sld [smem:[#allocation15 + $0x50]] }
 0x3da   :  { %12333 = sst [smem:[#allocation76_spill]] %s9610_s24  ;;  %s9664_s15 = sld [smem:[#allocation15 + $0xb0]] }
 0x3db   :  { %12335 = sst [smem:[#allocation81_spill]] %s9612_s14  ;;  %s9678_s30 = sld [smem:[#allocation15 + $0x36]] }
 0x3dc   :  { %12341 = sst [smem:[#allocation84_spill]] %s9620_s9  ;;  %s9688_s13 = sld [smem:[#allocation15 + $0x4e]] }
 0x3dd   :  { %12343 = sst [smem:[#allocation97_spill]] %s9640_s8  ;;  %s12371_s20 = sld [smem:[#allocation147_spill]] }
 0x3de   :  { %12344 = sst [smem:[#allocation72_spill]] %s9642_s26  ;;  %s9690_s7 = sld [smem:[#allocation15 + $0x66]] }
 0x3df   :  { %12339 = sst [smem:[#allocation82_spill]] %s9618_s10  ;;  %s9704_s0 = sld [smem:[#allocation15 + $0x7e]] }
 0x3e0   :  { %12347 = sst [smem:[#allocation177_spill]] %s9664_s15  ;;  %s9720_s16 = sld [smem:[#allocation15 + $0xae]] }
 0x3e1   :  { %12348 = sst [smem:[#allocation83_spill]] %s9666_s19  ;;  %s9736_s3 = sld [smem:[#allocation15 + $0x23]] }
 0x3e2   :  { %12351 = sst [smem:[#allocation99_spill]] %s9676_s28  ;;  %s9756_s18 = sld [smem:[#allocation15 + $0x53]] }
 0x3e3   :  { %12352 = sst [smem:[#allocation73_spill]] %s9678_s30  ;;  %s9758_s25 = sld [smem:[#allocation15 + $0x6b]]  ;;  %v3619_v35 = vstv %s12371_s20 }
 0x3e4   :  { %12356 = sst [smem:[#allocation98_spill]] %s9688_s13  ;;  %s9706_s13 = sld [smem:[#allocation15 + $0x96]]  ;;  %v9951_v46 = vmul.f32 %v9348_v1, %v3619_v35 }
 0x3e5   :  { %12358 = sst [smem:[#allocation103_spill]] %s9690_s7  ;;  %s9775_s4 = sld [smem:[#allocation15 + $0x83]] }
 0x3e6   :  { %12362 = sst [smem:[#allocation104_spill]] %s9704_s0  ;;  %s9722_s0 = sld [smem:[#allocation15 + $0xb]]  ;;  %12442 = vst [vmem:[#allocation163_spill] sm:$0xff] %v9951_v46 }
 0x3e7   :  { %12368 = sst [smem:[#allocation49_spill]] %s9720_s16  ;;  %s9738_s16 = sld [smem:[#allocation15 + $0x3b]] }
 0x3e8   :  { %12374 = sst [smem:[#allocation145_spill]] %s9736_s3  ;;  %s9804_s1 = sld [smem:[#allocation15 + $0x21]] }
 0x3e9   :  { %12379 = sst [smem:[#allocation102_spill]] %s9756_s18  ;;  %s9811_s3 = sld [smem:[#allocation15 + $0x39]] }
 0x3ea   :  { %12364 = sst [smem:[#allocation48_spill]] %s9706_s13  ;;  %s9777_s18 = sld [smem:[#allocation15 + $0x9b]] }
 0x3eb   :  { %12380 = sst [smem:[#allocation113_spill]] %s9758_s25  ;;  %s12396_s13 = sld [smem:[#allocation148_spill]] }
 0x3ec   :  { %12370 = sst [smem:[#allocation50_spill]] %s9722_s0  ;;  %s9828_s19 = sld [smem:[#allocation15 + $0x51]] }
 0x3ed   :  { %12376 = sst [smem:[#allocation100_spill]] %s9738_s16  ;;  %s9876_s5 = sld [smem:[#allocation15 + $0xe]] }
 0x3ee   :  { %12384 = sst [smem:[#allocation114_spill]] %s9775_s4  ;;  %s9795_s4 = sld [smem:[#allocation15 + $0xb3]] }
 0x3ef   :  { %12394 = sst [smem:[#allocation118_spill]] %s9804_s1  ;;  %s9830_s1 = sld [smem:[#allocation15 + $0x69]] }
 0x3f0   :  { %12385 = sst [smem:[#allocation115_spill]] %s9777_s18  ;;  %s9797_s18 = sld [smem:[#allocation15 + $0x9]] }
 0x3f1   :  { %12397 = sst [smem:[#allocation119_spill]] %s9811_s3  ;;  %s9852_s22 = sld [smem:[#allocation15 + $0x81]]  ;;  %v3718_v53 = vstv %s12396_s13 }
 0x3f2   :  { %12399 = sst [smem:[#allocation105_spill]] %s9828_s19  ;;  %s9854_s30 = sld [smem:[#allocation15 + $0x99]]  ;;  %v9954_v62 = vmul.f32 %v9348_v1, %v3718_v53 }
 0x3f3   :  { %s9874_s6 = sld [smem:[#allocation15 + $0xb1]]  ;;  %12411 = sst [smem:[#allocation109_spill]] %s9876_s5 }
 0x3f4   :  { %12390 = sst [smem:[#allocation116_spill]] %s9795_s4  ;;  %s9890_s2 = sld [smem:[#allocation15 + $0x26]]  ;;  %12443 = vst [vmem:[#allocation164_spill] sm:$0xff] %v9954_v62 }
 0x3f5   :  { %12401 = sst [smem:[#allocation106_spill]] %s9830_s1  ;;  %s9892_s17 = sld [smem:[#allocation15 + $0x3e]] }
 0x3f6   :  { %12391 = sst [smem:[#allocation117_spill]] %s9797_s18  ;;  %s12420_s13 = sld [smem:[#allocation59_spill]] }
 0x3f7   :  { %12404 = sst [smem:[#allocation120_spill]] %s9852_s22  ;;  %s9906_s23 = sld [smem:[#allocation15 + $0x56]] }
 0x3f8   :  { %12406 = sst [smem:[#allocation107_spill]] %s9854_s30  ;;  %s12421_s21 = sld [smem:[#allocation60_spill]] }
 0x3f9   :  { %12410 = sst [smem:[#allocation108_spill]] %s9874_s6  ;;  %s9908_s14 = sld [smem:[#allocation15 + $0x6e]] }
 0x3fa   :  { %12415 = sst [smem:[#allocation110_spill]] %s9890_s2  ;;  %s9922_s11 = sld [smem:[#allocation15 + $0x86]] }
 0x3fb   :  { %12417 = sst [smem:[#allocation121_spill]] %s9892_s17  ;;  %s12434_s29 = sld [smem:[#allocation62_spill]] }
 0x3fc   :  { %s9924_s8 = sld [smem:[#allocation15 + $0x9e]]  ;;  %s9940_s24 = sld [smem:[#allocation15 + $0xc]]  ;;  %v3817_v18 = vstv %s12420_s13 }
 0x3fd   :  { %12422 = sst [smem:[#allocation122_spill]] %s9906_s23  ;;  %s12433_s27 = sld [smem:[#allocation61_spill]]  ;;  %v9971_v35 = vmul.f32 %v9348_v1, %v3817_v18 }
 0x3fe   :  { %s9938_s26 = sld [smem:[#allocation15 + $0xb6]]  ;;  %v3916_v0 = vstv %s12421_s21  ;;  %s9946_s12 = sld [smem:[#allocation15 + $0x24]] }
 0x3ff   :  { %12424 = sst [smem:[#allocation111_spill]] %s9908_s14  ;;  %s12444_s28 = sld [smem:[#allocation63_spill]]  ;;  %12454 = vst [vmem:[#allocation166_spill] sm:$0xff] %v9971_v35  ;;  %v9974_v53 = vmul.f32 %v9348_v1, %v3916_v0 }
 0x400   :  { %12428 = sst [smem:[#allocation123_spill]] %s9922_s11  ;;  %s9948_s16 = sld [smem:[#allocation15 + $0x3c]] }
 0x401   :  { %s9958_s13 = sld [smem:[#allocation15 + $0x54]]  ;;  %v3334_v16 = vstv %s12434_s29  ;;  %12455 = vst [vmem:[#allocation167_spill] sm:$0xff] %v9974_v53  ;;  %s12456_s9 = sld [smem:[#allocation65_spill]] }
 0x402   :  { %12429 = sst [smem:[#allocation124_spill]] %s9924_s8  ;;  %s9960_s25 = sld [smem:[#allocation15 + $0x6c]]  ;;  %v9994_v0 = vmul.f32 %v9354_v31, %v3334_v16 }
 0x403   :  { %12437 = sst [smem:[#allocation125_spill]] %s9940_s24  ;;  %s12445_s24 = sld [smem:[#allocation64_spill]]  ;;  %v3235_v57 = vstv %s12433_s27 }
 0x404   :  { %12435 = sst [smem:[#allocation147_spill]] %s9938_s26  ;;  %s9968_s26 = sld [smem:[#allocation15 + $0x9c]]  ;;  %v9991_v18 = vmul.f32 %v9354_v31, %v3235_v57  ;;  %12466 = vst [vmem:[#allocation169_spill] sm:$0xff] %v9994_v0 }
 0x405   :  { %12439 = sst [smem:[#allocation126_spill]] %s9946_s12  ;;  %s9978_s27 = sld [smem:[#allocation15 + $0xb4]]  ;;  %v3433_v3 = vstv %s12444_s28 }
 0x406   :  { %12440 = sst [smem:[#allocation127_spill]] %s9948_s16  ;;  %s9980_s4 = sld [smem:[#allocation15 + $0x11]]  ;;  %12465 = vst [vmem:[#allocation168_spill] sm:$0xff] %v9991_v18  ;;  %v10011_v57 = vmul.f32 %v9354_v31, %v3433_v3 }
 0x407   :  { %12446 = sst [smem:[#allocation112_spill]] %s9958_s13  ;;  %s9966_s16 = sld [smem:[#allocation15 + $0x84]]  ;;  %v3631_v46 = vstv %s12456_s9 }
 0x408   :  { %12448 = sst [smem:[#allocation128_spill]] %s9960_s25  ;;  %s12457_s25 = sld [smem:[#allocation66_spill]]  ;;  %12473 = vst [vmem:[#allocation165_spill] sm:$0xff] %v10011_v57 }
 0x409   :  { %v3532_v10 = vstv %s12445_s24  ;;  %s12467_s20 = sld [smem:[#allocation39_spill]]  ;;  %s9998_s28 = sld [smem:[#allocation15 + $0x59]] }
 0x40a   :  { %12452 = sst [smem:[#allocation137_spill]] %s9968_s26  ;;  %s9986_s26 = sld [smem:[#allocation15 + $0x29]]  ;;  %v10014_v16 = vmul.f32 %v9354_v31, %v3532_v10  ;;  %v10031_v10 = vmul.f32 %v9354_v31, %v3631_v46 }
 0x40b   :  { %12458 = sst [smem:[#allocation138_spill]] %s9978_s27  ;;  %s10000_s24 = sld [smem:[#allocation15 + $0x71]] }
 0x40c   :  { %12460 = sst [smem:[#allocation130_spill]] %s9980_s4  ;;  %s12468_s4 = sld [smem:[#allocation40_spill]]  ;;  %12474 = vst [vmem:[#allocation170_spill] sm:$0xff] %v10014_v16  ;;  %12478 = vst [vmem:[#allocation173_spill] sm:$0xff] %v10031_v10 }
 0x40d   :  { %12450 = sst [smem:[#allocation129_spill]] %s9966_s16  ;;  %s9988_s16 = sld [smem:[#allocation15 + $0x41]] }
 0x40e   :  { %v3730_v62 = vstv %s12457_s25  ;;  %s10006_s10 = sld [smem:[#allocation15 + $0x89]]  ;;  %s12475_s7 = sld [smem:[#allocation41_spill]] }
 0x40f   :  { %12469 = sst [smem:[#allocation132_spill]] %s9998_s28  ;;  %s12476_s12 = sld [smem:[#allocation42_spill]]  ;;  %v3829_v35 = vstv %s12467_s20  ;;  %v10034_v3 = vmul.f32 %v9354_v31, %v3730_v62 }
 0x410   :  { %12462 = sst [smem:[#allocation131_spill]] %s9986_s26  ;;  %s10008_s21 = sld [smem:[#allocation15 + $0xa1]]  ;;  %v10051_v46 = vmul.f32 %v9354_v31, %v3829_v35 }
 0x411   :  { %12470 = sst [smem:[#allocation133_spill]] %s10000_s24  ;;  %s10018_s9 = sld [smem:[#allocation15 + $0xb9]]  ;;  %12479 = vst [vmem:[#allocation171_spill] sm:$0xff] %v10034_v3 }
 0x412   :  { %s10020_s25 = sld [smem:[#allocation15 + $0xf]]  ;;  %v3928_v53 = vstv %s12468_s4  ;;  %s12480_s0 = sld [smem:[#allocation51_spill]]  ;;  %12486 = vst [vmem:[#allocation174_spill] sm:$0xff] %v10051_v46 }
 0x413   :  { %12463 = sst [smem:[#allocation139_spill]] %s9988_s16  ;;  %s10026_s15 = sld [smem:[#allocation15 + $0x27]]  ;;  %v10054_v62 = vmul.f32 %v9354_v31, %v3928_v53 }
 0x414   :  { %12471 = sst [smem:[#allocation44_spill]] %s10006_s10  ;;  %s10028_s29 = sld [smem:[#allocation15 + $0x3f]]  ;;  %v3247_v18 = vstv %s12475_s7 }
 0x415   :  { %s12481_s18 = sld [smem:[#allocation77_spill]]  ;;  %s10038_s20 = sld [smem:[#allocation15 + $0x57]]  ;;  %v3346_v0 = vstv %s12476_s12  ;;  %12487 = vst [vmem:[#allocation175_spill] sm:$0xff] %v10054_v62  ;;  %v10071_v35 = vmul.f32 %v9360_v48, %v3247_v18 }
 0x416   :  { %12472 = sst [smem:[#allocation144_spill]] %s10008_s21  ;;  %s10040_s4 = sld [smem:[#allocation15 + $0x6f]]  ;;  %v10074_v53 = vmul.f32 %v9360_v48, %v3346_v0 }
 0x417   :  { %12477 = sst [smem:[#allocation148_spill]] %s10018_s9  ;;  %s10046_s19 = sld [smem:[#allocation15 + $0x87]]  ;;  %12495 = vst [vmem:[#allocation172_spill] sm:$0xff] %v10071_v35  ;;  %v3112_v35 = vpop.permute.xlu1 %3111 }
 0x418   :  { %s10048_s3 = sld [smem:[#allocation15 + $0x9f]]  ;;  %s12490_s12 = sld [smem:[#allocation125_spill]]  ;;  %v3445_v57 = vstv %s12480_s0  ;;  %12497 = vst [vmem:[#allocation176_spill] sm:$0xff] %v10074_v53  ;;  %v3115_v53 = vpop.permute.xlu0 %3114  ;;  %v3113_v62 = vsel %vm2143_vm0, %v9308_v17, %v3112_v35 }
 0x419   :  { %s10058_s7 = sld [smem:[#allocation15 + $0xb7]]  ;;  %s10060_s6 = sld [smem:[#allocation15 + $0x14]]  ;;  %v10091_v0 = vmul.f32 %v9360_v48, %v3445_v57  ;;  %v3116_v29 = vsel %vm2144_vm1, %v9308_v17, %v3115_v53 }
 0x41a   :  { %s12492_s30 = sld [smem:[#allocation126_spill]]  ;;  %s10066_s1 = sld [smem:[#allocation15 + $0x2c]] }
 0x41b   :  { %12482 = sst [smem:[#allocation45_spill]] %s10038_s20  ;;  %v3544_v16 = vstv %s12481_s18  ;;  %s12496_s2 = sld [smem:[#allocation128_spill]]  ;;  %12504 = vst [vmem:[#allocation178_spill] sm:$0xff] %v10091_v0  ;;  %v3118_v35 = vpop.permute.xlu1 %3117 }
 0x41c   :  { %12483 = sst [smem:[#allocation46_spill]] %s10040_s4  ;;  %s12500_s18 = sld [smem:[#allocation137_spill]]  ;;  %v10094_v10 = vmul.f32 %v9360_v48, %v3544_v16  ;;  %v3121_v49 = vpop.permute.xlu0 %3120 }
 0x41d   :  { %12484 = sst [smem:[#allocation47_spill]] %s10046_s19  ;;  %s10068_s19 = sld [smem:[#allocation15 + $0x44]] }
 0x41e   :  { %12485 = sst [smem:[#allocation146_spill]] %s10048_s3  ;;  %s12493_s3 = sld [smem:[#allocation127_spill]]  ;;  %12505 = vst [vmem:[#allocation179_spill] sm:$0xff] %v10094_v10 }
 0x41f   :  { %12489 = sst [smem:[#allocation59_spill]] %s10058_s7  ;;  %s10104_s22 = sld [smem:[#allocation15 + $0x12]]  ;;  %v3124_v6 = vpop.permute.xlu1 %3123 }
 0x420   :  { %12491 = sst [smem:[#allocation60_spill]] %s10060_s6  ;;  %s12499_s6 = sld [smem:[#allocation129_spill]] }
 0x421   :  { %s10080_s23 = sld [smem:[#allocation15 + $0x5c]]  ;;  %s12506_s8 = sld [smem:[#allocation47_spill]] }
 0x422   :  { %s10082_s17 = sld [smem:[#allocation15 + $0x74]]  ;;  %s12508_s13 = sld [smem:[#allocation60_spill]] }
 0x423   :  { %12494 = sst [smem:[#allocation61_spill]] %s10068_s19  ;;  %s10086_s19 = sld [smem:[#allocation15 + $0x8c]] }
 0x424   :  { %s10088_s14 = sld [smem:[#allocation15 + $0xa4]]  ;;  %s12509_s5 = sld [smem:[#allocation61_spill]] }
 0x425   :  { %s12510_s26 = sld [smem:[#allocation78_spill]]  ;;  %s12511_s16 = sld [smem:[#allocation80_spill]] }
 0x426   :  { %s12512_s28 = sld [smem:[#allocation52_spill]]  ;;  %s12513_s21 = sld [smem:[#allocation53_spill]] }
 0x427   :  { %s12514_s9 = sld [smem:[#allocation134_spill]]  ;;  %s12515_s10 = sld [smem:[#allocation54_spill]] }
 0x428   :  { %12502 = sst [smem:[#allocation62_spill]] %s10082_s17  ;;  %s12516_s24 = sld [smem:[#allocation55_spill]] }
 0x429   :  { %s12517_s0 = sld [smem:[#allocation56_spill]]  ;;  %s12518_s4 = sld [smem:[#allocation57_spill]] }
 0x42a   :  { %12503 = sst [smem:[#allocation63_spill]] %s10088_s14  ;;  %s12519_s27 = sld [smem:[#allocation135_spill]] }
 0x42b   :  { %s12520_s20 = sld [smem:[#allocation136_spill]]  ;;  %v12521_v48 = vstv %s12510_s26  ;;  %s12522_s11 = sld [smem:[#allocation140_spill]]  ;;  %v12523_v3 = vstv %s12511_s16 }
 0x42c   :  { %v3161_v45 = vmul.f32 %v12521_v48, %v3113_v62  ;;  %v3260_v31 = vmul.f32 %v12523_v3, %v3113_v62  ;;  %v12524_v28 = vstv %s12512_s28  ;;  %v12525_v17 = vstv %s12513_s21  ;;  %s12526_s7 = sld [smem:[#allocation141_spill]]  ;;  %s12530_s17 = sld [smem:[#allocation142_spill]] }
 0x42d   :  { %v3359_v15 = vmul.f32 %v12524_v28, %v3113_v62  ;;  %v3458_v53 = vmul.f32 %v12525_v17, %v3113_v62  ;;  %v12527_v16 = vstv %s12514_s9  ;;  %v12528_v57 = vstv %s12515_s10  ;;  %s12532_s26 = sld [smem:[#allocation143_spill]]  ;;  %s12537_s10 = sld [smem:[#allocation96_spill]] }
 0x42e   :  { %v3168_v46 = vmul.f32 %v12527_v16, %v3116_v29  ;;  %v3557_v10 = vmul.f32 %v12528_v57, %v3113_v62  ;;  %v12529_v63 = vstv %s12516_s24  ;;  %v3165_v18 = vadd.f32 %v9627_v61, %v3161_v45  ;;  %s12538_s16 = sld [smem:[#allocation101_spill]]  ;;  %s12540_s21 = sld [smem:[#allocation74_spill]] }
 0x42f   :  { %v3656_v0 = vmul.f32 %v12529_v63, %v3113_v62  ;;  %v3264_v48 = vadd.f32 %v9632_v43, %v3260_v31  ;;  %v12531_v32 = vstv %s12517_s0  ;;  %v12533_v28 = vstv %s12518_s4  ;;  %s12541_s28 = sld [smem:[#allocation67_spill]]  ;;  %s12546_s24 = sld [smem:[#allocation68_spill]] }
 0x430   :  { %v3755_v3 = vmul.f32 %v12531_v32, %v3113_v62  ;;  %v3854_v38 = vmul.f32 %v12533_v28, %v3113_v62  ;;  %v12534_v1 = vstv %s12519_s27  ;;  %v3363_v63 = vadd.f32 %v9637_v36, %v3359_v15  ;;  %s12544_s27 = sld [smem:[#allocation43_spill]]  ;;  %s12550_s9 = sld [smem:[#allocation85_spill]] }
 0x431   :  { %v3267_v17 = vmul.f32 %v12534_v1, %v3116_v29  ;;  %v12535_v60 = vstv %s12520_s20  ;;  %v12536_v7 = vstv %s12522_s11  ;;  %v3462_v31 = vadd.f32 %v9647_v42, %v3458_v53  ;;  %s12543_s11 = sld [smem:[#allocation75_spill]]  ;;  %s12552_s20 = sld [smem:[#allocation69_spill]] }
 0x432   :  { %v3366_v16 = vmul.f32 %v12535_v60, %v3116_v29  ;;  %v3465_v57 = vmul.f32 %v12536_v7, %v3116_v29  ;;  %v12539_v41 = vstv %s12526_s7  ;;  %v3561_v43 = vadd.f32 %v9652_v23, %v3557_v10  ;;  %s12554_s4 = sld [smem:[#allocation86_spill]]  ;;  %s12557_s7 = sld [smem:[#allocation87_spill]] }
 0x433   :  { %v3564_v61 = vmul.f32 %v12539_v41, %v3116_v29  ;;  %v3119_v1 = vsel %vm2143_vm0, %v9319_v21, %v3118_v35  ;;  %v12542_v32 = vstv %s12530_s17  ;;  %v3660_v7 = vadd.f32 %v9657_v37, %v3656_v0  ;;  %s12549_s17 = sld [smem:[#allocation58_spill]]  ;;  %s12559_s0 = sld [smem:[#allocation70_spill]] }
 0x434   :  { %v3663_v60 = vmul.f32 %v12542_v32, %v3116_v29  ;;  %v3169_v36 = vadd.f32 %v3168_v46, %v3165_v18  ;;  %v3268_v15 = vadd.f32 %v3267_v17, %v3264_v48  ;;  %v12545_v45 = vstv %s12532_s26  ;;  %s12561_s26 = sld [smem:[#allocation88_spill]]  ;;  %s12630_s14 = sld [smem:[#allocation112_spill]] }
 0x435   :  { %v3762_v62 = vmul.f32 %v12545_v45, %v3116_v29  ;;  %v3759_v41 = vadd.f32 %v9662_v9, %v3755_v3  ;;  %v3858_v42 = vadd.f32 %v9671_v2, %v3854_v38  ;;  %v3122_v23 = vsel %vm2144_vm1, %v9319_v21, %v3121_v49 }
 0x436   :  { %v12547_v10 = vstv %s12537_s10  ;;  %v12548_v53 = vstv %s12538_s16  ;;  %v3367_v37 = vadd.f32 %v3366_v16, %v3363_v63  ;;  %v12551_v46 = vstv %s12540_s21  ;;  %s12565_s10 = sld [smem:[#allocation89_spill]]  ;;  %s12566_s16 = sld [smem:[#allocation90_spill]] }
 0x437   :  { %v3172_v35 = vmul.f32 %v12547_v10, %v3119_v1  ;;  %v3271_v28 = vmul.f32 %v12548_v53, %v3119_v1  ;;  %v3370_v18 = vmul.f32 %v12551_v46, %v3119_v1  ;;  %v3466_v0 = vadd.f32 %v3465_v57, %v3462_v31  ;;  %s10202_s21 = sld [smem:[#allocation15 + $0x2a]] }
 0x438   :  { %v12553_v48 = vstv %s12541_s28  ;;  %v3565_v2 = vadd.f32 %v3564_v61, %v3561_v43  ;;  %v12555_v38 = vstv %s12543_s11  ;;  %v12556_v17 = vstv %s12544_s27  ;;  %s12569_s28 = sld [smem:[#allocation83_spill]]  ;;  %s12571_s11 = sld [smem:[#allocation99_spill]] }
 0x439   :  { %v3469_v9 = vmul.f32 %v12553_v48, %v3119_v1  ;;  %v3568_v3 = vmul.f32 %v12555_v38, %v3119_v1  ;;  %v3861_v32 = vmul.f32 %v12556_v17, %v3116_v29  ;;  %v3173_v21 = vadd.f32 %v3172_v35, %v3169_v36  ;;  %s12572_s27 = sld [smem:[#allocation73_spill]] }
 0x43a   :  { %v3272_v49 = vadd.f32 %v3271_v28, %v3268_v15  ;;  %v3664_v45 = vadd.f32 %v3663_v60, %v3660_v7  ;;  %v3371_v10 = vadd.f32 %v3370_v18, %v3367_v37  ;;  %v12558_v19 = vstv %s12546_s24  ;;  %v3127_v18 = vpop.permute.xlu0 %3126  ;;  %s10216_s24 = sld [smem:[#allocation15 + $0x42]] }
 0x43b   :  { %v3470_v53 = vadd.f32 %v3469_v9, %v3466_v0  ;;  %v3667_v16 = vmul.f32 %v12558_v19, %v3119_v1  ;;  %v3763_v63 = vadd.f32 %v3762_v62, %v3759_v41  ;;  %v12560_v46 = vstv %s12549_s17  ;;  %s12574_s17 = sld [smem:[#allocation98_spill]] }
 0x43c   :  { %v3180_v57 = vmul.f32 %v12560_v46, %v3122_v23  ;;  %v12562_v31 = vstv %s12550_s9  ;;  %v3569_v61 = vadd.f32 %v3568_v3, %v3565_v2  ;;  %v12563_v43 = vstv %s12552_s20  ;;  %s12576_s9 = sld [smem:[#allocation103_spill]]  ;;  %s12577_s20 = sld [smem:[#allocation104_spill]] }
 0x43d   :  { %v3279_v48 = vmul.f32 %v12562_v31, %v3122_v23  ;;  %v3766_v38 = vmul.f32 %v12563_v43, %v3119_v1  ;;  %v12564_v29 = vstv %s12554_s4  ;;  %v3177_v60 = vadd.f32 %v9686_v8, %v3173_v21  ;;  %s12579_s4 = sld [smem:[#allocation93_spill]] }
 0x43e   :  { %v3378_v36 = vmul.f32 %v12564_v29, %v3122_v23  ;;  %v3668_v7 = vadd.f32 %v3667_v16, %v3664_v45  ;;  %v3862_v15 = vadd.f32 %v3861_v32, %v3858_v42  ;;  %v12567_v19 = vstv %s12557_s7  ;;  %s12582_s7 = sld [smem:[#allocation71_spill]] }
 0x43f   :  { %v3477_v62 = vmul.f32 %v12567_v19, %v3122_v23  ;;  %v3276_v41 = vadd.f32 %v9696_v20, %v3272_v49  ;;  %v3767_v35 = vadd.f32 %v3766_v38, %v3763_v63  ;;  %v12568_v28 = vstv %s12559_s0  ;;  %s12584_s0 = sld [smem:[#allocation48_spill]] }
 0x440   :  { %v3865_v37 = vmul.f32 %v12568_v28, %v3119_v1  ;;  %v12570_v0 = vstv %s12561_s26  ;;  %v3375_v2 = vadd.f32 %v9702_v30, %v3371_v10  ;;  %v3474_v8 = vadd.f32 %v9712_v59, %v3470_v53  ;;  %s12586_s26 = sld [smem:[#allocation49_spill]] }
 0x441   :  { %v3576_v9 = vmul.f32 %v12570_v0, %v3122_v23  ;;  %v3125_v42 = vsel %vm2143_vm0, %v9329_v24, %v3124_v6  ;;  %v12573_v20 = vstv %s12565_s10  ;;  %v12575_v1 = vstv %s12566_s16  ;;  %s12587_s10 = sld [smem:[#allocation76_spill]]  ;;  %s12589_s16 = sld [smem:[#allocation81_spill]] }
 0x442   :  { %v3675_v3 = vmul.f32 %v12573_v20, %v3122_v23  ;;  %v3774_v17 = vmul.f32 %v12575_v1, %v3122_v23  ;;  %v3573_v32 = vadd.f32 %v9718_v34, %v3569_v61  ;;  %v3866_v21 = vadd.f32 %v3865_v37, %v3862_v15 }
 0x443   :  { %v3672_v30 = vadd.f32 %v9728_v52, %v3668_v7  ;;  %v3771_v59 = vadd.f32 %v9734_v26, %v3767_v35  ;;  %v10228_v49 = vsel %vm2144_vm1, %v9329_v24, %v3127_v18  ;;  %v3181_v6 = vadd.f32 %v3180_v57, %v3177_v60 }
 0x444   :  { %v3870_v45 = vadd.f32 %v9744_v27, %v3866_v21  ;;  %v12578_v10 = vstv %s12569_s28  ;;  %v3280_v34 = vadd.f32 %v3279_v48, %v3276_v41  ;;  %v12580_v16 = vstv %s12571_s11  ;;  %s12592_s28 = sld [smem:[#allocation82_spill]]  ;;  %s12594_s11 = sld [smem:[#allocation84_spill]] }
 0x445   :  { %v3184_v53 = vmul.f32 %v12578_v10, %v3125_v42  ;;  %v3283_v63 = vmul.f32 %v12580_v16, %v3125_v42  ;;  %v3379_v46 = vadd.f32 %v3378_v36, %v3375_v2  ;;  %v12581_v52 = vstv %s12572_s27  ;;  %s12595_s27 = sld [smem:[#allocation97_spill]] }
 0x446   :  { %v3382_v26 = vmul.f32 %v12581_v52, %v3125_v42  ;;  %v3478_v31 = vadd.f32 %v3477_v62, %v3474_v8  ;;  %v12583_v61 = vstv %s12574_s17  ;;  %v3577_v38 = vadd.f32 %v3576_v9, %v3573_v32  ;;  %s12597_s17 = sld [smem:[#allocation72_spill]] }
 0x447   :  { %v3481_v24 = vmul.f32 %v12583_v61, %v3125_v42  ;;  %v3185_v43 = vadd.f32 %v3184_v53, %v3181_v6  ;;  %v3284_v57 = vadd.f32 %v3283_v63, %v3280_v34  ;;  %v12585_v29 = vstv %s12576_s9  ;;  %v3130_v53 = vpop.permute.xlu1 %3129  ;;  %s10263_s9 = sld [smem:[#allocation15 + $0x5a]] }
 0x448   :  { %v3580_v27 = vmul.f32 %v12585_v29, %v3125_v42  ;;  %v3383_v60 = vadd.f32 %v3382_v26, %v3379_v46  ;;  %v3676_v48 = vadd.f32 %v3675_v3, %v3672_v30  ;;  %v12588_v7 = vstv %s12577_s20  ;;  %s10265_s20 = sld [smem:[#allocation15 + $0x72]] }
 0x449   :  { %v3679_v36 = vmul.f32 %v12588_v7, %v3125_v42  ;;  %v3330_v15 = vstv %s10202_s21  ;;  %v12590_v19 = vstv %s12579_s4  ;;  %v3482_v62 = vadd.f32 %v3481_v24, %v3478_v31  ;;  %s12601_s4 = sld [smem:[#allocation117_spill]]  ;;  %s12702_s21 = sld [smem:[#allocation144_spill]] }
 0x44a   :  { %v3873_v41 = vmul.f32 %v12590_v19, %v3122_v23  ;;  %v3581_v35 = vadd.f32 %v3580_v27, %v3577_v38  ;;  %v3775_v28 = vadd.f32 %v3774_v17, %v3771_v59  ;;  %v12591_v37 = vstv %s12582_s7  ;;  %s12602_s7 = sld [smem:[#allocation118_spill]] }
 0x44b   :  { %v3192_v18 = vmul.f32 %v12591_v37, %v10228_v49  ;;  %v3680_v0 = vadd.f32 %v3679_v36, %v3676_v48  ;;  %v12593_v9 = vstv %s12584_s0  ;;  %v3429_v8 = vstv %s10216_s24  ;;  %s12603_s0 = sld [smem:[#allocation119_spill]]  ;;  %s10557_s24 = sld [smem:[#allocation15 + $0x8d]] }
 0x44c   :  { %v3778_v2 = vmul.f32 %v12593_v9, %v3125_v42  ;;  %v3189_v20 = vadd.f32 %v9749_v51, %v3185_v43  ;;  %v3288_v3 = vadd.f32 %v9754_v33, %v3284_v57  ;;  %v3874_v1 = vadd.f32 %v3873_v41, %v3870_v45  ;;  %v3133_v57 = vpop.permute.xlu0 %3132 }
 0x44d   :  { %v12596_v32 = vstv %s12586_s26  ;;  %v12598_v17 = vstv %s12587_s10  ;;  %v12599_v30 = vstv %s12589_s16  ;;  %v3387_v6 = vadd.f32 %v9763_v58, %v3383_v60  ;;  %s10272_s26 = sld [smem:[#allocation15 + $0x8a]]  ;;  %s12605_s10 = sld [smem:[#allocation105_spill]] }
 0x44e   :  { %v3877_v23 = vmul.f32 %v12596_v32, %v3125_v42  ;;  %v3291_v21 = vmul.f32 %v12598_v17, %v10228_v49  ;;  %v3390_v59 = vmul.f32 %v12599_v30, %v10228_v49  ;;  %v3779_v10 = vadd.f32 %v3778_v2, %v3775_v28  ;;  %s12608_s16 = sld [smem:[#allocation106_spill]] }
 0x44f   :  { %v12600_v51 = vstv %s12592_s28  ;;  %v3486_v42 = vadd.f32 %v9768_v47, %v3482_v62  ;;  %v3585_v45 = vadd.f32 %v9773_v5, %v3581_v35  ;;  %v12604_v58 = vstv %s12594_s11  ;;  %s12609_s28 = sld [smem:[#allocation120_spill]]  ;;  %s12611_s11 = sld [smem:[#allocation177_spill]] }
 0x450   :  { %v3489_v33 = vmul.f32 %v12600_v51, %v10228_v49  ;;  %v3878_v34 = vadd.f32 %v3877_v23, %v3874_v1  ;;  %v3588_v16 = vmul.f32 %v12604_v58, %v10228_v49  ;;  %v12606_v63 = vstv %s12595_s27  ;;  %s12616_s27 = sld [smem:[#allocation50_spill]]  ;;  %v3136_v23 = vpop.permute.xlu1 %3135 }
 0x451   :  { %v3687_v46 = vmul.f32 %v12606_v63, %v10228_v49  ;;  %v12607_v52 = vstv %s12597_s17  ;;  %v3684_v31 = vadd.f32 %v9783_v50, %v3680_v0  ;;  %v3783_v47 = vadd.f32 %v9788_v14, %v3779_v10  ;;  %s12617_s17 = sld [smem:[#allocation145_spill]] }
 0x452   :  { %v3786_v26 = vmul.f32 %v12607_v52, %v10228_v49  ;;  %v3131_v5 = vsel %vm2143_vm0, %v9336_v40, %v3130_v53  ;;  %v3193_v61 = vadd.f32 %v3192_v18, %v3189_v20  ;;  %v3292_v24 = vadd.f32 %v3291_v21, %v3288_v3 }
 0x453   :  { %v3882_v43 = vadd.f32 %v9793_v4, %v3878_v34  ;;  %v12610_v38 = vstv %s12601_s4  ;;  %v12612_v27 = vstv %s12602_s7  ;;  %v3391_v48 = vadd.f32 %v3390_v59, %v3387_v6  ;;  %s12620_s4 = sld [smem:[#allocation107_spill]]  ;;  %s12621_s7 = sld [smem:[#allocation100_spill]] }
 0x454   :  { %v3196_v29 = vmul.f32 %v12610_v38, %v3131_v5  ;;  %v3295_v60 = vmul.f32 %v12612_v27, %v3131_v5  ;;  %v12613_v50 = vstv %s12603_s0  ;;  %v3490_v14 = vadd.f32 %v3489_v33, %v3486_v42  ;;  %s12622_s0 = sld [smem:[#allocation102_spill]] }
 0x455   :  { %v3394_v7 = vmul.f32 %v12613_v50, %v3131_v5  ;;  %v12614_v36 = vstv %s12605_s10  ;;  %v3589_v41 = vadd.f32 %v3588_v16, %v3585_v45  ;;  %v12615_v4 = vstv %s12608_s16  ;;  %s12623_s10 = sld [smem:[#allocation108_spill]]  ;;  %s10311_s16 = sld [smem:[#allocation15 + $0xa2]] }
 0x456   :  { %v3493_v19 = vmul.f32 %v12614_v36, %v3131_v5  ;;  %v3197_v62 = vadd.f32 %v3196_v29, %v3193_v61  ;;  %v3296_v35 = vadd.f32 %v3295_v60, %v3292_v24  ;;  %v3592_v28 = vmul.f32 %v12615_v4, %v3131_v5 }
 0x457   :  { %v3688_v37 = vadd.f32 %v3687_v46, %v3684_v31  ;;  %v3134_v18 = vsel %vm2144_vm1, %v9336_v40, %v3133_v57  ;;  %v3395_v0 = vadd.f32 %v3394_v7, %v3391_v48  ;;  %v12618_v2 = vstv %s12609_s28  ;;  %s12625_s28 = sld [smem:[#allocation113_spill]] }
 0x458   :  { %v3494_v9 = vadd.f32 %v3493_v19, %v3490_v14  ;;  %v3691_v20 = vmul.f32 %v12618_v2, %v3131_v5  ;;  %v12619_v3 = vstv %s12611_s11  ;;  %v3593_v32 = vadd.f32 %v3592_v28, %v3589_v41  ;;  %s10318_s11 = sld [smem:[#allocation15 + $0xba]] }
 0x459   :  { %v3885_v1 = vmul.f32 %v12619_v3, %v10228_v49  ;;  %v3528_v17 = vstv %s10263_s9  ;;  %v3627_v21 = vstv %s10265_s20  ;;  %v3201_v30 = vadd.f32 %v9802_v12, %v3197_v62  ;;  %s10582_s9 = sld [smem:[#allocation16 + $0x2]]  ;;  %s10584_s20 = sld [smem:[#allocation15 + $0x8e]] }
 0x45a   :  { %v3692_v59 = vadd.f32 %v3691_v20, %v3688_v37  ;;  %v3787_v6 = vadd.f32 %v3786_v26, %v3783_v47  ;;  %v3726_v10 = vstv %s10272_s26  ;;  %v12624_v40 = vstv %s12616_s27  ;;  %s10329_s27 = sld [smem:[#allocation15 + $0x17]]  ;;  %s10586_s26 = sld [smem:[#allocation15 + $0xbc]] }
 0x45b   :  { %v3204_v53 = vmul.f32 %v12624_v40, %v3134_v18  ;;  %v12626_v51 = vstv %s12617_s17  ;;  %v3300_v33 = vadd.f32 %v9809_v22, %v3296_v35  ;;  %v3886_v42 = vadd.f32 %v3885_v1, %v3882_v43  ;;  %s10331_s17 = sld [smem:[#allocation15 + $0x2f]] }
 0x45c   :  { %v3303_v49 = vmul.f32 %v12626_v51, %v3134_v18  ;;  %v3399_v12 = vadd.f32 %v9816_v11, %v3395_v0  ;;  %v3498_v45 = vadd.f32 %v9821_v56, %v3494_v9  ;;  %v12627_v34 = vstv %s12620_s4  ;;  %s12633_s4 = sld [smem:[#allocation114_spill]] }
 0x45d   :  { %v3790_v58 = vmul.f32 %v12627_v34, %v3131_v5  ;;  %v10327_v16 = vsel %vm2143_vm0, %v9342_v54, %v3136_v23  ;;  %v12628_v22 = vstv %s12621_s7  ;;  %v12629_v46 = vstv %s12622_s0  ;;  %s12637_s7 = sld [smem:[#allocation115_spill]]  ;;  %s12647_s0 = sld [smem:[#allocation122_spill]]  ;;  %v12652_v34 = vld [vmem:[#allocation154_spill] sm:$0xff] }
 0x45e   :  { %v3402_v63 = vmul.f32 %v12628_v22, %v3134_v18  ;;  %v3501_v11 = vmul.f32 %v12629_v46, %v3134_v18  ;;  %v3597_v56 = vadd.f32 %v9826_v13, %v3593_v32  ;;  %v12631_v52 = vstv %s12623_s10  ;;  %v3139_v13 = vpop.permute.xlu0 %3138  ;;  %s12648_s10 = sld [smem:[#allocation111_spill]] }
 0x45f   :  { %v3889_v26 = vmul.f32 %v12631_v52, %v3131_v5  ;;  %v12632_v31 = vstv %s12625_s28  ;;  %v3696_v61 = vadd.f32 %v9835_v25, %v3692_v59  ;;  %v3791_v24 = vadd.f32 %v3790_v58, %v3787_v6  ;;  %s10386_s28 = sld [smem:[#allocation15 + $0x15]] }
 0x460   :  { %v3600_v47 = vmul.f32 %v12632_v31, %v3134_v18  ;;  %v3205_v43 = vadd.f32 %v3204_v53, %v3201_v30  ;;  %v12634_v38 = vstv %s12490_s12  ;;  %v3304_v27 = vadd.f32 %v3303_v49, %v3300_v33  ;;  %s12639_s12 = sld [smem:[#allocation116_spill]]  ;;  %v12650_v33 = vld [vmem:[#allocation153_spill] sm:$0xff] }
 0x461   :  { %v3890_v57 = vadd.f32 %v3889_v26, %v3886_v42  ;;  %v3208_v29 = vmul.f32 %v12634_v38, %v10327_v16  ;;  %v12635_v60 = vstv %s12492_s30  ;;  %v3403_v5 = vadd.f32 %v3402_v63, %v3399_v12  ;;  %s12645_s30 = sld [smem:[#allocation121_spill]]  ;;  %v12656_v26 = vld [vmem:[#allocation155_spill] sm:$0xff] }
 0x462   :  { %v3307_v48 = vmul.f32 %v12635_v60, %v10327_v16  ;;  %v12636_v50 = vstv %s12493_s3  ;;  %v3502_v25 = vadd.f32 %v3501_v11, %v3498_v45  ;;  %v12638_v14 = vstv %s12630_s14  ;;  %s12642_s3 = sld [smem:[#allocation109_spill]]  ;;  %s12644_s14 = sld [smem:[#allocation110_spill]]  ;;  %v3142_v11 = vpop.permute.xlu1 %3141 }
 0x463   :  { %v3406_v7 = vmul.f32 %v12636_v50, %v10327_v16  ;;  %v3505_v36 = vmul.f32 %v12638_v14, %v10327_v16  ;;  %v3209_v19 = vadd.f32 %v3208_v29, %v3205_v43  ;;  %v3601_v62 = vadd.f32 %v3600_v47, %v3597_v56  ;;  %v12657_v47 = vld [vmem:[#allocation156_spill] sm:$0xff] }
 0x464   :  { %v3308_v41 = vadd.f32 %v3307_v48, %v3304_v27  ;;  %v12640_v35 = vstv %s12496_s2  ;;  %v12641_v28 = vstv %s12633_s4  ;;  %v3795_v0 = vadd.f32 %v9840_v44, %v3791_v24  ;;  %s10372_s2 = sld [smem:[#allocation15 + $0x47]]  ;;  %s10388_s4 = sld [smem:[#allocation15 + $0x2d]] }
 0x465   :  { %v3604_v4 = vmul.f32 %v12640_v35, %v10327_v16  ;;  %v3699_v37 = vmul.f32 %v12641_v28, %v3134_v18  ;;  %v3407_v9 = vadd.f32 %v3406_v7, %v3403_v5  ;;  %v3825_v2 = vstv %s10311_s16  ;;  %v3145_v35 = vpop.permute.xlu0 %3144  ;;  %s10597_s16 = sld [smem:[#allocation15 + $0x77]] }
 0x466   :  { %v10365_v20 = vsel %vm2144_vm1, %v9342_v54, %v3139_v13  ;;  %v3506_v3 = vadd.f32 %v3505_v36, %v3502_v25  ;;  %v3924_v32 = vstv %s10318_s11  ;;  %v12643_v23 = vstv %s12637_s7  ;;  %v12649_v54 = vld [vmem:[#allocation152_spill] sm:$0xff]  ;;  %s10407_s7 = sld [smem:[#allocation15 + $0x45]]  ;;  %v12662_v13 = vld [vmem:[#allocation149_spill] sm:$0xff] }
 0x467   :  { %v3605_v1 = vadd.f32 %v3604_v4, %v3601_v62  ;;  %v3798_v30 = vmul.f32 %v12643_v23, %v3134_v18  ;;  %v3700_v59 = vadd.f32 %v3699_v37, %v3696_v61  ;;  %v3251_v6 = vstv %s10329_s27  ;;  %s10607_s27 = sld [smem:[#allocation16 + $0x3]]  ;;  %s10624_s11 = sld [smem:[#allocation15 + $0xbd]] }
 0x468   :  { %v3350_v40 = vstv %s10331_s17  ;;  %v12646_v44 = vstv %s12639_s12  ;;  %v3894_v51 = vadd.f32 %v9845_v39, %v3890_v57  ;;  %v3213_v49 = vadd.f32 %v12649_v54, %v3209_v19  ;;  %s12663_s12 = sld [smem:[#allocation138_spill]]  ;;  %s12728_s17 = sld [smem:[#allocation63_spill]] }
 0x469   :  { %v3897_v53 = vmul.f32 %v12646_v44, %v3134_v18  ;;  %v3312_v42 = vadd.f32 %v12650_v33, %v3308_v41  ;;  %v12651_v12 = vstv %s12642_s3  ;;  %v3411_v58 = vadd.f32 %v12652_v34, %v3407_v9  ;;  %s12665_s3 = sld [smem:[#allocation46_spill]] }
 0x46a   :  { %v3216_v45 = vmul.f32 %v12651_v12, %v10365_v20  ;;  %v12653_v22 = vstv %s12499_s6  ;;  %v3799_v46 = vadd.f32 %v3798_v30, %v3795_v0  ;;  %v12654_v39 = vstv %s12644_s14  ;;  %s12660_s6 = sld [smem:[#allocation45_spill]]  ;;  %s12678_s14 = sld [smem:[#allocation139_spill]] }
 0x46b   :  { %v3703_v63 = vmul.f32 %v12653_v22, %v10327_v16  ;;  %v3315_v18 = vmul.f32 %v12654_v39, %v10365_v20  ;;  %v12655_v56 = vstv %s12645_s30  ;;  %v3510_v31 = vadd.f32 %v12656_v26, %v3506_v3  ;;  %v12679_v39 = vld [vmem:[#allocation38_spill] sm:$0xff]  ;;  %s12680_s30 = sld [smem:[#allocation132_spill]] }
 0x46c   :  { %v3414_v52 = vmul.f32 %v12655_v56, %v10365_v20  ;;  %v3609_v61 = vadd.f32 %v12657_v47, %v3605_v1  ;;  %v12658_v24 = vstv %s12647_s0  ;;  %v12659_v57 = vstv %s12648_s10  ;;  %v12670_v1 = vld [vmem:[#allocation157_spill] sm:$0xff]  ;;  %s10446_s0 = sld [smem:[#allocation15 + $0x5d]]  ;;  %s12687_s10 = sld [smem:[#allocation147_spill]] }
 0x46d   :  { %v3513_v43 = vmul.f32 %v12658_v24, %v10365_v20  ;;  %v3612_v38 = vmul.f32 %v12659_v57, %v10365_v20  ;;  %v3704_v29 = vadd.f32 %v3703_v63, %v3700_v59  ;;  %v12661_v27 = vstv %s12500_s18  ;;  %s12667_s18 = sld [smem:[#allocation123_spill]] }
 0x46e   :  { %v3802_v60 = vmul.f32 %v12661_v27, %v10327_v16  ;;  %v3898_v48 = vadd.f32 %v3897_v53, %v3894_v51  ;;  %v10412_v5 = vsel %vm2143_vm0, %v12662_v13, %v3142_v11  ;;  %v3217_v50 = vadd.f32 %v3216_v45, %v3213_v49  ;;  %v12685_v27 = vld [vmem:[#allocation162_spill] sm:$0xff] }
 0x46f   :  { %v3316_v7 = vadd.f32 %v3315_v18, %v3312_v42  ;;  %v12664_v14 = vstv %s10020_s25  ;;  %v12666_v19 = vstv %s10026_s15  ;;  %v3415_v62 = vadd.f32 %v3414_v52, %v3411_v58  ;;  %s12671_s25 = sld [smem:[#allocation124_spill]]  ;;  %s12674_s15 = sld [smem:[#allocation130_spill]]  ;;  %v3148_v58 = vpop.permute.xlu1 %3147 }
 0x470   :  { %v3803_v25 = vadd.f32 %v3802_v60, %v3799_v46  ;;  %v3220_v36 = vmul.f32 %v12664_v14, %v10412_v5  ;;  %v3319_v41 = vmul.f32 %v12666_v19, %v10412_v5  ;;  %v12668_v4 = vstv %s10028_s29  ;;  %v12676_v46 = vld [vmem:[#allocation158_spill] sm:$0xff]  ;;  %s12677_s29 = sld [smem:[#allocation131_spill]] }
 0x471   :  { %v3418_v28 = vmul.f32 %v12668_v4, %v10412_v5  ;;  %v3514_v37 = vadd.f32 %v3513_v43, %v3510_v31  ;;  %v12669_v0 = vstv %s12660_s6  ;;  %v3613_v3 = vadd.f32 %v3612_v38, %v3609_v61  ;;  %v12682_v31 = vld [vmem:[#allocation160_spill] sm:$0xff]  ;;  %v12684_v38 = vld [vmem:[#allocation161_spill] sm:$0xff]  ;;  %s10463_s6 = sld [smem:[#allocation16]] }
 0x472   :  { %v3517_v9 = vmul.f32 %v12669_v0, %v10412_v5  ;;  %v3708_v23 = vadd.f32 %v12670_v1, %v3704_v29  ;;  %v3221_v30 = vadd.f32 %v3220_v36, %v3217_v50  ;;  %v3320_v59 = vadd.f32 %v3319_v41, %v3316_v7 }
 0x473   :  { %v3449_v44 = vstv %s10372_s2  ;;  %v12672_v53 = vstv %s12663_s12  ;;  %v3419_v54 = vadd.f32 %v3418_v28, %v3415_v62  ;;  %v12673_v33 = vstv %s12665_s3  ;;  %s10465_s12 = sld [smem:[#allocation15 + $0x75]]  ;;  %s12691_s3 = sld [smem:[#allocation133_spill]]  ;;  %v12695_v28 = vld [vmem:[#allocation163_spill] sm:$0xff] }
 0x474   :  { %v3901_v51 = vmul.f32 %v12672_v53, %v10327_v16  ;;  %v3518_v49 = vadd.f32 %v3517_v9, %v3514_v37  ;;  %v3616_v42 = vmul.f32 %v12673_v33, %v10412_v5  ;;  %v12675_v12 = vstv %s12667_s18  ;;  %s12693_s18 = sld [smem:[#allocation146_spill]]  ;;  %s10634_s2 = sld [smem:[#allocation16 + $0x4]] }
 0x475   :  { %v3711_v45 = vmul.f32 %v12675_v12, %v10365_v20  ;;  %v10440_v34 = vsel %vm2144_vm1, %v12662_v13, %v3145_v35  ;;  %v3243_v22 = vstv %s10386_s28  ;;  %v3342_v63 = vstv %s10388_s4  ;;  %v12694_v35 = vld [vmem:[#allocation159_spill] sm:$0xff]  ;;  %s10591_s28 = sld [smem:[#allocation15 + $0xa5]]  ;;  %s12729_s4 = sld [smem:[#allocation79_spill]] }
 0x476   :  { %v3807_v16 = vadd.f32 %v12676_v46, %v3803_v25  ;;  %v3902_v11 = vadd.f32 %v3901_v51, %v3898_v48  ;;  %v3225_v18 = vadd.f32 %v12679_v39, %v3221_v30  ;;  %v3617_v56 = vadd.f32 %v3616_v42, %v3613_v3  ;;  %v12686_v48 = vld [vmem:[#allocation150_spill] sm:$0xff] }
 0x477   :  { %v12681_v52 = vstv %s12671_s25  ;;  %v3324_v47 = vadd.f32 %v12682_v31, %v3320_v59  ;;  %v3712_v61 = vadd.f32 %v3711_v45, %v3708_v23  ;;  %v3441_v24 = vstv %s10407_s7  ;;  %s10617_s7 = sld [smem:[#allocation15 + $0xa6]]  ;;  %s10643_s25 = sld [smem:[#allocation15 + $0xa7]] }
 0x478   :  { %v3810_v26 = vmul.f32 %v12681_v52, %v10365_v20  ;;  %v12683_v43 = vstv %s12674_s15  ;;  %v3423_v29 = vadd.f32 %v12684_v38, %v3419_v54  ;;  %v3522_v60 = vadd.f32 %v12685_v27, %v3518_v49  ;;  %v3151_v54 = vpop.permute.xlu0 %3150  ;;  %v12706_v27 = vld [vmem:[#allocation168_spill] sm:$0xff]  ;;  %s10645_s15 = sld [smem:[#allocation15 + $0xbe]] }
 0x479   :  { %v3228_v57 = vmul.f32 %v12683_v43, %v10440_v34  ;;  %v10461_v13 = vsel %vm2143_vm0, %v12686_v48, %v3148_v58  ;;  %v12688_v50 = vstv %s12677_s29  ;;  %v12689_v25 = vstv %s12678_s14  ;;  %s10649_s29 = sld [smem:[#allocation16 + $0x5]]  ;;  %s10656_s14 = sld [smem:[#allocation15 + $0xbf]] }
 0x47a   :  { %v3327_v7 = vmul.f32 %v12688_v50, %v10440_v34  ;;  %v3426_v14 = vmul.f32 %v12689_v25, %v10440_v34  ;;  %v12690_v36 = vstv %s12680_s30  ;;  %v12692_v41 = vstv %s12506_s8  ;;  %s12698_s8 = sld [smem:[#allocation44_spill]]  ;;  %v12707_v50 = vld [vmem:[#allocation169_spill] sm:$0xff]  ;;  %s10661_s30 = sld [smem:[#allocation16 + $0x6]] }
 0x47b   :  { %v3525_v19 = vmul.f32 %v12690_v36, %v10440_v34  ;;  %v3715_v62 = vmul.f32 %v12692_v41, %v10412_v5  ;;  %v3906_v4 = vadd.f32 %v12694_v35, %v3902_v11  ;;  %v3621_v37 = vadd.f32 %v12695_v28, %v3617_v56  ;;  %v12711_v35 = vld [vmem:[#allocation165_spill] sm:$0xff]  ;;  %v3154_v28 = vpop.permute.xlu1 %3153 }
 0x47c   :  { %v3811_v0 = vadd.f32 %v3810_v26, %v3807_v16  ;;  %v3229_v9 = vadd.f32 %v3228_v57, %v3225_v18  ;;  %v12696_v1 = vstv %s10104_s22  ;;  %v3328_v30 = vadd.f32 %v3327_v7, %v3324_v47  ;;  %s12701_s22 = sld [smem:[#allocation59_spill]]  ;;  %v12703_v18 = vld [vmem:[#allocation164_spill] sm:$0xff] }
 0x47d   :  { %v3716_v3 = vadd.f32 %v3715_v62, %v3712_v61  ;;  %v3232_v23 = vmul.f32 %v12696_v1, %v10461_v13  ;;  %v3331_v59 = vmul.f32 %v3330_v15, %v10461_v13  ;;  %v12697_v53 = vstv %s12687_s10  ;;  %s12736_s10 = smov 1  }
 0x47e   :  { %v3909_v51 = vmul.f32 %v12697_v53, %v10365_v20  ;;  %v3427_v49 = vadd.f32 %v3426_v14, %v3423_v29  ;;  %v3430_v33 = vmul.f32 %v3429_v8, %v10461_v13  ;;  %v3526_v42 = vadd.f32 %v3525_v19, %v3522_v60  ;;  %v12715_v53 = vld [vmem:[#allocation170_spill] sm:$0xff] }
 0x47f   :  { %v12699_v12 = vstv %s12691_s3  ;;  %v12700_v58 = vstv %s12693_s18  ;;  %v3233_v15 = vadd.f32 %v3232_v23, %v3229_v9  ;;  %v3332_v16 = vadd.f32 %v3331_v59, %v3328_v30  ;;  %s10725_s3 = sld [smem:[#allocation18 + $0x19]] }
 0x480   :  { %v3624_v45 = vmul.f32 %v12699_v12, %v10440_v34  ;;  %v3814_v46 = vmul.f32 %v12700_v58, %v10412_v5  ;;  %v3910_v20 = vadd.f32 %v3909_v51, %v3906_v4  ;;  %v3431_v11 = vadd.f32 %v3430_v33, %v3427_v49  ;;  %v12716_v49 = vld [vmem:[#allocation151_spill] sm:$0xff]  ;;  %s10727_s18 = sld [smem:[#allocation18 + $0x31]] }
 0x481   :  { %v3529_v8 = vmul.f32 %v3528_v17, %v10461_v13  ;;  %v3540_v39 = vstv %s10446_s0  ;;  %v3720_v56 = vadd.f32 %v12703_v18, %v3716_v3  ;;  %v10507_v26 = vsel %vm2144_vm1, %v12686_v48, %v3151_v54  ;;  %s12735_s0 = smov 127  }
 0x482   :  { %v3815_v52 = vadd.f32 %v3814_v46, %v3811_v0  ;;  %v3625_v31 = vadd.f32 %v3624_v45, %v3621_v37  ;;  %v12704_v47 = vstv %s12698_s8  ;;  %v3255_v57 = vstv %s10463_s6  ;;  %v12712_v37 = vld [vmem:[#allocation166_spill] sm:$0xff]  ;;  %s6218_s6 = sld [smem:[#allocation16 + $0x7]]  ;;  %s10729_s8 = sld [smem:[#allocation18 + $0x4]] }
 0x483   :  { %v3723_v61 = vmul.f32 %v12704_v47, %v10440_v34  ;;  %v3530_v43 = vadd.f32 %v3529_v8, %v3526_v42  ;;  %v3639_v38 = vstv %s10465_s12  ;;  %v12705_v17 = vstv %s12701_s22  ;;  %s10723_s12 = sld [smem:[#allocation18 + $0x1]]  ;;  %s10731_s22 = sld [smem:[#allocation18 + $0x1c]] }
 0x484   :  { %v3913_v29 = vmul.f32 %v12705_v17, %v10412_v5  ;;  %v3237_v60 = vadd.f32 %v12706_v27, %v3233_v15  ;;  %v3336_v7 = vadd.f32 %v12707_v50, %v3332_v16  ;;  %v3628_v48 = vmul.f32 %v3627_v21, %v10461_v13  ;;  %v3157_v5 = vpop.permute.xlu0 %3156  ;;  %v12719_v16 = vld [vmem:[#allocation167_spill] sm:$0xff]  ;;  %v12723_v27 = vld [vmem:[#allocation172_spill] sm:$0xff] }
 0x485   :  { %v12708_v25 = vstv %s12702_s21  ;;  %v12709_v36 = vstv %s12508_s13  ;;  %v12710_v41 = vstv %s10066_s1  ;;  %v3435_v4 = vadd.f32 %v12711_v35, %v3431_v11  ;;  %s10548_s1 = sld [smem:[#allocation16 + $0x1]]  ;;  %s10555_s13 = sld [smem:[#allocation15 + $0x5f]]  ;;  %v12720_v11 = vld [vmem:[#allocation173_spill] sm:$0xff] }
 0x486   :  { %v3822_v14 = vmul.f32 %v12708_v25, %v10440_v34  ;;  %v3240_v19 = vmul.f32 %v12709_v36, %v10507_v26  ;;  %v3339_v62 = vmul.f32 %v12710_v41, %v10507_v26  ;;  %v3819_v0 = vadd.f32 %v12712_v37, %v3815_v52  ;;  %v12726_v41 = vld [vmem:[#allocation178_spill] sm:$0xff]  ;;  %s10733_s21 = sld [smem:[#allocation18 + $0x34]] }
 0x487   :  { %v3914_v9 = vadd.f32 %v3913_v29, %v3910_v20  ;;  %v3629_v3 = vadd.f32 %v3628_v48, %v3625_v31  ;;  %v3724_v21 = vadd.f32 %v3723_v61, %v3720_v56  ;;  %v12713_v1 = vstv %s12509_s5  ;;  %s12717_s5 = sld [smem:[#allocation148_spill]] }
 0x488   :  { %v3438_v23 = vmul.f32 %v12713_v1, %v10507_v26  ;;  %v12714_v30 = vstv %s10080_s23  ;;  %v3534_v51 = vadd.f32 %v12715_v53, %v3530_v43  ;;  %v3727_v54 = vmul.f32 %v3726_v10, %v10461_v13  ;;  %s12718_s23 = sld [smem:[#allocation62_spill]] }
 0x489   :  { %v3537_v59 = vmul.f32 %v12714_v30, %v10507_v26  ;;  %v10546_v33 = vsel %vm2144_vm1, %v12716_v49, %v3157_v5  ;;  %v10553_v42 = vsel %vm2143_vm0, %v12716_v49, %v3154_v28  ;;  %v3241_v12 = vadd.f32 %v3240_v19, %v3237_v60 }
 0x48a   :  { %v3340_v45 = vadd.f32 %v3339_v62, %v3336_v7  ;;  %v3244_v10 = vmul.f32 %v3243_v22, %v10553_v42  ;;  %v3343_v58 = vmul.f32 %v3342_v63, %v10553_v42  ;;  %v3439_v46 = vadd.f32 %v3438_v23, %v3435_v4  ;;  %v12725_v7 = vld [vmem:[#allocation171_spill] sm:$0xff] }
 0x48b   :  { %v3442_v15 = vmul.f32 %v3441_v24, %v10553_v42  ;;  %v3918_v20 = vadd.f32 %v12719_v16, %v3914_v9  ;;  %v3633_v8 = vadd.f32 %v12720_v11, %v3629_v3  ;;  %v3728_v18 = vadd.f32 %v3727_v54, %v3724_v21 }
 0x48c   :  { %v3823_v56 = vadd.f32 %v3822_v14, %v3819_v0  ;;  %v3245_v52 = vadd.f32 %v3244_v10, %v3241_v12  ;;  %v3344_v31 = vadd.f32 %v3343_v58, %v3340_v45  ;;  %v3538_v61 = vadd.f32 %v3537_v59, %v3534_v51  ;;  %v12731_v59 = vld [vmem:[#allocation179_spill] sm:$0xff] }
 0x48d   :  { %v3443_v47 = vadd.f32 %v3442_v15, %v3439_v46  ;;  %v12721_v22 = vstv %s12717_s5  ;;  %v3826_v24 = vmul.f32 %v3825_v2, %v10461_v13  ;;  %v3252_v29 = vmul.f32 %v3251_v6, %v10546_v33  ;;  %v12724_v2 = vld [vmem:[#allocation176_spill] sm:$0xff]  ;;  %s10737_s5 = sld [smem:[#allocation18 + $0x1f]] }
 0x48e   :  { %v3921_v43 = vmul.f32 %v12721_v22, %v10440_v34  ;;  %v12722_v63 = vstv %s12718_s23  ;;  %v3351_v34 = vmul.f32 %v3350_v40, %v10546_v33  ;;  %v3249_v60 = vadd.f32 %v12723_v27, %v3245_v52  ;;  %s10739_s23 = sld [smem:[#allocation18 + $0x37]] }
 0x48f   :  { %v3636_v17 = vmul.f32 %v12722_v63, %v10507_v26  ;;  %v3348_v50 = vadd.f32 %v12724_v2, %v3344_v31  ;;  %v3541_v6 = vmul.f32 %v3540_v39, %v10553_v42  ;;  %v3732_v48 = vadd.f32 %v12725_v7, %v3728_v18 }
 0x490   :  { %v3827_v25 = vadd.f32 %v3826_v24, %v3823_v56  ;;  %v3922_v14 = vadd.f32 %v3921_v43, %v3918_v20  ;;  %v3253_v36 = vadd.f32 %v3252_v29, %v3249_v60  ;;  %v3447_v62 = vadd.f32 %v12726_v41, %v3443_v47  ;;  %v12734_v20 = vld [vmem:[#allocation175_spill] sm:$0xff] }
 0x491   :  { %v3637_v40 = vadd.f32 %v3636_v17, %v3633_v8  ;;  %v3352_v19 = vadd.f32 %v3351_v34, %v3348_v50  ;;  %v3542_v35 = vadd.f32 %v3541_v6, %v3538_v61  ;;  %v12727_v4 = vstv %s10086_s19  ;;  %s10622_s19 = sld [smem:[#allocation15 + $0x8f]] }
 0x492   :  { %v3735_v5 = vmul.f32 %v12727_v4, %v10507_v26  ;;  %v3925_v39 = vmul.f32 %v3924_v32, %v10461_v13  ;;  %v3354_v28 = vstv %s10548_s1  ;;  %v3640_v37 = vmul.f32 %v3639_v38, %v10553_v42  ;;  %v12730_v32 = vld [vmem:[#allocation174_spill] sm:$0xff]  ;;  %s10735_s1 = sld [smem:[#allocation18 + $0x7]] }
 0x493   :  { %v3548_v0 = vstv %s10555_s13  ;;  %v3450_v9 = vmul.f32 %v3449_v44, %v10546_v33  ;;  %v3738_v3 = vstv %s10557_s24  ;;  %v3256_v21 = vadd.f32 %v3255_v57, %v3253_v36  ;;  %s10741_s13 = sld [smem:[#allocation18 + $0xa]] }
 0x494   :  { %v3831_v13 = vadd.f32 %v12730_v32, %v3827_v25  ;;  %v3926_v1 = vadd.f32 %v3925_v39, %v3922_v14  ;;  %v3641_v38 = vadd.f32 %v3640_v37, %v3637_v40  ;;  %v3736_v23 = vadd.f32 %v3735_v5, %v3732_v48  ;;  %s10743_s24 = sld [smem:[#allocation18 + $0x22]] }
 0x495   :  { %7283 = vtanh.f32 %v3256_v21  ;;  %v3355_v44 = vadd.f32 %v3354_v28, %v3352_v19  ;;  %v3451_v30 = vadd.f32 %v3450_v9, %v3447_v62  ;;  %v3546_v53 = vadd.f32 %v12731_v59, %v3542_v35  ;;  %v4341_v59 = vld [vmem:[#allocation8 + $0x180] sm:$0xff] }
 0x496   :  { %v12732_v51 = vstv %s12728_s17  ;;  %v3453_v54 = vstv %s10582_s9  ;;  %v12733_v12 = vstv %s12729_s4  ;;  %v3742_v10 = vstv %s10584_s20  ;;  %s10745_s9 = sld [smem:[#allocation18 + $0x3a]]  ;;  %s10747_s20 = sld [smem:[#allocation18 + $0xd]] }
 0x497   :  { %v3834_v57 = vmul.f32 %v12732_v51, %v10507_v26  ;;  %v3644_v45 = vmul.f32 %v12716_v49, %v12733_v12  ;;  %v3932_v58 = vstv %s10586_s26  ;;  %v3549_v46 = vmul.f32 %v3548_v0, %v10546_v33  ;;  %v4344_v51 = vld [vmem:[#allocation8 + $0x198] sm:$0xff]  ;;  %s10749_s26 = sld [smem:[#allocation18 + $0x25]]  ;;  %s10757_s17 = sld [smem:[#allocation18 + $0x40]] }
 0x498   :  { %v3837_v15 = vstv %s10591_s28  ;;  %v3739_v16 = vmul.f32 %v3738_v3, %v10553_v42  ;;  %v3930_v11 = vadd.f32 %v12734_v20, %v3926_v1  ;;  %v3647_v8 = vstv %s10597_s16  ;;  %v4348_v12 = vld [vmem:[#allocation8 + $0x1b8] sm:$0xff]  ;;  %s10751_s28 = sld [smem:[#allocation18 + $0x3d]]  ;;  %s10753_s16 = sld [smem:[#allocation18 + $0x10]] }
 0x499   :  { %v3645_v18 = vadd.f32 %v3644_v45, %v3641_v38  ;;  %v3835_v56 = vadd.f32 %v3834_v57, %v3831_v13  ;;  %7285 = vtanh.f32 %v3355_v44  ;;  %v3454_v52 = vadd.f32 %v3453_v54, %v3451_v30  ;;  %v4342_v44 = vld [vmem:[#allocation8 + $0x188] sm:$0xff]  ;;  %v4345_v30 = vld [vmem:[#allocation8 + $0x1a0] sm:$0xff]  ;;  %v4351_v45 = vld [vmem:[#allocation8 + $0x1d0] sm:$0xff]  ;;  %s10759_s4 = sld [smem:[#allocation18 + $0x13]] }
 0x49a   :  { %v3550_v31 = vadd.f32 %v3549_v46, %v3546_v53  ;;  %v3740_v47 = vadd.f32 %v3739_v16, %v3736_v23  ;;  %v3933_v61 = vmul.f32 %v3932_v58, %v10507_v26  ;;  %v3552_v22 = vstv %s10607_s27  ;;  %s10755_s27 = sld [smem:[#allocation18 + $0x28]] }
 0x49b   :  { %v3838_v43 = vmul.f32 %v3837_v15, %v10553_v42  ;;  %v3648_v63 = vmul.f32 %v3647_v8, %v10546_v33  ;;  %v3743_v17 = vmul.f32 %v12716_v49, %v3742_v10  ;;  %v3841_v24 = vstv %s10617_s7  ;;  %v4347_v10 = vld [vmem:[#allocation8 + $0x1b0] sm:$0xff]  ;;  %v4350_v15 = vld [vmem:[#allocation8 + $0x1c8] sm:$0xff]  ;;  %v4357_v8 = vld [vmem:[#allocation8 + $0x200] sm:$0xff]  ;;  %s10761_s7 = sld [smem:[#allocation18 + $0x2b]] }
 0x49c   :  { %v3746_v29 = vstv %s10622_s19  ;;  %v3936_v34 = vstv %s10624_s11  ;;  %v3934_v60 = vadd.f32 %v3933_v61, %v3930_v11  ;;  %7287 = vtanh.f32 %v3454_v52  ;;  %v4354_v11 = vld [vmem:[#allocation8 + $0x1e8] sm:$0xff]  ;;  %v4356_v52 = vld [vmem:[#allocation8 + $0x1f8] sm:$0xff]  ;;  %v4363_v61 = vld [vmem:[#allocation8 + $0x230] sm:$0xff]  ;;  %s10763_s19 = sld [smem:[#allocation18 + $0x43]]  ;;  %s10765_s11 = sld [smem:[#allocation18 + $0x16]] }
 0x49d   :  { %v3839_v27 = vadd.f32 %v3838_v43, %v3835_v56  ;;  %v3553_v26 = vadd.f32 %v3552_v22, %v3550_v31  ;;  %v3649_v2 = vadd.f32 %v3648_v63, %v3645_v18  ;;  %v3744_v50 = vadd.f32 %v3743_v17, %v3740_v47  ;;  %v4353_v18 = vld [vmem:[#allocation8 + $0x1e0] sm:$0xff]  ;;  %v4360_v47 = vld [vmem:[#allocation8 + $0x218] sm:$0xff]  ;;  %v4359_v43 = vld [vmem:[#allocation8 + $0x210] sm:$0xff] }
 0x49e   :  { %v3651_v6 = vstv %s10634_s2  ;;  %v3842_v7 = vmul.f32 %v12716_v49, %v3841_v24  ;;  %v3747_v25 = vmul.f32 %v3746_v29, %v10546_v33  ;;  %v3937_v14 = vmul.f32 %v3936_v34, %v10553_v42  ;;  %v4362_v63 = vld [vmem:[#allocation8 + $0x228] sm:$0xff]  ;;  %v4369_v29 = vld [vmem:[#allocation8 + $0x260] sm:$0xff]  ;;  %s10767_s2 = sld [smem:[#allocation18 + $0x2e]] }
 0x49f   :  { %v10663_v48 = vpop.eup %7283  ;;  %v3845_v40 = vstv %s10643_s25  ;;  %v3940_v36 = vstv %s10645_s15  ;;  %7289 = vtanh.f32 %v3553_v26  ;;  %v3652_v41 = vadd.f32 %v3651_v6, %v3649_v2  ;;  %v4366_v17 = vld [vmem:[#allocation8 + $0x248] sm:$0xff]  ;;  %v4365_v34 = vld [vmem:[#allocation8 + $0x240] sm:$0xff]  ;;  %v4372_v2 = vld [vmem:[#allocation8 + $0x278] sm:$0xff]  ;;  %s10769_s25 = sld [smem:[#allocation18 + $0x46]]  ;;  %s10771_s15 = sld [smem:[#allocation18 + $0x2]] }
 0x4a0   :  { %v3843_v19 = vadd.f32 %v3842_v7, %v3839_v27  ;;  %3954 = vrot.lane.b32.xlu0 %v10663_v48, %s12735_s0  ;;  %3951 = vrot.lane.b32.xlu1 %v10663_v48, %s12736_s10  ;;  %v3748_v62 = vadd.f32 %v3747_v25, %v3744_v50  ;;  %v3938_v35 = vadd.f32 %v3937_v14, %v3934_v60  ;;  %v3750_v4 = vstv %s10649_s29  ;;  %v4368_v27 = vld [vmem:[#allocation8 + $0x258] sm:$0xff]  ;;  %v4375_v50 = vld [vmem:[#allocation8 + $0x290] sm:$0xff]  ;;  %v4374_v14 = vld [vmem:[#allocation8 + $0x288] sm:$0xff]  ;;  %s10773_s29 = sld [smem:[#allocation18 + $0x1a]] }
 0x4a1   :  { %v3846_v42 = vmul.f32 %v3845_v40, %v10546_v33  ;;  %v3941_v39 = vmul.f32 %v12716_v49, %v3940_v36  ;;  %v3944_v28 = vstv %s10656_s14  ;;  %7291 = vtanh.f32 %v3652_v41  ;;  %v4371_v25 = vld [vmem:[#allocation8 + $0x270] sm:$0xff]  ;;  %v4378_v40 = vld [vmem:[#allocation8 + $0x2a8] sm:$0xff]  ;;  %v4381_v36 = vld [vmem:[#allocation8 + $0x2c0] sm:$0xff]  ;;  %s10775_s14 = sld [smem:[#allocation18 + $0x32]] }
 0x4a2   :  { %v3751_v37 = vadd.f32 %v3750_v4, %v3748_v62  ;;  %v3849_v3 = vstv %s10661_s30  ;;  %v3945_v32 = vmul.f32 %v3944_v28, %v10546_v33  ;;  %v3948_v1 = vstv %s6218_s6  ;;  %v4377_v62 = vld [vmem:[#allocation8 + $0x2a0] sm:$0xff]  ;;  %v4384_v4 = vld [vmem:[#allocation8 + $0x2d8] sm:$0xff]  ;;  %s10777_s30 = sld [smem:[#allocation18]]  ;;  %s10783_s6 = sld [smem:[#allocation18 + $0x5]] }
 0x4a3   :  { %v10674_v5 = vpop.eup %7285  ;;  %v3847_v0 = vadd.f32 %v3846_v42, %v3843_v19  ;;  %v3942_v9 = vadd.f32 %v3941_v39, %v3938_v35  ;;  %v6571_v53 = vpack.c.bf16 %v4345_v30, %v4342_v44  ;;  %v6573_v57 = vpack.c.bf16 %v4344_v51, %v4341_v59  ;;  %v4380_v35 = vld [vmem:[#allocation8 + $0x2b8] sm:$0xff]  ;;  %v4387_v42 = vld [vmem:[#allocation8 + $0x2f0] sm:$0xff] }
 0x4a4   :  { %3960 = vrot.lane.b32.xlu0 %v10674_v5, %s12735_s0  ;;  %3957 = vrot.lane.b32.xlu1 %v10674_v5, %s12736_s10  ;;  %7293 = vtanh.f32 %v3751_v37  ;;  %v6575_v46 = vpack.c.bf16 %v4351_v45, %v4348_v12  ;;  %v6577_v16 = vpack.c.bf16 %v4350_v15, %v4347_v10  ;;  %v6579_v56 = vpack.c.bf16 %v4357_v8, %v4354_v11  ;;  %v4383_v37 = vld [vmem:[#allocation8 + $0x2d0] sm:$0xff] }
 0x4a5   :  { %v3850_v49 = vadd.f32 %v3849_v3, %v3847_v0  ;;  %v3946_v13 = vadd.f32 %v3945_v32, %v3942_v9  ;;  %6572 = vmatprep.subr.bf16.mxu1 %v6571_v53  ;;  %v6581_v31 = vpack.c.bf16 %v4356_v52, %v4353_v18  ;;  %v6583_v22 = vpack.c.bf16 %v4363_v61, %v4360_v47  ;;  %v4386_v0 = vld [vmem:[#allocation8 + $0x2e8] sm:$0xff]  ;;  %12737 = sst [smem:[#allocation64_spill]] %s10769_s25  ;;  %s10785_s25 = sld [smem:[#allocation18 + $0x1d]] }
 0x4a6   :  { %v10684_v21 = vpop.eup %7287  ;;  %6574 = vmatpush1.bf16.msra.mxu1 %v6573_v57  ;;  %v6585_v24 = vpack.c.bf16 %v4362_v63, %v4359_v43  ;;  %v7520_v60 = vmov 0.0   ;;  %v6587_v26 = vpack.c.bf16 %v4369_v29, %v4366_v17  ;;  %v6589_v6 = vpack.c.bf16 %v4368_v27, %v4365_v34 }
 0x4a7   :  { %7295 = vtanh.f32 %v3850_v49  ;;  %v3949_v33 = vadd.f32 %v3948_v1, %v3946_v13  ;;  %6576 = vmatprep.subr.bf16.mxu1 %v6575_v46  ;;  %4453 = vmatprep.mubr.f32.mxu1 %v7520_v60  ;;  %v6591_v7 = vpack.c.bf16 %v4375_v50, %v4372_v2  ;;  %v6593_v19 = vpack.c.bf16 %v4374_v14, %v4371_v25  ;;  %12738 = sst [smem:[#allocation65_spill]] %s10775_s14  ;;  %s10789_s14 = sld [smem:[#allocation18 + $0x35]] }
 0x4a8   :  { %3966 = vrot.lane.b32.xlu0 %v10684_v21, %s12735_s0  ;;  %3963 = vrot.lane.b32.xlu1 %v10684_v21, %s12736_s10  ;;  %v6595_v41 = vpack.c.bf16 %v4381_v36, %v4378_v40  ;;  %v6597_v39 = vpack.c.bf16 %v4380_v35, %v4377_v62  ;;  %v6599_v28 = vpack.c.bf16 %v4387_v42, %v4384_v4  ;;  %v7521_v3 = vmov 0.0|0.0   ;;  %12739 = sst [smem:[#allocation66_spill]] %s10777_s30 }
 0x4a9   :  { %v10691_v38 = vpop.eup %7289  ;;  %7297 = vtanh.f32 %v3949_v33  ;;  %v6601_v9 = vpack.c.bf16 %v4386_v0, %v4383_v37  ;;  %v4003_v32 = vstv %s10723_s12  ;;  %v4101_v49 = vstv %s10725_s3  ;;  %s10791_s30 = sld [smem:[#allocation18 + $0x3]]  ;;  %s12742_s12 = sld [smem:[#allocation64_spill]] }
 0x4aa   :  { %6578 = vmatpush1.bf16.msra.mxu1 %v6577_v16  ;;  %v4199_v13 = vstv %s10727_s18  ;;  %v4015_v1 = vstv %s10729_s8  ;;  %v4113_v33 = vstv %s10731_s22  ;;  %v4211_v44 = vstv %s10733_s21  ;;  %s12743_s3 = sld [smem:[#allocation65_spill]]  ;;  %s12744_s18 = sld [smem:[#allocation66_spill]] }
 0x4ab   :  { %v10697_v23 = vpop.eup %7291  ;;  %6580 = vmatprep.subr.bf16.mxu1 %v6579_v56  ;;  %12741 = sst [smem:[#allocation40_spill]] %s10785_s25  ;;  %s10798_s25 = sld [smem:[#allocation18 + $0x33]]  ;;  %v4027_v30 = vstv %s10735_s1  ;;  %v4125_v59 = vstv %s10737_s5  ;;  %v4223_v53 = vstv %s10739_s23  ;;  %v4039_v51 = vstv %s10741_s13 }
 0x4ac   :  { %3972 = vrot.lane.b32.xlu0 %v10691_v38, %s12735_s0  ;;  %3969 = vrot.lane.b32.xlu1 %v10691_v38, %s12736_s10  ;;  %v4137_v57 = vstv %s10743_s24  ;;  %v4235_v12 = vstv %s10745_s9  ;;  %s12746_s22 = sld [smem:[#allocation40_spill]]  ;;  %s10825_s21 = sld [smem:[#allocation18 + $0x8]]  ;;  %v4114_v35 = vmul.f32 %v10674_v5, %v4113_v33  ;;  %v4212_v4 = vmul.f32 %v10674_v5, %v4211_v44 }
 0x4ad   :  { %v4051_v45 = vstv %s10747_s20  ;;  %v4149_v10 = vstv %s10749_s26  ;;  %v4247_v46 = vstv %s10751_s28  ;;  %v4063_v15 = vstv %s10753_s16  ;;  %s10835_s1 = sld [smem:[#allocation18 + $0x20]]  ;;  %s10845_s5 = sld [smem:[#allocation18 + $0x6]] }
 0x4ae   :  { %v10703_v54 = vpop.eup %7293  ;;  %6582 = vmatpush1.bf16.msra.mxu1 %v6581_v31  ;;  %v4161_v16 = vstv %s10755_s27  ;;  %v4259_v11 = vstv %s10757_s17  ;;  %v4075_v8 = vstv %s10759_s4  ;;  %v4173_v18 = vstv %s10761_s7  ;;  %s10852_s23 = sld [smem:[#allocation18 + $0x1e]]  ;;  %s10862_s24 = sld [smem:[#allocation18 + $0x38]] }
 0x4af   :  { %6584 = vmatprep.subr.bf16.mxu1 %v6583_v22  ;;  %v4271_v56 = vstv %s10763_s19  ;;  %v4087_v52 = vstv %s10765_s11  ;;  %v4007_v31 = vstv %s10771_s15  ;;  %v4105_v47 = vstv %s10773_s29  ;;  %s10854_s13 = sld [smem:[#allocation18 + $0x36]]  ;;  %s10877_s9 = sld [smem:[#allocation18 + $0x9]] }
 0x4b0   :  { %3978 = vrot.lane.b32.xlu0 %v10697_v23, %s12735_s0  ;;  %3975 = vrot.lane.b32.xlu1 %v10697_v23, %s12736_s10  ;;  %v4185_v61 = vstv %s10767_s2  ;;  %v4283_v22 = vstv %s12742_s12  ;;  %v10850_v42 = vmul.f32 %v10684_v21, %v4027_v30  ;;  %v10860_v37 = vmul.f32 %v10684_v21, %v4223_v53  ;;  %s10885_s15 = sld [smem:[#allocation18 + $0x39]]  ;;  %s10903_s20 = sld [smem:[#allocation18 + $0xb]] }
 0x4b1   :  { %v10709_v58 = vpop.eup %7295  ;;  %v4203_v43 = vstv %s12743_s3  ;;  %v4000_v63 = vstv %s12744_s18  ;;  %v4019_v29 = vstv %s10783_s6  ;;  %v4215_v27 = vstv %s10789_s14  ;;  %s10908_s26 = sld [smem:[#allocation18 + $0x23]]  ;;  %s10917_s14 = sld [smem:[#allocation18 + $0xc]] }
 0x4b2   :  { %6586 = vmatpush1.bf16.msra.mxu1 %v6585_v24  ;;  %v4117_v34 = vstv %s12746_s22  ;;  %v4207_v14 = vstv %s10798_s25  ;;  %s10883_s25 = sld [smem:[#allocation18 + $0x21]]  ;;  %s10915_s29 = sld [smem:[#allocation18 + $0x3b]] }
 0x4b3   :  { %v10715_v20 = vpop.eup %7297  ;;  %6588 = vmatprep.subr.bf16.mxu1 %v6587_v26  ;;  %v4011_v26 = vstv %s10791_s30  ;;  %s10922_s28 = sld [smem:[#allocation18 + $0x24]]  ;;  %s10942_s16 = sld [smem:[#allocation18 + $0xe]] }
 0x4b4   :  { %3984 = vrot.lane.b32.xlu0 %v10703_v54, %s12735_s0  ;;  %3981 = vrot.lane.b32.xlu1 %v10703_v54, %s12736_s10  ;;  %s10924_s30 = sld [smem:[#allocation18 + $0x3c]]  ;;  %s10948_s27 = sld [smem:[#allocation18 + $0x26]] }
 0x4b5   :  { %s10963_s17 = sld [smem:[#allocation18 + $0x27]]  ;;  %s10974_s3 = sld [smem:[#allocation18 + $0x11]] }
 0x4b6   :  { %6590 = vmatpush1.bf16.msra.mxu1 %v6589_v6  ;;  %v4004_v6 = vmul.f32 %v10663_v48, %v4003_v32  ;;  %s10965_s6 = sld [smem:[#allocation18 + $0x3f]]  ;;  %s10980_s18 = sld [smem:[#allocation18 + $0x29]] }
 0x4b7   :  { %6592 = vmatprep.subr.bf16.mxu1 %v6591_v7  ;;  %v4102_v7 = vmul.f32 %v10663_v48, %v4101_v49  ;;  %s10989_s22 = sld [smem:[#allocation18 + $0x12]]  ;;  %s11025_s7 = sld [smem:[#allocation18 + $0x2d]] }
 0x4b8   :  { %3990 = vrot.lane.b32.xlu0 %v10709_v58, %s12735_s0  ;;  %3987 = vrot.lane.b32.xlu1 %v10709_v58, %s12736_s10  ;;  %s10995_s4 = sld [smem:[#allocation18 + $0x2a]]  ;;  %s11060_s19 = sld [smem:[#allocation19 + $0x1]] }
 0x4b9   :  { %s4094_s11 = sld [smem:[#allocation19]]  ;;  %s6291_s2 = sld [smem:[#allocation19 + $0x2]] }
 0x4ba   :  { %6594 = vmatpush1.bf16.msra.mxu1 %v6593_v19  ;;  %v4200_v19 = vmul.f32 %v10663_v48, %v4199_v13  ;;  %v10865_v13 = vmul.f32 %v10691_v38, %v4039_v51  ;;  %s7523_s12 = smov [#allocation21]  }
 0x4bb   :  { %6596 = vmatprep.subr.bf16.mxu1 %v6595_v41  ;;  %v4016_v41 = vmul.f32 %v10674_v5, %v4015_v1 }
 0x4bc   :  { %3996 = vrot.lane.b32.xlu0 %v10715_v20, %s12735_s0  ;;  %3993 = vrot.lane.b32.xlu1 %v10715_v20, %s12736_s10  ;;  %s10779_s0 = sld [smem:[#allocation18 + $0x18]] }
 0x4bd   :  { %s10781_s10 = sld [smem:[#allocation18 + $0x30]] }
 0x4be   :  { %6598 = vmatpush1.bf16.msra.mxu1 %v6597_v39 }
 0x4bf   :  { %6600 = vmatprep.subr.bf16.mxu1 %v6599_v28 }
 0x4c2   :  { %6602 = vmatpush1.bf16.msra.mxu1 %v6601_v9  ;;  %v4098_v17 = vstv %s10779_s0  ;;  %s10955_s0 = sld [smem:[#allocation18 + $0x3e]] }
 0x4c3   :  { %6603 = vmatprep.subr.bf16.mxu1 %v7521_v3  ;;  %12740 = sst [smem:[#allocation39_spill]] %s10781_s10  ;;  %s10795_s10 = sld [smem:[#allocation18 + $0x1b]] }
 0x4c4   :  { %s12745_s8 = sld [smem:[#allocation39_spill]] }
 0x4c9   :  { %v4109_v25 = vstv %s10795_s10  ;;  %s10957_s10 = sld [smem:[#allocation18 + $0xf]] }
 0x4ca   :  { %v4196_v24 = vstv %s12745_s8  ;;  %s10987_s8 = sld [smem:[#allocation18 + $0x41]] }
 0x512   :  { %v3955_v2 = vpop.permute.xlu0 %3954  ;;  %v3952_v50 = vpop.permute.xlu1 %3951 }
 0x513   :  { %v3956_v40 = vsel %vm2144_vm1, %v10663_v48, %v3955_v2  ;;  %v3953_v36 = vsel %vm2143_vm0, %v10663_v48, %v3952_v50  ;;  %v10857_v48 = vmul.f32 %v10684_v21, %v4125_v59 }
 0x514   :  { %v4001_v62 = vmul.f32 %v4000_v63, %v3953_v36  ;;  %v4099_v39 = vmul.f32 %v4098_v17, %v3953_v36  ;;  %v4197_v28 = vmul.f32 %v4196_v24, %v3953_v36  ;;  %v4008_v0 = vmul.f32 %v4007_v31, %v3956_v40 }
 0x515   :  { %v4106_v9 = vmul.f32 %v4105_v47, %v3956_v40  ;;  %v4204_v1 = vmul.f32 %v4203_v43, %v3956_v40  ;;  %v4031_v31 = vstv %s10825_s21  ;;  %v10872_v47 = vmul.f32 %v10691_v38, %v4137_v57  ;;  %s10997_s21 = sld [smem:[#allocation18 + $0x42]] }
 0x516   :  { %v4005_v32 = vadd.f32 %v4004_v6, %v4001_v62  ;;  %v3958_v49 = vpop.permute.xlu1 %3957  ;;  %v4103_v33 = vadd.f32 %v4102_v7, %v4099_v39  ;;  %v4201_v44 = vadd.f32 %v4200_v19, %v4197_v28  ;;  %v3961_v30 = vpop.permute.xlu0 %3960  ;;  %v10875_v63 = vmul.f32 %v10691_v38, %v4235_v12 }
 0x517   :  { %v3959_v59 = vsel %vm2143_vm0, %v10674_v5, %v3958_v49  ;;  %v3962_v2 = vsel %vm2144_vm1, %v10674_v5, %v3961_v30  ;;  %v4129_v57 = vstv %s10835_s1  ;;  %v10890_v12 = vmul.f32 %v10697_v23, %v4051_v45  ;;  %s11006_s1 = sld [smem:[#allocation18 + $0x14]] }
 0x518   :  { %v4009_v53 = vadd.f32 %v4008_v0, %v4005_v32  ;;  %v4012_v51 = vmul.f32 %v4011_v26, %v3959_v59  ;;  %v4107_v43 = vadd.f32 %v4106_v9, %v4103_v33  ;;  %v4110_v17 = vmul.f32 %v4109_v25, %v3959_v59 }
 0x519   :  { %v4205_v24 = vadd.f32 %v4204_v1, %v4201_v44  ;;  %v4208_v50 = vmul.f32 %v4207_v14, %v3959_v59  ;;  %v4023_v25 = vstv %s10845_s5  ;;  %v10896_v5 = vmul.f32 %v10697_v23, %v4149_v10  ;;  %s11012_s5 = sld [smem:[#allocation18 + $0x2c]] }
 0x51a   :  { %v3964_v6 = vpop.permute.xlu1 %3963  ;;  %v4013_v26 = vadd.f32 %v4012_v51, %v4009_v53  ;;  %v4111_v7 = vadd.f32 %v4110_v17, %v4107_v43  ;;  %v4121_v40 = vstv %s10852_s23  ;;  %v4219_v36 = vstv %s10854_s13  ;;  %v3967_v0 = vpop.permute.xlu0 %3966  ;;  %s11017_s23 = sld [smem:[#allocation18 + $0x44]]  ;;  %s11019_s13 = sld [smem:[#allocation18 + $0x15]] }
 0x51b   :  { %v4209_v14 = vadd.f32 %v4208_v50, %v4205_v24  ;;  %v3965_v19 = vsel %vm2143_vm0, %v10684_v21, %v3964_v6  ;;  %v4020_v45 = vmul.f32 %v4019_v29, %v3962_v2  ;;  %v4118_v62 = vmul.f32 %v4117_v34, %v3962_v2 }
 0x51c   :  { %v4017_v39 = vadd.f32 %v4016_v41, %v4013_v26  ;;  %v4115_v28 = vadd.f32 %v4114_v35, %v4111_v7  ;;  %v4216_v9 = vmul.f32 %v4215_v27, %v3962_v2  ;;  %v4227_v10 = vstv %s10862_s24  ;;  %s11027_s24 = sld [smem:[#allocation18 + $0x45]] }
 0x51d   :  { %v4213_v32 = vadd.f32 %v4212_v4, %v4209_v14  ;;  %v10913_v49 = vmul.f32 %v10697_v23, %v4247_v46  ;;  %v4024_v33 = vmul.f32 %v4023_v25, %v3965_v19  ;;  %v4122_v34 = vmul.f32 %v4121_v40, %v3965_v19 }
 0x51e   :  { %v4021_v1 = vadd.f32 %v4020_v45, %v4017_v39  ;;  %v4119_v29 = vadd.f32 %v4118_v62, %v4115_v28  ;;  %v3970_v27 = vpop.permute.xlu1 %3969  ;;  %v3968_v41 = vsel %vm2144_vm1, %v10684_v21, %v3967_v0  ;;  %v4220_v46 = vmul.f32 %v4219_v36, %v3965_v19  ;;  %v3973_v6 = vpop.permute.xlu0 %3972 }
 0x51f   :  { %v4217_v35 = vadd.f32 %v4216_v9, %v4213_v32  ;;  %v10929_v4 = vmul.f32 %v10703_v54, %v4063_v15  ;;  %v4035_v59 = vstv %s10877_s9  ;;  %v10935_v53 = vmul.f32 %v10703_v54, %v4161_v16  ;;  %s11036_s9 = sld [smem:[#allocation18 + $0x17]] }
 0x520   :  { %v4025_v44 = vadd.f32 %v4024_v33, %v4021_v1  ;;  %v4123_v30 = vadd.f32 %v4122_v34, %v4119_v29  ;;  %v4133_v51 = vstv %s10883_s25  ;;  %v4231_v43 = vstv %s10885_s15  ;;  %s11045_s25 = sld [smem:[#allocation18 + $0x2f]] }
 0x521   :  { %v4221_v21 = vadd.f32 %v4220_v46, %v4217_v35  ;;  %v3971_v17 = vsel %vm2143_vm0, %v10691_v38, %v3970_v27  ;;  %v4032_v15 = vmul.f32 %v4031_v31, %v3968_v41  ;;  %v4130_v24 = vmul.f32 %v4129_v57, %v3968_v41  ;;  %s11047_s15 = sld [smem:[#allocation18 + $0x47]] }
 0x522   :  { %v4029_v2 = vadd.f32 %v10850_v42, %v4025_v44  ;;  %v4127_v50 = vadd.f32 %v10857_v48, %v4123_v30  ;;  %v4228_v26 = vmul.f32 %v4227_v10, %v3968_v41  ;;  %v4043_v7 = vstv %s10903_s20  ;;  %v3976_v48 = vpop.permute.xlu1 %3975  ;;  %v3979_v29 = vpop.permute.xlu0 %3978  ;;  %s5538_s20 = sshll.u32 %s7523_s12, 4  ;;  %s5539_s20 = int_to_ptr.vmem [resolvable:$true] %s5538_s20 }
 0x523   :  { %v4225_v16 = vadd.f32 %v10860_v37, %v4221_v21  ;;  %v10953_v25 = vmul.f32 %v10703_v54, %v4259_v11  ;;  %v4036_v31 = vmul.f32 %v4035_v59, %v3971_v17  ;;  %v4134_v42 = vmul.f32 %v4133_v51, %v3971_v17  ;;  %p7469_p9 = scmp.lt.s32.totalorder %s5539_s20, %s5539_s20 }
 0x524   :  { %v4033_v14 = vadd.f32 %v4032_v15, %v4029_v2  ;;  %v4131_v57 = vadd.f32 %v4130_v24, %v4127_v50  ;;  %v4141_v37 = vstv %s10908_s26  ;;  %v3974_v40 = vsel %vm2144_vm1, %v10691_v38, %v3973_v6  ;;  %s7464_s26 = scalar_lea.vmem %s5539_s20, 384 }
 0x525   :  { %v4229_v36 = vadd.f32 %v4228_v26, %v4225_v16  ;;  %v4232_v11 = vmul.f32 %v4231_v43, %v3971_v17  ;;  %v4239_v19 = vstv %s10915_s29  ;;  %v4047_v39 = vstv %s10917_s14  ;;  %p7465_p8 = scmp.ne.s32.totalorder %s5539_s20, %s7464_s26  ;;  %p7470_p10 = scmp.lt.s32.totalorder %s7464_s26, %s7464_s26 }
 0x526   :  { %v4037_v45 = vadd.f32 %v4036_v31, %v4033_v14  ;;  %v4135_v62 = vadd.f32 %v4134_v42, %v4131_v57  ;;  %v4145_v0 = vstv %s10922_s28  ;;  %v4243_v9 = vstv %s10924_s30  ;;  %v3985_v14 = vpop.permute.xlu0 %3984 }
 0x527   :  { %v4233_v28 = vadd.f32 %v4232_v11, %v4229_v36  ;;  %v3977_v32 = vsel %vm2143_vm0, %v10697_v23, %v3976_v48  ;;  %v4044_v38 = vmul.f32 %v4043_v7, %v3974_v40  ;;  %v4142_v10 = vmul.f32 %v4141_v37, %v3974_v40  ;;  %p7471_p11 = por %p7470_p10, %p7469_p9 }
 0x528   :  { %v4041_v1 = vadd.f32 %v10865_v13, %v4037_v45  ;;  %v4139_v33 = vadd.f32 %v10872_v47, %v4135_v62  ;;  %v4240_v34 = vmul.f32 %v4239_v19, %v3974_v40  ;;  %v4055_v41 = vstv %s10942_s16  ;;  %v3982_v47 = vpop.permute.xlu1 %3981 }
 0x529   :  { %v4237_v27 = vadd.f32 %v10875_v63, %v4233_v28  ;;  %v10985_v35 = vmul.f32 %v10709_v58, %v4075_v8  ;;  %v4048_v44 = vmul.f32 %v4047_v39, %v3977_v32  ;;  %v4146_v13 = vmul.f32 %v4145_v0, %v3977_v32  ;;  %p7472_p12 = pnand %p7471_p11, %p7465_p8 }
 0x52a   :  { %v4045_v46 = vadd.f32 %v4044_v38, %v4041_v1  ;;  %v4143_v30 = vadd.f32 %v4142_v10, %v4139_v33  ;;  %v4153_v63 = vstv %s10948_s27  ;;  %v3980_v59 = vsel %vm2144_vm1, %v10697_v23, %v3979_v29  ;;  %v3991_v29 = vpop.permute.xlu0 %3990 }
 0x52b   :  { %v4241_v21 = vadd.f32 %v4240_v34, %v4237_v27  ;;  %v4244_v8 = vmul.f32 %v4243_v9, %v3977_v32  ;;  %v4251_v51 = vstv %s10955_s0  ;;  %v4059_v15 = vstv %s10957_s10 }
 0x52c   :  { %v4049_v43 = vadd.f32 %v4048_v44, %v4045_v46  ;;  %v4147_v17 = vadd.f32 %v4146_v13, %v4143_v30  ;;  %v4157_v2 = vstv %s10963_s17  ;;  %v4255_v50 = vstv %s10965_s6 }
 0x52d   :  { %v4245_v24 = vadd.f32 %v4244_v8, %v4241_v21  ;;  %v3983_v6 = vsel %vm2143_vm0, %v10703_v54, %v3982_v47  ;;  %v4056_v23 = vmul.f32 %v4055_v41, %v3980_v59  ;;  %v4154_v26 = vmul.f32 %v4153_v63, %v3980_v59 }
 0x52e   :  { %v4053_v16 = vadd.f32 %v10890_v12, %v4049_v43  ;;  %v4151_v7 = vadd.f32 %v10896_v5, %v4147_v17  ;;  %v4252_v31 = vmul.f32 %v4251_v51, %v3980_v59  ;;  %v4067_v42 = vstv %s10974_s3  ;;  %v3988_v12 = vpop.permute.xlu1 %3987 }
 0x52f   :  { %v4249_v57 = vadd.f32 %v10913_v49, %v4245_v24  ;;  %v4174_v48 = vmul.f32 %v10709_v58, %v4173_v18  ;;  %v4060_v40 = vmul.f32 %v4059_v15, %v3983_v6  ;;  %v4158_v11 = vmul.f32 %v4157_v2, %v3983_v6 }
 0x530   :  { %v4057_v37 = vadd.f32 %v4056_v23, %v4053_v16  ;;  %v4155_v36 = vadd.f32 %v4154_v26, %v4151_v7  ;;  %v4165_v5 = vstv %s10980_s18  ;;  %v3986_v49 = vsel %vm2144_vm1, %v10703_v54, %v3985_v14  ;;  %v3997_v23 = vpop.permute.xlu0 %3996 }
 0x531   :  { %v4253_v19 = vadd.f32 %v4252_v31, %v4249_v57  ;;  %v4256_v45 = vmul.f32 %v4255_v50, %v3983_v6  ;;  %v4263_v18 = vstv %s10987_s8  ;;  %v4071_v28 = vstv %s10989_s22 }
 0x532   :  { %v4061_v62 = vadd.f32 %v4060_v40, %v4057_v37  ;;  %v4159_v39 = vadd.f32 %v4158_v11, %v4155_v36  ;;  %v4169_v9 = vstv %s10995_s4  ;;  %v4267_v32 = vstv %s10997_s21 }
 0x533   :  { %v4257_v0 = vadd.f32 %v4256_v45, %v4253_v19  ;;  %v3989_v38 = vsel %vm2143_vm0, %v10709_v58, %v3988_v12  ;;  %v4068_v54 = vmul.f32 %v4067_v42, %v3986_v49  ;;  %v4166_v10 = vmul.f32 %v4165_v5, %v3986_v49 }
 0x534   :  { %v4065_v1 = vadd.f32 %v10929_v4, %v4061_v62  ;;  %v4163_v33 = vadd.f32 %v10935_v53, %v4159_v39  ;;  %v4264_v34 = vmul.f32 %v4263_v18, %v3986_v49  ;;  %v4079_v41 = vstv %s11006_s1  ;;  %v3994_v53 = vpop.permute.xlu1 %3993 }
 0x535   :  { %v4261_v27 = vadd.f32 %v10953_v25, %v4257_v0  ;;  %v4272_v46 = vmul.f32 %v10709_v58, %v4271_v56  ;;  %v4072_v30 = vmul.f32 %v4071_v28, %v3989_v38  ;;  %v4170_v4 = vmul.f32 %v4169_v9, %v3989_v38  ;;  %v4343_v28 = vld [vmem:[#allocation8 + $0x190] sm:$0xff] }
 0x536   :  { %v4069_v44 = vadd.f32 %v4068_v54, %v4065_v1  ;;  %v4167_v13 = vadd.f32 %v4166_v10, %v4163_v33  ;;  %v4177_v47 = vstv %s11012_s5  ;;  %v3992_v25 = vsel %vm2144_vm1, %v10709_v58, %v3991_v29  ;;  %v4349_v33 = vld [vmem:[#allocation8 + $0x1c0] sm:$0xff]  ;;  %v4352_v29 = vld [vmem:[#allocation8 + $0x1d8] sm:$0xff] }
 0x537   :  { %v4265_v63 = vadd.f32 %v4264_v34, %v4261_v27  ;;  %v4268_v59 = vmul.f32 %v4267_v32, %v3989_v38  ;;  %v4275_v21 = vstv %s11017_s23  ;;  %v4083_v51 = vstv %s11019_s13  ;;  %v4358_v34 = vld [vmem:[#allocation8 + $0x208] sm:$0xff] }
 0x538   :  { %v4073_v56 = vadd.f32 %v4072_v30, %v4069_v44  ;;  %v4171_v8 = vadd.f32 %v4170_v4, %v4167_v13  ;;  %v4181_v17 = vstv %s11025_s7  ;;  %v4279_v15 = vstv %s11027_s24  ;;  %v4367_v30 = vld [vmem:[#allocation8 + $0x250] sm:$0xff]  ;;  %v4370_v13 = vld [vmem:[#allocation8 + $0x268] sm:$0xff] }
 0x539   :  { %v4269_v43 = vadd.f32 %v4268_v59, %v4265_v63  ;;  %v3995_v24 = vsel %vm2143_vm0, %v10715_v20, %v3994_v53  ;;  %v4080_v2 = vmul.f32 %v4079_v41, %v3992_v25  ;;  %v4178_v58 = vmul.f32 %v4177_v47, %v3992_v25  ;;  %v4361_v41 = vld [vmem:[#allocation8 + $0x220] sm:$0xff]  ;;  %v4376_v47 = vld [vmem:[#allocation8 + $0x298] sm:$0xff]  ;;  %v4379_v63 = vld [vmem:[#allocation8 + $0x2b0] sm:$0xff] }
 0x53a   :  { %v4077_v50 = vadd.f32 %v10985_v35, %v4073_v56  ;;  %v4175_v6 = vadd.f32 %v4174_v48, %v4171_v8  ;;  %v4276_v26 = vmul.f32 %v4275_v21, %v3992_v25  ;;  %v4091_v7 = vstv %s11036_s9  ;;  %v4373_v53 = vld [vmem:[#allocation8 + $0x280] sm:$0xff]  ;;  %v4382_v59 = vld [vmem:[#allocation8 + $0x2c8] sm:$0xff]  ;;  %v4388_v8 = vld [vmem:[#allocation8 + $0x2f8] sm:$0xff] }
 0x53b   :  { %v4273_v16 = vadd.f32 %v4272_v46, %v4269_v43  ;;  %v4088_v14 = vmul.f32 %v10715_v20, %v4087_v52  ;;  %v4084_v57 = vmul.f32 %v4083_v51, %v3995_v24  ;;  %v4182_v37 = vmul.f32 %v4181_v17, %v3995_v24  ;;  %v4364_v46 = vld [vmem:[#allocation8 + $0x238] sm:$0xff]  ;;  %v4385_v56 = vld [vmem:[#allocation8 + $0x2e0] sm:$0xff]  ;;  %v4294_v51 = vld [vmem:[#allocation8 + $0x8] sm:$0xff] }
 0x53c   :  { %v4081_v31 = vadd.f32 %v4080_v2, %v4077_v50  ;;  %v4179_v42 = vadd.f32 %v4178_v58, %v4175_v6  ;;  %v4189_v40 = vstv %s11045_s25  ;;  %v3998_v36 = vsel %vm2144_vm1, %v10715_v20, %v3997_v23  ;;  %v4297_v43 = vld [vmem:[#allocation8 + $0x20] sm:$0xff]  ;;  %v4296_v2 = vld [vmem:[#allocation8 + $0x18] sm:$0xff]  ;;  %v4303_v50 = vld [vmem:[#allocation8 + $0x50] sm:$0xff] }
 0x53d   :  { %v4277_v35 = vadd.f32 %v4276_v26, %v4273_v16  ;;  %v4280_v48 = vmul.f32 %v4279_v15, %v3995_v24  ;;  %v4287_v11 = vstv %s11047_s15  ;;  %v4186_v12 = vmul.f32 %v10715_v20, %v4185_v61  ;;  %v4293_v24 = vld [vmem:[#allocation8] sm:$0xff]  ;;  %v4300_v58 = vld [vmem:[#allocation8 + $0x38] sm:$0xff]  ;;  %v4299_v26 = vld [vmem:[#allocation8 + $0x30] sm:$0xff] }
 0x53e   :  { %v4085_v5 = vadd.f32 %v4084_v57, %v4081_v31  ;;  %v4183_v49 = vadd.f32 %v4182_v37, %v4179_v42  ;;  %v4284_v52 = vmul.f32 %v10715_v20, %v4283_v22  ;;  %v4092_v45 = vmul.f32 %v4091_v7, %v3998_v36  ;;  %v4355_v22 = vld [vmem:[#allocation8 + $0x1f0] sm:$0xff]  ;;  %v4302_v16 = vld [vmem:[#allocation8 + $0x48] sm:$0xff]  ;;  %v7158_v37 = vld [vmem:[#allocation6 + $0x58] ss:$40 sps:$4 sm:$0xff]  }
 0x53f   :  { %v4281_v19 = vadd.f32 %v4280_v48, %v4277_v35  ;;  %v4190_v18 = vmul.f32 %v4189_v40, %v3998_v36  ;;  %v4288_v0 = vmul.f32 %v4287_v11, %v3998_v36  ;;  %v4193_v32 = vstv %s11060_s19  ;;  %v4306_v7 = vld [vmem:[#allocation8 + $0x68] sm:$0xff]  ;;  %v4305_v36 = vld [vmem:[#allocation8 + $0x60] sm:$0xff]  ;;  %v4308_v35 = vld [vmem:[#allocation8 + $0x78] sm:$0xff] }
 0x540   :  { %v4089_v62 = vadd.f32 %v4088_v14, %v4085_v5  ;;  %v4187_v39 = vadd.f32 %v4186_v12, %v4183_v49  ;;  %v6604_v10 = vpack.c.bf16 %v4346_v55, %v4343_v28  ;;  %v6607_v20 = vpack.c.bf16 %v4352_v29, %v4349_v33  ;;  %v4309_v14 = vld [vmem:[#allocation8 + $0x80] sm:$0xff]  ;;  %v7155_v57 = vld [vmem:[#allocation6 + $0x8] ss:$40 sps:$4 sm:$0xff]   ;;  %v4312_v48 = vld [vmem:[#allocation8 + $0x98] sm:$0xff] }
 0x541   :  { %v4285_v9 = vadd.f32 %v4284_v52, %v4281_v19  ;;  %v6610_v27 = vpack.c.bf16 %v4358_v34, %v4355_v22  ;;  %v6613_v44 = vpack.c.bf16 %v4364_v46, %v4361_v41  ;;  %v6616_v4 = vpack.c.bf16 %v4370_v13, %v4367_v30  ;;  %v7153_v31 = vld [vmem:[#allocation6 + $0x4] ss:$40 sps:$4 sm:$0xff]   ;;  %5355 = vmatprep.subr.bf16.mxu0 %v7155_v57  ;;  %v4315_v11 = vld [vmem:[#allocation8 + $0xb0] sm:$0xff]  ;;  %v7164_v28 = vld [vmem:[#allocation6 + $0xf8] ss:$40 sps:$4 sm:$0xff]  }
 0x542   :  { %v4191_v38 = vadd.f32 %v4190_v18, %v4187_v39  ;;  %v11079_v54 = vadd.f32 %v4092_v45, %v4089_v62  ;;  %v6619_v25 = vpack.c.bf16 %v4376_v47, %v4373_v53  ;;  %v6622_v21 = vpack.c.bf16 %v4382_v59, %v4379_v63  ;;  %5356 = vmatpush1.bf16.msra.mxu0 %v7153_v31  ;;  %v7156_v12 = vld [vmem:[#allocation6 + $0x54] ss:$40 sps:$4 sm:$0xff]   ;;  %v7161_v5 = vld [vmem:[#allocation6 + $0xa8] ss:$40 sps:$4 sm:$0xff]   ;;  %v4321_v62 = vld [vmem:[#allocation8 + $0xe0] sm:$0xff] }
 0x543   :  { %v11081_v61 = vadd.f32 %v4288_v0, %v4285_v9  ;;  %v6625_v17 = vpack.c.bf16 %v4388_v8, %v4385_v56  ;;  %v6627_v15 = vpack.c.bf16 %v4297_v43, %v4294_v51  ;;  %v6629_v6 = vpack.c.bf16 %v4296_v2, %v4293_v24  ;;  %5357 = vmatprep.subr.bf16.mxu0 %v7158_v37  ;;  %v4311_v19 = vld [vmem:[#allocation8 + $0x90] sm:$0xff]  ;;  %v4314_v45 = vld [vmem:[#allocation8 + $0xa8] sm:$0xff]  ;;  %v4317_v9 = vld [vmem:[#allocation8 + $0xc0] sm:$0xff] }
 0x544   :  { %v4194_v1 = vadd.f32 %v4193_v32, %v4191_v38  ;;  %v6631_v23 = vpack.c.bf16 %v4303_v50, %v4300_v58  ;;  %v6633_v42 = vpack.c.bf16 %v4302_v16, %v4299_v26  ;;  %v6635_v40 = vpack.c.bf16 %v4309_v14, %v4306_v7  ;;  %v4318_v18 = vld [vmem:[#allocation8 + $0xc8] sm:$0xff]  ;;  %v4320_v32 = vld [vmem:[#allocation8 + $0xd8] sm:$0xff]  ;;  %v4323_v22 = vld [vmem:[#allocation8 + $0xf0] sm:$0xff] }
 0x545   :  { %v6637_v49 = vpack.c.bf16 %v4308_v35, %v4305_v36  ;;  %v6639_v52 = vpack.c.bf16 %v4315_v11, %v4312_v48  ;;  %v7159_v39 = vld [vmem:[#allocation6 + $0xa4] ss:$40 sps:$4 sm:$0xff]   ;;  %v6641_v55 = vpack.c.bf16 %v4314_v45, %v4311_v19  ;;  %v6643_v0 = vpack.c.bf16 %v4321_v62, %v4318_v18  ;;  %v4324_v38 = vld [vmem:[#allocation8 + $0xf8] sm:$0xff]  ;;  %v7167_v33 = vld [vmem:[#allocation6 + $0x148] ss:$40 sps:$4 sm:$0xff]  }
 0x546   :  { %4454 = vmatmul.mubr.f32.vlgmr.msra.gmra.mrb[8].mxu1 %v4194_v1  ;;  %5358 = vmatpush1.bf16.msra.mxu0 %v7156_v12  ;;  %v6645_v29 = vpack.c.bf16 %v4320_v32, %v4317_v9  ;;  %v4326_v34 = vld [vmem:[#allocation8 + $0x108] sm:$0xff]  ;;  %v4333_v41 = vld [vmem:[#allocation8 + $0x140] sm:$0xff]  ;;  %v4332_v53 = vld [vmem:[#allocation8 + $0x138] sm:$0xff]  ;;  %v4095_v58 = vstv %s4094_s11 }
 0x547   :  { %6605 = vmatpush3.bf16.msra.mxu1 %v6604_v10  ;;  %6478 = vmatprep.mubr.msk.f32.mxu1 %vm7522_vm2, %v7520_v60  ;;  %v4327_v10 = vld [vmem:[#allocation8 + $0x110] sm:$0xff]  ;;  %v7165_v46 = vld [vmem:[#allocation6 + $0x144] ss:$40 sps:$4 sm:$0xff]   ;;  %v6649_v30 = vpack.c.bf16 %v4326_v34, %v4323_v22  ;;  %v4336_v47 = vld [vmem:[#allocation8 + $0x158] sm:$0xff]  ;;  %v11094_v26 = vadd.f32 %v4095_v58, %v11079_v54 }
 0x548   :  { %6606 = vmatprep.subr.bf16.mxu1 %v7521_v3  ;;  %5359 = vmatprep.subr.bf16.mxu0 %v7161_v5  ;;  %v7168_v63 = vld [vmem:[#allocation6 + $0x194] ss:$40 sps:$4 sm:$0xff]   ;;  %v7173_v59 = vld [vmem:[#allocation6 + $0x1e8] ss:$40 sps:$4 sm:$0xff]   ;;  %v7171_v43 = vld [vmem:[#allocation6 + $0x1e4] ss:$40 sps:$4 sm:$0xff]  }
 0x549   :  { %v4335_v8 = vld [vmem:[#allocation8 + $0x150] sm:$0xff]  ;;  %v4338_v51 = vld [vmem:[#allocation8 + $0x168] sm:$0xff]  ;;  %v4301_v16 = vld [vmem:[#allocation8 + $0x40] sm:$0xff] }
 0x54a   :  { %5360 = vmatpush1.bf16.msra.mxu0 %v7159_v39  ;;  %v4295_v24 = vld [vmem:[#allocation8 + $0x10] sm:$0xff]  ;;  %v4298_v2 = vld [vmem:[#allocation8 + $0x28] sm:$0xff]  ;;  %v4304_v7 = vld [vmem:[#allocation8 + $0x58] sm:$0xff] }
 0x54b   :  { %6608 = vmatpush3.bf16.msra.mxu1 %v6607_v20  ;;  %5361 = vmatprep.subr.bf16.mxu0 %v7164_v28  ;;  %v6647_v20 = vpack.c.bf16 %v4327_v10, %v4324_v38  ;;  %v7174_v50 = vld [vmem:[#allocation6 + $0x234] ss:$40 sps:$4 sm:$0xff]   ;;  %v7177_v14 = vld [vmem:[#allocation6 + $0x284] ss:$40 sps:$4 sm:$0xff]   ;;  %v7182_v31 = vld [vmem:[#allocation6 + $0x2d8] ss:$40 sps:$4 sm:$0xff]   ;;  %v6663_v57 = vpack.c.bf16 %v4304_v7, %v4301_v16 }
 0x54c   :  { %6609 = vmatprep.subr.bf16.mxu1 %v7521_v3  ;;  %v4310_v54 = vld [vmem:[#allocation8 + $0x88] sm:$0xff]  ;;  %v7180_v37 = vld [vmem:[#allocation6 + $0x2d4] ss:$40 sps:$4 sm:$0xff]   ;;  %v4313_v35 = vld [vmem:[#allocation8 + $0xa0] sm:$0xff] }
 0x54d   :  { %v4316_v48 = vld [vmem:[#allocation8 + $0xb8] sm:$0xff]  ;;  %v7183_v11 = vld [vmem:[#allocation6 + $0x324] ss:$40 sps:$4 sm:$0xff]   ;;  %v7191_v45 = vld [vmem:[#allocation6 + $0x3c8] ss:$40 sps:$4 sm:$0xff]  }
 0x54e   :  { %v7188_v12 = vld [vmem:[#allocation6 + $0x378] ss:$40 sps:$4 sm:$0xff]   ;;  %v6669_v5 = vpack.c.bf16 %v4316_v48, %v4313_v35  ;;  %v7186_v19 = vld [vmem:[#allocation6 + $0x374] ss:$40 sps:$4 sm:$0xff]   ;;  %v7189_v28 = vld [vmem:[#allocation6 + $0x3c4] ss:$40 sps:$4 sm:$0xff]  }
 0x54f   :  { %6611 = vmatpush3.bf16.msra.mxu1 %v6610_v27  ;;  %v4330_v27 = vld [vmem:[#allocation8 + $0x128] sm:$0xff]  ;;  %v4325_v62 = vld [vmem:[#allocation8 + $0x100] sm:$0xff]  ;;  %v4328_v39 = vld [vmem:[#allocation8 + $0x118] sm:$0xff] }
 0x550   :  { %6612 = vmatprep.subr.bf16.mxu1 %v7521_v3  ;;  %v6651_v13 = vpack.c.bf16 %v4333_v41, %v4330_v27  ;;  %v4331_v9 = vld [vmem:[#allocation8 + $0x130] sm:$0xff]  ;;  %v4334_v32 = vld [vmem:[#allocation8 + $0x148] sm:$0xff]  ;;  %v4671_v27 = vld [vmem:[#allocation8 + $0x300] sm:$0xff] }
 0x551   :  { %v7192_v38 = vld [vmem:[#allocation6 + $0x414] ss:$40 sps:$4 sm:$0xff]   ;;  %v6678_v10 = vpack.c.bf16 %v4334_v32, %v4331_v9  ;;  %v4699_v58 = vld [vmem:[#allocation8 + $0x3e0] sm:$0xff] }
 0x552   :  { %v4674_v41 = vld [vmem:[#allocation8 + $0x318] sm:$0xff]  ;;  %v4705_v7 = vld [vmem:[#allocation8 + $0x410] sm:$0xff]  ;;  %v4707_v35 = vld [vmem:[#allocation8 + $0x420] sm:$0xff] }
 0x553   :  { %6614 = vmatpush3.bf16.msra.mxu1 %v6613_v44  ;;  %v7170_v44 = vld [vmem:[#allocation6 + $0x198] ss:$40 sps:$4 sm:$0xff]  }
 0x554   :  { %6615 = vmatprep.subr.bf16.mxu1 %v7521_v3  ;;  %v4702_v16 = vld [vmem:[#allocation8 + $0x3f8] sm:$0xff] }
 0x555   :  { %v4710_v48 = vld [vmem:[#allocation8 + $0x438] sm:$0xff] }
 0x556   :  { %v4682_v9 = vld [vmem:[#allocation8 + $0x358] sm:$0xff] }
 0x557   :  { %6617 = vmatpush3.bf16.msra.mxu1 %v6616_v4  ;;  %v4329_v4 = vld [vmem:[#allocation8 + $0x120] sm:$0xff] }
 0x558   :  { %6618 = vmatprep.subr.bf16.mxu1 %v7521_v3 }
 0x55b   :  { %6620 = vmatpush3.bf16.msra.mxu1 %v6619_v25  ;;  %v4339_v25 = vld [vmem:[#allocation8 + $0x170] sm:$0xff] }
 0x55c   :  { %6621 = vmatprep.subr.bf16.mxu1 %v7521_v3  ;;  %v6655_v56 = vpack.c.bf16 %v4339_v25, %v4336_v47  ;;  %v4684_v47 = vld [vmem:[#allocation8 + $0x368] sm:$0xff]  ;;  %v4687_v25 = vld [vmem:[#allocation8 + $0x380] sm:$0xff] }
 0x55f   :  { %6623 = vmatpush3.bf16.msra.mxu1 %v6622_v21  ;;  %v6653_v21 = vpack.c.bf16 %v4332_v53, %v4329_v4  ;;  %v4677_v4 = vld [vmem:[#allocation8 + $0x330] sm:$0xff]  ;;  %v4680_v53 = vld [vmem:[#allocation8 + $0x348] sm:$0xff] }
 0x560   :  { %6624 = vmatprep.subr.bf16.mxu1 %v7521_v3 }
 0x563   :  { %6626 = vmatpush3.bf16.msra.mxu1 %v6625_v17  ;;  %v7176_v17 = vld [vmem:[#allocation6 + $0x238] ss:$40 sps:$4 sm:$0xff]  }
 0x564   :  { %6628 = vmatprep.subr.bf16.mxu1 %v6627_v15  ;;  %v6657_v15 = vpack.c.bf16 %v4338_v51, %v4335_v8  ;;  %v4690_v8 = vld [vmem:[#allocation8 + $0x398] sm:$0xff]  ;;  %v4693_v51 = vld [vmem:[#allocation8 + $0x3b0] sm:$0xff] }
 0x566   :  { %6479 = vmatmul.mubr.f32.vlgmr.msra.gmra.mrb[10].mxu1 %v4194_v1  ;;  %v7162_v1 = vld [vmem:[#allocation6 + $0xf4] ss:$40 sps:$4 sm:$0xff]  }
 0x567   :  { %6630 = vmatpush1.bf16.msra.mxu1 %v6629_v6  ;;  %4594 = vmatprep.mubr.f32.mxu1 %v7520_v60  ;;  %v7179_v6 = vld [vmem:[#allocation6 + $0x288] ss:$40 sps:$4 sm:$0xff]  }
 0x568   :  { %6632 = vmatprep.subr.bf16.mxu1 %v6631_v23  ;;  %5362 = vmatpush1.bf16.msra.mxu0 %v7162_v1  ;;  %v6660_v23 = vpack.c.bf16 %v4298_v2, %v4295_v24  ;;  %v4337_v1 = vld [vmem:[#allocation8 + $0x160] sm:$0xff]  ;;  %v4692_v24 = vld [vmem:[#allocation8 + $0x3a8] sm:$0xff] }
 0x569   :  { %5363 = vmatprep.subr.bf16.mxu0 %v7167_v33  ;;  %v4340_v33 = vld [vmem:[#allocation8 + $0x178] sm:$0xff]  ;;  %v4696_v2 = vld [vmem:[#allocation8 + $0x3c8] sm:$0xff] }
 0x56a   :  { %v6681_v22 = vpack.c.bf16 %v4340_v33, %v4337_v1  ;;  %v4691_v33 = vld [vmem:[#allocation8 + $0x3a0] sm:$0xff] }
 0x56b   :  { %6634 = vmatpush1.bf16.msra.mxu1 %v6633_v42  ;;  %v4307_v42 = vld [vmem:[#allocation8 + $0x70] sm:$0xff] }
 0x56c   :  { %6636 = vmatprep.subr.bf16.mxu1 %v6635_v40  ;;  %5364 = vmatpush1.bf16.msra.mxu0 %v7165_v46  ;;  %v7185_v40 = vld [vmem:[#allocation6 + $0x328] ss:$40 sps:$4 sm:$0xff]   ;;  %v6666_v36 = vpack.c.bf16 %v4310_v54, %v4307_v42  ;;  %v4678_v46 = vld [vmem:[#allocation8 + $0x338] sm:$0xff] }
 0x56d   :  { %5365 = vmatprep.subr.bf16.mxu0 %v7170_v44  ;;  %v4681_v44 = vld [vmem:[#allocation8 + $0x350] sm:$0xff]  ;;  %v4704_v42 = vld [vmem:[#allocation8 + $0x408] sm:$0xff] }
 0x56e   :  { %v4708_v54 = vld [vmem:[#allocation8 + $0x428] sm:$0xff] }
 0x56f   :  { %6638 = vmatpush1.bf16.msra.mxu1 %v6637_v49  ;;  %v4319_v49 = vld [vmem:[#allocation8 + $0xd0] sm:$0xff] }
 0x570   :  { %6640 = vmatprep.subr.bf16.mxu1 %v6639_v52  ;;  %5366 = vmatpush1.bf16.msra.mxu0 %v7168_v63  ;;  %v4322_v52 = vld [vmem:[#allocation8 + $0xe8] sm:$0xff]  ;;  %v6689_v63 = vpack.c.bf16 %v4680_v53, %v4677_v4  ;;  %v4715_v4 = vld [vmem:[#allocation8 + $0x460] sm:$0xff]  ;;  %v4718_v53 = vld [vmem:[#allocation8 + $0x478] sm:$0xff] }
 0x571   :  { %5367 = vmatprep.subr.bf16.mxu0 %v7173_v59  ;;  %v6672_v18 = vpack.c.bf16 %v4322_v52, %v4319_v49  ;;  %v6691_v59 = vpack.c.bf16 %v4687_v25, %v4684_v47  ;;  %v4713_v52 = vld [vmem:[#allocation8 + $0x450] sm:$0xff]  ;;  %v6737_v47 = vpack.c.bf16 %v4718_v53, %v4715_v4  ;;  %v7195_v25 = vld [vmem:[#allocation6 + $0x464] ss:$40 sps:$4 sm:$0xff]  }
 0x572   :  { %v7236_v4 = vld [vmem:[#allocation6 + $0x5c] ss:$40 sps:$4 sm:$0xff]   ;;  %v7237_v53 = vld [vmem:[#allocation6 + $0x32c] ss:$40 sps:$4 sm:$0xff]  }
 0x573   :  { %6642 = vmatpush1.bf16.msra.mxu1 %v6641_v55  ;;  %v7194_v55 = vld [vmem:[#allocation6 + $0x418] ss:$40 sps:$4 sm:$0xff]  }
 0x574   :  { %6644 = vmatprep.subr.bf16.mxu1 %v6643_v0  ;;  %5368 = vmatpush1.bf16.msra.mxu0 %v7171_v43  ;;  %v6675_v0 = vpack.c.bf16 %v4328_v39, %v4325_v62  ;;  %v4676_v62 = vld [vmem:[#allocation8 + $0x328] sm:$0xff]  ;;  %v4291_v39 = vstv %s6291_s2 }
 0x575   :  { %5369 = vmatprep.subr.bf16.mxu0 %v7176_v17  ;;  %v6695_v17 = vpack.c.bf16 %v4693_v51, %v4690_v8  ;;  %v7203_v8 = vld [vmem:[#allocation6 + $0x508] ss:$40 sps:$4 sm:$0xff]   ;;  %v7212_v51 = vld [vmem:[#allocation6 + $0x5ac] ss:$40 sps:$4 sm:$0xff]  }
 0x577   :  { %6646 = vmatpush1.bf16.msra.mxu1 %v6645_v29  ;;  %v4672_v29 = vld [vmem:[#allocation8 + $0x308] sm:$0xff] }
 0x578   :  { %6648 = vmatprep.subr.bf16.mxu1 %v6647_v20  ;;  %5370 = vmatpush1.bf16.msra.mxu0 %v7174_v50  ;;  %v4675_v20 = vld [vmem:[#allocation8 + $0x320] sm:$0xff] }
 0x579   :  { %5371 = vmatprep.subr.bf16.mxu0 %v7179_v6  ;;  %v6683_v34 = vpack.c.bf16 %v4675_v20, %v4672_v29  ;;  %v6699_v6 = vpack.c.bf16 %v4699_v58, %v4696_v2  ;;  %v4697_v20 = vld [vmem:[#allocation8 + $0x3d0] sm:$0xff]  ;;  %v7232_v2 = vld [vmem:[#allocation6 + $0x73c] ss:$40 sps:$4 sm:$0xff]   ;;  %v12747_v58 = vld [vmem:[#allocation36_spill] sm:$0xff] }
 0x57b   :  { %6650 = vmatpush1.bf16.msra.mxu1 %v6649_v30  ;;  %v6685_v30 = vpack.c.bf16 %v4674_v41, %v4671_v27  ;;  %v4703_v27 = vld [vmem:[#allocation8 + $0x400] sm:$0xff]  ;;  %v4706_v41 = vld [vmem:[#allocation8 + $0x418] sm:$0xff] }
 0x57c   :  { %6652 = vmatprep.subr.bf16.mxu1 %v6651_v13  ;;  %5372 = vmatpush1.bf16.msra.mxu0 %v7177_v14  ;;  %v6687_v13 = vpack.c.bf16 %v4681_v44, %v4678_v46  ;;  %v6731_v46 = vpack.c.bf16 %v4706_v41, %v4703_v27  ;;  %v4709_v44 = vld [vmem:[#allocation8 + $0x430] sm:$0xff] }
 0x57d   :  { %5373 = vmatprep.subr.bf16.mxu0 %v7182_v31  ;;  %v6703_v31 = vpack.c.bf16 %v4705_v7, %v4702_v16  ;;  %v12751_v16 = vld [vmem:[#allocation91_spill] sm:$0xff]  ;;  %v12752_v7 = vld [vmem:[#allocation92_spill] sm:$0xff]  ;;  %v7229_v27 = vld [vmem:[#allocation6 + $0x734] ss:$40 sps:$4 sm:$0xff]  }
 0x57f   :  { %6654 = vmatpush1.bf16.msra.mxu1 %v6653_v21  ;;  %v4683_v21 = vld [vmem:[#allocation8 + $0x360] sm:$0xff] }
 0x580   :  { %6656 = vmatprep.subr.bf16.mxu1 %v6655_v56  ;;  %5374 = vmatpush1.bf16.msra.mxu0 %v7180_v37  ;;  %v4686_v56 = vld [vmem:[#allocation8 + $0x378] sm:$0xff]  ;;  %v4711_v37 = vld [vmem:[#allocation8 + $0x440] sm:$0xff] }
 0x581   :  { %5375 = vmatprep.subr.bf16.mxu0 %v7185_v40  ;;  %v6693_v43 = vpack.c.bf16 %v4686_v56, %v4683_v21  ;;  %v7198_v21 = vld [vmem:[#allocation6 + $0x4b4] ss:$40 sps:$4 sm:$0xff]  }
 0x582   :  { %v7204_v56 = vld [vmem:[#allocation6 + $0x50c] ss:$40 sps:$4 sm:$0xff]  }
 0x583   :  { %6658 = vmatpush1.bf16.msra.mxu1 %v6657_v15  ;;  %v4689_v15 = vld [vmem:[#allocation8 + $0x390] sm:$0xff] }
 0x584   :  { %6659 = vmatprep.subr.bf16.mxu1 %v7521_v3  ;;  %5376 = vmatpush1.bf16.msra.mxu0 %v7183_v11  ;;  %v6697_v50 = vpack.c.bf16 %v4692_v24, %v4689_v15  ;;  %v4714_v11 = vld [vmem:[#allocation8 + $0x458] sm:$0xff]  ;;  %v7228_v24 = vld [vmem:[#allocation6 + $0x6ec] ss:$40 sps:$4 sm:$0xff]  }
 0x585   :  { %5377 = vmatprep.subr.bf16.mxu0 %v7188_v12  ;;  %v4717_v12 = vld [vmem:[#allocation8 + $0x470] sm:$0xff]  ;;  %v7224_v15 = vld [vmem:[#allocation6 + $0x69c] ss:$40 sps:$4 sm:$0xff]  }
 0x586   :  { %4595 = vmatmul.mubr.f32.vlgmr.msra.gmra.mrb[8].mxu1 %v11094_v26  ;;  %v6711_v49 = vpack.c.bf16 %v4717_v12, %v4714_v11  ;;  %v7201_v11 = vld [vmem:[#allocation6 + $0x504] ss:$40 sps:$4 sm:$0xff]  }
 0x587   :  { %6661 = vmatpush3.bf16.msra.mxu1 %v6660_v23  ;;  %6513 = vmatprep.mubr.msk.f32.mxu1 %vm7522_vm2, %v7520_v60  ;;  %v4695_v23 = vld [vmem:[#allocation8 + $0x3c0] sm:$0xff] }
 0x588   :  { %6662 = vmatprep.subr.bf16.mxu1 %v7521_v3  ;;  %5378 = vmatpush1.bf16.msra.mxu0 %v7186_v19  ;;  %v4716_v19 = vld [vmem:[#allocation8 + $0x468] sm:$0xff] }
 0x589   :  { %5379 = vmatprep.subr.bf16.mxu0 %v7191_v45  ;;  %v6713_v45 = vpack.c.bf16 %v4716_v19, %v4713_v52  ;;  %v12754_v52 = vmov 0   ;;  %v7211_v19 = vld [vmem:[#allocation6 + $0x5a8] ss:$40 sps:$4 sm:$0xff]  }
 0x58b   :  { %6664 = vmatpush3.bf16.msra.mxu1 %v6663_v57  ;;  %v4701_v57 = vld [vmem:[#allocation8 + $0x3f0] sm:$0xff] }
 0x58c   :  { %6665 = vmatprep.subr.bf16.mxu1 %v7521_v3  ;;  %5380 = vmatpush1.bf16.msra.mxu0 %v7189_v28  ;;  %v6705_v40 = vpack.c.bf16 %v4704_v42, %v4701_v57 }
 0x58d   :  { %5381 = vmatprep.subr.bf16.mxu0 %v7194_v55  ;;  %v4292_v55 = vadd.f32 %v4291_v39, %v11081_v61  ;;  %v4694_v61 = vld [vmem:[#allocation8 + $0x3b8] sm:$0xff]  ;;  %v7219_v39 = vld [vmem:[#allocation6 + $0x648] ss:$40 sps:$4 sm:$0xff]  }
 0x58e   :  { %v6725_v29 = vpack.c.bf16 %v4694_v61, %v4691_v33  ;;  %v7225_v33 = vld [vmem:[#allocation6 + $0x6e4] ss:$40 sps:$4 sm:$0xff]  }
 0x58f   :  { %6667 = vmatpush3.bf16.msra.mxu1 %v6666_v36  ;;  %v6707_v36 = vpack.c.bf16 %v4711_v37, %v4708_v54 }
 0x590   :  { %6668 = vmatprep.subr.bf16.mxu1 %v7521_v3  ;;  %5382 = vmatpush1.bf16.msra.mxu0 %v7192_v38  ;;  %v4685_v38 = vld [vmem:[#allocation8 + $0x370] sm:$0xff] }
 0x593   :  { %6670 = vmatpush3.bf16.msra.mxu1 %v6669_v5  ;;  %v6709_v5 = vpack.c.bf16 %v4710_v48, %v4707_v35 }
 0x594   :  { %6671 = vmatprep.subr.bf16.mxu1 %v7521_v3 }
 0x597   :  { %6673 = vmatpush3.bf16.msra.mxu1 %v6672_v18  ;;  %v4673_v18 = vld [vmem:[#allocation8 + $0x310] sm:$0xff] }
 0x598   :  { %6674 = vmatprep.subr.bf16.mxu1 %v7521_v3  ;;  %v6716_v28 = vpack.c.bf16 %v4676_v62, %v4673_v18  ;;  %v7215_v18 = vld [vmem:[#allocation6 + $0x5f8] ss:$40 sps:$4 sm:$0xff]   ;;  %v7213_v62 = vld [vmem:[#allocation6 + $0x5f4] ss:$40 sps:$4 sm:$0xff]  }
 0x59b   :  { %6676 = vmatpush3.bf16.msra.mxu1 %v6675_v0  ;;  %v4679_v0 = vld [vmem:[#allocation8 + $0x340] sm:$0xff] }
 0x59c   :  { %6677 = vmatprep.subr.bf16.mxu1 %v7521_v3  ;;  %v6719_v32 = vpack.c.bf16 %v4682_v9, %v4679_v0  ;;  %v7221_v0 = vld [vmem:[#allocation6 + $0x694] ss:$40 sps:$4 sm:$0xff]  }
 0x59d   :  { %v12755_v9 = vld [vmem:[#allocation94_spill] sm:$0xff] }
 0x59f   :  { %6679 = vmatpush3.bf16.msra.mxu1 %v6678_v10  ;;  %v4688_v10 = vld [vmem:[#allocation8 + $0x388] sm:$0xff] }
 0x5a0   :  { %6680 = vmatprep.subr.bf16.mxu1 %v7521_v3  ;;  %v6722_v1 = vpack.c.bf16 %v4688_v10, %v4685_v38 }
 0x5a3   :  { %6682 = vmatpush3.bf16.msra.mxu1 %v6681_v22  ;;  %v4700_v22 = vld [vmem:[#allocation8 + $0x3e8] sm:$0xff] }
 0x5a4   :  { %6684 = vmatprep.subr.bf16.mxu1 %v6683_v34  ;;  %v6728_v34 = vpack.c.bf16 %v4700_v22, %v4697_v20 }
 0x5a6   :  { %6514 = vmatmul.mubr.f32.vlgmr.msra.gmra.mrb[10].mxu1 %v11094_v26  ;;  %v4698_v26 = vld [vmem:[#allocation8 + $0x3d8] sm:$0xff] }
 0x5a7   :  { %6686 = vmatpush1.bf16.msra.mxu1 %v6685_v30  ;;  %4783 = vmatprep.mubr.f32.mxu1 %v7520_v60  ;;  %v6701_v14 = vpack.c.bf16 %v4698_v26, %v4695_v23  ;;  %v4712_v30 = vld [vmem:[#allocation8 + $0x448] sm:$0xff]  ;;  %v12750_v23 = vld [vmem:[#allocation35_spill] sm:$0xff] }
 0x5a8   :  { %6688 = vmatprep.subr.bf16.mxu1 %v6687_v13  ;;  %v6734_v13 = vpack.c.bf16 %v4712_v30, %v4709_v44  ;;  %v7234_v30 = vld [vmem:[#allocation6 + $0xc] ss:$40 sps:$4 sm:$0xff]  }
 0x5ab   :  { %6690 = vmatpush1.bf16.msra.mxu1 %v6689_v63  ;;  %v7197_v63 = vld [vmem:[#allocation6 + $0x468] ss:$40 sps:$4 sm:$0xff]  }
 0x5ac   :  { %6692 = vmatprep.subr.bf16.mxu1 %v6691_v59  ;;  %v7200_v59 = vld [vmem:[#allocation6 + $0x4b8] ss:$40 sps:$4 sm:$0xff]   ;;  %5383 = vmatprep.subr.bf16.mxu0 %v7197_v63  ;;  %v7240_v63 = vld [vmem:[#allocation6 + $0xfc] ss:$40 sps:$4 sm:$0xff]  }
 0x5ad   :  { %5384 = vmatpush1.bf16.msra.mxu0 %v7195_v25  ;;  %v7239_v25 = vld [vmem:[#allocation6 + $0x37c] ss:$40 sps:$4 sm:$0xff]  }
 0x5ae   :  { %5385 = vmatprep.subr.bf16.mxu0 %v7200_v59  ;;  %v7241_v59 = vld [vmem:[#allocation6 + $0x3cc] ss:$40 sps:$4 sm:$0xff]  }
 0x5af   :  { %6694 = vmatpush1.bf16.msra.mxu1 %v6693_v43  ;;  %v7216_v43 = vld [vmem:[#allocation6 + $0x5fc] ss:$40 sps:$4 sm:$0xff]  }
 0x5b0   :  { %6696 = vmatprep.subr.bf16.mxu1 %v6695_v17  ;;  %v7220_v17 = vld [vmem:[#allocation6 + $0x64c] ss:$40 sps:$4 sm:$0xff]  }
 0x5b1   :  { %5386 = vmatpush1.bf16.msra.mxu0 %v7198_v21  ;;  %v7242_v21 = vld [vmem:[#allocation6 + $0x14c] ss:$40 sps:$4 sm:$0xff]  }
 0x5b2   :  { %5396 = vmatprep.subr.bf16.mxu0 %v7203_v8  ;;  %v7244_v8 = vld [vmem:[#allocation6 + $0x19c] ss:$40 sps:$4 sm:$0xff]  }
 0x5b3   :  { %6698 = vmatpush1.bf16.msra.mxu1 %v6697_v50  ;;  %v12748_v50 = vld [vmem:[#allocation37_spill] sm:$0xff] }
 0x5b4   :  { %6700 = vmatprep.subr.bf16.mxu1 %v6699_v6  ;;  %v12749_v6 = vmin.f32 %v12747_v58, %v12748_v50 }
 0x5b6   :  { %v2130_v26 = vmul.f32 %v12750_v23, %v12749_v6  ;;  %v12760_v6 = vld [vmem:[#allocation32_spill] sm:$0xff] }
 0x5b7   :  { %6702 = vmatpush1.bf16.msra.mxu1 %v6701_v14  ;;  %v12753_v14 = vmin.f32 %v12751_v16, %v12752_v7 }
 0x5b8   :  { %6704 = vmatprep.subr.bf16.mxu1 %v6703_v31  ;;  %v4863_v57 = vsub.f32 0.0, %v2130_v26 }
 0x5b9   :  { %v2131_v31 = vmul.f32 %v12750_v23, %v12753_v14 }
 0x5bb   :  { %6706 = vmatpush1.bf16.msra.mxu1 %v6705_v40  ;;  %v4864_v54 = vsub.f32 0.0, %v2131_v31 }
 0x5bc   :  { %6708 = vmatprep.subr.bf16.mxu1 %v6707_v36 }
 0x5bf   :  { %6710 = vmatpush1.bf16.msra.mxu1 %v6709_v5  ;;  %v7207_v5 = vld [vmem:[#allocation6 + $0x558] ss:$40 sps:$4 sm:$0xff]  }
 0x5c0   :  { %6712 = vmatprep.subr.bf16.mxu1 %v6711_v49  ;;  %v7205_v49 = vld [vmem:[#allocation6 + $0x554] ss:$40 sps:$4 sm:$0xff]  }
 0x5c3   :  { %6714 = vmatpush1.bf16.msra.mxu1 %v6713_v45  ;;  %v7209_v45 = vld [vmem:[#allocation6 + $0x5a4] ss:$40 sps:$4 sm:$0xff]  }
 0x5c4   :  { %6715 = vmatprep.subr.bf16.mxu1 %v7521_v3 }
 0x5c6   :  { %4784 = vmatmul.mubr.f32.vlgmr.msra.gmra.mrb[8].mxu1 %v4292_v55 }
 0x5c7   :  { %6717 = vmatpush3.bf16.msra.mxu1 %v6716_v28  ;;  %6548 = vmatprep.mubr.msk.f32.mxu1 %vm7522_vm2, %v7520_v60  ;;  %v7217_v28 = vld [vmem:[#allocation6 + $0x644] ss:$40 sps:$4 sm:$0xff]  }
 0x5c8   :  { %6718 = vmatprep.subr.bf16.mxu1 %v7521_v3 }
 0x5cb   :  { %6720 = vmatpush3.bf16.msra.mxu1 %v6719_v32  ;;  %v12756_v32 = vld [vmem:[#allocation95_spill] sm:$0xff] }
 0x5cc   :  { %6721 = vmatprep.subr.bf16.mxu1 %v7521_v3  ;;  %v12757_v38 = vmin.f32 %v12755_v9, %v12756_v32 }
 0x5ce   :  { %v2132_v10 = vmul.f32 %v12750_v23, %v12757_v38 }
 0x5cf   :  { %6723 = vmatpush3.bf16.msra.mxu1 %v6722_v1  ;;  %v7227_v1 = vld [vmem:[#allocation6 + $0x6e8] ss:$40 sps:$4 sm:$0xff]  }
 0x5d0   :  { %6724 = vmatprep.subr.bf16.mxu1 %v7521_v3  ;;  %v4865_v61 = vsub.f32 0.0, %v2132_v10 }
 0x5d3   :  { %6726 = vmatpush3.bf16.msra.mxu1 %v6725_v29  ;;  %v7231_v29 = vld [vmem:[#allocation6 + $0x738] ss:$40 sps:$4 sm:$0xff]  }
 0x5d4   :  { %6727 = vmatprep.subr.bf16.mxu1 %v7521_v3 }
 0x5d7   :  { %6729 = vmatpush3.bf16.msra.mxu1 %v6728_v34 }
 0x5d8   :  { %6730 = vmatprep.subr.bf16.mxu1 %v7521_v3 }
 0x5db   :  { %6732 = vmatpush3.bf16.msra.mxu1 %v6731_v46  ;;  %v7233_v46 = vld [vmem:[#allocation6 + $0x28c] ss:$40 sps:$4 sm:$0xff]  }
 0x5dc   :  { %6733 = vmatprep.subr.bf16.mxu1 %v7521_v3 }
 0x5df   :  { %6735 = vmatpush3.bf16.msra.mxu1 %v6734_v13  ;;  %v7235_v13 = vld [vmem:[#allocation6 + $0x2dc] ss:$40 sps:$4 sm:$0xff]  }
 0x5e0   :  { %6736 = vmatprep.subr.bf16.mxu1 %v7521_v3  ;;  %v7208_v3 = vld [vmem:[#allocation6 + $0x55c] ss:$40 sps:$4 sm:$0xff]  }
 0x5e3   :  { %6738 = vmatpush3.bf16.msra.mxu1 %v6737_v47  ;;  %v7238_v47 = vld [vmem:[#allocation6 + $0xac] ss:$40 sps:$4 sm:$0xff]  }
 0x5e4   :  { %6551 = vmatprep.subr.bf16.mxu1 %v7520_v60 }
 0x5e6   :  { %6549 = vmatmul.mubr.f32.vlgmr.msra.gmra.mrb[10].mxu1 %v4292_v55  ;;  %v7223_v55 = vld [vmem:[#allocation6 + $0x698] ss:$40 sps:$4 sm:$0xff]  }
 0x5e7   :  { %6567 = vmatprep.mubr.msk.bf16.mxu1 %vm7522_vm2, %v7520_v60  ;;  %6552 = vmatpush3.bf16.msra.mxu1 %v7204_v56  ;;  %v7243_v56 = vld [vmem:[#allocation6 + $0x41c] ss:$40 sps:$4 sm:$0xff]  }
 0x5e8   :  { %6553 = vmatprep.subr.bf16.mxu1 %v7520_v60 }
 0x5eb   :  { %6554 = vmatpush3.bf16.msra.mxu1 %v7208_v3  ;;  %v7245_v3 = vld [vmem:[#allocation6 + $0x46c] ss:$40 sps:$4 sm:$0xff]  }
 0x5ec   :  { %6555 = vmatprep.subr.bf16.mxu1 %v7520_v60 }
 0x5ef   :  { %6556 = vmatpush3.bf16.msra.mxu1 %v7212_v51  ;;  %v7246_v51 = vld [vmem:[#allocation6 + $0x1ec] ss:$40 sps:$4 sm:$0xff]  }
 0x5f0   :  { %6557 = vmatprep.subr.bf16.mxu1 %v7520_v60 }
 0x5f3   :  { %6558 = vmatpush3.bf16.msra.mxu1 %v7216_v43  ;;  %v7247_v43 = vld [vmem:[#allocation6 + $0x4bc] ss:$40 sps:$4 sm:$0xff]  }
 0x5f4   :  { %6559 = vmatprep.subr.bf16.mxu1 %v7520_v60 }
 0x5f7   :  { %6560 = vmatpush3.bf16.msra.mxu1 %v7220_v17  ;;  %v7248_v17 = vld [vmem:[#allocation6 + $0x23c] ss:$40 sps:$4 sm:$0xff]  }
 0x5f8   :  { %6561 = vmatprep.subr.bf16.mxu1 %v7520_v60 }
 0x5fb   :  { %6562 = vmatpush3.bf16.msra.mxu1 %v7224_v15  ;;  %v12758_v15 = vld [vmem:[#allocation30_spill] sm:$0xff] }
 0x5fc   :  { %6563 = vmatprep.subr.bf16.mxu1 %v7520_v60 }
 0x5ff   :  { %6564 = vmatpush3.bf16.msra.mxu1 %v7228_v24  ;;  %v12759_v24 = vld [vmem:[#allocation33_spill] sm:$0xff] }
 0x600   :  { %6565 = vmatprep.subr.bf16.mxu1 %v7520_v60 }
 0x603   :  { %6566 = vmatpush3.bf16.msra.mxu1 %v7232_v2  ;;  %v2135_v2 = vsub.f32 %v12759_v24, %v12758_v15 }
 0x605   :  { %v2138_v14 = vmul.f32 %v12750_v23, %v2135_v2 }
 0x699   :  { %v4785_v42 = vpop.f32.mrb[8].mxu1 }
 0x69a   :  { %v4866_v37 = vmax.f32 %v4863_v57, %v4785_v42  ;;  %v4787_v40 = vpop.f32.mrb[9].mxu1 }
 0x69b   :  { %v4867_v36 = vmax.f32 %v4864_v54, %v4787_v40 }
 0x69c   :  { %v11138_v35 = vmin.f32 %v2130_v26, %v4866_v37  ;;  %v2136_v26 = vsub.f32 %v12760_v6, %v12758_v15 }
 0x69d   :  { %v11140_v60 = vmin.f32 %v2131_v31, %v4867_v36  ;;  %v12761_v36 = vld [vmem:[#allocation31_spill] sm:$0xff] }
 0x69e   :  { %v11146_v12 = vpack.c.bf16 %v11138_v35, %v11138_v35  ;;  %v2139_v54 = vmul.f32 %v12750_v23, %v2136_v26 }
 0x69f   :  { %v4969_v48 = vpack.c.bf16 %v11140_v60, %v11140_v60 }
 0x6a1   :  { %5387 = vmatprep.mubr.bf16.mxu0 %v4969_v48 }
 0x6a2   :  { %5388 = vmatmul.mubr.bf16.vlgmr.msra.gmra.mrb[12].mxu0 %v11146_v12 }
 0x6a3   :  { %5397 = vmatpush1.bf16.msra.mxu0 %v7201_v11  ;;  %5428 = vmatprep.mubr.bf16.mxu0 %v12754_v52 }
 0x6a4   :  { %5398 = vmatprep.subr.bf16.mxu0 %v7207_v5 }
 0x6a7   :  { %5399 = vmatpush1.bf16.msra.mxu0 %v7205_v49 }
 0x6a8   :  { %5400 = vmatprep.subr.bf16.mxu0 %v7211_v19 }
 0x6ab   :  { %5401 = vmatpush1.bf16.msra.mxu0 %v7209_v45 }
 0x6ac   :  { %5402 = vmatprep.subr.bf16.mxu0 %v7215_v18 }
 0x6af   :  { %5403 = vmatpush1.bf16.msra.mxu0 %v7213_v62  ;;  %v12762_v62 = vld [vmem:[#allocation34_spill] sm:$0xff] }
 0x6b0   :  { %5404 = vmatprep.subr.bf16.mxu0 %v7219_v39 }
 0x6b3   :  { %5405 = vmatpush1.bf16.msra.mxu0 %v7217_v28 }
 0x6b4   :  { %5406 = vmatprep.subr.bf16.mxu0 %v7223_v55 }
 0x6b7   :  { %5407 = vmatpush1.bf16.msra.mxu0 %v7221_v0 }
 0x6b8   :  { %5408 = vmatprep.subr.bf16.mxu0 %v7227_v1 }
 0x6b9   :  { %v4856_v20 = vpop.f32.mrb[10].mxu1 }
 0x6ba   :  { %v4868_v22 = vmax.f32 %v4865_v61, %v4856_v20  ;;  %v6550_v34 = vpop.f32.mrb[11].mxu1 }
 0x6bb   :  { %5409 = vmatpush1.bf16.msra.mxu0 %v7225_v33 }
 0x6bc   :  { %v11154_v41 = vmin.f32 %v2132_v10, %v4868_v22  ;;  %5410 = vmatprep.subr.bf16.mxu0 %v7231_v29 }
 0x6be   :  { %v4970_v44 = vpack.c.bf16 %v11154_v41, %v11154_v41 }
 0x6bf   :  { %5411 = vmatpush1.bf16.msra.mxu0 %v7229_v27 }
 0x6c0   :  { %6568 = vmatmul.mubr.bf16.vlgmr.msra.gmra.mrb[12].mxu1 %v4970_v44  ;;  %6415 = vmatprep.subr.bf16.mxu0 %v7233_v46 }
 0x6c2   :  { %5429 = vmatmul.mubr.bf16.vlgmr.msra.gmra.mrb[12].mxu0 %v4970_v44 }
 0x6c3   :  { %6416 = vmatpush3.bf16.msra.mxu0 %v7234_v30  ;;  %5469 = vmatprep.mubr.bf16.mxu0 %v4969_v48  ;;  %v2052_v48 = vmul.f32 %v12750_v23, %v12761_v36 }
 0x6c4   :  { %6417 = vmatprep.subr.bf16.mxu0 %v7235_v13 }
 0x6c7   :  { %6418 = vmatpush3.bf16.msra.mxu0 %v7236_v4 }
 0x6c8   :  { %6419 = vmatprep.subr.bf16.mxu0 %v7237_v53 }
 0x6cb   :  { %6420 = vmatpush3.bf16.msra.mxu0 %v7238_v47 }
 0x6cc   :  { %6421 = vmatprep.subr.bf16.mxu0 %v7239_v25 }
 0x6cf   :  { %6422 = vmatpush3.bf16.msra.mxu0 %v7240_v63 }
 0x6d0   :  { %6423 = vmatprep.subr.bf16.mxu0 %v7241_v59 }
 0x6d3   :  { %6424 = vmatpush3.bf16.msra.mxu0 %v7242_v21 }
 0x6d4   :  { %6425 = vmatprep.subr.bf16.mxu0 %v7243_v56 }
 0x6d7   :  { %6426 = vmatpush3.bf16.msra.mxu0 %v7244_v8 }
 0x6d8   :  { %6427 = vmatprep.subr.bf16.mxu0 %v7245_v3 }
 0x6db   :  { %6428 = vmatpush3.bf16.msra.mxu0 %v7246_v51 }
 0x6dc   :  { %6429 = vmatprep.subr.bf16.mxu0 %v7247_v43 }
 0x6df   :  { %6430 = vmatpush3.bf16.msra.mxu0 %v7248_v17 }
 0x6e2   :  { %5470 = vmatmul.mubr.bf16.vlgmr.msra.gmra.mrb[16].mxu0 %v11146_v12 }
 0x793   :  { %v5511_v58 = vpop.f32.mrb[12].mxu1 }
 0x794   :  { %v6569_v50 = vpop.f32.mrb[13].mxu1 }
 0x795   :  { %v5430_v16 = vpop.f32.mrb[12].mxu0  ;;  %v5514_v7 = vpop.f32.mrb[14].mxu1 }
 0x796   :  { %v5517_v31 = vsub.f32 %v11138_v35, %v5430_v16  ;;  %v5432_v57 = vpop.f32.mrb[13].mxu0  ;;  %v6570_v42 = vpop.f32.mrb[15].mxu1 }
 0x797   :  { %v5518_v37 = vsub.f32 %v11140_v60, %v5432_v57  ;;  %v5434_v40 = vpop.f32.mrb[14].mxu0  ;;  %v2137_v60 = vsub.f32 %v12762_v62, %v12758_v15 }
 0x798   :  { %v5520_v11 = vadd.f32 %v5517_v31, %v2138_v14  ;;  %v5435_v12 = vpop.f32.mrb[15].mxu0 }
 0x799   :  { %v5521_v5 = vadd.f32 %v5518_v37, %v2139_v54  ;;  %v2140_v9 = vmul.f32 %v12750_v23, %v2137_v60 }
 0x79a   :  { %v5523_v49 = vmul.f32 %v5520_v11, %v2052_v48 }
 0x79b   :  { %v5524_v52 = vmul.f32 %v5521_v5, %v2052_v48 }
 0x79c   :  { %v5526_v19 = vadd.f32 %v5523_v49, %v12758_v15 }
 0x79d   :  { %v5527_v45 = vadd.f32 %v5524_v52, %v12758_v15 }
 0x79e   :  { %5529 = vst [vmem:[#allocation21] sm:$0xff] %v5526_v19 }
 0x79f   :  { %5530 = vst [vmem:[#allocation21 + $0x8] sm:$0xff] %v5527_v45 }
 0x7b5   :  { %v6431_v35 = vpop.f32.mrb[16].mxu0 }
 0x7b6   :  { %v6432_v18 = vpop.f32.mrb[17].mxu0 }
 0x7b7   :  { %v6433_v39 = vadd.f32 %v6432_v18, %v6431_v35  ;;  %v6434_v28 = vpop.f32.mrb[18].mxu0 }
 0x7b8   :  { %v6435_v55 = vpop.f32.mrb[19].mxu0 }
 0x7b9   :  { %v5512_v0 = vadd.f32 %v6433_v39, %v5511_v58 }
 0x7bb   :  { %v5519_v32 = vsub.f32 %v11154_v41, %v5512_v0 }
 0x7bd   :  { %v5522_v38 = vadd.f32 %v5519_v32, %v2140_v9 }
 0x7bf   :  { %v5525_v10 = vmul.f32 %v5522_v38, %v2052_v48 }
 0x7c1   :  { %v5528_v1 = vadd.f32 %v5525_v10, %v12758_v15 }
 0x7c3   :  { %5531 = vst [vmem:[#allocation21 + $0x10] sm:$0xff] %v5528_v1 }
 0x7c4   :  { %7475 = shalt.err (!%p7472_p12)
}
 0x7c5   :  { %s12763_s28 = sld [smem:[#allocation180_spill]] }
 0x7cb   :  { %s7476_s30 = scalar_lea.hbm %s12763_s28, 384 }
 0x7cc   :  { %p7477_p13 = scmp.ne.s32.totalorder %s12763_s28, %s7476_s30  ;;  %p7480_p0 = scmp.lt.u32.totalorder %s7476_s30, %s12763_s28 }
 0x7ce   :  { %p7482_p1 = pnand %p7480_p0, %p7477_p13 }
 0x7d0   :  { %7485 = shalt.err (!%p7482_p1)
}
 0x7d1   :  { %5541 = dma.vmem_to_hbm [thread:$0]  %s5539_s20, 384, %s12763_s28, [#allocation4]  }
 0x7d2   :  { %7500 = dma.done.wait [#allocation4], 384  }
 0x7d3   :  { %7501 = vsyncadd [#allocation4], 4294966912 }
 0x7d4   :  { %5545 = vsyncpa [#allocation3], 1 }
 0x7d5   :  { %5546 = vsyncpa [#allocation7], 1 }
 0x7d6   :  { %5547 = vsyncpa [#allocation4], 1 }
 0x7d7   :  { %5548 = vsyncpa [#allocation5], 1 }
 0x7d8   :  { %5549 = vsyncpa [#allocation11], 1 }
 0x7d9   :  { %5550 = vsyncpa [#allocation14], 1 }
 0x7da   :  { %5551 = vsyncpa [#allocation17], 1 }
 0x7db   :  { %5552 = vsyncpa [#allocation20], 1 }

</bundles_post_ra>
